<compile_context>
chip_gen: v7x
topology: tpu7x:2x2x1
jax: 0.10.0
libtpu: 0.0.40
codegen_flags: <defaults>
</compile_context>

<pallas_src>
import numpy as np
import jax
import jax.numpy as jnp
from jax import lax
from jax.experimental import pallas as pl
from jax.experimental.pallas import tpu as pltpu

Conv_W = 3
CC, LL, WW = 32, 2, 2          # conv3 channels and pooled spatial dims for 30x30 input

# Encoder stages: (H, Hp) per stage (square images, channels come from weights)
_ENC_GEOM = ((30, 14), (14, 6), (6, 2))
# Decoder stages (forward order): pooled spatial size Hp (== Wp) fed to unpool
_DEC_GEOM = (2, 6, 14)

_HI = jax.lax.Precision.HIGHEST


# ----------------------------------------------------------------------------
# Host-side structural constants (tiny, numpy) used as matmul operands so the
# kernel never needs reshape / transpose / strided ops.
# ----------------------------------------------------------------------------
def _sel_rows(Hp, H):
    """(4, Hp, H): Sel[r, hp, h] = 1 iff h == 2*hp + r  (conv-row gather)."""
    s = np.zeros((4, Hp, H), np.float32)
    for r in range(4):
        for hp in range(Hp):
            s[r, hp, 2 * hp + r] = 1.0
    return s


def _unpool_row_place(Hp):
    """(2, 2*Hp, Hp): R[dy, 2*hp+dy, hp] = 1  (row scatter for 2x unpool)."""
    r = np.zeros((2, 2 * Hp, Hp), np.float32)
    for dy in range(2):
        for hp in range(Hp):
            r[dy, 2 * hp + dy, hp] = 1.0
    return r


def _unpool_col_place(Wp, C):
    """(2, Wp*C, 2*Wp*C): Ccol[dx, wp*C+c, (2*wp+dx)*C+c] = 1 (col scatter)."""
    m = np.zeros((2, Wp * C, 2 * Wp * C), np.float32)
    for dx in range(2):
        for wp in range(Wp):
            for c in range(C):
                m[dx, wp * C + c, (2 * wp + dx) * C + c] = 1.0
    return m


def _deconv_row_shift(Hin):
    """(3, Hin+2, Hin): Syn[ky, y, y-ky] = 1 (implicit zero row padding)."""
    s = np.zeros((3, Hin + 2, Hin), np.float32)
    for ky in range(3):
        for y in range(Hin + 2):
            if 0 <= y - ky < Hin:
                s[ky, y, y - ky] = 1.0
    return s


def _qry_group_sum():
    """(11, 11) block matrix spreading per-group softmax sums ([0:6], [6:11])."""
    g = np.zeros((11, 11), np.float32)
    g[:6, :6] = 1.0
    g[6:, 6:] = 1.0
    return g


def _row_embed2():
    """(2, 2, 64): E[r, r, :] = 1; places a (1,64) row into row r of (2,64)."""
    e = np.zeros((2, 2, WW * CC), np.float32)
    e[0, 0, :] = 1.0
    e[1, 1, :] = 1.0
    return e


def _flat_perm():
    """our flat index r*64 + wp*32 + c -> torch NCHW flat index c*4 + r*2 + wp."""
    p = np.zeros((CC * LL * WW,), np.int32)
    for r in range(LL):
        for wp in range(WW):
            for c in range(CC):
                p[r * (WW * CC) + wp * CC + c] = c * (LL * WW) + r * WW + wp
    return p


# ----------------------------------------------------------------------------
# Banded weight construction (host): conv / deconv as 2-D matmuls on (H, W*C).
# ----------------------------------------------------------------------------
def _conv_banded(wt, Wp):
    """wt: (Cout, Cin, 3, 3) torch Conv2d weight.
    Returns (6, W*Cin, Wp*Cout), band index ky*2+dx, producing the pooling tap
    rows  tap[dy,dx][hp, wp*Cout+co] = conv_out[2hp+dy, 2wp+dx, co]."""
    Cout, Cin = int(wt.shape[0]), int(wt.shape[1])
    W = 2 * Wp + 2
    ky, dx, wp, kx, ci, co = [a.ravel() for a in np.meshgrid(
        np.arange(3), np.arange(2), np.arange(Wp), np.arange(3),
        np.arange(Cin), np.arange(Cout), indexing="ij")]
    band = ky * 2 + dx
    row = (2 * wp + dx + kx) * Cin + ci
    col = wp * Cout + co
    vals = wt[co, ci, ky, kx]
    return jnp.zeros((6, W * Cin, Wp * Cout), jnp.float32).at[band, row, col].add(vals)


def _deconv_banded(wt, Win):
    """wt: (Cin, Cout, 3, 3) torch ConvTranspose2d weight.
    Returns (3, Win*Cin, (Win+2)*Cout) acting on unpooled (Hin, Win*Cin) rows."""
    Cin, Cout = int(wt.shape[0]), int(wt.shape[1])
    ky, v, kx, ci, co = [a.ravel() for a in np.meshgrid(
        np.arange(3), np.arange(Win), np.arange(3),
        np.arange(Cin), np.arange(Cout), indexing="ij")]
    row = v * Cin + ci
    col = (v + kx) * Cout + co
    vals = wt[ci, co, ky, kx]
    return jnp.zeros((3, Win * Cin, (Win + 2) * Cout),
                     jnp.float32).at[ky, row, col].add(vals)


def prepare_kernel_weights(params):
    """Convert PyTorch-convention parameters into the kernel's matmul operands."""
    perm = _flat_perm()
    w = {}
    # encoder convs (banded) + pooling row-selection matrices
    for s, (H, Hp) in enumerate(_ENC_GEOM):
        cw, cb = params[f"conv{s + 1}_w"], params[f"conv{s + 1}_b"]
        cout = cb.shape[0]
        w[f"enc{s}_wb"] = _conv_banded(cw, Hp)
        w[f"enc{s}_brow"] = jnp.tile(cb, Hp).reshape(1, Hp * cout)
        w[f"enc{s}_sel"] = jnp.asarray(_sel_rows(Hp, H))
    # latent heads (merged / permuted to the kernel's flat layout)
    we = params["dense_enc_w"]                               # (128+11, 100)
    w["enc_w_flat"] = we[perm].reshape(LL, WW * CC, 100)
    w["enc_w_qry"] = we[CC * LL * WW:]
    w["enc_b"] = params["dense_enc_b"].reshape(1, -1)
    w["mulv_w"] = jnp.concatenate([params["fc_mu_w"], params["fc_logvar_w"]], axis=1)
    w["mulv_b"] = jnp.concatenate([params["fc_mu_b"], params["fc_logvar_b"]]).reshape(1, -1)
    w["fcdec_w"] = params["fc_dec_w"]
    w["fcdec_b"] = params["fc_dec_b"].reshape(1, -1)
    w["qry_w"] = jnp.concatenate([params["dense_dec_qry1_w"],
                                  params["dense_dec_qry2_w"]], axis=1)
    w["qry_b"] = jnp.concatenate([params["dense_dec_qry1_b"],
                                  params["dense_dec_qry2_b"]]).reshape(1, -1)
    w["qry_gsum"] = jnp.asarray(_qry_group_sum())
    wd = params["dense_dec_w"][:, perm]                      # (100, 128)
    w["ddec_w"] = jnp.transpose(wd.reshape(100, LL, WW * CC), (1, 0, 2))  # (2,100,64)
    w["ddec_b"] = params["dense_dec_b"][perm].reshape(LL, 1, WW * CC)
    w["row_embed"] = jnp.asarray(_row_embed2())
    # decoder: unpool placement + banded transposed convs
    for s, Hp in enumerate(_DEC_GEOM):
        name = f"deconv{3 - s}"
        dw, db = params[f"{name}_w"], params[f"{name}_b"]
        cin, cout = int(dw.shape[0]), int(dw.shape[1])
        win = 2 * Hp
        w[f"dec{s}_rows"] = jnp.asarray(_unpool_row_place(Hp))
        w[f"dec{s}_cols"] = jnp.asarray(_unpool_col_place(Hp, cin))
        w[f"dec{s}_syn"] = jnp.asarray(_deconv_row_shift(win))
        w[f"dec{s}_wb"] = _deconv_banded(dw, win)
        w[f"dec{s}_brow"] = jnp.tile(db, win + 2).reshape(1, (win + 2) * cout)
    return w


# ----------------------------------------------------------------------------
# The single fused Pallas kernel (per-sample: grid=(B,))
# ----------------------------------------------------------------------------
def _make_kernel(names):
    n_w = len(names)

    def kernel(*refs):
        x_ref, xq_ref, eps_ref = refs[:3]
        w = dict(zip(names, refs[3:3 + n_w]))
        xrec_ref, qry_ref, mu_ref, lv_ref = refs[3 + n_w:]

        def mm(a, b):
            return jnp.dot(a, b, preferred_element_type=jnp.float32)

        # ------------------------------ encoder ------------------------------
        act = x_ref[0]                                    # (30, 30*n_chan)
        pool_idx = []
        for s in range(3):
            sel = w[f"enc{s}_sel"]                        # (4, Hp, H)
            wb = w[f"enc{s}_wb"]                          # (6, W*Cin, Wp*Cout)
            brow = w[f"enc{s}_brow"][...]                 # (1, Wp*Cout)
            rows = [mm(sel[r], act) for r in range(4)]    # rows 2*hp + r of act
            val = None
            idx = None
            for dy in range(2):
                for dx in range(2):
                    pre = mm(rows[dy], wb[dx])
                    pre = pre + mm(rows[dy + 1], wb[2 + dx])
                    pre = pre + mm(rows[dy + 2], wb[4 + dx])
                    tap = jnp.maximum(pre + brow, 0.0)    # conv + bias + relu at tap
                    if val is None:
                        val = tap
                        idx = jnp.zeros(tap.shape, jnp.int32)
                    else:
                        take = tap > val
                        val = jnp.where(take, tap, val)
                        idx = jnp.where(take, dy * 2 + dx, idx)
            act = val                                     # 2x2 max-pooled output
            pool_idx.append(idx)
        p3 = act                                          # (2, 64)

        # --------------------------- latent heads ----------------------------
        xq = xq_ref[0]                                    # (1, 11)
        eps = eps_ref[0]                                  # (1, 32)
        wef = w["enc_w_flat"]                             # (2, 64, 100)
        h = mm(p3[0:1, :], wef[0]) + mm(p3[1:2, :], wef[1])
        h = h + mm(xq, w["enc_w_qry"][...]) + w["enc_b"][...]
        h = jnp.maximum(h, 0.0)                           # dense_enc + relu
        ml = mm(h, w["mulv_w"][...]) + w["mulv_b"][...]   # fused fc_mu | fc_logvar
        mu = ml[:, 0:32]
        logvar = ml[:, 32:64]
        z = eps * jnp.exp(0.5 * logvar) + mu              # reparameterize
        hd = jnp.maximum(mm(z, w["fcdec_w"][...]) + w["fcdec_b"][...], 0.0)

        q = mm(hd, w["qry_w"][...]) + w["qry_b"][...]     # fused qry1 | qry2 heads
        q = q - jnp.max(q, axis=-1, keepdims=True)        # shift is per-group invariant
        e = jnp.exp(q)
        qry_rec = e / mm(e, w["qry_gsum"][...])           # per-group softmax

        # dense_dec (+relu), assembled into the (2, 64) pooled spatial layout
        emb = w["row_embed"]                              # (2, 2, 64)
        d = None
        for r in range(2):
            row = jnp.maximum(mm(hd, w["ddec_w"][r]) + w["ddec_b"][r], 0.0)
            part = emb[r] * row                           # place row r
            d = part if d is None else d + part           # (2, 64)

        # ------------------------------ decoder ------------------------------
        for s in range(3):
            idx = pool_idx[2 - s]
            rplace = w[f"dec{s}_rows"]                    # (2, 2Hp, Hp)
            cplace = w[f"dec{s}_cols"]                    # (2, Wp*C, 2*Wp*C)
            syn = w[f"dec{s}_syn"]                        # (3, Hout, Hin)
            wb = w[f"dec{s}_wb"]                          # (3, Win*Cin, Wout*Cout)
            brow = w[f"dec{s}_brow"][...]                 # (1, Wout*Cout)
            # max-unpool: scatter d into the argmax tap positions
            u = None
            for dy in range(2):
                vrow = None
                for dx in range(2):
                    v = jnp.where(idx == dy * 2 + dx, d, 0.0)
                    t = mm(v, cplace[dx])
                    vrow = t if vrow is None else vrow + t
                t = mm(rplace[dy], vrow)
                u = t if u is None else u + t             # (2Hp, 2Wp*C)
            # transposed conv (stride 1, no padding)
            pre = mm(mm(syn[0], u), wb[0])
            pre = pre + mm(mm(syn[1], u), wb[1])
            pre = pre + mm(mm(syn[2], u), wb[2])
            pre = pre + brow
            if s < 2:
                d = jnp.maximum(pre, 0.0)
            else:                                         # final layer: sigmoid (stable)
                pos = 1.0 / (1.0 + jnp.exp(-pre))
                ep = jnp.exp(pre)
                d = jnp.where(pre >= 0.0, pos, ep / (1.0 + ep))

        xrec_ref[0] = d                                   # (30, 30*n_chan)
        qry_ref[0] = qry_rec
        mu_ref[0] = mu
        lv_ref[0] = logvar

    return kernel


# ----------------------------------------------------------------------------
# Forward pass wrapper (matches ECLVR.forward)
# ----------------------------------------------------------------------------
@jax.jit
def eclvr_forward(params, x_nchw, x_qry, eps_key):
    B, n_chan, S, _ = x_nchw.shape
    w = prepare_kernel_weights(params)
    names = tuple(sorted(w.keys()))
    weights = [w[k] for k in names]

    x2d = jnp.transpose(x_nchw, (0, 2, 3, 1)).reshape(B, S, S * n_chan)  # (B,H,W*C)
    xq3 = x_qry.reshape(B, 1, x_qry.shape[1])
    eps3 = jax.random.normal(eps_key, (B, 1, 32), jnp.float32)           # randn_like

    def batched(shape):
        return pl.BlockSpec((1,) + tuple(shape[1:]),
                            lambda b, _n=len(shape): (b,) + (0,) * (_n - 1))

    def whole(arr):
        return pl.BlockSpec(arr.shape, lambda b, _n=arr.ndim: (0,) * _n)

    in_specs = [batched(x2d.shape), batched(xq3.shape), batched(eps3.shape)]
    in_specs += [whole(a) for a in weights]

    out_shape = (
        jax.ShapeDtypeStruct((B, S, S * n_chan), jnp.float32),   # x_rec, (H, W*C) rows
        jax.ShapeDtypeStruct((B, 1, 11), jnp.float32),           # qry_rec
        jax.ShapeDtypeStruct((B, 1, 32), jnp.float32),           # mu
        jax.ShapeDtypeStruct((B, 1, 32), jnp.float32),           # logvar
    )
    out_specs = tuple(batched(o.shape) for o in out_shape)

    xrec3, qry3, mu3, lv3 = pl.pallas_call(
        _make_kernel(names),
        grid=(B,),
        in_specs=in_specs,
        out_specs=out_specs,
        out_shape=out_shape,
        compiler_params=pltpu.CompilerParams(
            dimension_semantics=("parallel",)),
    )(x2d, xq3, eps3, *weights)

    x_rec = jnp.transpose(xrec3.reshape(B, S, S, n_chan), (0, 3, 1, 2))   # back to NCHW
    return x_rec, qry3.reshape(B, 11), mu3.reshape(B, 32), lv3.reshape(B, 32)


# ----------------------------------------------------------------------------
# Parameters (deterministic, PyTorch-style uniform fan-in init)
# ----------------------------------------------------------------------------
def init_params(key, n_chan):
    flat = CC * LL * WW
    keys = iter(jax.random.split(key, 32))

    def u(shape, fan_in):
        lim = 1.0 / float(np.sqrt(fan_in))
        return jax.random.uniform(next(keys), shape, jnp.float32, -lim, lim)

    p = {}
    p["conv1_w"], p["conv1_b"] = u((8, n_chan, 3, 3), n_chan * 9), u((8,), n_chan * 9)
    p["conv2_w"], p["conv2_b"] = u((16, 8, 3, 3), 8 * 9), u((16,), 8 * 9)
    p["conv3_w"], p["conv3_b"] = u((32, 16, 3, 3), 16 * 9), u((32,), 16 * 9)
    p["dense_enc_w"], p["dense_enc_b"] = u((flat + 11, 100), flat + 11), u((100,), flat + 11)
    p["fc_mu_w"], p["fc_mu_b"] = u((100, 32), 100), u((32,), 100)
    p["fc_logvar_w"], p["fc_logvar_b"] = u((100, 32), 100), u((32,), 100)
    p["fc_dec_w"], p["fc_dec_b"] = u((32, 100), 32), u((100,), 32)
    p["dense_dec_w"], p["dense_dec_b"] = u((100, flat), 100), u((flat,), 100)
    p["dense_dec_qry1_w"], p["dense_dec_qry1_b"] = u((100, 6), 100), u((6,), 100)
    p["dense_dec_qry2_w"], p["dense_dec_qry2_b"] = u((100, 5), 100), u((5,), 100)
    p["deconv3_w"], p["deconv3_b"] = u((32, 16, 3, 3), 32 * 9), u((16,), 32 * 9)
    p["deconv2_w"], p["deconv2_b"] = u((16, 8, 3, 3), 16 * 9), u((8,), 16 * 9)
    p["deconv1_w"], p["deconv1_b"] = u((8, n_chan, 3, 3), 8 * 9), u((n_chan,), 8 * 9)
    return p


# ----------------------------------------------------------------------------
# Pure-JAX (XLA) reference of the same forward pass, for correctness checking.
# ----------------------------------------------------------------------------
def _reference_forward(params, x_nchw, x_qry, eps):
    B = x_nchw.shape[0]

    def mmh(a, b):
        return jnp.dot(a, b, precision=_HI)

    def conv(x, wt, b):
        out = lax.conv_general_dilated(x, wt, (1, 1), "VALID",
                                       dimension_numbers=("NHWC", "OIHW", "NHWC"),
                                       precision=_HI)
        return jax.nn.relu(out + b)

    def pool(x):
        b_, H, W, C = x.shape
        xw = x.reshape(b_, H // 2, 2, W // 2, 2, C)
        taps = [xw[:, :, dy, :, dx, :] for dy in range(2) for dx in range(2)]
        val = taps[0]
        idx = jnp.zeros(val.shape, jnp.int32)
        for k in range(1, 4):
            take = taps[k] > val
            val = jnp.where(take, taps[k], val)
            idx = jnp.where(take, k, idx)
        return val, idx

    def unpool(v, idx):
        b_, Hp, Wp, C = v.shape
        outs = [jnp.where(idx == k, v, 0.0) for k in range(4)]
        st = jnp.stack(outs, axis=3).reshape(b_, Hp, Wp, 2, 2, C)
        st = jnp.transpose(st, (0, 1, 3, 2, 4, 5))
        return st.reshape(b_, 2 * Hp, 2 * Wp, C)

    def deconv(x, wt, b):
        wf = jnp.transpose(wt[:, :, ::-1, ::-1], (1, 0, 2, 3))
        xp = jnp.pad(x, ((0, 0), (2, 2), (2, 2), (0, 0)))
        out = lax.conv_general_dilated(xp, wf, (1, 1), "VALID",
                                       dimension_numbers=("NHWC", "OIHW", "NHWC"),
                                       precision=_HI)
        return out + b

    x = jnp.transpose(x_nchw, (0, 2, 3, 1))
    h1 = conv(x, params["conv1_w"], params["conv1_b"]);  p1, i1 = pool(h1)
    h2 = conv(p1, params["conv2_w"], params["conv2_b"]); p2, i2 = pool(h2)
    h3 = conv(p2, params["conv3_w"], params["conv3_b"]); p3, i3 = pool(h3)
    flat = jnp.transpose(p3, (0, 3, 1, 2)).reshape(B, CC * LL * WW)
    enc_in = jnp.concatenate([flat, x_qry], axis=1)
    h = jax.nn.relu(mmh(enc_in, params["dense_enc_w"]) + params["dense_enc_b"])
    mu = mmh(h, params["fc_mu_w"]) + params["fc_mu_b"]
    logvar = mmh(h, params["fc_logvar_w"]) + params["fc_logvar_b"]
    z = eps * jnp.exp(0.5 * logvar) + mu
    hd = jax.nn.relu(mmh(z, params["fc_dec_w"]) + params["fc_dec_b"])
    q1 = jax.nn.softmax(mmh(hd, params["dense_dec_qry1_w"]) + params["dense_dec_qry1_b"], axis=1)
    q2 = jax.nn.softmax(mmh(hd, params["dense_dec_qry2_w"]) + params["dense_dec_qry2_b"], axis=1)
    qry_rec = jnp.concatenate([q1, q2], axis=1)
    dec = jax.nn.relu(mmh(hd, params["dense_dec_w"]) + params["dense_dec_b"])
    d = jnp.transpose(dec.reshape(B, CC, LL, WW), (0, 2, 3, 1))
    u3 = unpool(d, i3);  g3 = jax.nn.relu(deconv(u3, params["deconv3_w"], params["deconv3_b"]))
    u2 = unpool(g3, i2); g2 = jax.nn.relu(deconv(u2, params["deconv2_w"], params["deconv2_b"]))
    u1 = unpool(g2, i1); g1 = jax.nn.sigmoid(deconv(u1, params["deconv1_w"], params["deconv1_b"]))
    x_rec = jnp.transpose(g1, (0, 3, 1, 2))
    return x_rec, qry_rec, mu, logvar


if __name__ == "__main__":
    n_chan, B, S = 4, 2, 30   # 30x30 input => CC*LL*WW = 32*2*2 = 128 as in the module
    key = jax.random.PRNGKey(0)
    kp, kx, kq, ke = jax.random.split(key, 4)

    params = init_params(kp, n_chan)
    x = jax.random.uniform(kx, (B, n_chan, S, S), jnp.float32)
    x_qry = jax.random.uniform(kq, (B, 11), jnp.float32)

    outs = jax.block_until_ready(eclvr_forward(params, x, x_qry, ke))
    x_rec, qry_rec, mu, logvar = outs

    assert x_rec.shape == (B, n_chan, S, S)
    assert qry_rec.shape == (B, 11)
    assert mu.shape == (B, 32) and logvar.shape == (B, 32)
    assert bool(jnp.all((x_rec >= 0.0) & (x_rec <= 1.0)))
    assert bool(jnp.allclose(jnp.sum(qry_rec[:, :6], axis=1), 1.0, atol=1e-5))
    assert bool(jnp.allclose(jnp.sum(qry_rec[:, 6:], axis=1), 1.0, atol=1e-5))

    # Cross-check against a pure-JAX/XLA reference of the same forward pass.
    eps = jax.random.normal(ke, (B, 1, 32), jnp.float32).reshape(B, 32)
    r_rec, r_qry, r_mu, r_lv = _reference_forward(params, x, x_qry, eps)
    assert bool(jnp.allclose(mu, r_mu, atol=5e-3, rtol=5e-3))
    assert bool(jnp.allclose(logvar, r_lv, atol=5e-3, rtol=5e-3))
    assert bool(jnp.allclose(qry_rec, r_qry, atol=5e-3, rtol=5e-3))
    # mean-abs metric is robust to rare pool-argmax ties between the two paths
    assert float(jnp.mean(jnp.abs(x_rec - r_rec))) < 3e-2

    print("KERNEL_OK")
</pallas_src>

<mosaic_0001>
module attributes {stable_mosaic.version = 11 : i64} {
  func.func private @main(%arg0: i32) attributes {dimension_semantics = [#tpu.dimension_semantics<core_parallel>], iteration_bounds = array<i64: 2>, tpu.core_type = #tpu.core_type<sc_scalar_subcore>, window_params = []} {
    return
  }
}

module attributes {stable_mosaic.version = 11 : i64} {
  func.func private @main(%arg0: i32) attributes {dimension_semantics = [#tpu.dimension_semantics<core_parallel>], iteration_bounds = array<i64: 2>, tpu.core_type = #tpu.core_type<sc_scalar_subcore>, window_params = []} {
    return
  }
}

module attributes {stable_mosaic.version = 11 : i64} {
  func.func @kernel(%arg0: i32, %arg1: memref<1x30x120xf32, #tpu.memory_space<vmem>>, %arg2: memref<1x1x11xf32, #tpu.memory_space<vmem>>, %arg3: memref<1x1x32xf32, #tpu.memory_space<vmem>>, %arg4: memref<2x1x64xf32, #tpu.memory_space<vmem>>, %arg5: memref<2x100x64xf32, #tpu.memory_space<vmem>>, %arg6: memref<1x96xf32, #tpu.memory_space<vmem>>, %arg7: memref<2x64x128xf32, #tpu.memory_space<vmem>>, %arg8: memref<2x4x2xf32, #tpu.memory_space<vmem>>, %arg9: memref<3x6x4xf32, #tpu.memory_space<vmem>>, %arg10: memref<3x128x96xf32, #tpu.memory_space<vmem>>, %arg11: memref<1x112xf32, #tpu.memory_space<vmem>>, %arg12: memref<2x96x192xf32, #tpu.memory_space<vmem>>, %arg13: memref<2x12x6xf32, #tpu.memory_space<vmem>>, %arg14: memref<3x14x12xf32, #tpu.memory_space<vmem>>, %arg15: memref<3x192x112xf32, #tpu.memory_space<vmem>>, %arg16: memref<1x120xf32, #tpu.memory_space<vmem>>, %arg17: memref<2x112x224xf32, #tpu.memory_space<vmem>>, %arg18: memref<2x28x14xf32, #tpu.memory_space<vmem>>, %arg19: memref<3x30x28xf32, #tpu.memory_space<vmem>>, %arg20: memref<3x224x120xf32, #tpu.memory_space<vmem>>, %arg21: memref<1x112xf32, #tpu.memory_space<vmem>>, %arg22: memref<4x14x30xf32, #tpu.memory_space<vmem>>, %arg23: memref<6x120x112xf32, #tpu.memory_space<vmem>>, %arg24: memref<1x96xf32, #tpu.memory_space<vmem>>, %arg25: memref<4x6x14xf32, #tpu.memory_space<vmem>>, %arg26: memref<6x112x96xf32, #tpu.memory_space<vmem>>, %arg27: memref<1x64xf32, #tpu.memory_space<vmem>>, %arg28: memref<4x2x6xf32, #tpu.memory_space<vmem>>, %arg29: memref<6x96x64xf32, #tpu.memory_space<vmem>>, %arg30: memref<1x100xf32, #tpu.memory_space<vmem>>, %arg31: memref<2x64x100xf32, #tpu.memory_space<vmem>>, %arg32: memref<11x100xf32, #tpu.memory_space<vmem>>, %arg33: memref<1x100xf32, #tpu.memory_space<vmem>>, %arg34: memref<32x100xf32, #tpu.memory_space<vmem>>, %arg35: memref<1x64xf32, #tpu.memory_space<vmem>>, %arg36: memref<100x64xf32, #tpu.memory_space<vmem>>, %arg37: memref<1x11xf32, #tpu.memory_space<vmem>>, %arg38: memref<11x11xf32, #tpu.memory_space<vmem>>, %arg39: memref<100x11xf32, #tpu.memory_space<vmem>>, %arg40: memref<2x2x64xf32, #tpu.memory_space<vmem>>, %arg41: memref<1x30x120xf32, #tpu.memory_space<vmem>>, %arg42: memref<1x1x11xf32, #tpu.memory_space<vmem>>, %arg43: memref<1x1x32xf32, #tpu.memory_space<vmem>>, %arg44: memref<1x1x32xf32, #tpu.memory_space<vmem>>) attributes {dimension_semantics = [#tpu.dimension_semantics<parallel>], iteration_bounds = array<i64: 2>, scalar_prefetch = 0 : i64, scratch_operands = 0 : i64, tpu.core_type = #tpu.core_type<tc>, window_params = [{transform_indices = @transform_0, window_bounds = array<i64: 1, 30, 120>}, {transform_indices = @transform_1, window_bounds = array<i64: 1, 1, 11>}, {transform_indices = @transform_2, window_bounds = array<i64: 1, 1, 32>}, {pipeline_mode = #tpu.pipeline_mode<synchronous>, transform_indices = @transform_3, window_bounds = array<i64: 2, 1, 64>}, {pipeline_mode = #tpu.pipeline_mode<synchronous>, transform_indices = @transform_4, window_bounds = array<i64: 2, 100, 64>}, {pipeline_mode = #tpu.pipeline_mode<synchronous>, transform_indices = @transform_5, window_bounds = array<i64: 1, 96>}, {pipeline_mode = #tpu.pipeline_mode<synchronous>, transform_indices = @transform_6, window_bounds = array<i64: 2, 64, 128>}, {pipeline_mode = #tpu.pipeline_mode<synchronous>, transform_indices = @transform_7, window_bounds = array<i64: 2, 4, 2>}, {pipeline_mode = #tpu.pipeline_mode<synchronous>, transform_indices = @transform_8, window_bounds = array<i64: 3, 6, 4>}, {pipeline_mode = #tpu.pipeline_mode<synchronous>, transform_indices = @transform_9, window_bounds = array<i64: 3, 128, 96>}, {pipeline_mode = #tpu.pipeline_mode<synchronous>, transform_indices = @transform_10, window_bounds = array<i64: 1, 112>}, {pipeline_mode = #tpu.pipeline_mode<synchronous>, transform_indices = @transform_11, window_bounds = array<i64: 2, 96, 192>}, {pipeline_mode = #tpu.pipeline_mode<synchronous>, transform_indices = @transform_12, window_bounds = array<i64: 2, 12, 6>}, {pipeline_mode = #tpu.pipeline_mode<synchronous>, transform_indices = @transform_13, window_bounds = array<i64: 3, 14, 12>}, {pipeline_mode = #tpu.pipeline_mode<synchronous>, transform_indices = @transform_14, window_bounds = array<i64: 3, 192, 112>}, {pipeline_mode = #tpu.pipeline_mode<synchronous>, transform_indices = @transform_15, window_bounds = array<i64: 1, 120>}, {pipeline_mode = #tpu.pipeline_mode<synchronous>, transform_indices = @transform_16, window_bounds = array<i64: 2, 112, 224>}, {pipeline_mode = #tpu.pipeline_mode<synchronous>, transform_indices = @transform_17, window_bounds = array<i64: 2, 28, 14>}, {pipeline_mode = #tpu.pipeline_mode<synchronous>, transform_indices = @transform_18, window_bounds = array<i64: 3, 30, 28>}, {pipeline_mode = #tpu.pipeline_mode<synchronous>, transform_indices = @transform_19, window_bounds = array<i64: 3, 224, 120>}, {pipeline_mode = #tpu.pipeline_mode<synchronous>, transform_indices = @transform_20, window_bounds = array<i64: 1, 112>}, {pipeline_mode = #tpu.pipeline_mode<synchronous>, transform_indices = @transform_21, window_bounds = array<i64: 4, 14, 30>}, {pipeline_mode = #tpu.pipeline_mode<synchronous>, transform_indices = @transform_22, window_bounds = array<i64: 6, 120, 112>}, {pipeline_mode = #tpu.pipeline_mode<synchronous>, transform_indices = @transform_23, window_bounds = array<i64: 1, 96>}, {pipeline_mode = #tpu.pipeline_mode<synchronous>, transform_indices = @transform_24, window_bounds = array<i64: 4, 6, 14>}, {pipeline_mode = #tpu.pipeline_mode<synchronous>, transform_indices = @transform_25, window_bounds = array<i64: 6, 112, 96>}, {pipeline_mode = #tpu.pipeline_mode<synchronous>, transform_indices = @transform_26, window_bounds = array<i64: 1, 64>}, {pipeline_mode = #tpu.pipeline_mode<synchronous>, transform_indices = @transform_27, window_bounds = array<i64: 4, 2, 6>}, {pipeline_mode = #tpu.pipeline_mode<synchronous>, transform_indices = @transform_28, window_bounds = array<i64: 6, 96, 64>}, {pipeline_mode = #tpu.pipeline_mode<synchronous>, transform_indices = @transform_29, window_bounds = array<i64: 1, 100>}, {pipeline_mode = #tpu.pipeline_mode<synchronous>, transform_indices = @transform_30, window_bounds = array<i64: 2, 64, 100>}, {pipeline_mode = #tpu.pipeline_mode<synchronous>, transform_indices = @transform_31, window_bounds = array<i64: 11, 100>}, {pipeline_mode = #tpu.pipeline_mode<synchronous>, transform_indices = @transform_32, window_bounds = array<i64: 1, 100>}, {pipeline_mode = #tpu.pipeline_mode<synchronous>, transform_indices = @transform_33, window_bounds = array<i64: 32, 100>}, {pipeline_mode = #tpu.pipeline_mode<synchronous>, transform_indices = @transform_34, window_bounds = array<i64: 1, 64>}, {pipeline_mode = #tpu.pipeline_mode<synchronous>, transform_indices = @transform_35, window_bounds = array<i64: 100, 64>}, {pipeline_mode = #tpu.pipeline_mode<synchronous>, transform_indices = @transform_36, window_bounds = array<i64: 1, 11>}, {pipeline_mode = #tpu.pipeline_mode<synchronous>, transform_indices = @transform_37, window_bounds = array<i64: 11, 11>}, {pipeline_mode = #tpu.pipeline_mode<synchronous>, transform_indices = @transform_38, window_bounds = array<i64: 100, 11>}, {pipeline_mode = #tpu.pipeline_mode<synchronous>, transform_indices = @transform_39, window_bounds = array<i64: 2, 2, 64>}, {transform_indices = @transform_40, window_bounds = array<i64: 1, 30, 120>}, {transform_indices = @transform_41, window_bounds = array<i64: 1, 1, 11>}, {transform_indices = @transform_42, window_bounds = array<i64: 1, 1, 32>}, {transform_indices = @transform_43, window_bounds = array<i64: 1, 1, 32>}]} {
    %c0 = arith.constant 0 : index
    %c0_0 = arith.constant 0 : index
    %c0_1 = arith.constant 0 : index
    %0 = vector.load %arg1[%c0, %c0_0, %c0_1] : memref<1x30x120xf32, #tpu.memory_space<vmem>>, vector<1x30x120xf32>
    %1 = vector.shape_cast %0 : vector<1x30x120xf32> to vector<30x120xf32>
    %c0_2 = arith.constant 0 : index
    %c0_3 = arith.constant 0 : index
    %2 = vector.load %arg21[%c0_2, %c0_3] : memref<1x112xf32, #tpu.memory_space<vmem>>, vector<1x112xf32>
    %c0_4 = arith.constant 0 : index
    %c0_5 = arith.constant 0 : index
    %c0_6 = arith.constant 0 : index
    %3 = vector.load %arg22[%c0_4, %c0_5, %c0_6] : memref<4x14x30xf32, #tpu.memory_space<vmem>>, vector<1x14x30xf32>
    %4 = vector.shape_cast %3 : vector<1x14x30xf32> to vector<14x30xf32>
    %cst = arith.constant dense<0.000000e+00> : vector<14x120xf32>
    %5 = tpu.matmul %4, %1, %cst {dimension_numbers = #tpu.dot_dimension_numbers<[1], [0], [0], [1], [0, 0, 1, 1], [], []>} : vector<14x30xf32>, vector<30x120xf32>, vector<14x120xf32> -> vector<14x120xf32>
    %c1 = arith.constant 1 : index
    %c0_7 = arith.constant 0 : index
    %c0_8 = arith.constant 0 : index
    %6 = vector.load %arg22[%c1, %c0_7, %c0_8] : memref<4x14x30xf32, #tpu.memory_space<vmem>>, vector<1x14x30xf32>
    %7 = vector.shape_cast %6 : vector<1x14x30xf32> to vector<14x30xf32>
    %cst_9 = arith.constant dense<0.000000e+00> : vector<14x120xf32>
    %8 = tpu.matmul %7, %1, %cst_9 {dimension_numbers = #tpu.dot_dimension_numbers<[1], [0], [0], [1], [0, 0, 1, 1], [], []>} : vector<14x30xf32>, vector<30x120xf32>, vector<14x120xf32> -> vector<14x120xf32>
    %c2 = arith.constant 2 : index
    %c0_10 = arith.constant 0 : index
    %c0_11 = arith.constant 0 : index
    %9 = vector.load %arg22[%c2, %c0_10, %c0_11] : memref<4x14x30xf32, #tpu.memory_space<vmem>>, vector<1x14x30xf32>
    %10 = vector.shape_cast %9 : vector<1x14x30xf32> to vector<14x30xf32>
    %cst_12 = arith.constant dense<0.000000e+00> : vector<14x120xf32>
    %11 = tpu.matmul %10, %1, %cst_12 {dimension_numbers = #tpu.dot_dimension_numbers<[1], [0], [0], [1], [0, 0, 1, 1], [], []>} : vector<14x30xf32>, vector<30x120xf32>, vector<14x120xf32> -> vector<14x120xf32>
    %c3 = arith.constant 3 : index
    %c0_13 = arith.constant 0 : index
    %c0_14 = arith.constant 0 : index
    %12 = vector.load %arg22[%c3, %c0_13, %c0_14] : memref<4x14x30xf32, #tpu.memory_space<vmem>>, vector<1x14x30xf32>
    %13 = vector.shape_cast %12 : vector<1x14x30xf32> to vector<14x30xf32>
    %cst_15 = arith.constant dense<0.000000e+00> : vector<14x120xf32>
    %14 = tpu.matmul %13, %1, %cst_15 {dimension_numbers = #tpu.dot_dimension_numbers<[1], [0], [0], [1], [0, 0, 1, 1], [], []>} : vector<14x30xf32>, vector<30x120xf32>, vector<14x120xf32> -> vector<14x120xf32>
    %c0_16 = arith.constant 0 : index
    %c0_17 = arith.constant 0 : index
    %c0_18 = arith.constant 0 : index
    %15 = vector.load %arg23[%c0_16, %c0_17, %c0_18] : memref<6x120x112xf32, #tpu.memory_space<vmem>>, vector<1x120x112xf32>
    %16 = vector.shape_cast %15 : vector<1x120x112xf32> to vector<120x112xf32>
    %cst_19 = arith.constant dense<0.000000e+00> : vector<14x112xf32>
    %17 = tpu.matmul %5, %16, %cst_19 {dimension_numbers = #tpu.dot_dimension_numbers<[1], [0], [0], [1], [0, 0, 1, 1], [], []>} : vector<14x120xf32>, vector<120x112xf32>, vector<14x112xf32> -> vector<14x112xf32>
    %c2_20 = arith.constant 2 : index
    %c0_21 = arith.constant 0 : index
    %c0_22 = arith.constant 0 : index
    %18 = vector.load %arg23[%c2_20, %c0_21, %c0_22] : memref<6x120x112xf32, #tpu.memory_space<vmem>>, vector<1x120x112xf32>
    %19 = vector.shape_cast %18 : vector<1x120x112xf32> to vector<120x112xf32>
    %cst_23 = arith.constant dense<0.000000e+00> : vector<14x112xf32>
    %20 = tpu.matmul %8, %19, %cst_23 {dimension_numbers = #tpu.dot_dimension_numbers<[1], [0], [0], [1], [0, 0, 1, 1], [], []>} : vector<14x120xf32>, vector<120x112xf32>, vector<14x112xf32> -> vector<14x112xf32>
    %21 = arith.addf %17, %20 : vector<14x112xf32>
    %c4 = arith.constant 4 : index
    %c0_24 = arith.constant 0 : index
    %c0_25 = arith.constant 0 : index
    %22 = vector.load %arg23[%c4, %c0_24, %c0_25] : memref<6x120x112xf32, #tpu.memory_space<vmem>>, vector<1x120x112xf32>
    %23 = vector.shape_cast %22 : vector<1x120x112xf32> to vector<120x112xf32>
    %cst_26 = arith.constant dense<0.000000e+00> : vector<14x112xf32>
    %24 = tpu.matmul %11, %23, %cst_26 {dimension_numbers = #tpu.dot_dimension_numbers<[1], [0], [0], [1], [0, 0, 1, 1], [], []>} : vector<14x120xf32>, vector<120x112xf32>, vector<14x112xf32> -> vector<14x112xf32>
    %25 = arith.addf %21, %24 : vector<14x112xf32>
    %26 = vector.broadcast %2 : vector<1x112xf32> to vector<14x112xf32>
    %27 = arith.addf %25, %26 : vector<14x112xf32>
    %cst_27 = arith.constant 0.000000e+00 : f32
    %28 = vector.broadcast %cst_27 : f32 to vector<14x112xf32>
    %29 = arith.maximumf %27, %28 : vector<14x112xf32>
    %c0_i32 = arith.constant 0 : i32
    %30 = vector.broadcast %c0_i32 : i32 to vector<14x112xi32>
    %c1_28 = arith.constant 1 : index
    %c0_29 = arith.constant 0 : index
    %c0_30 = arith.constant 0 : index
    %31 = vector.load %arg23[%c1_28, %c0_29, %c0_30] : memref<6x120x112xf32, #tpu.memory_space<vmem>>, vector<1x120x112xf32>
    %32 = vector.shape_cast %31 : vector<1x120x112xf32> to vector<120x112xf32>
    %cst_31 = arith.constant dense<0.000000e+00> : vector<14x112xf32>
    %33 = tpu.matmul %5, %32, %cst_31 {dimension_numbers = #tpu.dot_dimension_numbers<[1], [0], [0], [1], [0, 0, 1, 1], [], []>} : vector<14x120xf32>, vector<120x112xf32>, vector<14x112xf32> -> vector<14x112xf32>
    %c3_32 = arith.constant 3 : index
    %c0_33 = arith.constant 0 : index
    %c0_34 = arith.constant 0 : index
    %34 = vector.load %arg23[%c3_32, %c0_33, %c0_34] : memref<6x120x112xf32, #tpu.memory_space<vmem>>, vector<1x120x112xf32>
    %35 = vector.shape_cast %34 : vector<1x120x112xf32> to vector<120x112xf32>
    %cst_35 = arith.constant dense<0.000000e+00> : vector<14x112xf32>
    %36 = tpu.matmul %8, %35, %cst_35 {dimension_numbers = #tpu.dot_dimension_numbers<[1], [0], [0], [1], [0, 0, 1, 1], [], []>} : vector<14x120xf32>, vector<120x112xf32>, vector<14x112xf32> -> vector<14x112xf32>
    %37 = arith.addf %33, %36 : vector<14x112xf32>
    %c5 = arith.constant 5 : index
    %c0_36 = arith.constant 0 : index
    %c0_37 = arith.constant 0 : index
    %38 = vector.load %arg23[%c5, %c0_36, %c0_37] : memref<6x120x112xf32, #tpu.memory_space<vmem>>, vector<1x120x112xf32>
    %39 = vector.shape_cast %38 : vector<1x120x112xf32> to vector<120x112xf32>
    %cst_38 = arith.constant dense<0.000000e+00> : vector<14x112xf32>
    %40 = tpu.matmul %11, %39, %cst_38 {dimension_numbers = #tpu.dot_dimension_numbers<[1], [0], [0], [1], [0, 0, 1, 1], [], []>} : vector<14x120xf32>, vector<120x112xf32>, vector<14x112xf32> -> vector<14x112xf32>
    %41 = arith.addf %37, %40 : vector<14x112xf32>
    %42 = vector.broadcast %2 : vector<1x112xf32> to vector<14x112xf32>
    %43 = arith.addf %41, %42 : vector<14x112xf32>
    %cst_39 = arith.constant 0.000000e+00 : f32
    %44 = vector.broadcast %cst_39 : f32 to vector<14x112xf32>
    %45 = arith.maximumf %43, %44 : vector<14x112xf32>
    %46 = arith.cmpf ogt, %45, %29 : vector<14x112xf32>
    %47 = arith.select %46, %45, %29 : vector<14x112xi1>, vector<14x112xf32>
    %c1_i32 = arith.constant 1 : i32
    %48 = vector.broadcast %c1_i32 : i32 to vector<14x112xi32>
    %49 = arith.select %46, %48, %30 : vector<14x112xi1>, vector<14x112xi32>
    %c0_40 = arith.constant 0 : index
    %c0_41 = arith.constant 0 : index
    %c0_42 = arith.constant 0 : index
    %50 = vector.load %arg23[%c0_40, %c0_41, %c0_42] : memref<6x120x112xf32, #tpu.memory_space<vmem>>, vector<1x120x112xf32>
    %51 = vector.shape_cast %50 : vector<1x120x112xf32> to vector<120x112xf32>
    %cst_43 = arith.constant dense<0.000000e+00> : vector<14x112xf32>
    %52 = tpu.matmul %8, %51, %cst_43 {dimension_numbers = #tpu.dot_dimension_numbers<[1], [0], [0], [1], [0, 0, 1, 1], [], []>} : vector<14x120xf32>, vector<120x112xf32>, vector<14x112xf32> -> vector<14x112xf32>
    %c2_44 = arith.constant 2 : index
    %c0_45 = arith.constant 0 : index
    %c0_46 = arith.constant 0 : index
    %53 = vector.load %arg23[%c2_44, %c0_45, %c0_46] : memref<6x120x112xf32, #tpu.memory_space<vmem>>, vector<1x120x112xf32>
    %54 = vector.shape_cast %53 : vector<1x120x112xf32> to vector<120x112xf32>
    %cst_47 = arith.constant dense<0.000000e+00> : vector<14x112xf32>
    %55 = tpu.matmul %11, %54, %cst_47 {dimension_numbers = #tpu.dot_dimension_numbers<[1], [0], [0], [1], [0, 0, 1, 1], [], []>} : vector<14x120xf32>, vector<120x112xf32>, vector<14x112xf32> -> vector<14x112xf32>
    %56 = arith.addf %52, %55 : vector<14x112xf32>
    %c4_48 = arith.constant 4 : index
    %c0_49 = arith.constant 0 : index
    %c0_50 = arith.constant 0 : index
    %57 = vector.load %arg23[%c4_48, %c0_49, %c0_50] : memref<6x120x112xf32, #tpu.memory_space<vmem>>, vector<1x120x112xf32>
    %58 = vector.shape_cast %57 : vector<1x120x112xf32> to vector<120x112xf32>
    %cst_51 = arith.constant dense<0.000000e+00> : vector<14x112xf32>
    %59 = tpu.matmul %14, %58, %cst_51 {dimension_numbers = #tpu.dot_dimension_numbers<[1], [0], [0], [1], [0, 0, 1, 1], [], []>} : vector<14x120xf32>, vector<120x112xf32>, vector<14x112xf32> -> vector<14x112xf32>
    %60 = arith.addf %56, %59 : vector<14x112xf32>
    %61 = vector.broadcast %2 : vector<1x112xf32> to vector<14x112xf32>
    %62 = arith.addf %60, %61 : vector<14x112xf32>
    %cst_52 = arith.constant 0.000000e+00 : f32
    %63 = vector.broadcast %cst_52 : f32 to vector<14x112xf32>
    %64 = arith.maximumf %62, %63 : vector<14x112xf32>
    %65 = arith.cmpf ogt, %64, %47 : vector<14x112xf32>
    %66 = arith.select %65, %64, %47 : vector<14x112xi1>, vector<14x112xf32>
    %c2_i32 = arith.constant 2 : i32
    %67 = vector.broadcast %c2_i32 : i32 to vector<14x112xi32>
    %68 = arith.select %65, %67, %49 : vector<14x112xi1>, vector<14x112xi32>
    %c1_53 = arith.constant 1 : index
    %c0_54 = arith.constant 0 : index
    %c0_55 = arith.constant 0 : index
    %69 = vector.load %arg23[%c1_53, %c0_54, %c0_55] : memref<6x120x112xf32, #tpu.memory_space<vmem>>, vector<1x120x112xf32>
    %70 = vector.shape_cast %69 : vector<1x120x112xf32> to vector<120x112xf32>
    %cst_56 = arith.constant dense<0.000000e+00> : vector<14x112xf32>
    %71 = tpu.matmul %8, %70, %cst_56 {dimension_numbers = #tpu.dot_dimension_numbers<[1], [0], [0], [1], [0, 0, 1, 1], [], []>} : vector<14x120xf32>, vector<120x112xf32>, vector<14x112xf32> -> vector<14x112xf32>
    %c3_57 = arith.constant 3 : index
    %c0_58 = arith.constant 0 : index
    %c0_59 = arith.constant 0 : index
    %72 = vector.load %arg23[%c3_57, %c0_58, %c0_59] : memref<6x120x112xf32, #tpu.memory_space<vmem>>, vector<1x120x112xf32>
    %73 = vector.shape_cast %72 : vector<1x120x112xf32> to vector<120x112xf32>
    %cst_60 = arith.constant dense<0.000000e+00> : vector<14x112xf32>
    %74 = tpu.matmul %11, %73, %cst_60 {dimension_numbers = #tpu.dot_dimension_numbers<[1], [0], [0], [1], [0, 0, 1, 1], [], []>} : vector<14x120xf32>, vector<120x112xf32>, vector<14x112xf32> -> vector<14x112xf32>
    %75 = arith.addf %71, %74 : vector<14x112xf32>
    %c5_61 = arith.constant 5 : index
    %c0_62 = arith.constant 0 : index
    %c0_63 = arith.constant 0 : index
    %76 = vector.load %arg23[%c5_61, %c0_62, %c0_63] : memref<6x120x112xf32, #tpu.memory_space<vmem>>, vector<1x120x112xf32>
    %77 = vector.shape_cast %76 : vector<1x120x112xf32> to vector<120x112xf32>
    %cst_64 = arith.constant dense<0.000000e+00> : vector<14x112xf32>
    %78 = tpu.matmul %14, %77, %cst_64 {dimension_numbers = #tpu.dot_dimension_numbers<[1], [0], [0], [1], [0, 0, 1, 1], [], []>} : vector<14x120xf32>, vector<120x112xf32>, vector<14x112xf32> -> vector<14x112xf32>
    %79 = arith.addf %75, %78 : vector<14x112xf32>
    %80 = vector.broadcast %2 : vector<1x112xf32> to vector<14x112xf32>
    %81 = arith.addf %79, %80 : vector<14x112xf32>
    %cst_65 = arith.constant 0.000000e+00 : f32
    %82 = vector.broadcast %cst_65 : f32 to vector<14x112xf32>
    %83 = arith.maximumf %81, %82 : vector<14x112xf32>
    %84 = arith.cmpf ogt, %83, %66 : vector<14x112xf32>
    %85 = arith.select %84, %83, %66 : vector<14x112xi1>, vector<14x112xf32>
    %c3_i32 = arith.constant 3 : i32
    %86 = vector.broadcast %c3_i32 : i32 to vector<14x112xi32>
    %87 = arith.select %84, %86, %68 : vector<14x112xi1>, vector<14x112xi32>
    %c0_66 = arith.constant 0 : index
    %c0_67 = arith.constant 0 : index
    %88 = vector.load %arg24[%c0_66, %c0_67] : memref<1x96xf32, #tpu.memory_space<vmem>>, vector<1x96xf32>
    %c0_68 = arith.constant 0 : index
    %c0_69 = arith.constant 0 : index
    %c0_70 = arith.constant 0 : index
    %89 = vector.load %arg25[%c0_68, %c0_69, %c0_70] : memref<4x6x14xf32, #tpu.memory_space<vmem>>, vector<1x6x14xf32>
    %90 = vector.shape_cast %89 : vector<1x6x14xf32> to vector<6x14xf32>
    %cst_71 = arith.constant dense<0.000000e+00> : vector<6x112xf32>
    %91 = tpu.matmul %90, %85, %cst_71 {dimension_numbers = #tpu.dot_dimension_numbers<[1], [0], [0], [1], [0, 0, 1, 1], [], []>} : vector<6x14xf32>, vector<14x112xf32>, vector<6x112xf32> -> vector<6x112xf32>
    %c1_72 = arith.constant 1 : index
    %c0_73 = arith.constant 0 : index
    %c0_74 = arith.constant 0 : index
    %92 = vector.load %arg25[%c1_72, %c0_73, %c0_74] : memref<4x6x14xf32, #tpu.memory_space<vmem>>, vector<1x6x14xf32>
    %93 = vector.shape_cast %92 : vector<1x6x14xf32> to vector<6x14xf32>
    %cst_75 = arith.constant dense<0.000000e+00> : vector<6x112xf32>
    %94 = tpu.matmul %93, %85, %cst_75 {dimension_numbers = #tpu.dot_dimension_numbers<[1], [0], [0], [1], [0, 0, 1, 1], [], []>} : vector<6x14xf32>, vector<14x112xf32>, vector<6x112xf32> -> vector<6x112xf32>
    %c2_76 = arith.constant 2 : index
    %c0_77 = arith.constant 0 : index
    %c0_78 = arith.constant 0 : index
    %95 = vector.load %arg25[%c2_76, %c0_77, %c0_78] : memref<4x6x14xf32, #tpu.memory_space<vmem>>, vector<1x6x14xf32>
    %96 = vector.shape_cast %95 : vector<1x6x14xf32> to vector<6x14xf32>
    %cst_79 = arith.constant dense<0.000000e+00> : vector<6x112xf32>
    %97 = tpu.matmul %96, %85, %cst_79 {dimension_numbers = #tpu.dot_dimension_numbers<[1], [0], [0], [1], [0, 0, 1, 1], [], []>} : vector<6x14xf32>, vector<14x112xf32>, vector<6x112xf32> -> vector<6x112xf32>
    %c3_80 = arith.constant 3 : index
    %c0_81 = arith.constant 0 : index
    %c0_82 = arith.constant 0 : index
    %98 = vector.load %arg25[%c3_80, %c0_81, %c0_82] : memref<4x6x14xf32, #tpu.memory_space<vmem>>, vector<1x6x14xf32>
    %99 = vector.shape_cast %98 : vector<1x6x14xf32> to vector<6x14xf32>
    %cst_83 = arith.constant dense<0.000000e+00> : vector<6x112xf32>
    %100 = tpu.matmul %99, %85, %cst_83 {dimension_numbers = #tpu.dot_dimension_numbers<[1], [0], [0], [1], [0, 0, 1, 1], [], []>} : vector<6x14xf32>, vector<14x112xf32>, vector<6x112xf32> -> vector<6x112xf32>
    %c0_84 = arith.constant 0 : index
    %c0_85 = arith.constant 0 : index
    %c0_86 = arith.constant 0 : index
    %101 = vector.load %arg26[%c0_84, %c0_85, %c0_86] : memref<6x112x96xf32, #tpu.memory_space<vmem>>, vector<1x112x96xf32>
    %102 = vector.shape_cast %101 : vector<1x112x96xf32> to vector<112x96xf32>
    %cst_87 = arith.constant dense<0.000000e+00> : vector<6x96xf32>
    %103 = tpu.matmul %91, %102, %cst_87 {dimension_numbers = #tpu.dot_dimension_numbers<[1], [0], [0], [1], [0, 0, 1, 1], [], []>} : vector<6x112xf32>, vector<112x96xf32>, vector<6x96xf32> -> vector<6x96xf32>
    %c2_88 = arith.constant 2 : index
    %c0_89 = arith.constant 0 : index
    %c0_90 = arith.constant 0 : index
    %104 = vector.load %arg26[%c2_88, %c0_89, %c0_90] : memref<6x112x96xf32, #tpu.memory_space<vmem>>, vector<1x112x96xf32>
    %105 = vector.shape_cast %104 : vector<1x112x96xf32> to vector<112x96xf32>
    %cst_91 = arith.constant dense<0.000000e+00> : vector<6x96xf32>
    %106 = tpu.matmul %94, %105, %cst_91 {dimension_numbers = #tpu.dot_dimension_numbers<[1], [0], [0], [1], [0, 0, 1, 1], [], []>} : vector<6x112xf32>, vector<112x96xf32>, vector<6x96xf32> -> vector<6x96xf32>
    %107 = arith.addf %103, %106 : vector<6x96xf32>
    %c4_92 = arith.constant 4 : index
    %c0_93 = arith.constant 0 : index
    %c0_94 = arith.constant 0 : index
    %108 = vector.load %arg26[%c4_92, %c0_93, %c0_94] : memref<6x112x96xf32, #tpu.memory_space<vmem>>, vector<1x112x96xf32>
    %109 = vector.shape_cast %108 : vector<1x112x96xf32> to vector<112x96xf32>
    %cst_95 = arith.constant dense<0.000000e+00> : vector<6x96xf32>
    %110 = tpu.matmul %97, %109, %cst_95 {dimension_numbers = #tpu.dot_dimension_numbers<[1], [0], [0], [1], [0, 0, 1, 1], [], []>} : vector<6x112xf32>, vector<112x96xf32>, vector<6x96xf32> -> vector<6x96xf32>
    %111 = arith.addf %107, %110 : vector<6x96xf32>
    %112 = vector.broadcast %88 : vector<1x96xf32> to vector<6x96xf32>
    %113 = arith.addf %111, %112 : vector<6x96xf32>
    %cst_96 = arith.constant 0.000000e+00 : f32
    %114 = vector.broadcast %cst_96 : f32 to vector<6x96xf32>
    %115 = arith.maximumf %113, %114 : vector<6x96xf32>
    %c0_i32_97 = arith.constant 0 : i32
    %116 = vector.broadcast %c0_i32_97 : i32 to vector<6x96xi32>
    %c1_98 = arith.constant 1 : index
    %c0_99 = arith.constant 0 : index
    %c0_100 = arith.constant 0 : index
    %117 = vector.load %arg26[%c1_98, %c0_99, %c0_100] : memref<6x112x96xf32, #tpu.memory_space<vmem>>, vector<1x112x96xf32>
    %118 = vector.shape_cast %117 : vector<1x112x96xf32> to vector<112x96xf32>
    %cst_101 = arith.constant dense<0.000000e+00> : vector<6x96xf32>
    %119 = tpu.matmul %91, %118, %cst_101 {dimension_numbers = #tpu.dot_dimension_numbers<[1], [0], [0], [1], [0, 0, 1, 1], [], []>} : vector<6x112xf32>, vector<112x96xf32>, vector<6x96xf32> -> vector<6x96xf32>
    %c3_102 = arith.constant 3 : index
    %c0_103 = arith.constant 0 : index
    %c0_104 = arith.constant 0 : index
    %120 = vector.load %arg26[%c3_102, %c0_103, %c0_104] : memref<6x112x96xf32, #tpu.memory_space<vmem>>, vector<1x112x96xf32>
    %121 = vector.shape_cast %120 : vector<1x112x96xf32> to vector<112x96xf32>
    %cst_105 = arith.constant dense<0.000000e+00> : vector<6x96xf32>
    %122 = tpu.matmul %94, %121, %cst_105 {dimension_numbers = #tpu.dot_dimension_numbers<[1], [0], [0], [1], [0, 0, 1, 1], [], []>} : vector<6x112xf32>, vector<112x96xf32>, vector<6x96xf32> -> vector<6x96xf32>
    %123 = arith.addf %119, %122 : vector<6x96xf32>
    %c5_106 = arith.constant 5 : index
    %c0_107 = arith.constant 0 : index
    %c0_108 = arith.constant 0 : index
    %124 = vector.load %arg26[%c5_106, %c0_107, %c0_108] : memref<6x112x96xf32, #tpu.memory_space<vmem>>, vector<1x112x96xf32>
    %125 = vector.shape_cast %124 : vector<1x112x96xf32> to vector<112x96xf32>
    %cst_109 = arith.constant dense<0.000000e+00> : vector<6x96xf32>
    %126 = tpu.matmul %97, %125, %cst_109 {dimension_numbers = #tpu.dot_dimension_numbers<[1], [0], [0], [1], [0, 0, 1, 1], [], []>} : vector<6x112xf32>, vector<112x96xf32>, vector<6x96xf32> -> vector<6x96xf32>
    %127 = arith.addf %123, %126 : vector<6x96xf32>
    %128 = vector.broadcast %88 : vector<1x96xf32> to vector<6x96xf32>
    %129 = arith.addf %127, %128 : vector<6x96xf32>
    %cst_110 = arith.constant 0.000000e+00 : f32
    %130 = vector.broadcast %cst_110 : f32 to vector<6x96xf32>
    %131 = arith.maximumf %129, %130 : vector<6x96xf32>
    %132 = arith.cmpf ogt, %131, %115 : vector<6x96xf32>
    %133 = arith.select %132, %131, %115 : vector<6x96xi1>, vector<6x96xf32>
    %c1_i32_111 = arith.constant 1 : i32
    %134 = vector.broadcast %c1_i32_111 : i32 to vector<6x96xi32>
    %135 = arith.select %132, %134, %116 : vector<6x96xi1>, vector<6x96xi32>
    %c0_112 = arith.constant 0 : index
    %c0_113 = arith.constant 0 : index
    %c0_114 = arith.constant 0 : index
    %136 = vector.load %arg26[%c0_112, %c0_113, %c0_114] : memref<6x112x96xf32, #tpu.memory_space<vmem>>, vector<1x112x96xf32>
    %137 = vector.shape_cast %136 : vector<1x112x96xf32> to vector<112x96xf32>
    %cst_115 = arith.constant dense<0.000000e+00> : vector<6x96xf32>
    %138 = tpu.matmul %94, %137, %cst_115 {dimension_numbers = #tpu.dot_dimension_numbers<[1], [0], [0], [1], [0, 0, 1, 1], [], []>} : vector<6x112xf32>, vector<112x96xf32>, vector<6x96xf32> -> vector<6x96xf32>
    %c2_116 = arith.constant 2 : index
    %c0_117 = arith.constant 0 : index
    %c0_118 = arith.constant 0 : index
    %139 = vector.load %arg26[%c2_116, %c0_117, %c0_118] : memref<6x112x96xf32, #tpu.memory_space<vmem>>, vector<1x112x96xf32>
    %140 = vector.shape_cast %139 : vector<1x112x96xf32> to vector<112x96xf32>
    %cst_119 = arith.constant dense<0.000000e+00> : vector<6x96xf32>
    %141 = tpu.matmul %97, %140, %cst_119 {dimension_numbers = #tpu.dot_dimension_numbers<[1], [0], [0], [1], [0, 0, 1, 1], [], []>} : vector<6x112xf32>, vector<112x96xf32>, vector<6x96xf32> -> vector<6x96xf32>
    %142 = arith.addf %138, %141 : vector<6x96xf32>
    %c4_120 = arith.constant 4 : index
    %c0_121 = arith.constant 0 : index
    %c0_122 = arith.constant 0 : index
    %143 = vector.load %arg26[%c4_120, %c0_121, %c0_122] : memref<6x112x96xf32, #tpu.memory_space<vmem>>, vector<1x112x96xf32>
    %144 = vector.shape_cast %143 : vector<1x112x96xf32> to vector<112x96xf32>
    %cst_123 = arith.constant dense<0.000000e+00> : vector<6x96xf32>
    %145 = tpu.matmul %100, %144, %cst_123 {dimension_numbers = #tpu.dot_dimension_numbers<[1], [0], [0], [1], [0, 0, 1, 1], [], []>} : vector<6x112xf32>, vector<112x96xf32>, vector<6x96xf32> -> vector<6x96xf32>
    %146 = arith.addf %142, %145 : vector<6x96xf32>
    %147 = vector.broadcast %88 : vector<1x96xf32> to vector<6x96xf32>
    %148 = arith.addf %146, %147 : vector<6x96xf32>
    %cst_124 = arith.constant 0.000000e+00 : f32
    %149 = vector.broadcast %cst_124 : f32 to vector<6x96xf32>
    %150 = arith.maximumf %148, %149 : vector<6x96xf32>
    %151 = arith.cmpf ogt, %150, %133 : vector<6x96xf32>
    %152 = arith.select %151, %150, %133 : vector<6x96xi1>, vector<6x96xf32>
    %c2_i32_125 = arith.constant 2 : i32
    %153 = vector.broadcast %c2_i32_125 : i32 to vector<6x96xi32>
    %154 = arith.select %151, %153, %135 : vector<6x96xi1>, vector<6x96xi32>
    %c1_126 = arith.constant 1 : index
    %c0_127 = arith.constant 0 : index
    %c0_128 = arith.constant 0 : index
    %155 = vector.load %arg26[%c1_126, %c0_127, %c0_128] : memref<6x112x96xf32, #tpu.memory_space<vmem>>, vector<1x112x96xf32>
    %156 = vector.shape_cast %155 : vector<1x112x96xf32> to vector<112x96xf32>
    %cst_129 = arith.constant dense<0.000000e+00> : vector<6x96xf32>
    %157 = tpu.matmul %94, %156, %cst_129 {dimension_numbers = #tpu.dot_dimension_numbers<[1], [0], [0], [1], [0, 0, 1, 1], [], []>} : vector<6x112xf32>, vector<112x96xf32>, vector<6x96xf32> -> vector<6x96xf32>
    %c3_130 = arith.constant 3 : index
    %c0_131 = arith.constant 0 : index
    %c0_132 = arith.constant 0 : index
    %158 = vector.load %arg26[%c3_130, %c0_131, %c0_132] : memref<6x112x96xf32, #tpu.memory_space<vmem>>, vector<1x112x96xf32>
    %159 = vector.shape_cast %158 : vector<1x112x96xf32> to vector<112x96xf32>
    %cst_133 = arith.constant dense<0.000000e+00> : vector<6x96xf32>
    %160 = tpu.matmul %97, %159, %cst_133 {dimension_numbers = #tpu.dot_dimension_numbers<[1], [0], [0], [1], [0, 0, 1, 1], [], []>} : vector<6x112xf32>, vector<112x96xf32>, vector<6x96xf32> -> vector<6x96xf32>
    %161 = arith.addf %157, %160 : vector<6x96xf32>
    %c5_134 = arith.constant 5 : index
    %c0_135 = arith.constant 0 : index
    %c0_136 = arith.constant 0 : index
    %162 = vector.load %arg26[%c5_134, %c0_135, %c0_136] : memref<6x112x96xf32, #tpu.memory_space<vmem>>, vector<1x112x96xf32>
    %163 = vector.shape_cast %162 : vector<1x112x96xf32> to vector<112x96xf32>
    %cst_137 = arith.constant dense<0.000000e+00> : vector<6x96xf32>
    %164 = tpu.matmul %100, %163, %cst_137 {dimension_numbers = #tpu.dot_dimension_numbers<[1], [0], [0], [1], [0, 0, 1, 1], [], []>} : vector<6x112xf32>, vector<112x96xf32>, vector<6x96xf32> -> vector<6x96xf32>
    %165 = arith.addf %161, %164 : vector<6x96xf32>
    %166 = vector.broadcast %88 : vector<1x96xf32> to vector<6x96xf32>
    %167 = arith.addf %165, %166 : vector<6x96xf32>
    %cst_138 = arith.constant 0.000000e+00 : f32
    %168 = vector.broadcast %cst_138 : f32 to vector<6x96xf32>
    %169 = arith.maximumf %167, %168 : vector<6x96xf32>
    %170 = arith.cmpf ogt, %169, %152 : vector<6x96xf32>
    %171 = arith.select %170, %169, %152 : vector<6x96xi1>, vector<6x96xf32>
    %c3_i32_139 = arith.constant 3 : i32
    %172 = vector.broadcast %c3_i32_139 : i32 to vector<6x96xi32>
    %173 = arith.select %170, %172, %154 : vector<6x96xi1>, vector<6x96xi32>
    %c0_140 = arith.constant 0 : index
    %c0_141 = arith.constant 0 : index
    %174 = vector.load %arg27[%c0_140, %c0_141] : memref<1x64xf32, #tpu.memory_space<vmem>>, vector<1x64xf32>
    %c0_142 = arith.constant 0 : index
    %c0_143 = arith.constant 0 : index
    %c0_144 = arith.constant 0 : index
    %175 = vector.load %arg28[%c0_142, %c0_143, %c0_144] : memref<4x2x6xf32, #tpu.memory_space<vmem>>, vector<1x2x6xf32>
    %176 = vector.shape_cast %175 : vector<1x2x6xf32> to vector<2x6xf32>
    %cst_145 = arith.constant dense<0.000000e+00> : vector<2x96xf32>
    %177 = tpu.matmul %176, %171, %cst_145 {dimension_numbers = #tpu.dot_dimension_numbers<[1], [0], [0], [1], [0, 0, 1, 1], [], []>} : vector<2x6xf32>, vector<6x96xf32>, vector<2x96xf32> -> vector<2x96xf32>
    %c1_146 = arith.constant 1 : index
    %c0_147 = arith.constant 0 : index
    %c0_148 = arith.constant 0 : index
    %178 = vector.load %arg28[%c1_146, %c0_147, %c0_148] : memref<4x2x6xf32, #tpu.memory_space<vmem>>, vector<1x2x6xf32>
    %179 = vector.shape_cast %178 : vector<1x2x6xf32> to vector<2x6xf32>
    %cst_149 = arith.constant dense<0.000000e+00> : vector<2x96xf32>
    %180 = tpu.matmul %179, %171, %cst_149 {dimension_numbers = #tpu.dot_dimension_numbers<[1], [0], [0], [1], [0, 0, 1, 1], [], []>} : vector<2x6xf32>, vector<6x96xf32>, vector<2x96xf32> -> vector<2x96xf32>
    %c2_150 = arith.constant 2 : index
    %c0_151 = arith.constant 0 : index
    %c0_152 = arith.constant 0 : index
    %181 = vector.load %arg28[%c2_150, %c0_151, %c0_152] : memref<4x2x6xf32, #tpu.memory_space<vmem>>, vector<1x2x6xf32>
    %182 = vector.shape_cast %181 : vector<1x2x6xf32> to vector<2x6xf32>
    %cst_153 = arith.constant dense<0.000000e+00> : vector<2x96xf32>
    %183 = tpu.matmul %182, %171, %cst_153 {dimension_numbers = #tpu.dot_dimension_numbers<[1], [0], [0], [1], [0, 0, 1, 1], [], []>} : vector<2x6xf32>, vector<6x96xf32>, vector<2x96xf32> -> vector<2x96xf32>
    %c3_154 = arith.constant 3 : index
    %c0_155 = arith.constant 0 : index
    %c0_156 = arith.constant 0 : index
    %184 = vector.load %arg28[%c3_154, %c0_155, %c0_156] : memref<4x2x6xf32, #tpu.memory_space<vmem>>, vector<1x2x6xf32>
    %185 = vector.shape_cast %184 : vector<1x2x6xf32> to vector<2x6xf32>
    %cst_157 = arith.constant dense<0.000000e+00> : vector<2x96xf32>
    %186 = tpu.matmul %185, %171, %cst_157 {dimension_numbers = #tpu.dot_dimension_numbers<[1], [0], [0], [1], [0, 0, 1, 1], [], []>} : vector<2x6xf32>, vector<6x96xf32>, vector<2x96xf32> -> vector<2x96xf32>
    %c0_158 = arith.constant 0 : index
    %c0_159 = arith.constant 0 : index
    %c0_160 = arith.constant 0 : index
    %187 = vector.load %arg29[%c0_158, %c0_159, %c0_160] : memref<6x96x64xf32, #tpu.memory_space<vmem>>, vector<1x96x64xf32>
    %188 = vector.shape_cast %187 : vector<1x96x64xf32> to vector<96x64xf32>
    %cst_161 = arith.constant dense<0.000000e+00> : vector<2x64xf32>
    %189 = tpu.matmul %177, %188, %cst_161 {dimension_numbers = #tpu.dot_dimension_numbers<[1], [0], [0], [1], [0, 0, 1, 1], [], []>} : vector<2x96xf32>, vector<96x64xf32>, vector<2x64xf32> -> vector<2x64xf32>
    %c2_162 = arith.constant 2 : index
    %c0_163 = arith.constant 0 : index
    %c0_164 = arith.constant 0 : index
    %190 = vector.load %arg29[%c2_162, %c0_163, %c0_164] : memref<6x96x64xf32, #tpu.memory_space<vmem>>, vector<1x96x64xf32>
    %191 = vector.shape_cast %190 : vector<1x96x64xf32> to vector<96x64xf32>
    %cst_165 = arith.constant dense<0.000000e+00> : vector<2x64xf32>
    %192 = tpu.matmul %180, %191, %cst_165 {dimension_numbers = #tpu.dot_dimension_numbers<[1], [0], [0], [1], [0, 0, 1, 1], [], []>} : vector<2x96xf32>, vector<96x64xf32>, vector<2x64xf32> -> vector<2x64xf32>
    %193 = arith.addf %189, %192 : vector<2x64xf32>
    %c4_166 = arith.constant 4 : index
    %c0_167 = arith.constant 0 : index
    %c0_168 = arith.constant 0 : index
    %194 = vector.load %arg29[%c4_166, %c0_167, %c0_168] : memref<6x96x64xf32, #tpu.memory_space<vmem>>, vector<1x96x64xf32>
    %195 = vector.shape_cast %194 : vector<1x96x64xf32> to vector<96x64xf32>
    %cst_169 = arith.constant dense<0.000000e+00> : vector<2x64xf32>
    %196 = tpu.matmul %183, %195, %cst_169 {dimension_numbers = #tpu.dot_dimension_numbers<[1], [0], [0], [1], [0, 0, 1, 1], [], []>} : vector<2x96xf32>, vector<96x64xf32>, vector<2x64xf32> -> vector<2x64xf32>
    %197 = arith.addf %193, %196 : vector<2x64xf32>
    %198 = vector.broadcast %174 : vector<1x64xf32> to vector<2x64xf32>
    %199 = arith.addf %197, %198 : vector<2x64xf32>
    %cst_170 = arith.constant 0.000000e+00 : f32
    %200 = vector.broadcast %cst_170 : f32 to vector<2x64xf32>
    %201 = arith.maximumf %199, %200 : vector<2x64xf32>
    %c0_i32_171 = arith.constant 0 : i32
    %202 = vector.broadcast %c0_i32_171 : i32 to vector<2x64xi32>
    %c1_172 = arith.constant 1 : index
    %c0_173 = arith.constant 0 : index
    %c0_174 = arith.constant 0 : index
    %203 = vector.load %arg29[%c1_172, %c0_173, %c0_174] : memref<6x96x64xf32, #tpu.memory_space<vmem>>, vector<1x96x64xf32>
    %204 = vector.shape_cast %203 : vector<1x96x64xf32> to vector<96x64xf32>
    %cst_175 = arith.constant dense<0.000000e+00> : vector<2x64xf32>
    %205 = tpu.matmul %177, %204, %cst_175 {dimension_numbers = #tpu.dot_dimension_numbers<[1], [0], [0], [1], [0, 0, 1, 1], [], []>} : vector<2x96xf32>, vector<96x64xf32>, vector<2x64xf32> -> vector<2x64xf32>
    %c3_176 = arith.constant 3 : index
    %c0_177 = arith.constant 0 : index
    %c0_178 = arith.constant 0 : index
    %206 = vector.load %arg29[%c3_176, %c0_177, %c0_178] : memref<6x96x64xf32, #tpu.memory_space<vmem>>, vector<1x96x64xf32>
    %207 = vector.shape_cast %206 : vector<1x96x64xf32> to vector<96x64xf32>
    %cst_179 = arith.constant dense<0.000000e+00> : vector<2x64xf32>
    %208 = tpu.matmul %180, %207, %cst_179 {dimension_numbers = #tpu.dot_dimension_numbers<[1], [0], [0], [1], [0, 0, 1, 1], [], []>} : vector<2x96xf32>, vector<96x64xf32>, vector<2x64xf32> -> vector<2x64xf32>
    %209 = arith.addf %205, %208 : vector<2x64xf32>
    %c5_180 = arith.constant 5 : index
    %c0_181 = arith.constant 0 : index
    %c0_182 = arith.constant 0 : index
    %210 = vector.load %arg29[%c5_180, %c0_181, %c0_182] : memref<6x96x64xf32, #tpu.memory_space<vmem>>, vector<1x96x64xf32>
    %211 = vector.shape_cast %210 : vector<1x96x64xf32> to vector<96x64xf32>
    %cst_183 = arith.constant dense<0.000000e+00> : vector<2x64xf32>
    %212 = tpu.matmul %183, %211, %cst_183 {dimension_numbers = #tpu.dot_dimension_numbers<[1], [0], [0], [1], [0, 0, 1, 1], [], []>} : vector<2x96xf32>, vector<96x64xf32>, vector<2x64xf32> -> vector<2x64xf32>
    %213 = arith.addf %209, %212 : vector<2x64xf32>
    %214 = vector.broadcast %174 : vector<1x64xf32> to vector<2x64xf32>
    %215 = arith.addf %213, %214 : vector<2x64xf32>
    %cst_184 = arith.constant 0.000000e+00 : f32
    %216 = vector.broadcast %cst_184 : f32 to vector<2x64xf32>
    %217 = arith.maximumf %215, %216 : vector<2x64xf32>
    %218 = arith.cmpf ogt, %217, %201 : vector<2x64xf32>
    %219 = arith.select %218, %217, %201 : vector<2x64xi1>, vector<2x64xf32>
    %c1_i32_185 = arith.constant 1 : i32
    %220 = vector.broadcast %c1_i32_185 : i32 to vector<2x64xi32>
    %221 = arith.select %218, %220, %202 : vector<2x64xi1>, vector<2x64xi32>
    %c0_186 = arith.constant 0 : index
    %c0_187 = arith.constant 0 : index
    %c0_188 = arith.constant 0 : index
    %222 = vector.load %arg29[%c0_186, %c0_187, %c0_188] : memref<6x96x64xf32, #tpu.memory_space<vmem>>, vector<1x96x64xf32>
    %223 = vector.shape_cast %222 : vector<1x96x64xf32> to vector<96x64xf32>
    %cst_189 = arith.constant dense<0.000000e+00> : vector<2x64xf32>
    %224 = tpu.matmul %180, %223, %cst_189 {dimension_numbers = #tpu.dot_dimension_numbers<[1], [0], [0], [1], [0, 0, 1, 1], [], []>} : vector<2x96xf32>, vector<96x64xf32>, vector<2x64xf32> -> vector<2x64xf32>
    %c2_190 = arith.constant 2 : index
    %c0_191 = arith.constant 0 : index
    %c0_192 = arith.constant 0 : index
    %225 = vector.load %arg29[%c2_190, %c0_191, %c0_192] : memref<6x96x64xf32, #tpu.memory_space<vmem>>, vector<1x96x64xf32>
    %226 = vector.shape_cast %225 : vector<1x96x64xf32> to vector<96x64xf32>
    %cst_193 = arith.constant dense<0.000000e+00> : vector<2x64xf32>
    %227 = tpu.matmul %183, %226, %cst_193 {dimension_numbers = #tpu.dot_dimension_numbers<[1], [0], [0], [1], [0, 0, 1, 1], [], []>} : vector<2x96xf32>, vector<96x64xf32>, vector<2x64xf32> -> vector<2x64xf32>
    %228 = arith.addf %224, %227 : vector<2x64xf32>
    %c4_194 = arith.constant 4 : index
    %c0_195 = arith.constant 0 : index
    %c0_196 = arith.constant 0 : index
    %229 = vector.load %arg29[%c4_194, %c0_195, %c0_196] : memref<6x96x64xf32, #tpu.memory_space<vmem>>, vector<1x96x64xf32>
    %230 = vector.shape_cast %229 : vector<1x96x64xf32> to vector<96x64xf32>
    %cst_197 = arith.constant dense<0.000000e+00> : vector<2x64xf32>
    %231 = tpu.matmul %186, %230, %cst_197 {dimension_numbers = #tpu.dot_dimension_numbers<[1], [0], [0], [1], [0, 0, 1, 1], [], []>} : vector<2x96xf32>, vector<96x64xf32>, vector<2x64xf32> -> vector<2x64xf32>
    %232 = arith.addf %228, %231 : vector<2x64xf32>
    %233 = vector.broadcast %174 : vector<1x64xf32> to vector<2x64xf32>
    %234 = arith.addf %232, %233 : vector<2x64xf32>
    %cst_198 = arith.constant 0.000000e+00 : f32
    %235 = vector.broadcast %cst_198 : f32 to vector<2x64xf32>
    %236 = arith.maximumf %234, %235 : vector<2x64xf32>
    %237 = arith.cmpf ogt, %236, %219 : vector<2x64xf32>
    %238 = arith.select %237, %236, %219 : vector<2x64xi1>, vector<2x64xf32>
    %c2_i32_199 = arith.constant 2 : i32
    %239 = vector.broadcast %c2_i32_199 : i32 to vector<2x64xi32>
    %240 = arith.select %237, %239, %221 : vector<2x64xi1>, vector<2x64xi32>
    %c1_200 = arith.constant 1 : index
    %c0_201 = arith.constant 0 : index
    %c0_202 = arith.constant 0 : index
    %241 = vector.load %arg29[%c1_200, %c0_201, %c0_202] : memref<6x96x64xf32, #tpu.memory_space<vmem>>, vector<1x96x64xf32>
    %242 = vector.shape_cast %241 : vector<1x96x64xf32> to vector<96x64xf32>
    %cst_203 = arith.constant dense<0.000000e+00> : vector<2x64xf32>
    %243 = tpu.matmul %180, %242, %cst_203 {dimension_numbers = #tpu.dot_dimension_numbers<[1], [0], [0], [1], [0, 0, 1, 1], [], []>} : vector<2x96xf32>, vector<96x64xf32>, vector<2x64xf32> -> vector<2x64xf32>
    %c3_204 = arith.constant 3 : index
    %c0_205 = arith.constant 0 : index
    %c0_206 = arith.constant 0 : index
    %244 = vector.load %arg29[%c3_204, %c0_205, %c0_206] : memref<6x96x64xf32, #tpu.memory_space<vmem>>, vector<1x96x64xf32>
    %245 = vector.shape_cast %244 : vector<1x96x64xf32> to vector<96x64xf32>
    %cst_207 = arith.constant dense<0.000000e+00> : vector<2x64xf32>
    %246 = tpu.matmul %183, %245, %cst_207 {dimension_numbers = #tpu.dot_dimension_numbers<[1], [0], [0], [1], [0, 0, 1, 1], [], []>} : vector<2x96xf32>, vector<96x64xf32>, vector<2x64xf32> -> vector<2x64xf32>
    %247 = arith.addf %243, %246 : vector<2x64xf32>
    %c5_208 = arith.constant 5 : index
    %c0_209 = arith.constant 0 : index
    %c0_210 = arith.constant 0 : index
    %248 = vector.load %arg29[%c5_208, %c0_209, %c0_210] : memref<6x96x64xf32, #tpu.memory_space<vmem>>, vector<1x96x64xf32>
    %249 = vector.shape_cast %248 : vector<1x96x64xf32> to vector<96x64xf32>
    %cst_211 = arith.constant dense<0.000000e+00> : vector<2x64xf32>
    %250 = tpu.matmul %186, %249, %cst_211 {dimension_numbers = #tpu.dot_dimension_numbers<[1], [0], [0], [1], [0, 0, 1, 1], [], []>} : vector<2x96xf32>, vector<96x64xf32>, vector<2x64xf32> -> vector<2x64xf32>
    %251 = arith.addf %247, %250 : vector<2x64xf32>
    %252 = vector.broadcast %174 : vector<1x64xf32> to vector<2x64xf32>
    %253 = arith.addf %251, %252 : vector<2x64xf32>
    %cst_212 = arith.constant 0.000000e+00 : f32
    %254 = vector.broadcast %cst_212 : f32 to vector<2x64xf32>
    %255 = arith.maximumf %253, %254 : vector<2x64xf32>
    %256 = arith.cmpf ogt, %255, %238 : vector<2x64xf32>
    %257 = arith.select %256, %255, %238 : vector<2x64xi1>, vector<2x64xf32>
    %c3_i32_213 = arith.constant 3 : i32
    %258 = vector.broadcast %c3_i32_213 : i32 to vector<2x64xi32>
    %259 = arith.select %256, %258, %240 : vector<2x64xi1>, vector<2x64xi32>
    %c0_214 = arith.constant 0 : index
    %c0_215 = arith.constant 0 : index
    %c0_216 = arith.constant 0 : index
    %260 = vector.load %arg2[%c0_214, %c0_215, %c0_216] : memref<1x1x11xf32, #tpu.memory_space<vmem>>, vector<1x1x11xf32>
    %261 = vector.shape_cast %260 : vector<1x1x11xf32> to vector<1x11xf32>
    %c0_217 = arith.constant 0 : index
    %c0_218 = arith.constant 0 : index
    %c0_219 = arith.constant 0 : index
    %262 = vector.load %arg3[%c0_217, %c0_218, %c0_219] : memref<1x1x32xf32, #tpu.memory_space<vmem>>, vector<1x1x32xf32>
    %263 = vector.shape_cast %262 : vector<1x1x32xf32> to vector<1x32xf32>
    %264 = vector.extract_strided_slice %257 {offsets = [0, 0], sizes = [1, 64], strides = [1, 1]} : vector<2x64xf32> to vector<1x64xf32>
    %c0_220 = arith.constant 0 : index
    %c0_221 = arith.constant 0 : index
    %c0_222 = arith.constant 0 : index
    %265 = vector.load %arg31[%c0_220, %c0_221, %c0_222] : memref<2x64x100xf32, #tpu.memory_space<vmem>>, vector<1x64x100xf32>
    %266 = vector.shape_cast %265 : vector<1x64x100xf32> to vector<64x100xf32>
    %cst_223 = arith.constant dense<0.000000e+00> : vector<1x100xf32>
    %267 = tpu.matmul %264, %266, %cst_223 {dimension_numbers = #tpu.dot_dimension_numbers<[1], [0], [0], [1], [0, 0, 1, 1], [], []>} : vector<1x64xf32>, vector<64x100xf32>, vector<1x100xf32> -> vector<1x100xf32>
    %268 = vector.extract_strided_slice %257 {offsets = [1, 0], sizes = [1, 64], strides = [1, 1]} : vector<2x64xf32> to vector<1x64xf32>
    %c1_224 = arith.constant 1 : index
    %c0_225 = arith.constant 0 : index
    %c0_226 = arith.constant 0 : index
    %269 = vector.load %arg31[%c1_224, %c0_225, %c0_226] : memref<2x64x100xf32, #tpu.memory_space<vmem>>, vector<1x64x100xf32>
    %270 = vector.shape_cast %269 : vector<1x64x100xf32> to vector<64x100xf32>
    %cst_227 = arith.constant dense<0.000000e+00> : vector<1x100xf32>
    %271 = tpu.matmul %268, %270, %cst_227 {dimension_numbers = #tpu.dot_dimension_numbers<[1], [0], [0], [1], [0, 0, 1, 1], [], []>} : vector<1x64xf32>, vector<64x100xf32>, vector<1x100xf32> -> vector<1x100xf32>
    %272 = arith.addf %267, %271 : vector<1x100xf32>
    %c0_228 = arith.constant 0 : index
    %c0_229 = arith.constant 0 : index
    %273 = vector.load %arg32[%c0_228, %c0_229] : memref<11x100xf32, #tpu.memory_space<vmem>>, vector<11x100xf32>
    %cst_230 = arith.constant dense<0.000000e+00> : vector<1x100xf32>
    %274 = tpu.matmul %261, %273, %cst_230 {dimension_numbers = #tpu.dot_dimension_numbers<[1], [0], [0], [1], [0, 0, 1, 1], [], []>} : vector<1x11xf32>, vector<11x100xf32>, vector<1x100xf32> -> vector<1x100xf32>
    %275 = arith.addf %272, %274 : vector<1x100xf32>
    %c0_231 = arith.constant 0 : index
    %c0_232 = arith.constant 0 : index
    %276 = vector.load %arg30[%c0_231, %c0_232] : memref<1x100xf32, #tpu.memory_space<vmem>>, vector<1x100xf32>
    %277 = arith.addf %275, %276 : vector<1x100xf32>
    %cst_233 = arith.constant 0.000000e+00 : f32
    %278 = vector.broadcast %cst_233 : f32 to vector<1x100xf32>
    %279 = arith.maximumf %277, %278 : vector<1x100xf32>
    %c0_234 = arith.constant 0 : index
    %c0_235 = arith.constant 0 : index
    %280 = vector.load %arg36[%c0_234, %c0_235] : memref<100x64xf32, #tpu.memory_space<vmem>>, vector<100x64xf32>
    %cst_236 = arith.constant dense<0.000000e+00> : vector<1x64xf32>
    %281 = tpu.matmul %279, %280, %cst_236 {dimension_numbers = #tpu.dot_dimension_numbers<[1], [0], [0], [1], [0, 0, 1, 1], [], []>} : vector<1x100xf32>, vector<100x64xf32>, vector<1x64xf32> -> vector<1x64xf32>
    %c0_237 = arith.constant 0 : index
    %c0_238 = arith.constant 0 : index
    %282 = vector.load %arg35[%c0_237, %c0_238] : memref<1x64xf32, #tpu.memory_space<vmem>>, vector<1x64xf32>
    %283 = arith.addf %281, %282 : vector<1x64xf32>
    %284 = vector.extract_strided_slice %283 {offsets = [0, 0], sizes = [1, 32], strides = [1, 1]} : vector<1x64xf32> to vector<1x32xf32>
    %285 = vector.extract_strided_slice %283 {offsets = [0, 32], sizes = [1, 32], strides = [1, 1]} : vector<1x64xf32> to vector<1x32xf32>
    %cst_239 = arith.constant 5.000000e-01 : f32
    %286 = vector.broadcast %cst_239 : f32 to vector<1x32xf32>
    %287 = arith.mulf %286, %285 : vector<1x32xf32>
    %288 = math.exp %287 : vector<1x32xf32>
    %289 = arith.mulf %263, %288 : vector<1x32xf32>
    %290 = arith.addf %289, %284 : vector<1x32xf32>
    %c0_240 = arith.constant 0 : index
    %c0_241 = arith.constant 0 : index
    %291 = vector.load %arg34[%c0_240, %c0_241] : memref<32x100xf32, #tpu.memory_space<vmem>>, vector<32x100xf32>
    %cst_242 = arith.constant dense<0.000000e+00> : vector<1x100xf32>
    %292 = tpu.matmul %290, %291, %cst_242 {dimension_numbers = #tpu.dot_dimension_numbers<[1], [0], [0], [1], [0, 0, 1, 1], [], []>} : vector<1x32xf32>, vector<32x100xf32>, vector<1x100xf32> -> vector<1x100xf32>
    %c0_243 = arith.constant 0 : index
    %c0_244 = arith.constant 0 : index
    %293 = vector.load %arg33[%c0_243, %c0_244] : memref<1x100xf32, #tpu.memory_space<vmem>>, vector<1x100xf32>
    %294 = arith.addf %292, %293 : vector<1x100xf32>
    %cst_245 = arith.constant 0.000000e+00 : f32
    %295 = vector.broadcast %cst_245 : f32 to vector<1x100xf32>
    %296 = arith.maximumf %294, %295 : vector<1x100xf32>
    %c0_246 = arith.constant 0 : index
    %c0_247 = arith.constant 0 : index
    %297 = vector.load %arg39[%c0_246, %c0_247] : memref<100x11xf32, #tpu.memory_space<vmem>>, vector<100x11xf32>
    %cst_248 = arith.constant dense<0.000000e+00> : vector<1x11xf32>
    %298 = tpu.matmul %296, %297, %cst_248 {dimension_numbers = #tpu.dot_dimension_numbers<[1], [0], [0], [1], [0, 0, 1, 1], [], []>} : vector<1x100xf32>, vector<100x11xf32>, vector<1x11xf32> -> vector<1x11xf32>
    %c0_249 = arith.constant 0 : index
    %c0_250 = arith.constant 0 : index
    %299 = vector.load %arg37[%c0_249, %c0_250] : memref<1x11xf32, #tpu.memory_space<vmem>>, vector<1x11xf32>
    %300 = arith.addf %298, %299 : vector<1x11xf32>
    %cst_251 = arith.constant dense<0xFF800000> : vector<1xf32>
    %301 = vector.multi_reduction <maximumf>, %300, %cst_251 [1] : vector<1x11xf32> to vector<1xf32>
    %302 = vector.shape_cast %301 : vector<1xf32> to vector<1x1xf32>
    %303 = vector.broadcast %302 : vector<1x1xf32> to vector<1x11xf32>
    %304 = arith.subf %300, %303 : vector<1x11xf32>
    %305 = math.exp %304 : vector<1x11xf32>
    %c0_252 = arith.constant 0 : index
    %c0_253 = arith.constant 0 : index
    %306 = vector.load %arg38[%c0_252, %c0_253] : memref<11x11xf32, #tpu.memory_space<vmem>>, vector<11x11xf32>
    %cst_254 = arith.constant dense<0.000000e+00> : vector<1x11xf32>
    %307 = tpu.matmul %305, %306, %cst_254 {dimension_numbers = #tpu.dot_dimension_numbers<[1], [0], [0], [1], [0, 0, 1, 1], [], []>} : vector<1x11xf32>, vector<11x11xf32>, vector<1x11xf32> -> vector<1x11xf32>
    %308 = arith.divf %305, %307 : vector<1x11xf32>
    %c0_255 = arith.constant 0 : index
    %c0_256 = arith.constant 0 : index
    %c0_257 = arith.constant 0 : index
    %309 = vector.load %arg5[%c0_255, %c0_256, %c0_257] : memref<2x100x64xf32, #tpu.memory_space<vmem>>, vector<1x100x64xf32>
    %310 = vector.shape_cast %309 : vector<1x100x64xf32> to vector<100x64xf32>
    %cst_258 = arith.constant dense<0.000000e+00> : vector<1x64xf32>
    %311 = tpu.matmul %296, %310, %cst_258 {dimension_numbers = #tpu.dot_dimension_numbers<[1], [0], [0], [1], [0, 0, 1, 1], [], []>} : vector<1x100xf32>, vector<100x64xf32>, vector<1x64xf32> -> vector<1x64xf32>
    %c0_259 = arith.constant 0 : index
    %c0_260 = arith.constant 0 : index
    %c0_261 = arith.constant 0 : index
    %312 = vector.load %arg4[%c0_259, %c0_260, %c0_261] : memref<2x1x64xf32, #tpu.memory_space<vmem>>, vector<1x1x64xf32>
    %313 = vector.shape_cast %312 : vector<1x1x64xf32> to vector<1x64xf32>
    %314 = arith.addf %311, %313 : vector<1x64xf32>
    %cst_262 = arith.constant 0.000000e+00 : f32
    %315 = vector.broadcast %cst_262 : f32 to vector<1x64xf32>
    %316 = arith.maximumf %314, %315 : vector<1x64xf32>
    %c0_263 = arith.constant 0 : index
    %c0_264 = arith.constant 0 : index
    %c0_265 = arith.constant 0 : index
    %317 = vector.load %arg40[%c0_263, %c0_264, %c0_265] : memref<2x2x64xf32, #tpu.memory_space<vmem>>, vector<1x2x64xf32>
    %318 = vector.shape_cast %317 : vector<1x2x64xf32> to vector<2x64xf32>
    %319 = vector.broadcast %316 : vector<1x64xf32> to vector<2x64xf32>
    %320 = arith.mulf %318, %319 : vector<2x64xf32>
    %c1_266 = arith.constant 1 : index
    %c0_267 = arith.constant 0 : index
    %c0_268 = arith.constant 0 : index
    %321 = vector.load %arg5[%c1_266, %c0_267, %c0_268] : memref<2x100x64xf32, #tpu.memory_space<vmem>>, vector<1x100x64xf32>
    %322 = vector.shape_cast %321 : vector<1x100x64xf32> to vector<100x64xf32>
    %cst_269 = arith.constant dense<0.000000e+00> : vector<1x64xf32>
    %323 = tpu.matmul %296, %322, %cst_269 {dimension_numbers = #tpu.dot_dimension_numbers<[1], [0], [0], [1], [0, 0, 1, 1], [], []>} : vector<1x100xf32>, vector<100x64xf32>, vector<1x64xf32> -> vector<1x64xf32>
    %c1_270 = arith.constant 1 : index
    %c0_271 = arith.constant 0 : index
    %c0_272 = arith.constant 0 : index
    %324 = vector.load %arg4[%c1_270, %c0_271, %c0_272] : memref<2x1x64xf32, #tpu.memory_space<vmem>>, vector<1x1x64xf32>
    %325 = vector.shape_cast %324 : vector<1x1x64xf32> to vector<1x64xf32>
    %326 = arith.addf %323, %325 : vector<1x64xf32>
    %cst_273 = arith.constant 0.000000e+00 : f32
    %327 = vector.broadcast %cst_273 : f32 to vector<1x64xf32>
    %328 = arith.maximumf %326, %327 : vector<1x64xf32>
    %c1_274 = arith.constant 1 : index
    %c0_275 = arith.constant 0 : index
    %c0_276 = arith.constant 0 : index
    %329 = vector.load %arg40[%c1_274, %c0_275, %c0_276] : memref<2x2x64xf32, #tpu.memory_space<vmem>>, vector<1x2x64xf32>
    %330 = vector.shape_cast %329 : vector<1x2x64xf32> to vector<2x64xf32>
    %331 = vector.broadcast %328 : vector<1x64xf32> to vector<2x64xf32>
    %332 = arith.mulf %330, %331 : vector<2x64xf32>
    %333 = arith.addf %320, %332 : vector<2x64xf32>
    %c0_277 = arith.constant 0 : index
    %c0_278 = arith.constant 0 : index
    %334 = vector.load %arg6[%c0_277, %c0_278] : memref<1x96xf32, #tpu.memory_space<vmem>>, vector<1x96xf32>
    %c0_i32_279 = arith.constant 0 : i32
    %335 = vector.broadcast %c0_i32_279 : i32 to vector<2x64xi32>
    %336 = arith.cmpi eq, %259, %335 : vector<2x64xi32>
    %cst_280 = arith.constant 0.000000e+00 : f32
    %337 = vector.broadcast %cst_280 : f32 to vector<2x64xf32>
    %338 = arith.select %336, %333, %337 : vector<2x64xi1>, vector<2x64xf32>
    %c0_281 = arith.constant 0 : index
    %c0_282 = arith.constant 0 : index
    %c0_283 = arith.constant 0 : index
    %339 = vector.load %arg7[%c0_281, %c0_282, %c0_283] : memref<2x64x128xf32, #tpu.memory_space<vmem>>, vector<1x64x128xf32>
    %340 = vector.shape_cast %339 : vector<1x64x128xf32> to vector<64x128xf32>
    %cst_284 = arith.constant dense<0.000000e+00> : vector<2x128xf32>
    %341 = tpu.matmul %338, %340, %cst_284 {dimension_numbers = #tpu.dot_dimension_numbers<[1], [0], [0], [1], [0, 0, 1, 1], [], []>} : vector<2x64xf32>, vector<64x128xf32>, vector<2x128xf32> -> vector<2x128xf32>
    %c1_i32_285 = arith.constant 1 : i32
    %342 = vector.broadcast %c1_i32_285 : i32 to vector<2x64xi32>
    %343 = arith.cmpi eq, %259, %342 : vector<2x64xi32>
    %cst_286 = arith.constant 0.000000e+00 : f32
    %344 = vector.broadcast %cst_286 : f32 to vector<2x64xf32>
    %345 = arith.select %343, %333, %344 : vector<2x64xi1>, vector<2x64xf32>
    %c1_287 = arith.constant 1 : index
    %c0_288 = arith.constant 0 : index
    %c0_289 = arith.constant 0 : index
    %346 = vector.load %arg7[%c1_287, %c0_288, %c0_289] : memref<2x64x128xf32, #tpu.memory_space<vmem>>, vector<1x64x128xf32>
    %347 = vector.shape_cast %346 : vector<1x64x128xf32> to vector<64x128xf32>
    %cst_290 = arith.constant dense<0.000000e+00> : vector<2x128xf32>
    %348 = tpu.matmul %345, %347, %cst_290 {dimension_numbers = #tpu.dot_dimension_numbers<[1], [0], [0], [1], [0, 0, 1, 1], [], []>} : vector<2x64xf32>, vector<64x128xf32>, vector<2x128xf32> -> vector<2x128xf32>
    %349 = arith.addf %341, %348 : vector<2x128xf32>
    %c0_291 = arith.constant 0 : index
    %c0_292 = arith.constant 0 : index
    %c0_293 = arith.constant 0 : index
    %350 = vector.load %arg8[%c0_291, %c0_292, %c0_293] : memref<2x4x2xf32, #tpu.memory_space<vmem>>, vector<1x4x2xf32>
    %351 = vector.shape_cast %350 : vector<1x4x2xf32> to vector<4x2xf32>
    %cst_294 = arith.constant dense<0.000000e+00> : vector<4x128xf32>
    %352 = tpu.matmul %351, %349, %cst_294 {dimension_numbers = #tpu.dot_dimension_numbers<[1], [0], [0], [1], [0, 0, 1, 1], [], []>} : vector<4x2xf32>, vector<2x128xf32>, vector<4x128xf32> -> vector<4x128xf32>
    %c2_i32_295 = arith.constant 2 : i32
    %353 = vector.broadcast %c2_i32_295 : i32 to vector<2x64xi32>
    %354 = arith.cmpi eq, %259, %353 : vector<2x64xi32>
    %cst_296 = arith.constant 0.000000e+00 : f32
    %355 = vector.broadcast %cst_296 : f32 to vector<2x64xf32>
    %356 = arith.select %354, %333, %355 : vector<2x64xi1>, vector<2x64xf32>
    %c0_297 = arith.constant 0 : index
    %c0_298 = arith.constant 0 : index
    %c0_299 = arith.constant 0 : index
    %357 = vector.load %arg7[%c0_297, %c0_298, %c0_299] : memref<2x64x128xf32, #tpu.memory_space<vmem>>, vector<1x64x128xf32>
    %358 = vector.shape_cast %357 : vector<1x64x128xf32> to vector<64x128xf32>
    %cst_300 = arith.constant dense<0.000000e+00> : vector<2x128xf32>
    %359 = tpu.matmul %356, %358, %cst_300 {dimension_numbers = #tpu.dot_dimension_numbers<[1], [0], [0], [1], [0, 0, 1, 1], [], []>} : vector<2x64xf32>, vector<64x128xf32>, vector<2x128xf32> -> vector<2x128xf32>
    %c3_i32_301 = arith.constant 3 : i32
    %360 = vector.broadcast %c3_i32_301 : i32 to vector<2x64xi32>
    %361 = arith.cmpi eq, %259, %360 : vector<2x64xi32>
    %cst_302 = arith.constant 0.000000e+00 : f32
    %362 = vector.broadcast %cst_302 : f32 to vector<2x64xf32>
    %363 = arith.select %361, %333, %362 : vector<2x64xi1>, vector<2x64xf32>
    %c1_303 = arith.constant 1 : index
    %c0_304 = arith.constant 0 : index
    %c0_305 = arith.constant 0 : index
    %364 = vector.load %arg7[%c1_303, %c0_304, %c0_305] : memref<2x64x128xf32, #tpu.memory_space<vmem>>, vector<1x64x128xf32>
    %365 = vector.shape_cast %364 : vector<1x64x128xf32> to vector<64x128xf32>
    %cst_306 = arith.constant dense<0.000000e+00> : vector<2x128xf32>
    %366 = tpu.matmul %363, %365, %cst_306 {dimension_numbers = #tpu.dot_dimension_numbers<[1], [0], [0], [1], [0, 0, 1, 1], [], []>} : vector<2x64xf32>, vector<64x128xf32>, vector<2x128xf32> -> vector<2x128xf32>
    %367 = arith.addf %359, %366 : vector<2x128xf32>
    %c1_307 = arith.constant 1 : index
    %c0_308 = arith.constant 0 : index
    %c0_309 = arith.constant 0 : index
    %368 = vector.load %arg8[%c1_307, %c0_308, %c0_309] : memref<2x4x2xf32, #tpu.memory_space<vmem>>, vector<1x4x2xf32>
    %369 = vector.shape_cast %368 : vector<1x4x2xf32> to vector<4x2xf32>
    %cst_310 = arith.constant dense<0.000000e+00> : vector<4x128xf32>
    %370 = tpu.matmul %369, %367, %cst_310 {dimension_numbers = #tpu.dot_dimension_numbers<[1], [0], [0], [1], [0, 0, 1, 1], [], []>} : vector<4x2xf32>, vector<2x128xf32>, vector<4x128xf32> -> vector<4x128xf32>
    %371 = arith.addf %352, %370 : vector<4x128xf32>
    %c0_311 = arith.constant 0 : index
    %c0_312 = arith.constant 0 : index
    %c0_313 = arith.constant 0 : index
    %372 = vector.load %arg9[%c0_311, %c0_312, %c0_313] : memref<3x6x4xf32, #tpu.memory_space<vmem>>, vector<1x6x4xf32>
    %373 = vector.shape_cast %372 : vector<1x6x4xf32> to vector<6x4xf32>
    %cst_314 = arith.constant dense<0.000000e+00> : vector<6x128xf32>
    %374 = tpu.matmul %373, %371, %cst_314 {dimension_numbers = #tpu.dot_dimension_numbers<[1], [0], [0], [1], [0, 0, 1, 1], [], []>} : vector<6x4xf32>, vector<4x128xf32>, vector<6x128xf32> -> vector<6x128xf32>
    %c0_315 = arith.constant 0 : index
    %c0_316 = arith.constant 0 : index
    %c0_317 = arith.constant 0 : index
    %375 = vector.load %arg10[%c0_315, %c0_316, %c0_317] : memref<3x128x96xf32, #tpu.memory_space<vmem>>, vector<1x128x96xf32>
    %376 = vector.shape_cast %375 : vector<1x128x96xf32> to vector<128x96xf32>
    %cst_318 = arith.constant dense<0.000000e+00> : vector<6x96xf32>
    %377 = tpu.matmul %374, %376, %cst_318 {dimension_numbers = #tpu.dot_dimension_numbers<[1], [0], [0], [1], [0, 0, 1, 1], [], []>} : vector<6x128xf32>, vector<128x96xf32>, vector<6x96xf32> -> vector<6x96xf32>
    %c1_319 = arith.constant 1 : index
    %c0_320 = arith.constant 0 : index
    %c0_321 = arith.constant 0 : index
    %378 = vector.load %arg9[%c1_319, %c0_320, %c0_321] : memref<3x6x4xf32, #tpu.memory_space<vmem>>, vector<1x6x4xf32>
    %379 = vector.shape_cast %378 : vector<1x6x4xf32> to vector<6x4xf32>
    %cst_322 = arith.constant dense<0.000000e+00> : vector<6x128xf32>
    %380 = tpu.matmul %379, %371, %cst_322 {dimension_numbers = #tpu.dot_dimension_numbers<[1], [0], [0], [1], [0, 0, 1, 1], [], []>} : vector<6x4xf32>, vector<4x128xf32>, vector<6x128xf32> -> vector<6x128xf32>
    %c1_323 = arith.constant 1 : index
    %c0_324 = arith.constant 0 : index
    %c0_325 = arith.constant 0 : index
    %381 = vector.load %arg10[%c1_323, %c0_324, %c0_325] : memref<3x128x96xf32, #tpu.memory_space<vmem>>, vector<1x128x96xf32>
    %382 = vector.shape_cast %381 : vector<1x128x96xf32> to vector<128x96xf32>
    %cst_326 = arith.constant dense<0.000000e+00> : vector<6x96xf32>
    %383 = tpu.matmul %380, %382, %cst_326 {dimension_numbers = #tpu.dot_dimension_numbers<[1], [0], [0], [1], [0, 0, 1, 1], [], []>} : vector<6x128xf32>, vector<128x96xf32>, vector<6x96xf32> -> vector<6x96xf32>
    %384 = arith.addf %377, %383 : vector<6x96xf32>
    %c2_327 = arith.constant 2 : index
    %c0_328 = arith.constant 0 : index
    %c0_329 = arith.constant 0 : index
    %385 = vector.load %arg9[%c2_327, %c0_328, %c0_329] : memref<3x6x4xf32, #tpu.memory_space<vmem>>, vector<1x6x4xf32>
    %386 = vector.shape_cast %385 : vector<1x6x4xf32> to vector<6x4xf32>
    %cst_330 = arith.constant dense<0.000000e+00> : vector<6x128xf32>
    %387 = tpu.matmul %386, %371, %cst_330 {dimension_numbers = #tpu.dot_dimension_numbers<[1], [0], [0], [1], [0, 0, 1, 1], [], []>} : vector<6x4xf32>, vector<4x128xf32>, vector<6x128xf32> -> vector<6x128xf32>
    %c2_331 = arith.constant 2 : index
    %c0_332 = arith.constant 0 : index
    %c0_333 = arith.constant 0 : index
    %388 = vector.load %arg10[%c2_331, %c0_332, %c0_333] : memref<3x128x96xf32, #tpu.memory_space<vmem>>, vector<1x128x96xf32>
    %389 = vector.shape_cast %388 : vector<1x128x96xf32> to vector<128x96xf32>
    %cst_334 = arith.constant dense<0.000000e+00> : vector<6x96xf32>
    %390 = tpu.matmul %387, %389, %cst_334 {dimension_numbers = #tpu.dot_dimension_numbers<[1], [0], [0], [1], [0, 0, 1, 1], [], []>} : vector<6x128xf32>, vector<128x96xf32>, vector<6x96xf32> -> vector<6x96xf32>
    %391 = arith.addf %384, %390 : vector<6x96xf32>
    %392 = vector.broadcast %334 : vector<1x96xf32> to vector<6x96xf32>
    %393 = arith.addf %391, %392 : vector<6x96xf32>
    %cst_335 = arith.constant 0.000000e+00 : f32
    %394 = vector.broadcast %cst_335 : f32 to vector<6x96xf32>
    %395 = arith.maximumf %393, %394 : vector<6x96xf32>
    %c0_336 = arith.constant 0 : index
    %c0_337 = arith.constant 0 : index
    %396 = vector.load %arg11[%c0_336, %c0_337] : memref<1x112xf32, #tpu.memory_space<vmem>>, vector<1x112xf32>
    %c0_i32_338 = arith.constant 0 : i32
    %397 = vector.broadcast %c0_i32_338 : i32 to vector<6x96xi32>
    %398 = arith.cmpi eq, %173, %397 : vector<6x96xi32>
    %cst_339 = arith.constant 0.000000e+00 : f32
    %399 = vector.broadcast %cst_339 : f32 to vector<6x96xf32>
    %400 = arith.select %398, %395, %399 : vector<6x96xi1>, vector<6x96xf32>
    %c0_340 = arith.constant 0 : index
    %c0_341 = arith.constant 0 : index
    %c0_342 = arith.constant 0 : index
    %401 = vector.load %arg12[%c0_340, %c0_341, %c0_342] : memref<2x96x192xf32, #tpu.memory_space<vmem>>, vector<1x96x192xf32>
    %402 = vector.shape_cast %401 : vector<1x96x192xf32> to vector<96x192xf32>
    %cst_343 = arith.constant dense<0.000000e+00> : vector<6x192xf32>
    %403 = tpu.matmul %400, %402, %cst_343 {dimension_numbers = #tpu.dot_dimension_numbers<[1], [0], [0], [1], [0, 0, 1, 1], [], []>} : vector<6x96xf32>, vector<96x192xf32>, vector<6x192xf32> -> vector<6x192xf32>
    %c1_i32_344 = arith.constant 1 : i32
    %404 = vector.broadcast %c1_i32_344 : i32 to vector<6x96xi32>
    %405 = arith.cmpi eq, %173, %404 : vector<6x96xi32>
    %cst_345 = arith.constant 0.000000e+00 : f32
    %406 = vector.broadcast %cst_345 : f32 to vector<6x96xf32>
    %407 = arith.select %405, %395, %406 : vector<6x96xi1>, vector<6x96xf32>
    %c1_346 = arith.constant 1 : index
    %c0_347 = arith.constant 0 : index
    %c0_348 = arith.constant 0 : index
    %408 = vector.load %arg12[%c1_346, %c0_347, %c0_348] : memref<2x96x192xf32, #tpu.memory_space<vmem>>, vector<1x96x192xf32>
    %409 = vector.shape_cast %408 : vector<1x96x192xf32> to vector<96x192xf32>
    %cst_349 = arith.constant dense<0.000000e+00> : vector<6x192xf32>
    %410 = tpu.matmul %407, %409, %cst_349 {dimension_numbers = #tpu.dot_dimension_numbers<[1], [0], [0], [1], [0, 0, 1, 1], [], []>} : vector<6x96xf32>, vector<96x192xf32>, vector<6x192xf32> -> vector<6x192xf32>
    %411 = arith.addf %403, %410 : vector<6x192xf32>
    %c0_350 = arith.constant 0 : index
    %c0_351 = arith.constant 0 : index
    %c0_352 = arith.constant 0 : index
    %412 = vector.load %arg13[%c0_350, %c0_351, %c0_352] : memref<2x12x6xf32, #tpu.memory_space<vmem>>, vector<1x12x6xf32>
    %413 = vector.shape_cast %412 : vector<1x12x6xf32> to vector<12x6xf32>
    %cst_353 = arith.constant dense<0.000000e+00> : vector<12x192xf32>
    %414 = tpu.matmul %413, %411, %cst_353 {dimension_numbers = #tpu.dot_dimension_numbers<[1], [0], [0], [1], [0, 0, 1, 1], [], []>} : vector<12x6xf32>, vector<6x192xf32>, vector<12x192xf32> -> vector<12x192xf32>
    %c2_i32_354 = arith.constant 2 : i32
    %415 = vector.broadcast %c2_i32_354 : i32 to vector<6x96xi32>
    %416 = arith.cmpi eq, %173, %415 : vector<6x96xi32>
    %cst_355 = arith.constant 0.000000e+00 : f32
    %417 = vector.broadcast %cst_355 : f32 to vector<6x96xf32>
    %418 = arith.select %416, %395, %417 : vector<6x96xi1>, vector<6x96xf32>
    %c0_356 = arith.constant 0 : index
    %c0_357 = arith.constant 0 : index
    %c0_358 = arith.constant 0 : index
    %419 = vector.load %arg12[%c0_356, %c0_357, %c0_358] : memref<2x96x192xf32, #tpu.memory_space<vmem>>, vector<1x96x192xf32>
    %420 = vector.shape_cast %419 : vector<1x96x192xf32> to vector<96x192xf32>
    %cst_359 = arith.constant dense<0.000000e+00> : vector<6x192xf32>
    %421 = tpu.matmul %418, %420, %cst_359 {dimension_numbers = #tpu.dot_dimension_numbers<[1], [0], [0], [1], [0, 0, 1, 1], [], []>} : vector<6x96xf32>, vector<96x192xf32>, vector<6x192xf32> -> vector<6x192xf32>
    %c3_i32_360 = arith.constant 3 : i32
    %422 = vector.broadcast %c3_i32_360 : i32 to vector<6x96xi32>
    %423 = arith.cmpi eq, %173, %422 : vector<6x96xi32>
    %cst_361 = arith.constant 0.000000e+00 : f32
    %424 = vector.broadcast %cst_361 : f32 to vector<6x96xf32>
    %425 = arith.select %423, %395, %424 : vector<6x96xi1>, vector<6x96xf32>
    %c1_362 = arith.constant 1 : index
    %c0_363 = arith.constant 0 : index
    %c0_364 = arith.constant 0 : index
    %426 = vector.load %arg12[%c1_362, %c0_363, %c0_364] : memref<2x96x192xf32, #tpu.memory_space<vmem>>, vector<1x96x192xf32>
    %427 = vector.shape_cast %426 : vector<1x96x192xf32> to vector<96x192xf32>
    %cst_365 = arith.constant dense<0.000000e+00> : vector<6x192xf32>
    %428 = tpu.matmul %425, %427, %cst_365 {dimension_numbers = #tpu.dot_dimension_numbers<[1], [0], [0], [1], [0, 0, 1, 1], [], []>} : vector<6x96xf32>, vector<96x192xf32>, vector<6x192xf32> -> vector<6x192xf32>
    %429 = arith.addf %421, %428 : vector<6x192xf32>
    %c1_366 = arith.constant 1 : index
    %c0_367 = arith.constant 0 : index
    %c0_368 = arith.constant 0 : index
    %430 = vector.load %arg13[%c1_366, %c0_367, %c0_368] : memref<2x12x6xf32, #tpu.memory_space<vmem>>, vector<1x12x6xf32>
    %431 = vector.shape_cast %430 : vector<1x12x6xf32> to vector<12x6xf32>
    %cst_369 = arith.constant dense<0.000000e+00> : vector<12x192xf32>
    %432 = tpu.matmul %431, %429, %cst_369 {dimension_numbers = #tpu.dot_dimension_numbers<[1], [0], [0], [1], [0, 0, 1, 1], [], []>} : vector<12x6xf32>, vector<6x192xf32>, vector<12x192xf32> -> vector<12x192xf32>
    %433 = arith.addf %414, %432 : vector<12x192xf32>
    %c0_370 = arith.constant 0 : index
    %c0_371 = arith.constant 0 : index
    %c0_372 = arith.constant 0 : index
    %434 = vector.load %arg14[%c0_370, %c0_371, %c0_372] : memref<3x14x12xf32, #tpu.memory_space<vmem>>, vector<1x14x12xf32>
    %435 = vector.shape_cast %434 : vector<1x14x12xf32> to vector<14x12xf32>
    %cst_373 = arith.constant dense<0.000000e+00> : vector<14x192xf32>
    %436 = tpu.matmul %435, %433, %cst_373 {dimension_numbers = #tpu.dot_dimension_numbers<[1], [0], [0], [1], [0, 0, 1, 1], [], []>} : vector<14x12xf32>, vector<12x192xf32>, vector<14x192xf32> -> vector<14x192xf32>
    %c0_374 = arith.constant 0 : index
    %c0_375 = arith.constant 0 : index
    %c0_376 = arith.constant 0 : index
    %437 = vector.load %arg15[%c0_374, %c0_375, %c0_376] : memref<3x192x112xf32, #tpu.memory_space<vmem>>, vector<1x192x112xf32>
    %438 = vector.shape_cast %437 : vector<1x192x112xf32> to vector<192x112xf32>
    %cst_377 = arith.constant dense<0.000000e+00> : vector<14x112xf32>
    %439 = tpu.matmul %436, %438, %cst_377 {dimension_numbers = #tpu.dot_dimension_numbers<[1], [0], [0], [1], [0, 0, 1, 1], [], []>} : vector<14x192xf32>, vector<192x112xf32>, vector<14x112xf32> -> vector<14x112xf32>
    %c1_378 = arith.constant 1 : index
    %c0_379 = arith.constant 0 : index
    %c0_380 = arith.constant 0 : index
    %440 = vector.load %arg14[%c1_378, %c0_379, %c0_380] : memref<3x14x12xf32, #tpu.memory_space<vmem>>, vector<1x14x12xf32>
    %441 = vector.shape_cast %440 : vector<1x14x12xf32> to vector<14x12xf32>
    %cst_381 = arith.constant dense<0.000000e+00> : vector<14x192xf32>
    %442 = tpu.matmul %441, %433, %cst_381 {dimension_numbers = #tpu.dot_dimension_numbers<[1], [0], [0], [1], [0, 0, 1, 1], [], []>} : vector<14x12xf32>, vector<12x192xf32>, vector<14x192xf32> -> vector<14x192xf32>
    %c1_382 = arith.constant 1 : index
    %c0_383 = arith.constant 0 : index
    %c0_384 = arith.constant 0 : index
    %443 = vector.load %arg15[%c1_382, %c0_383, %c0_384] : memref<3x192x112xf32, #tpu.memory_space<vmem>>, vector<1x192x112xf32>
    %444 = vector.shape_cast %443 : vector<1x192x112xf32> to vector<192x112xf32>
    %cst_385 = arith.constant dense<0.000000e+00> : vector<14x112xf32>
    %445 = tpu.matmul %442, %444, %cst_385 {dimension_numbers = #tpu.dot_dimension_numbers<[1], [0], [0], [1], [0, 0, 1, 1], [], []>} : vector<14x192xf32>, vector<192x112xf32>, vector<14x112xf32> -> vector<14x112xf32>
    %446 = arith.addf %439, %445 : vector<14x112xf32>
    %c2_386 = arith.constant 2 : index
    %c0_387 = arith.constant 0 : index
    %c0_388 = arith.constant 0 : index
    %447 = vector.load %arg14[%c2_386, %c0_387, %c0_388] : memref<3x14x12xf32, #tpu.memory_space<vmem>>, vector<1x14x12xf32>
    %448 = vector.shape_cast %447 : vector<1x14x12xf32> to vector<14x12xf32>
    %cst_389 = arith.constant dense<0.000000e+00> : vector<14x192xf32>
    %449 = tpu.matmul %448, %433, %cst_389 {dimension_numbers = #tpu.dot_dimension_numbers<[1], [0], [0], [1], [0, 0, 1, 1], [], []>} : vector<14x12xf32>, vector<12x192xf32>, vector<14x192xf32> -> vector<14x192xf32>
    %c2_390 = arith.constant 2 : index
    %c0_391 = arith.constant 0 : index
    %c0_392 = arith.constant 0 : index
    %450 = vector.load %arg15[%c2_390, %c0_391, %c0_392] : memref<3x192x112xf32, #tpu.memory_space<vmem>>, vector<1x192x112xf32>
    %451 = vector.shape_cast %450 : vector<1x192x112xf32> to vector<192x112xf32>
    %cst_393 = arith.constant dense<0.000000e+00> : vector<14x112xf32>
    %452 = tpu.matmul %449, %451, %cst_393 {dimension_numbers = #tpu.dot_dimension_numbers<[1], [0], [0], [1], [0, 0, 1, 1], [], []>} : vector<14x192xf32>, vector<192x112xf32>, vector<14x112xf32> -> vector<14x112xf32>
    %453 = arith.addf %446, %452 : vector<14x112xf32>
    %454 = vector.broadcast %396 : vector<1x112xf32> to vector<14x112xf32>
    %455 = arith.addf %453, %454 : vector<14x112xf32>
    %cst_394 = arith.constant 0.000000e+00 : f32
    %456 = vector.broadcast %cst_394 : f32 to vector<14x112xf32>
    %457 = arith.maximumf %455, %456 : vector<14x112xf32>
    %c0_395 = arith.constant 0 : index
    %c0_396 = arith.constant 0 : index
    %458 = vector.load %arg16[%c0_395, %c0_396] : memref<1x120xf32, #tpu.memory_space<vmem>>, vector<1x120xf32>
    %c0_i32_397 = arith.constant 0 : i32
    %459 = vector.broadcast %c0_i32_397 : i32 to vector<14x112xi32>
    %460 = arith.cmpi eq, %87, %459 : vector<14x112xi32>
    %cst_398 = arith.constant 0.000000e+00 : f32
    %461 = vector.broadcast %cst_398 : f32 to vector<14x112xf32>
    %462 = arith.select %460, %457, %461 : vector<14x112xi1>, vector<14x112xf32>
    %c0_399 = arith.constant 0 : index
    %c0_400 = arith.constant 0 : index
    %c0_401 = arith.constant 0 : index
    %463 = vector.load %arg17[%c0_399, %c0_400, %c0_401] : memref<2x112x224xf32, #tpu.memory_space<vmem>>, vector<1x112x224xf32>
    %464 = vector.shape_cast %463 : vector<1x112x224xf32> to vector<112x224xf32>
    %cst_402 = arith.constant dense<0.000000e+00> : vector<14x224xf32>
    %465 = tpu.matmul %462, %464, %cst_402 {dimension_numbers = #tpu.dot_dimension_numbers<[1], [0], [0], [1], [0, 0, 1, 1], [], []>} : vector<14x112xf32>, vector<112x224xf32>, vector<14x224xf32> -> vector<14x224xf32>
    %c1_i32_403 = arith.constant 1 : i32
    %466 = vector.broadcast %c1_i32_403 : i32 to vector<14x112xi32>
    %467 = arith.cmpi eq, %87, %466 : vector<14x112xi32>
    %cst_404 = arith.constant 0.000000e+00 : f32
    %468 = vector.broadcast %cst_404 : f32 to vector<14x112xf32>
    %469 = arith.select %467, %457, %468 : vector<14x112xi1>, vector<14x112xf32>
    %c1_405 = arith.constant 1 : index
    %c0_406 = arith.constant 0 : index
    %c0_407 = arith.constant 0 : index
    %470 = vector.load %arg17[%c1_405, %c0_406, %c0_407] : memref<2x112x224xf32, #tpu.memory_space<vmem>>, vector<1x112x224xf32>
    %471 = vector.shape_cast %470 : vector<1x112x224xf32> to vector<112x224xf32>
    %cst_408 = arith.constant dense<0.000000e+00> : vector<14x224xf32>
    %472 = tpu.matmul %469, %471, %cst_408 {dimension_numbers = #tpu.dot_dimension_numbers<[1], [0], [0], [1], [0, 0, 1, 1], [], []>} : vector<14x112xf32>, vector<112x224xf32>, vector<14x224xf32> -> vector<14x224xf32>
    %473 = arith.addf %465, %472 : vector<14x224xf32>
    %c0_409 = arith.constant 0 : index
    %c0_410 = arith.constant 0 : index
    %c0_411 = arith.constant 0 : index
    %474 = vector.load %arg18[%c0_409, %c0_410, %c0_411] : memref<2x28x14xf32, #tpu.memory_space<vmem>>, vector<1x28x14xf32>
    %475 = vector.shape_cast %474 : vector<1x28x14xf32> to vector<28x14xf32>
    %cst_412 = arith.constant dense<0.000000e+00> : vector<28x224xf32>
    %476 = tpu.matmul %475, %473, %cst_412 {dimension_numbers = #tpu.dot_dimension_numbers<[1], [0], [0], [1], [0, 0, 1, 1], [], []>} : vector<28x14xf32>, vector<14x224xf32>, vector<28x224xf32> -> vector<28x224xf32>
    %c2_i32_413 = arith.constant 2 : i32
    %477 = vector.broadcast %c2_i32_413 : i32 to vector<14x112xi32>
    %478 = arith.cmpi eq, %87, %477 : vector<14x112xi32>
    %cst_414 = arith.constant 0.000000e+00 : f32
    %479 = vector.broadcast %cst_414 : f32 to vector<14x112xf32>
    %480 = arith.select %478, %457, %479 : vector<14x112xi1>, vector<14x112xf32>
    %c0_415 = arith.constant 0 : index
    %c0_416 = arith.constant 0 : index
    %c0_417 = arith.constant 0 : index
    %481 = vector.load %arg17[%c0_415, %c0_416, %c0_417] : memref<2x112x224xf32, #tpu.memory_space<vmem>>, vector<1x112x224xf32>
    %482 = vector.shape_cast %481 : vector<1x112x224xf32> to vector<112x224xf32>
    %cst_418 = arith.constant dense<0.000000e+00> : vector<14x224xf32>
    %483 = tpu.matmul %480, %482, %cst_418 {dimension_numbers = #tpu.dot_dimension_numbers<[1], [0], [0], [1], [0, 0, 1, 1], [], []>} : vector<14x112xf32>, vector<112x224xf32>, vector<14x224xf32> -> vector<14x224xf32>
    %c3_i32_419 = arith.constant 3 : i32
    %484 = vector.broadcast %c3_i32_419 : i32 to vector<14x112xi32>
    %485 = arith.cmpi eq, %87, %484 : vector<14x112xi32>
    %cst_420 = arith.constant 0.000000e+00 : f32
    %486 = vector.broadcast %cst_420 : f32 to vector<14x112xf32>
    %487 = arith.select %485, %457, %486 : vector<14x112xi1>, vector<14x112xf32>
    %c1_421 = arith.constant 1 : index
    %c0_422 = arith.constant 0 : index
    %c0_423 = arith.constant 0 : index
    %488 = vector.load %arg17[%c1_421, %c0_422, %c0_423] : memref<2x112x224xf32, #tpu.memory_space<vmem>>, vector<1x112x224xf32>
    %489 = vector.shape_cast %488 : vector<1x112x224xf32> to vector<112x224xf32>
    %cst_424 = arith.constant dense<0.000000e+00> : vector<14x224xf32>
    %490 = tpu.matmul %487, %489, %cst_424 {dimension_numbers = #tpu.dot_dimension_numbers<[1], [0], [0], [1], [0, 0, 1, 1], [], []>} : vector<14x112xf32>, vector<112x224xf32>, vector<14x224xf32> -> vector<14x224xf32>
    %491 = arith.addf %483, %490 : vector<14x224xf32>
    %c1_425 = arith.constant 1 : index
    %c0_426 = arith.constant 0 : index
    %c0_427 = arith.constant 0 : index
    %492 = vector.load %arg18[%c1_425, %c0_426, %c0_427] : memref<2x28x14xf32, #tpu.memory_space<vmem>>, vector<1x28x14xf32>
    %493 = vector.shape_cast %492 : vector<1x28x14xf32> to vector<28x14xf32>
    %cst_428 = arith.constant dense<0.000000e+00> : vector<28x224xf32>
    %494 = tpu.matmul %493, %491, %cst_428 {dimension_numbers = #tpu.dot_dimension_numbers<[1], [0], [0], [1], [0, 0, 1, 1], [], []>} : vector<28x14xf32>, vector<14x224xf32>, vector<28x224xf32> -> vector<28x224xf32>
    %495 = arith.addf %476, %494 : vector<28x224xf32>
    %c0_429 = arith.constant 0 : index
    %c0_430 = arith.constant 0 : index
    %c0_431 = arith.constant 0 : index
    %496 = vector.load %arg19[%c0_429, %c0_430, %c0_431] : memref<3x30x28xf32, #tpu.memory_space<vmem>>, vector<1x30x28xf32>
    %497 = vector.shape_cast %496 : vector<1x30x28xf32> to vector<30x28xf32>
    %cst_432 = arith.constant dense<0.000000e+00> : vector<30x224xf32>
    %498 = tpu.matmul %497, %495, %cst_432 {dimension_numbers = #tpu.dot_dimension_numbers<[1], [0], [0], [1], [0, 0, 1, 1], [], []>} : vector<30x28xf32>, vector<28x224xf32>, vector<30x224xf32> -> vector<30x224xf32>
    %c0_433 = arith.constant 0 : index
    %c0_434 = arith.constant 0 : index
    %c0_435 = arith.constant 0 : index
    %499 = vector.load %arg20[%c0_433, %c0_434, %c0_435] : memref<3x224x120xf32, #tpu.memory_space<vmem>>, vector<1x224x120xf32>
    %500 = vector.shape_cast %499 : vector<1x224x120xf32> to vector<224x120xf32>
    %cst_436 = arith.constant dense<0.000000e+00> : vector<30x120xf32>
    %501 = tpu.matmul %498, %500, %cst_436 {dimension_numbers = #tpu.dot_dimension_numbers<[1], [0], [0], [1], [0, 0, 1, 1], [], []>} : vector<30x224xf32>, vector<224x120xf32>, vector<30x120xf32> -> vector<30x120xf32>
    %c1_437 = arith.constant 1 : index
    %c0_438 = arith.constant 0 : index
    %c0_439 = arith.constant 0 : index
    %502 = vector.load %arg19[%c1_437, %c0_438, %c0_439] : memref<3x30x28xf32, #tpu.memory_space<vmem>>, vector<1x30x28xf32>
    %503 = vector.shape_cast %502 : vector<1x30x28xf32> to vector<30x28xf32>
    %cst_440 = arith.constant dense<0.000000e+00> : vector<30x224xf32>
    %504 = tpu.matmul %503, %495, %cst_440 {dimension_numbers = #tpu.dot_dimension_numbers<[1], [0], [0], [1], [0, 0, 1, 1], [], []>} : vector<30x28xf32>, vector<28x224xf32>, vector<30x224xf32> -> vector<30x224xf32>
    %c1_441 = arith.constant 1 : index
    %c0_442 = arith.constant 0 : index
    %c0_443 = arith.constant 0 : index
    %505 = vector.load %arg20[%c1_441, %c0_442, %c0_443] : memref<3x224x120xf32, #tpu.memory_space<vmem>>, vector<1x224x120xf32>
    %506 = vector.shape_cast %505 : vector<1x224x120xf32> to vector<224x120xf32>
    %cst_444 = arith.constant dense<0.000000e+00> : vector<30x120xf32>
    %507 = tpu.matmul %504, %506, %cst_444 {dimension_numbers = #tpu.dot_dimension_numbers<[1], [0], [0], [1], [0, 0, 1, 1], [], []>} : vector<30x224xf32>, vector<224x120xf32>, vector<30x120xf32> -> vector<30x120xf32>
    %508 = arith.addf %501, %507 : vector<30x120xf32>
    %c2_445 = arith.constant 2 : index
    %c0_446 = arith.constant 0 : index
    %c0_447 = arith.constant 0 : index
    %509 = vector.load %arg19[%c2_445, %c0_446, %c0_447] : memref<3x30x28xf32, #tpu.memory_space<vmem>>, vector<1x30x28xf32>
    %510 = vector.shape_cast %509 : vector<1x30x28xf32> to vector<30x28xf32>
    %cst_448 = arith.constant dense<0.000000e+00> : vector<30x224xf32>
    %511 = tpu.matmul %510, %495, %cst_448 {dimension_numbers = #tpu.dot_dimension_numbers<[1], [0], [0], [1], [0, 0, 1, 1], [], []>} : vector<30x28xf32>, vector<28x224xf32>, vector<30x224xf32> -> vector<30x224xf32>
    %c2_449 = arith.constant 2 : index
    %c0_450 = arith.constant 0 : index
    %c0_451 = arith.constant 0 : index
    %512 = vector.load %arg20[%c2_449, %c0_450, %c0_451] : memref<3x224x120xf32, #tpu.memory_space<vmem>>, vector<1x224x120xf32>
    %513 = vector.shape_cast %512 : vector<1x224x120xf32> to vector<224x120xf32>
    %cst_452 = arith.constant dense<0.000000e+00> : vector<30x120xf32>
    %514 = tpu.matmul %511, %513, %cst_452 {dimension_numbers = #tpu.dot_dimension_numbers<[1], [0], [0], [1], [0, 0, 1, 1], [], []>} : vector<30x224xf32>, vector<224x120xf32>, vector<30x120xf32> -> vector<30x120xf32>
    %515 = arith.addf %508, %514 : vector<30x120xf32>
    %516 = vector.broadcast %458 : vector<1x120xf32> to vector<30x120xf32>
    %517 = arith.addf %515, %516 : vector<30x120xf32>
    %cst_453 = arith.constant 0.000000e+00 : f32
    %518 = vector.broadcast %cst_453 : f32 to vector<30x120xf32>
    %519 = arith.subf %518, %517 : vector<30x120xf32>
    %520 = math.exp %519 : vector<30x120xf32>
    %cst_454 = arith.constant 1.000000e+00 : f32
    %521 = vector.broadcast %cst_454 : f32 to vector<30x120xf32>
    %522 = arith.addf %521, %520 : vector<30x120xf32>
    %cst_455 = arith.constant 1.000000e+00 : f32
    %523 = vector.broadcast %cst_455 : f32 to vector<30x120xf32>
    %524 = arith.divf %523, %522 : vector<30x120xf32>
    %525 = math.exp %517 : vector<30x120xf32>
    %cst_456 = arith.constant 0.000000e+00 : f32
    %526 = vector.broadcast %cst_456 : f32 to vector<30x120xf32>
    %527 = arith.cmpf oge, %517, %526 : vector<30x120xf32>
    %cst_457 = arith.constant 1.000000e+00 : f32
    %528 = vector.broadcast %cst_457 : f32 to vector<30x120xf32>
    %529 = arith.addf %528, %525 : vector<30x120xf32>
    %530 = arith.divf %525, %529 : vector<30x120xf32>
    %531 = arith.select %527, %524, %530 : vector<30x120xi1>, vector<30x120xf32>
    %c0_458 = arith.constant 0 : index
    %c0_459 = arith.constant 0 : index
    %c0_460 = arith.constant 0 : index
    %532 = vector.load %arg41[%c0_458, %c0_459, %c0_460] : memref<1x30x120xf32, #tpu.memory_space<vmem>>, vector<1x30x120xf32>
    %533 = vector.shape_cast %532 : vector<1x30x120xf32> to vector<30x120xf32>
    %534 = vector.shape_cast %531 : vector<30x120xf32> to vector<1x30x120xf32>
    tpu.vector_store %arg41[%c0_458, %c0_459, %c0_460], %534 {strides = array<i32>} : memref<1x30x120xf32, #tpu.memory_space<vmem>>, vector<1x30x120xf32>,
    %c0_461 = arith.constant 0 : index
    %c0_462 = arith.constant 0 : index
    %c0_463 = arith.constant 0 : index
    %535 = vector.load %arg42[%c0_461, %c0_462, %c0_463] : memref<1x1x11xf32, #tpu.memory_space<vmem>>, vector<1x1x11xf32>
    %536 = vector.shape_cast %535 : vector<1x1x11xf32> to vector<1x11xf32>
    %537 = vector.shape_cast %308 : vector<1x11xf32> to vector<1x1x11xf32>
    tpu.vector_store %arg42[%c0_461, %c0_462, %c0_463], %537 {strides = array<i32>} : memref<1x1x11xf32, #tpu.memory_space<vmem>>, vector<1x1x11xf32>,
    %c0_464 = arith.constant 0 : index
    %c0_465 = arith.constant 0 : index
    %c0_466 = arith.constant 0 : index
    %538 = vector.load %arg43[%c0_464, %c0_465, %c0_466] : memref<1x1x32xf32, #tpu.memory_space<vmem>>, vector<1x1x32xf32>
    %539 = vector.shape_cast %538 : vector<1x1x32xf32> to vector<1x32xf32>
    %540 = vector.shape_cast %284 : vector<1x32xf32> to vector<1x1x32xf32>
    tpu.vector_store %arg43[%c0_464, %c0_465, %c0_466], %540 {strides = array<i32>} : memref<1x1x32xf32, #tpu.memory_space<vmem>>, vector<1x1x32xf32>,
    %c0_467 = arith.constant 0 : index
    %c0_468 = arith.constant 0 : index
    %c0_469 = arith.constant 0 : index
    %541 = vector.load %arg44[%c0_467, %c0_468, %c0_469] : memref<1x1x32xf32, #tpu.memory_space<vmem>>, vector<1x1x32xf32>
    %542 = vector.shape_cast %541 : vector<1x1x32xf32> to vector<1x32xf32>
    %543 = vector.shape_cast %285 : vector<1x32xf32> to vector<1x1x32xf32>
    tpu.vector_store %arg44[%c0_467, %c0_468, %c0_469], %543 {strides = array<i32>} : memref<1x1x32xf32, #tpu.memory_space<vmem>>, vector<1x1x32xf32>,
    return
  }
  func.func @transform_0(%arg0: i32) -> (i32, i32, i32) {
    %c0_i32 = arith.constant 0 : i32
    %c0_i32_0 = arith.constant 0 : i32
    %c0_i32_1 = arith.constant 0 : i32
    return %arg0, %c0_i32, %c0_i32_0 : i32, i32, i32
  }
  func.func @transform_1(%arg0: i32) -> (i32, i32, i32) {
    %c0_i32 = arith.constant 0 : i32
    %c0_i32_0 = arith.constant 0 : i32
    %c0_i32_1 = arith.constant 0 : i32
    return %arg0, %c0_i32, %c0_i32_0 : i32, i32, i32
  }
  func.func @transform_2(%arg0: i32) -> (i32, i32, i32) {
    %c0_i32 = arith.constant 0 : i32
    %c0_i32_0 = arith.constant 0 : i32
    %c0_i32_1 = arith.constant 0 : i32
    return %arg0, %c0_i32, %c0_i32_0 : i32, i32, i32
  }
  func.func @transform_3(%arg0: i32) -> (i32, i32, i32) {
    %c0_i32 = arith.constant 0 : i32
    %c0_i32_0 = arith.constant 0 : i32
    %c0_i32_1 = arith.constant 0 : i32
    %c0_i32_2 = arith.constant 0 : i32
    return %c0_i32, %c0_i32_0, %c0_i32_1 : i32, i32, i32
  }
  func.func @transform_4(%arg0: i32) -> (i32, i32, i32) {
    %c0_i32 = arith.constant 0 : i32
    %c0_i32_0 = arith.constant 0 : i32
    %c0_i32_1 = arith.constant 0 : i32
    %c0_i32_2 = arith.constant 0 : i32
    return %c0_i32, %c0_i32_0, %c0_i32_1 : i32, i32, i32
  }
  func.func @transform_5(%arg0: i32) -> (i32, i32) {
    %c0_i32 = arith.constant 0 : i32
    %c0_i32_0 = arith.constant 0 : i32
    %c0_i32_1 = arith.constant 0 : i32
    return %c0_i32, %c0_i32_0 : i32, i32
  }
  func.func @transform_6(%arg0: i32) -> (i32, i32, i32) {
    %c0_i32 = arith.constant 0 : i32
    %c0_i32_0 = arith.constant 0 : i32
    %c0_i32_1 = arith.constant 0 : i32
    %c0_i32_2 = arith.constant 0 : i32
    return %c0_i32, %c0_i32_0, %c0_i32_1 : i32, i32, i32
  }
  func.func @transform_7(%arg0: i32) -> (i32, i32, i32) {
    %c0_i32 = arith.constant 0 : i32
    %c0_i32_0 = arith.constant 0 : i32
    %c0_i32_1 = arith.constant 0 : i32
    %c0_i32_2 = arith.constant 0 : i32
    return %c0_i32, %c0_i32_0, %c0_i32_1 : i32, i32, i32
  }
  func.func @transform_8(%arg0: i32) -> (i32, i32, i32) {
    %c0_i32 = arith.constant 0 : i32
    %c0_i32_0 = arith.constant 0 : i32
    %c0_i32_1 = arith.constant 0 : i32
    %c0_i32_2 = arith.constant 0 : i32
    return %c0_i32, %c0_i32_0, %c0_i32_1 : i32, i32, i32
  }
  func.func @transform_9(%arg0: i32) -> (i32, i32, i32) {
    %c0_i32 = arith.constant 0 : i32
    %c0_i32_0 = arith.constant 0 : i32
    %c0_i32_1 = arith.constant 0 : i32
    %c0_i32_2 = arith.constant 0 : i32
    return %c0_i32, %c0_i32_0, %c0_i32_1 : i32, i32, i32
  }
  func.func @transform_10(%arg0: i32) -> (i32, i32) {
    %c0_i32 = arith.constant 0 : i32
    %c0_i32_0 = arith.constant 0 : i32
    %c0_i32_1 = arith.constant 0 : i32
    return %c0_i32, %c0_i32_0 : i32, i32
  }
  func.func @transform_11(%arg0: i32) -> (i32, i32, i32) {
    %c0_i32 = arith.constant 0 : i32
    %c0_i32_0 = arith.constant 0 : i32
    %c0_i32_1 = arith.constant 0 : i32
    %c0_i32_2 = arith.constant 0 : i32
    return %c0_i32, %c0_i32_0, %c0_i32_1 : i32, i32, i32
  }
  func.func @transform_12(%arg0: i32) -> (i32, i32, i32) {
    %c0_i32 = arith.constant 0 : i32
    %c0_i32_0 = arith.constant 0 : i32
    %c0_i32_1 = arith.constant 0 : i32
    %c0_i32_2 = arith.constant 0 : i32
    return %c0_i32, %c0_i32_0, %c0_i32_1 : i32, i32, i32
  }
  func.func @transform_13(%arg0: i32) -> (i32, i32, i32) {
    %c0_i32 = arith.constant 0 : i32
    %c0_i32_0 = arith.constant 0 : i32
    %c0_i32_1 = arith.constant 0 : i32
    %c0_i32_2 = arith.constant 0 : i32
    return %c0_i32, %c0_i32_0, %c0_i32_1 : i32, i32, i32
  }
  func.func @transform_14(%arg0: i32) -> (i32, i32, i32) {
    %c0_i32 = arith.constant 0 : i32
    %c0_i32_0 = arith.constant 0 : i32
    %c0_i32_1 = arith.constant 0 : i32
    %c0_i32_2 = arith.constant 0 : i32
    return %c0_i32, %c0_i32_0, %c0_i32_1 : i32, i32, i32
  }
  func.func @transform_15(%arg0: i32) -> (i32, i32) {
    %c0_i32 = arith.constant 0 : i32
    %c0_i32_0 = arith.constant 0 : i32
    %c0_i32_1 = arith.constant 0 : i32
    return %c0_i32, %c0_i32_0 : i32, i32
  }
  func.func @transform_16(%arg0: i32) -> (i32, i32, i32) {
    %c0_i32 = arith.constant 0 : i32
    %c0_i32_0 = arith.constant 0 : i32
    %c0_i32_1 = arith.constant 0 : i32
    %c0_i32_2 = arith.constant 0 : i32
    return %c0_i32, %c0_i32_0, %c0_i32_1 : i32, i32, i32
  }
  func.func @transform_17(%arg0: i32) -> (i32, i32, i32) {
    %c0_i32 = arith.constant 0 : i32
    %c0_i32_0 = arith.constant 0 : i32
    %c0_i32_1 = arith.constant 0 : i32
    %c0_i32_2 = arith.constant 0 : i32
    return %c0_i32, %c0_i32_0, %c0_i32_1 : i32, i32, i32
  }
  func.func @transform_18(%arg0: i32) -> (i32, i32, i32) {
    %c0_i32 = arith.constant 0 : i32
    %c0_i32_0 = arith.constant 0 : i32
    %c0_i32_1 = arith.constant 0 : i32
    %c0_i32_2 = arith.constant 0 : i32
    return %c0_i32, %c0_i32_0, %c0_i32_1 : i32, i32, i32
  }
  func.func @transform_19(%arg0: i32) -> (i32, i32, i32) {
    %c0_i32 = arith.constant 0 : i32
    %c0_i32_0 = arith.constant 0 : i32
    %c0_i32_1 = arith.constant 0 : i32
    %c0_i32_2 = arith.constant 0 : i32
    return %c0_i32, %c0_i32_0, %c0_i32_1 : i32, i32, i32
  }
  func.func @transform_20(%arg0: i32) -> (i32, i32) {
    %c0_i32 = arith.constant 0 : i32
    %c0_i32_0 = arith.constant 0 : i32
    %c0_i32_1 = arith.constant 0 : i32
    return %c0_i32, %c0_i32_0 : i32, i32
  }
  func.func @transform_21(%arg0: i32) -> (i32, i32, i32) {
    %c0_i32 = arith.constant 0 : i32
    %c0_i32_0 = arith.constant 0 : i32
    %c0_i32_1 = arith.constant 0 : i32
    %c0_i32_2 = arith.constant 0 : i32
    return %c0_i32, %c0_i32_0, %c0_i32_1 : i32, i32, i32
  }
  func.func @transform_22(%arg0: i32) -> (i32, i32, i32) {
    %c0_i32 = arith.constant 0 : i32
    %c0_i32_0 = arith.constant 0 : i32
    %c0_i32_1 = arith.constant 0 : i32
    %c0_i32_2 = arith.constant 0 : i32
    return %c0_i32, %c0_i32_0, %c0_i32_1 : i32, i32, i32
  }
  func.func @transform_23(%arg0: i32) -> (i32, i32) {
    %c0_i32 = arith.constant 0 : i32
    %c0_i32_0 = arith.constant 0 : i32
    %c0_i32_1 = arith.constant 0 : i32
    return %c0_i32, %c0_i32_0 : i32, i32
  }
  func.func @transform_24(%arg0: i32) -> (i32, i32, i32) {
    %c0_i32 = arith.constant 0 : i32
    %c0_i32_0 = arith.constant 0 : i32
    %c0_i32_1 = arith.constant 0 : i32
    %c0_i32_2 = arith.constant 0 : i32
    return %c0_i32, %c0_i32_0, %c0_i32_1 : i32, i32, i32
  }
  func.func @transform_25(%arg0: i32) -> (i32, i32, i32) {
    %c0_i32 = arith.constant 0 : i32
    %c0_i32_0 = arith.constant 0 : i32
    %c0_i32_1 = arith.constant 0 : i32
    %c0_i32_2 = arith.constant 0 : i32
    return %c0_i32, %c0_i32_0, %c0_i32_1 : i32, i32, i32
  }
  func.func @transform_26(%arg0: i32) -> (i32, i32) {
    %c0_i32 = arith.constant 0 : i32
    %c0_i32_0 = arith.constant 0 : i32
    %c0_i32_1 = arith.constant 0 : i32
    return %c0_i32, %c0_i32_0 : i32, i32
  }
  func.func @transform_27(%arg0: i32) -> (i32, i32, i32) {
    %c0_i32 = arith.constant 0 : i32
    %c0_i32_0 = arith.constant 0 : i32
    %c0_i32_1 = arith.constant 0 : i32
    %c0_i32_2 = arith.constant 0 : i32
    return %c0_i32, %c0_i32_0, %c0_i32_1 : i32, i32, i32
  }
  func.func @transform_28(%arg0: i32) -> (i32, i32, i32) {
    %c0_i32 = arith.constant 0 : i32
    %c0_i32_0 = arith.constant 0 : i32
    %c0_i32_1 = arith.constant 0 : i32
    %c0_i32_2 = arith.constant 0 : i32
    return %c0_i32, %c0_i32_0, %c0_i32_1 : i32, i32, i32
  }
  func.func @transform_29(%arg0: i32) -> (i32, i32) {
    %c0_i32 = arith.constant 0 : i32
    %c0_i32_0 = arith.constant 0 : i32
    %c0_i32_1 = arith.constant 0 : i32
    return %c0_i32, %c0_i32_0 : i32, i32
  }
  func.func @transform_30(%arg0: i32) -> (i32, i32, i32) {
    %c0_i32 = arith.constant 0 : i32
    %c0_i32_0 = arith.constant 0 : i32
    %c0_i32_1 = arith.constant 0 : i32
    %c0_i32_2 = arith.constant 0 : i32
    return %c0_i32, %c0_i32_0, %c0_i32_1 : i32, i32, i32
  }
  func.func @transform_31(%arg0: i32) -> (i32, i32) {
    %c0_i32 = arith.constant 0 : i32
    %c0_i32_0 = arith.constant 0 : i32
    %c0_i32_1 = arith.constant 0 : i32
    return %c0_i32, %c0_i32_0 : i32, i32
  }
  func.func @transform_32(%arg0: i32) -> (i32, i32) {
    %c0_i32 = arith.constant 0 : i32
    %c0_i32_0 = arith.constant 0 : i32
    %c0_i32_1 = arith.constant 0 : i32
    return %c0_i32, %c0_i32_0 : i32, i32
  }
  func.func @transform_33(%arg0: i32) -> (i32, i32) {
    %c0_i32 = arith.constant 0 : i32
    %c0_i32_0 = arith.constant 0 : i32
    %c0_i32_1 = arith.constant 0 : i32
    return %c0_i32, %c0_i32_0 : i32, i32
  }
  func.func @transform_34(%arg0: i32) -> (i32, i32) {
    %c0_i32 = arith.constant 0 : i32
    %c0_i32_0 = arith.constant 0 : i32
    %c0_i32_1 = arith.constant 0 : i32
    return %c0_i32, %c0_i32_0 : i32, i32
  }
  func.func @transform_35(%arg0: i32) -> (i32, i32) {
    %c0_i32 = arith.constant 0 : i32
    %c0_i32_0 = arith.constant 0 : i32
    %c0_i32_1 = arith.constant 0 : i32
    return %c0_i32, %c0_i32_0 : i32, i32
  }
  func.func @transform_36(%arg0: i32) -> (i32, i32) {
    %c0_i32 = arith.constant 0 : i32
    %c0_i32_0 = arith.constant 0 : i32
    %c0_i32_1 = arith.constant 0 : i32
    return %c0_i32, %c0_i32_0 : i32, i32
  }
  func.func @transform_37(%arg0: i32) -> (i32, i32) {
    %c0_i32 = arith.constant 0 : i32
    %c0_i32_0 = arith.constant 0 : i32
    %c0_i32_1 = arith.constant 0 : i32
    return %c0_i32, %c0_i32_0 : i32, i32
  }
  func.func @transform_38(%arg0: i32) -> (i32, i32) {
    %c0_i32 = arith.constant 0 : i32
    %c0_i32_0 = arith.constant 0 : i32
    %c0_i32_1 = arith.constant 0 : i32
    return %c0_i32, %c0_i32_0 : i32, i32
  }
  func.func @transform_39(%arg0: i32) -> (i32, i32, i32) {
    %c0_i32 = arith.constant 0 : i32
    %c0_i32_0 = arith.constant 0 : i32
    %c0_i32_1 = arith.constant 0 : i32
    %c0_i32_2 = arith.constant 0 : i32
    return %c0_i32, %c0_i32_0, %c0_i32_1 : i32, i32, i32
  }
  func.func @transform_40(%arg0: i32) -> (i32, i32, i32) {
    %c0_i32 = arith.constant 0 : i32
    %c0_i32_0 = arith.constant 0 : i32
    %c0_i32_1 = arith.constant 0 : i32
    return %arg0, %c0_i32, %c0_i32_0 : i32, i32, i32
  }
  func.func @transform_41(%arg0: i32) -> (i32, i32, i32) {
    %c0_i32 = arith.constant 0 : i32
    %c0_i32_0 = arith.constant 0 : i32
    %c0_i32_1 = arith.constant 0 : i32
    return %arg0, %c0_i32, %c0_i32_0 : i32, i32, i32
  }
  func.func @transform_42(%arg0: i32) -> (i32, i32, i32) {
    %c0_i32 = arith.constant 0 : i32
    %c0_i32_0 = arith.constant 0 : i32
    %c0_i32_1 = arith.constant 0 : i32
    return %arg0, %c0_i32, %c0_i32_0 : i32, i32, i32
  }
  func.func @transform_43(%arg0: i32) -> (i32, i32, i32) {
    %c0_i32 = arith.constant 0 : i32
    %c0_i32_0 = arith.constant 0 : i32
    %c0_i32_1 = arith.constant 0 : i32
    return %arg0, %c0_i32, %c0_i32_0 : i32, i32, i32
  }
}

</mosaic_0001>

<bundles_post_ra>
// kernel: tile.48
= control target key start
LH: loop header
LB: loop body
LE: loop exit
PB: predicated region body
PF: predicated region fallthrough
CT: control target
= control target key end

     0   :  { %s22_s0 = inlined_call_operand.vmem [shape: f32[16], index: 0, kind: input, shape index: {}]   ;;  %s23_s1 = inlined_call_operand.vmem [shape: f32[6,16], index: 1, kind: output, shape index: {}]  }
   0x1   :  { %v4_v0 = vld [vmem:[%s22_s0] ss:$0 sm:$0xff] }
   0x2   :  { %5 = vst [vmem:[%s23_s1] sm:$0xff] %v4_v0 }

// kernel: tile.49
= control target key start
LH: loop header
LB: loop body
LE: loop exit
PB: predicated region body
PF: predicated region fallthrough
CT: control target
= control target key end

     0   :  { %s87_s10 = smov 80   ;;  %s88_s11 = smov 48   ;;  %vm4_vm0 = vcmask 130048   ;;  %s133_s0 = inlined_call_operand.vmem [shape: f32[6,16], index: 0, kind: input, shape index: {}]   ;;  %s134_s1 = inlined_call_operand.hbm [shape: f32[1,96], index: 1, kind: output, shape index: {}]  }
   0x1   :  { %v52_v0 = vld [vmem:[%s133_s0 + $0x5] sm:$0x1]   ;;  %v54_v1 = vld [vmem:[%s133_s0 + $0x3] sm:$0x1]   ;;  %v53_v2 = vld [vmem:[%s133_s0 + $0x4] sm:$0x1]  }
   0x2   :  { %8 = vrot.lane.b32.xlu0 %v52_v0, %s87_s10  ;;  %20 = vrot.lane.b32.xlu1 %v54_v1, %s88_s11  ;;  %v55_v3 = vld [vmem:[%s133_s0 + $0x2] sm:$0x1]   ;;  %v3_v4 = vld [vmem:[%s133_s0] sm:$0x1]  }
   0x3   :  { %2 = vsyncpa [#allocation1], 0  ;;  %5 = vst.msk [vmem:[#allocation2] sm:$0x1] %vm4_vm0, %v3_v4   ;;  %s89_s18 = smov 64   ;;  %s90_s19 = smov 32  }
   0x4   :  { %v56_v5 = vld [vmem:[%s133_s0 + $0x1] sm:$0x1]   ;;  %s91_s0 = smov 16   ;;  %vm10_vm1 = vcmask 786048   ;;  %vm16_vm2 = vcmask 654848   ;;  %vm22_vm3 = vcmask 523648  }
   0x5   :  { %vm28_vm4 = vcmask 392448   ;;  %vm34_vm5 = vcmask 261248   ;;  %s92_s22 = smov [#allocation0]  }
   0x6   :  { %14 = vrot.lane.b32.xlu0 %v53_v2, %s89_s18  ;;  %26 = vrot.lane.b32.xlu1 %v55_v3, %s90_s19  ;;  %s46_s23 = sshll.u32 %s92_s22, 4  ;;  %s47_s23 = int_to_ptr.vmem [resolvable:$true] %s46_s23 }
   0x7   :  { %s63_s24 = scalar_lea.vmem %s47_s23, 16  ;;  %s67_s25 = scalar_lea.vmem %s47_s23, 32 }
   0x8   :  { %p64_p0 = scmp.ne.s32.totalorder %s47_s23, %s63_s24  ;;  %p68_p1 = scmp.lt.s32.totalorder %s47_s23, %s47_s23 }
   0x9   :  { %p69_p2 = scmp.lt.s32.totalorder %s67_s25, %s63_s24 }
   0xa   :  { %32 = vrot.lane.b32.xlu0 %v56_v5, %s91_s0 }
   0xb   :  { %p70_p3 = por %p69_p2, %p68_p1 }
   0xd   :  { %p71_p4 = pnand %p70_p3, %p64_p0 }
  0x74   :  { %v9_v6 = vpop.permute.xlu0 %8   ;;  %v21_v7 = vpop.permute.xlu1 %20  }
  0x75   :  { %11 = vst.msk [vmem:[#allocation2] sm:$0x1] %vm10_vm1, %v9_v6  }
  0x78   :  { %v15_v8 = vpop.permute.xlu0 %14   ;;  %v27_v9 = vpop.permute.xlu1 %26  }
  0x79   :  { %17 = vst.msk [vmem:[#allocation2] sm:$0x1] %vm16_vm2, %v15_v8  }
  0x7a   :  { %23 = vst.msk [vmem:[#allocation2] sm:$0x1] %vm22_vm3, %v21_v7  }
  0x7b   :  { %29 = vst.msk [vmem:[#allocation2] sm:$0x1] %vm28_vm4, %v27_v9  }
  0x7c   :  { %v33_v10 = vpop.permute.xlu0 %32  }
  0x7d   :  { %35 = vst.msk [vmem:[#allocation2] sm:$0x1] %vm34_vm5, %v33_v10  }
  0x84   :  { %v39_v11 = vld [vmem:[#allocation2] sm:$0x1] }
  0x85   :  { %41 = vst [vmem:[#allocation0] sm:$0x1] %v39_v11 }
  0x86   :  { %74 = shalt.err (!%p71_p4)
}
  0x87   :  { %s75_s28 = scalar_lea.hbm %s134_s1, 16 }
  0x88   :  { %p76_p5 = scmp.ne.s32.totalorder %s134_s1, %s75_s28  ;;  %p79_p6 = scmp.lt.u32.totalorder %s75_s28, %s134_s1 }
  0x8a   :  { %p81_p7 = pnand %p79_p6, %p76_p5 }
  0x8c   :  { %84 = shalt.err (!%p81_p7)
}
  0x8d   :  { %49 = dma.vmem_to_hbm [thread:$0]  %s47_s23, 16, %s134_s1, [#allocation1]  }
  0x8e   :  { %85 = dma.done.wait [#allocation1], 16  }
  0x8f   :  { %86 = vsyncadd [#allocation1], 4294967280 }
  0x90   :  { %51 = vsyncpa [#allocation1], 1 }

// kernel: tile.53
= control target key start
LH: loop header
LB: loop body
LE: loop exit
PB: predicated region body
PF: predicated region fallthrough
CT: control target
= control target key end

     0   :  { %s28_s0 = inlined_call_operand.vmem [shape: f32[8], index: 0, kind: input, shape index: {}]   ;;  %s29_s1 = inlined_call_operand.vmem [shape: f32[14,8], index: 1, kind: output, shape index: {}]  }
   0x1   :  { %v4_v0 = vld [vmem:[%s28_s0] ss:$0 sm:$0xff] }
   0x2   :  { %5 = vst [vmem:[%s29_s1] sm:$0xff] %v4_v0  ;;  %8 = vst [vmem:[%s29_s1 + $0x8] sm:$0xff] %v4_v0 }

// kernel: tile.54
= control target key start
LH: loop header
LB: loop body
LE: loop exit
PB: predicated region body
PF: predicated region fallthrough
CT: control target
= control target key end

     0   :  { %s151_s10 = smov 104   ;;  %s152_s11 = smov 88   ;;  %vm4_vm0 = vcmask 64512   ;;  %s229_s0 = inlined_call_operand.vmem [shape: f32[14,8], index: 0, kind: input, shape index: {}]   ;;  %s230_s1 = inlined_call_operand.hbm [shape: f32[1,112], index: 1, kind: output, shape index: {}]  }
   0x1   :  { %v100_v0 = vld [vmem:[%s229_s0 + $0xd] sm:$0x1]   ;;  %v102_v1 = vld [vmem:[%s229_s0 + $0xb] sm:$0x1]   ;;  %v101_v2 = vld [vmem:[%s229_s0 + $0xc] sm:$0x1]  }
   0x2   :  { %8 = vrot.lane.b32.xlu0 %v100_v0, %s151_s10  ;;  %20 = vrot.lane.b32.xlu1 %v102_v1, %s152_s11  ;;  %v103_v3 = vld [vmem:[%s229_s0 + $0xa] sm:$0x1]   ;;  %s153_s16 = smov 96   ;;  %s154_s17 = smov 80   ;;  %v104_v4 = vld [vmem:[%s229_s0 + $0x9] sm:$0x1]  }
   0x3   :  { %v105_v5 = vld [vmem:[%s229_s0 + $0x8] sm:$0x1]   ;;  %v3_v6 = vld [vmem:[%s229_s0] sm:$0x1]  }
   0x6   :  { %14 = vrot.lane.b32.xlu0 %v101_v2, %s153_s16  ;;  %26 = vrot.lane.b32.xlu1 %v103_v3, %s154_s17 }
   0x7   :  { %2 = vsyncpa [#allocation1], 0  ;;  %5 = vst.msk [vmem:[#allocation2] sm:$0x1] %vm4_vm0, %v3_v6   ;;  %s155_s24 = smov 72   ;;  %s156_s25 = smov 64  }
   0x8   :  { %v106_v7 = vld [vmem:[%s229_s0 + $0x7] sm:$0x1]   ;;  %v107_v8 = vld [vmem:[%s229_s0 + $0x6] sm:$0x1]   ;;  %s157_s30 = smov 56   ;;  %s158_s2 = smov 48  }
   0x9   :  { %v108_v9 = vld [vmem:[%s229_s0 + $0x5] sm:$0x1]   ;;  %v109_v10 = vld [vmem:[%s229_s0 + $0x4] sm:$0x1]   ;;  %s159_s7 = smov 40   ;;  %s160_s8 = smov 32  }
   0xa   :  { %32 = vrot.lane.b32.xlu0 %v104_v4, %s155_s24  ;;  %38 = vrot.lane.b32.xlu1 %v105_v5, %s156_s25  ;;  %v110_v11 = vld [vmem:[%s229_s0 + $0x3] sm:$0x1]   ;;  %v111_v12 = vld [vmem:[%s229_s0 + $0x2] sm:$0x1]   ;;  %s161_s13 = smov 24   ;;  %s162_s14 = smov 16  }
   0xb   :  { %v112_v13 = vld [vmem:[%s229_s0 + $0x1] sm:$0x1]   ;;  %s163_s0 = smov 8   ;;  %vm10_vm1 = vcmask 917312   ;;  %vm16_vm2 = vcmask 851712   ;;  %vm22_vm3 = vcmask 786112  }
   0xc   :  { %vm28_vm4 = vcmask 720512   ;;  %vm34_vm5 = vcmask 654912   ;;  %vm40_vm6 = vcmask 589312   ;;  %vm46_vm7 = vcmask 523712   ;;  %s164_s17 = smov [#allocation0]  }
   0xd   :  { %vm52_vm8 = vcmask 458112   ;;  %vm58_vm9 = vcmask 392512   ;;  %vm64_vm10 = vcmask 326912   ;;  %vm70_vm11 = vcmask 261312   ;;  %s94_s18 = sshll.u32 %s164_s17, 4  ;;  %s95_s18 = int_to_ptr.vmem [resolvable:$true] %s94_s18 }
   0xe   :  { %44 = vrot.lane.b32.xlu0 %v106_v7, %s157_s30  ;;  %50 = vrot.lane.b32.xlu1 %v107_v8, %s158_s2  ;;  %vm76_vm12 = vcmask 195712   ;;  %vm82_vm13 = vcmask 130112   ;;  %s127_s19 = scalar_lea.vmem %s95_s18, 16  ;;  %s131_s20 = scalar_lea.vmem %s95_s18, 32 }
   0xf   :  { %p128_p0 = scmp.ne.s32.totalorder %s95_s18, %s127_s19  ;;  %p132_p1 = scmp.lt.s32.totalorder %s95_s18, %s95_s18 }
  0x10   :  { %p133_p2 = scmp.lt.s32.totalorder %s131_s20, %s127_s19 }
  0x12   :  { %56 = vrot.lane.b32.xlu0 %v108_v9, %s159_s7  ;;  %62 = vrot.lane.b32.xlu1 %v109_v10, %s160_s8  ;;  %p134_p3 = por %p133_p2, %p132_p1 }
  0x14   :  { %p135_p4 = pnand %p134_p3, %p128_p0 }
  0x16   :  { %68 = vrot.lane.b32.xlu0 %v110_v11, %s161_s13  ;;  %74 = vrot.lane.b32.xlu1 %v111_v12, %s162_s14 }
  0x1a   :  { %80 = vrot.lane.b32.xlu0 %v112_v13, %s163_s0 }
  0x74   :  { %v9_v14 = vpop.permute.xlu0 %8   ;;  %v21_v15 = vpop.permute.xlu1 %20  }
  0x75   :  { %11 = vst.msk [vmem:[#allocation2] sm:$0x1] %vm10_vm1, %v9_v14  }
  0x78   :  { %v15_v16 = vpop.permute.xlu0 %14   ;;  %v27_v17 = vpop.permute.xlu1 %26  }
  0x79   :  { %17 = vst.msk [vmem:[#allocation2] sm:$0x1] %vm16_vm2, %v15_v16  }
  0x7a   :  { %23 = vst.msk [vmem:[#allocation2] sm:$0x1] %vm22_vm3, %v21_v15  }
  0x7b   :  { %29 = vst.msk [vmem:[#allocation2] sm:$0x1] %vm28_vm4, %v27_v17  }
  0x7c   :  { %v33_v18 = vpop.permute.xlu0 %32   ;;  %v39_v19 = vpop.permute.xlu1 %38  }
  0x7d   :  { %35 = vst.msk [vmem:[#allocation2] sm:$0x1] %vm34_vm5, %v33_v18  }
  0x7e   :  { %41 = vst.msk [vmem:[#allocation2] sm:$0x1] %vm40_vm6, %v39_v19  }
  0x80   :  { %v45_v20 = vpop.permute.xlu0 %44   ;;  %v51_v21 = vpop.permute.xlu1 %50  }
  0x81   :  { %47 = vst.msk [vmem:[#allocation2] sm:$0x1] %vm46_vm7, %v45_v20  }
  0x82   :  { %53 = vst.msk [vmem:[#allocation2] sm:$0x1] %vm52_vm8, %v51_v21  }
  0x84   :  { %v57_v22 = vpop.permute.xlu0 %56   ;;  %v63_v23 = vpop.permute.xlu1 %62  }
  0x85   :  { %59 = vst.msk [vmem:[#allocation2] sm:$0x1] %vm58_vm9, %v57_v22  }
  0x86   :  { %65 = vst.msk [vmem:[#allocation2] sm:$0x1] %vm64_vm10, %v63_v23  }
  0x88   :  { %v69_v24 = vpop.permute.xlu0 %68   ;;  %v75_v25 = vpop.permute.xlu1 %74  }
  0x89   :  { %71 = vst.msk [vmem:[#allocation2] sm:$0x1] %vm70_vm11, %v69_v24  }
  0x8a   :  { %77 = vst.msk [vmem:[#allocation2] sm:$0x1] %vm76_vm12, %v75_v25  }
  0x8c   :  { %v81_v26 = vpop.permute.xlu0 %80  }
  0x8d   :  { %83 = vst.msk [vmem:[#allocation2] sm:$0x1] %vm82_vm13, %v81_v26  }
  0x94   :  { %v87_v27 = vld [vmem:[#allocation2] sm:$0x1] }
  0x95   :  { %89 = vst [vmem:[#allocation0] sm:$0x1] %v87_v27 }
  0x96   :  { %138 = shalt.err (!%p135_p4)
}
  0x97   :  { %s139_s23 = scalar_lea.hbm %s230_s1, 16 }
  0x98   :  { %p140_p5 = scmp.ne.s32.totalorder %s230_s1, %s139_s23  ;;  %p143_p6 = scmp.lt.u32.totalorder %s139_s23, %s230_s1 }
  0x9a   :  { %p145_p7 = pnand %p143_p6, %p140_p5 }
  0x9c   :  { %148 = shalt.err (!%p145_p7)
}
  0x9d   :  { %97 = dma.vmem_to_hbm [thread:$0]  %s95_s18, 16, %s230_s1, [#allocation1]  }
  0x9e   :  { %149 = dma.done.wait [#allocation1], 16  }
  0x9f   :  { %150 = vsyncadd [#allocation1], 4294967280 }
  0xa0   :  { %99 = vsyncpa [#allocation1], 1 }

// kernel: tile.58
= control target key start
LH: loop header
LB: loop body
LE: loop exit
PB: predicated region body
PF: predicated region fallthrough
CT: control target
= control target key end

     0   :  { %s40_s0 = inlined_call_operand.vmem [shape: f32[4], index: 0, kind: input, shape index: {}]   ;;  %s41_s1 = inlined_call_operand.vmem [shape: f32[30,4], index: 1, kind: output, shape index: {}]  }
   0x1   :  { %v4_v0 = vld [vmem:[%s40_s0] ss:$0 sm:$0xff] }
   0x2   :  { %5 = vst [vmem:[%s41_s1] sm:$0xff] %v4_v0  ;;  %12 = vst [vmem:[%s41_s1 + $0x8] sm:$0xff] %v4_v0 }
   0x3   :  { %13 = vst [vmem:[%s41_s1 + $0x10] sm:$0xff] %v4_v0  ;;  %14 = vst [vmem:[%s41_s1 + $0x18] sm:$0xff] %v4_v0 }

// kernel: tile.43
= control target key start
LH: loop header
LB: loop body
LE: loop exit
PB: predicated region body
PF: predicated region fallthrough
CT: control target
= control target key end

     0   :  { %s22_s0 = inlined_call_operand.vmem [shape: f32[32], index: 0, kind: input, shape index: {}]   ;;  %s23_s1 = inlined_call_operand.vmem [shape: f32[2,32], index: 1, kind: output, shape index: {}]  }
   0x1   :  { %v4_v0 = vld [vmem:[%s22_s0] ss:$0 sm:$0xff] }
   0x2   :  { %5 = vst [vmem:[%s23_s1] sm:$0x3] %v4_v0 }

// kernel: tile.59
= control target key start
LH: loop header
LB: loop body
LE: loop exit
PB: predicated region body
PF: predicated region fallthrough
CT: control target
= control target key end

     0   :  { %s279_s10 = smov 116   ;;  %s280_s11 = smov 108   ;;  %vm4_vm0 = vcmask 31744   ;;  %s421_s0 = inlined_call_operand.vmem [shape: f32[30,4], index: 0, kind: input, shape index: {}]   ;;  %s422_s1 = inlined_call_operand.hbm [shape: f32[1,120], index: 1, kind: output, shape index: {}]  }
   0x1   :  { %v196_v0 = vld [vmem:[%s421_s0 + $0x1d] sm:$0x1]   ;;  %v198_v1 = vld [vmem:[%s421_s0 + $0x1b] sm:$0x1]   ;;  %v197_v2 = vld [vmem:[%s421_s0 + $0x1c] sm:$0x1]  }
   0x2   :  { %8 = vrot.lane.b32.xlu0 %v196_v0, %s279_s10  ;;  %20 = vrot.lane.b32.xlu1 %v198_v1, %s280_s11  ;;  %v199_v3 = vld [vmem:[%s421_s0 + $0x1a] sm:$0x1]   ;;  %s281_s16 = smov 112   ;;  %s282_s17 = smov 104   ;;  %v200_v4 = vld [vmem:[%s421_s0 + $0x19] sm:$0x1]  }
   0x3   :  { %v201_v5 = vld [vmem:[%s421_s0 + $0x18] sm:$0x1]   ;;  %s283_s22 = smov 100   ;;  %s284_s23 = smov 96   ;;  %v202_v6 = vld [vmem:[%s421_s0 + $0x17] sm:$0x1]  }
   0x4   :  { %v203_v7 = vld [vmem:[%s421_s0 + $0x16] sm:$0x1]   ;;  %s285_s28 = smov 92   ;;  %s286_s29 = smov 88   ;;  %v204_v8 = vld [vmem:[%s421_s0 + $0x15] sm:$0x1]  }
   0x5   :  { %v205_v9 = vld [vmem:[%s421_s0 + $0x14] sm:$0x1]   ;;  %v3_v10 = vld [vmem:[%s421_s0] sm:$0x1]  }
   0x6   :  { %14 = vrot.lane.b32.xlu0 %v197_v2, %s281_s16  ;;  %26 = vrot.lane.b32.xlu1 %v199_v3, %s282_s17 }
   0xa   :  { %32 = vrot.lane.b32.xlu0 %v200_v4, %s283_s22  ;;  %38 = vrot.lane.b32.xlu1 %v201_v5, %s284_s23 }
   0xe   :  { %44 = vrot.lane.b32.xlu0 %v202_v6, %s285_s28  ;;  %50 = vrot.lane.b32.xlu1 %v203_v7, %s286_s29 }
   0xf   :  { %2 = vsyncpa [#allocation1], 0  ;;  %5 = vst.msk [vmem:[#allocation2] sm:$0x1] %vm4_vm0, %v3_v10   ;;  %s287_s7 = smov 84   ;;  %s288_s8 = smov 80  }
  0x10   :  { %v206_v11 = vld [vmem:[%s421_s0 + $0x13] sm:$0x1]   ;;  %v207_v12 = vld [vmem:[%s421_s0 + $0x12] sm:$0x1]   ;;  %s289_s13 = smov 76   ;;  %s290_s14 = smov 72  }
  0x11   :  { %v208_v13 = vld [vmem:[%s421_s0 + $0x11] sm:$0x1]   ;;  %v209_v14 = vld [vmem:[%s421_s0 + $0x10] sm:$0x1]   ;;  %s291_s19 = smov 68   ;;  %s292_s20 = smov 64  }
  0x12   :  { %56 = vrot.lane.b32.xlu0 %v204_v8, %s287_s7  ;;  %62 = vrot.lane.b32.xlu1 %v205_v9, %s288_s8  ;;  %v210_v15 = vld [vmem:[%s421_s0 + $0xf] sm:$0x1]   ;;  %v211_v16 = vld [vmem:[%s421_s0 + $0xe] sm:$0x1]   ;;  %s293_s25 = smov 60   ;;  %s294_s26 = smov 56  }
  0x13   :  { %v212_v17 = vld [vmem:[%s421_s0 + $0xd] sm:$0x1]   ;;  %v213_v18 = vld [vmem:[%s421_s0 + $0xc] sm:$0x1]   ;;  %s295_s2 = smov 52   ;;  %s296_s3 = smov 48  }
  0x14   :  { %v214_v19 = vld [vmem:[%s421_s0 + $0xb] sm:$0x1]   ;;  %v215_v20 = vld [vmem:[%s421_s0 + $0xa] sm:$0x1]   ;;  %s297_s8 = smov 44   ;;  %s298_s9 = smov 40  }
  0x15   :  { %v216_v21 = vld [vmem:[%s421_s0 + $0x9] sm:$0x1]   ;;  %v217_v22 = vld [vmem:[%s421_s0 + $0x8] sm:$0x1]   ;;  %s300_s15 = smov 32   ;;  %s302_s21 = smov 24  }
  0x16   :  { %68 = vrot.lane.b32.xlu0 %v206_v11, %s289_s13  ;;  %74 = vrot.lane.b32.xlu1 %v207_v12, %s290_s14  ;;  %s299_s14 = smov 36   ;;  %v218_v23 = vld [vmem:[%s421_s0 + $0x7] sm:$0x1]   ;;  %v219_v24 = vld [vmem:[%s421_s0 + $0x6] sm:$0x1]   ;;  %s304_s27 = smov 16  }
  0x17   :  { %v220_v25 = vld [vmem:[%s421_s0 + $0x5] sm:$0x1]   ;;  %v221_v26 = vld [vmem:[%s421_s0 + $0x4] sm:$0x1]   ;;  %v222_v27 = vld [vmem:[%s421_s0 + $0x3] sm:$0x1]  }
  0x18   :  { %v223_v28 = vld [vmem:[%s421_s0 + $0x2] sm:$0x1]   ;;  %s306_s4 = smov 8   ;;  %v224_v29 = vld [vmem:[%s421_s0 + $0x1] sm:$0x1]   ;;  %s307_s0 = smov 4  }
  0x19   :  { %vm10_vm1 = vcmask 982944   ;;  %vm16_vm2 = vcmask 950144   ;;  %vm22_vm3 = vcmask 917344   ;;  %vm28_vm4 = vcmask 884544   ;;  %s308_s7 = smov [#allocation0]  }
  0x1a   :  { %80 = vrot.lane.b32.xlu0 %v208_v13, %s291_s19  ;;  %86 = vrot.lane.b32.xlu1 %v209_v14, %s292_s20  ;;  %s301_s20 = smov 28   ;;  %vm34_vm5 = vcmask 851744   ;;  %vm40_vm6 = vcmask 818944   ;;  %vm46_vm7 = vcmask 786144   ;;  %vm52_vm8 = vcmask 753344  }
  0x1b   :  { %vm58_vm9 = vcmask 720544   ;;  %vm64_vm10 = vcmask 687744   ;;  %vm70_vm11 = vcmask 654944   ;;  %vm76_vm12 = vcmask 622144  }
  0x1c   :  { %vm82_vm13 = vcmask 589344   ;;  %vm88_vm14 = vcmask 556544   ;;  %vm94_vm15 = vcmask 523744   ;;  %vm100_vm0 = vcmask 490944  }
  0x1e   :  { %92 = vrot.lane.b32.xlu0 %v210_v15, %s293_s25  ;;  %98 = vrot.lane.b32.xlu1 %v211_v16, %s294_s26  ;;  %s303_s26 = smov 20  }
  0x22   :  { %104 = vrot.lane.b32.xlu0 %v212_v17, %s295_s2  ;;  %110 = vrot.lane.b32.xlu1 %v213_v18, %s296_s3  ;;  %s305_s3 = smov 12  }
  0x26   :  { %116 = vrot.lane.b32.xlu0 %v214_v19, %s297_s8  ;;  %122 = vrot.lane.b32.xlu1 %v215_v20, %s298_s9  ;;  %s190_s8 = sshll.u32 %s308_s7, 4  ;;  %s191_s8 = int_to_ptr.vmem [resolvable:$true] %s190_s8 }
  0x27   :  { %s255_s9 = scalar_lea.vmem %s191_s8, 16  ;;  %s259_s10 = scalar_lea.vmem %s191_s8, 32 }
  0x28   :  { %p256_p0 = scmp.ne.s32.totalorder %s191_s8, %s255_s9  ;;  %p260_p1 = scmp.lt.s32.totalorder %s191_s8, %s191_s8 }
  0x29   :  { %p261_p2 = scmp.lt.s32.totalorder %s259_s10, %s255_s9 }
  0x2a   :  { %128 = vrot.lane.b32.xlu0 %v216_v21, %s299_s14  ;;  %134 = vrot.lane.b32.xlu1 %v217_v22, %s300_s15 }
  0x2b   :  { %p262_p3 = por %p261_p2, %p260_p1 }
  0x2d   :  { %p263_p4 = pnand %p262_p3, %p256_p0 }
  0x2e   :  { %140 = vrot.lane.b32.xlu0 %v218_v23, %s301_s20  ;;  %146 = vrot.lane.b32.xlu1 %v219_v24, %s302_s21 }
  0x32   :  { %152 = vrot.lane.b32.xlu0 %v220_v25, %s303_s26  ;;  %158 = vrot.lane.b32.xlu1 %v221_v26, %s304_s27 }
  0x36   :  { %164 = vrot.lane.b32.xlu0 %v222_v27, %s305_s3  ;;  %170 = vrot.lane.b32.xlu1 %v223_v28, %s306_s4 }
  0x3a   :  { %176 = vrot.lane.b32.xlu0 %v224_v29, %s307_s0 }
  0x74   :  { %v9_v30 = vpop.permute.xlu0 %8   ;;  %v21_v31 = vpop.permute.xlu1 %20  }
  0x75   :  { %11 = vst.msk [vmem:[#allocation2] sm:$0x1] %vm10_vm1, %v9_v30   ;;  %vm106_vm1 = vcmask 458144  }
  0x78   :  { %v15_v32 = vpop.permute.xlu0 %14   ;;  %v27_v33 = vpop.permute.xlu1 %26  }
  0x79   :  { %17 = vst.msk [vmem:[#allocation2] sm:$0x1] %vm16_vm2, %v15_v32   ;;  %vm112_vm2 = vcmask 425344  }
  0x7a   :  { %23 = vst.msk [vmem:[#allocation2] sm:$0x1] %vm22_vm3, %v21_v31   ;;  %vm118_vm3 = vcmask 392544  }
  0x7b   :  { %29 = vst.msk [vmem:[#allocation2] sm:$0x1] %vm28_vm4, %v27_v33   ;;  %vm124_vm4 = vcmask 359744  }
  0x7c   :  { %v33_v34 = vpop.permute.xlu0 %32   ;;  %v39_v35 = vpop.permute.xlu1 %38  }
  0x7d   :  { %35 = vst.msk [vmem:[#allocation2] sm:$0x1] %vm34_vm5, %v33_v34   ;;  %vm130_vm5 = vcmask 326944  }
  0x7e   :  { %41 = vst.msk [vmem:[#allocation2] sm:$0x1] %vm40_vm6, %v39_v35   ;;  %vm136_vm6 = vcmask 294144  }
  0x80   :  { %v45_v36 = vpop.permute.xlu0 %44   ;;  %v51_v37 = vpop.permute.xlu1 %50  }
  0x81   :  { %47 = vst.msk [vmem:[#allocation2] sm:$0x1] %vm46_vm7, %v45_v36   ;;  %vm142_vm7 = vcmask 261344  }
  0x82   :  { %53 = vst.msk [vmem:[#allocation2] sm:$0x1] %vm52_vm8, %v51_v37   ;;  %vm148_vm8 = vcmask 228544  }
  0x84   :  { %v57_v38 = vpop.permute.xlu0 %56   ;;  %v63_v39 = vpop.permute.xlu1 %62  }
  0x85   :  { %59 = vst.msk [vmem:[#allocation2] sm:$0x1] %vm58_vm9, %v57_v38   ;;  %vm154_vm9 = vcmask 195744  }
  0x86   :  { %65 = vst.msk [vmem:[#allocation2] sm:$0x1] %vm64_vm10, %v63_v39   ;;  %vm160_vm10 = vcmask 162944  }
  0x88   :  { %v69_v40 = vpop.permute.xlu0 %68   ;;  %v75_v41 = vpop.permute.xlu1 %74  }
  0x89   :  { %71 = vst.msk [vmem:[#allocation2] sm:$0x1] %vm70_vm11, %v69_v40   ;;  %vm166_vm11 = vcmask 130144  }
  0x8a   :  { %77 = vst.msk [vmem:[#allocation2] sm:$0x1] %vm76_vm12, %v75_v41   ;;  %vm172_vm12 = vcmask 97344  }
  0x8c   :  { %v81_v42 = vpop.permute.xlu0 %80   ;;  %v87_v43 = vpop.permute.xlu1 %86  }
  0x8d   :  { %83 = vst.msk [vmem:[#allocation2] sm:$0x1] %vm82_vm13, %v81_v42   ;;  %vm178_vm13 = vcmask 64544  }
  0x8e   :  { %89 = vst.msk [vmem:[#allocation2] sm:$0x1] %vm88_vm14, %v87_v43  }
  0x90   :  { %v93_v44 = vpop.permute.xlu0 %92   ;;  %v99_v45 = vpop.permute.xlu1 %98  }
  0x91   :  { %95 = vst.msk [vmem:[#allocation2] sm:$0x1] %vm94_vm15, %v93_v44  }
  0x92   :  { %101 = vst.msk [vmem:[#allocation2] sm:$0x1] %vm100_vm0, %v99_v45  }
  0x94   :  { %v105_v46 = vpop.permute.xlu0 %104   ;;  %v111_v47 = vpop.permute.xlu1 %110  }
  0x95   :  { %107 = vst.msk [vmem:[#allocation2] sm:$0x1] %vm106_vm1, %v105_v46  }
  0x96   :  { %113 = vst.msk [vmem:[#allocation2] sm:$0x1] %vm112_vm2, %v111_v47  }
  0x98   :  { %v117_v48 = vpop.permute.xlu0 %116   ;;  %v123_v49 = vpop.permute.xlu1 %122  }
  0x99   :  { %119 = vst.msk [vmem:[#allocation2] sm:$0x1] %vm118_vm3, %v117_v48  }
  0x9a   :  { %125 = vst.msk [vmem:[#allocation2] sm:$0x1] %vm124_vm4, %v123_v49  }
  0x9c   :  { %v129_v50 = vpop.permute.xlu0 %128   ;;  %v135_v51 = vpop.permute.xlu1 %134  }
  0x9d   :  { %131 = vst.msk [vmem:[#allocation2] sm:$0x1] %vm130_vm5, %v129_v50  }
  0x9e   :  { %137 = vst.msk [vmem:[#allocation2] sm:$0x1] %vm136_vm6, %v135_v51  }
  0xa0   :  { %v141_v52 = vpop.permute.xlu0 %140   ;;  %v147_v53 = vpop.permute.xlu1 %146  }
  0xa1   :  { %143 = vst.msk [vmem:[#allocation2] sm:$0x1] %vm142_vm7, %v141_v52  }
  0xa2   :  { %149 = vst.msk [vmem:[#allocation2] sm:$0x1] %vm148_vm8, %v147_v53  }
  0xa4   :  { %v153_v54 = vpop.permute.xlu0 %152   ;;  %v159_v55 = vpop.permute.xlu1 %158  }
  0xa5   :  { %155 = vst.msk [vmem:[#allocation2] sm:$0x1] %vm154_vm9, %v153_v54  }
  0xa6   :  { %161 = vst.msk [vmem:[#allocation2] sm:$0x1] %vm160_vm10, %v159_v55  }
  0xa8   :  { %v165_v56 = vpop.permute.xlu0 %164   ;;  %v171_v57 = vpop.permute.xlu1 %170  }
  0xa9   :  { %167 = vst.msk [vmem:[#allocation2] sm:$0x1] %vm166_vm11, %v165_v56  }
  0xaa   :  { %173 = vst.msk [vmem:[#allocation2] sm:$0x1] %vm172_vm12, %v171_v57  }
  0xac   :  { %v177_v58 = vpop.permute.xlu0 %176  }
  0xad   :  { %179 = vst.msk [vmem:[#allocation2] sm:$0x1] %vm178_vm13, %v177_v58  }
  0xb4   :  { %v183_v59 = vld [vmem:[#allocation2] sm:$0x1] }
  0xb5   :  { %185 = vst [vmem:[#allocation0] sm:$0x1] %v183_v59 }
  0xb6   :  { %266 = shalt.err (!%p263_p4)
}
  0xb7   :  { %s267_s13 = scalar_lea.hbm %s422_s1, 16 }
  0xb8   :  { %p268_p5 = scmp.ne.s32.totalorder %s422_s1, %s267_s13  ;;  %p271_p6 = scmp.lt.u32.totalorder %s267_s13, %s422_s1 }
  0xba   :  { %p273_p7 = pnand %p271_p6, %p268_p5 }
  0xbc   :  { %276 = shalt.err (!%p273_p7)
}
  0xbd   :  { %193 = dma.vmem_to_hbm [thread:$0]  %s191_s8, 16, %s422_s1, [#allocation1]  }
  0xbe   :  { %277 = dma.done.wait [#allocation1], 16  }
  0xbf   :  { %278 = vsyncadd [#allocation1], 4294967280 }
  0xc0   :  { %195 = vsyncpa [#allocation1], 1 }

// kernel: tile.44
= control target key start
LH: loop header
LB: loop body
LE: loop exit
PB: predicated region body
PF: predicated region fallthrough
CT: control target
= control target key end

     0   :  { %s85_s0 = inlined_call_operand.vmem [shape: f32[2,32], index: 0, kind: input, shape index: {}]   ;;  %s86_s1 = inlined_call_operand.hbm [shape: f32[1,64], index: 1, kind: output, shape index: {}]  }
   0x1   :  { %v5_v0 = vld [vmem:[%s85_s0] sm:$0x3] }
   0x2   :  { %6 = vst [vmem:[#allocation3] sm:$0x3] %v5_v0 }
   0x3   :  { %2 = vsyncpa [#allocation1], 0  ;;  %vm8_vm0 = vcmask 261120   ;;  %s58_s0 = smov 32   ;;  %vm14_vm1 = vcmask 523520   ;;  %s59_s8 = smov [#allocation0]  }
   0x4   :  { %s26_s9 = sshll.u32 %s59_s8, 4  ;;  %s27_s9 = int_to_ptr.vmem [resolvable:$true] %s26_s9 }
   0x5   :  { %s34_s10 = scalar_lea.vmem %s27_s9, 16  ;;  %s38_s11 = scalar_lea.vmem %s27_s9, 32 }
   0x6   :  { %p35_p0 = scmp.ne.s32.totalorder %s27_s9, %s34_s10  ;;  %p39_p1 = scmp.lt.s32.totalorder %s27_s9, %s27_s9 }
   0x7   :  { %p40_p2 = scmp.lt.s32.totalorder %s38_s11, %s34_s10 }
   0x9   :  { %v11_v1 = vld [vmem:[#allocation3 + $0x1] sm:$0x1]   ;;  %v7_v2 = vld [vmem:[#allocation3] sm:$0x1]   ;;  %p41_p3 = por %p40_p2, %p39_p1 }
   0xa   :  { %12 = vrot.lane.b32.xlu0 %v11_v1, %s58_s0  ;;  %9 = vst.msk [vmem:[#allocation2] sm:$0x1] %vm8_vm0, %v7_v2  }
   0xb   :  { %p42_p4 = pnand %p41_p3, %p35_p0 }
  0x7c   :  { %v13_v3 = vpop.permute.xlu0 %12  }
  0x7d   :  { %15 = vst.msk [vmem:[#allocation2] sm:$0x1] %vm14_vm1, %v13_v3  }
  0x84   :  { %v19_v4 = vld [vmem:[#allocation2] sm:$0x1] }
  0x85   :  { %21 = vst [vmem:[#allocation0] sm:$0x1] %v19_v4 }
  0x86   :  { %45 = shalt.err (!%p42_p4)
}
  0x87   :  { %s46_s14 = scalar_lea.hbm %s86_s1, 16 }
  0x88   :  { %p47_p5 = scmp.ne.s32.totalorder %s86_s1, %s46_s14  ;;  %p50_p6 = scmp.lt.u32.totalorder %s46_s14, %s86_s1 }
  0x8a   :  { %p52_p7 = pnand %p50_p6, %p47_p5 }
  0x8c   :  { %55 = shalt.err (!%p52_p7)
}
  0x8d   :  { %29 = dma.vmem_to_hbm [thread:$0]  %s27_s9, 16, %s86_s1, [#allocation1]  }
  0x8e   :  { %56 = dma.done.wait [#allocation1], 16  }
  0x8f   :  { %57 = vsyncadd [#allocation1], 4294967280 }
  0x90   :  { %31 = vsyncpa [#allocation1], 1 }

// kernel: eclvr_forward.1
= control target key start
LH: loop header
LB: loop body
LE: loop exit
PB: predicated region body
PF: predicated region fallthrough
CT: control target
= control target key end

     0   :  { %s14766_s6 = smov 1   ;;  %s14767_s10 = smov 2   ;;  %s17410_s0 = inlined_call_operand.smem [shape: u32[44], index: -1, kind: input, shape index: {}] }
   0x1   :  { %s14827_s5 = sld [smem:[%s17410_s0]]   ;;  %s14768_s14 = smov 3  }
   0x2   :  { %s14832_s9 = sld [smem:[%s17410_s0 + %s14766_s6]]   ;;  %s14769_s18 = smov 4  }
   0x3   :  { %s14837_s13 = sld [smem:[%s17410_s0 + %s14767_s10]]   ;;  %s14770_s22 = smov 5  }
   0x4   :  { %s14842_s17 = sld [smem:[%s17410_s0 + %s14768_s14]]   ;;  %s14771_s26 = smov 6  }
   0x5   :  { %s14847_s21 = sld [smem:[%s17410_s0 + %s14769_s18]]   ;;  %s14772_s30 = smov 7  }
   0x6   :  { %s14852_s25 = sld [smem:[%s17410_s0 + %s14770_s22]]   ;;  %s14773_s4 = smov 8  }
   0x7   :  { %17460 = sst [smem:[#allocation9_spill]] %s14827_s5  ;;  %s14774_s10 = smov 9  }
   0x8   :  { %17461 = sst [smem:[#allocation10_spill]] %s14832_s9  ;;  %s14775_s15 = smov 10  }
   0x9   :  { %17462 = sst [smem:[#allocation11_spill]] %s14837_s13  ;;  %s14776_s20 = smov 11  }
   0xa   :  { %17463 = sst [smem:[#allocation12_spill]] %s14842_s17  ;;  %s14778_s1 = smov 13  }
   0xb   :  { %17464 = sst [smem:[#allocation13_spill]] %s14847_s21  ;;  %s14779_s7 = smov 14  }
   0xc   :  { %17465 = sst [smem:[#allocation14_spill]] %s14852_s25  ;;  %s14781_s22 = smov 16  }
   0xd   :  { %s14857_s29 = sld [smem:[%s17410_s0 + %s14771_s26]]   ;;  %s14777_s26 = smov 12  }
   0xe   :  { %s14862_s3 = sld [smem:[%s17410_s0 + %s14772_s30]]   ;;  %s14782_s28 = smov 17  }
   0xf   :  { %s14867_s8 = sld [smem:[%s17410_s0 + %s14773_s4]]  }
  0x10   :  { %s14872_s14 = sld [smem:[%s17410_s0 + %s14774_s10]]  }
  0x11   :  { %s14877_s19 = sld [smem:[%s17410_s0 + %s14775_s15]]   ;;  %s14780_s15 = smov 15  }
  0x12   :  { %s14882_s24 = sld [smem:[%s17410_s0 + %s14776_s20]]  }
  0x13   :  { %17466 = sst [smem:[#allocation15_spill]] %s14857_s29 }
  0x14   :  { %17467 = sst [smem:[#allocation16_spill]] %s14862_s3 }
  0x15   :  { %17468 = sst [smem:[#allocation17_spill]] %s14867_s8 }
  0x16   :  { %17469 = sst [smem:[#allocation18_spill]] %s14872_s14 }
  0x17   :  { %17470 = sst [smem:[#allocation19_spill]] %s14877_s19 }
  0x18   :  { %17471 = sst [smem:[#allocation20_spill]] %s14882_s24 }
  0x19   :  { %s14887_s30 = sld [smem:[%s17410_s0 + %s14777_s26]]  }
  0x1a   :  { %s14892_s6 = sld [smem:[%s17410_s0 + %s14778_s1]]  }
  0x1b   :  { %s14897_s12 = sld [smem:[%s17410_s0 + %s14779_s7]]   ;;  %s14783_s7 = smov 18  }
  0x1c   :  { %s14902_s20 = sld [smem:[%s17410_s0 + %s14780_s15]]   ;;  %s14784_s15 = smov 19  }
  0x1d   :  { %s14907_s27 = sld [smem:[%s17410_s0 + %s14781_s22]]   ;;  %s14785_s22 = smov 20  }
  0x1e   :  { %s14912_s4 = sld [smem:[%s17410_s0 + %s14782_s28]]   ;;  %s14786_s28 = smov 21  }
  0x1f   :  { %17472 = sst [smem:[#allocation21_spill]] %s14887_s30 }
  0x20   :  { %17473 = sst [smem:[#allocation22_spill]] %s14892_s6 }
  0x21   :  { %17474 = sst [smem:[#allocation23_spill]] %s14897_s12 }
  0x22   :  { %17475 = sst [smem:[#allocation24_spill]] %s14902_s20 }
  0x23   :  { %17476 = sst [smem:[#allocation25_spill]] %s14907_s27 }
  0x24   :  { %17477 = sst [smem:[#allocation26_spill]] %s14912_s4 }
  0x25   :  { %s14917_s19 = sld [smem:[%s17410_s0 + %s14783_s7]]   ;;  %s14787_s7 = smov 22  }
  0x26   :  { %s14922_s20 = sld [smem:[%s17410_s0 + %s14784_s15]]   ;;  %s14788_s15 = smov 23  }
  0x27   :  { %s14927_s27 = sld [smem:[%s17410_s0 + %s14785_s22]]   ;;  %s14789_s22 = smov 24  }
  0x28   :  { %s14932_s4 = sld [smem:[%s17410_s0 + %s14786_s28]]   ;;  %s14790_s28 = smov 25  }
  0x29   :  { %s14947_s6 = sld [smem:[%s17410_s0 + %s14789_s22]]   ;;  %s14793_s22 = smov 28  }
  0x2a   :  { %s14952_s12 = sld [smem:[%s17410_s0 + %s14790_s28]]   ;;  %s14794_s28 = smov 29  }
  0x2b   :  { %17478 = sst [smem:[#allocation27_spill]] %s14917_s19 }
  0x2c   :  { %17479 = sst [smem:[#allocation28_spill]] %s14922_s20 }
  0x2d   :  { %s14937_s19 = sld [smem:[%s17410_s0 + %s14787_s7]]   ;;  %s14791_s7 = smov 26  }
  0x2e   :  { %17480 = sst [smem:[#allocation29_spill]] %s14932_s4 }
  0x2f   :  { %s14942_s20 = sld [smem:[%s17410_s0 + %s14788_s15]]   ;;  %s14792_s15 = smov 27  }
  0x30   :  { %17483 = sst [smem:[#allocation32_spill]] %s14947_s6 }
  0x31   :  { %17484 = sst [smem:[#allocation33_spill]] %s14952_s12 }
  0x32   :  { %s14957_s30 = sld [smem:[%s17410_s0 + %s14791_s7]]   ;;  %s14795_s7 = smov 30  }
  0x33   :  { %17481 = sst [smem:[#allocation30_spill]] %s14937_s19 }
  0x34   :  { %s14962_s25 = sld [smem:[%s17410_s0 + %s14792_s15]]   ;;  %s14796_s15 = smov 31  }
  0x35   :  { %17482 = sst [smem:[#allocation31_spill]] %s14942_s20 }
  0x36   :  { %s14967_s24 = sld [smem:[%s17410_s0 + %s14793_s22]]   ;;  %s14797_s22 = smov 32  }
  0x37   :  { %s14972_s8 = sld [smem:[%s17410_s0 + %s14794_s28]]   ;;  %s14798_s28 = smov 33  }
  0x38   :  { %s14977_s14 = sld [smem:[%s17410_s0 + %s14795_s7]]   ;;  %s14799_s7 = smov 34  }
  0x39   :  { %s14982_s3 = sld [smem:[%s17410_s0 + %s14796_s15]]   ;;  %s14800_s15 = smov 35  }
  0x3a   :  { %s14987_s17 = sld [smem:[%s17410_s0 + %s14797_s22]]   ;;  %s14801_s22 = smov 36  }
  0x3b   :  { %s14992_s29 = sld [smem:[%s17410_s0 + %s14798_s28]]   ;;  %s14802_s28 = smov 37  }
  0x3c   :  { %s14997_s21 = sld [smem:[%s17410_s0 + %s14799_s7]]   ;;  %s14803_s7 = smov 38  }
  0x3d   :  { %17485 = sst [smem:[#allocation34_spill]] %s14972_s8 }
  0x3e   :  { %17486 = sst [smem:[#allocation35_spill]] %s14977_s14 }
  0x3f   :  { %17487 = sst [smem:[#allocation36_spill]] %s14982_s3 }
  0x40   :  { %17488 = sst [smem:[#allocation37_spill]] %s14987_s17 }
  0x41   :  { %17489 = sst [smem:[#allocation38_spill]] %s14992_s29 }
  0x42   :  { %17490 = sst [smem:[#allocation39_spill]] %s14997_s21 }
  0x43   :  { %s15002_s13 = sld [smem:[%s17410_s0 + %s14800_s15]]   ;;  %s14804_s15 = smov 39  }
  0x44   :  { %s15007_s17 = sld [smem:[%s17410_s0 + %s14801_s22]]   ;;  %s14805_s22 = smov 40  }
  0x45   :  { %s15012_s29 = sld [smem:[%s17410_s0 + %s14802_s28]]   ;;  %s14806_s28 = smov 41  }
  0x46   :  { %s15017_s21 = sld [smem:[%s17410_s0 + %s14803_s7]]   ;;  %s14807_s7 = smov 42  }
  0x47   :  { %s15022_s8 = sld [smem:[%s17410_s0 + %s14804_s15]]   ;;  %s14808_s15 = smov 43  }
  0x49   :  { %17491 = sst [smem:[#allocation40_spill]] %s15002_s13 }
  0x4a   :  { %17492 = sst [smem:[#allocation41_spill]] %s15007_s17 }
  0x4b   :  { %17493 = sst [smem:[#allocation42_spill]] %s15012_s29 }
  0x4c   :  { %17494 = sst [smem:[#allocation43_spill]] %s15017_s21 }
  0x4d   :  { %17495 = sst [smem:[#allocation44_spill]] %s15022_s8 }
  0x4e   :  { %s15027_s17 = sld [smem:[%s17410_s0 + %s14805_s22]]  }
  0x4f   :  { %s15032_s29 = sld [smem:[%s17410_s0 + %s14806_s28]]  }
  0x50   :  { %s15037_s21 = sld [smem:[%s17410_s0 + %s14807_s7]]  }
  0x51   :  { %s15042_s8 = sld [smem:[%s17410_s0 + %s14808_s15]]  }
  0x56   :  { %17496 = sst [smem:[#allocation45_spill]] %s15037_s21 }
  0x57   :  { %93 = vsyncpa [#allocation3], 0 }
  0x58   :  { %95 = vsyncpa [#allocation3 + $0x1], 0 }
  0x59   :  { %96 = vsyncpa [#allocation5], 0 }
  0x5a   :  { %98 = vsyncpa [#allocation5 + $0x1], 0  ;;  %s15044_s22 = smov 0   ;;  %s15046_s23 = smov 0  }
  0x5b   :  { %s15048_s26 = smov 0   ;;  %s15050_s28 = smov 0  }
  0x5c LB: > { %s17497_s21 = sld [smem:[#allocation45_spill]]  ;;  %s17498_s19 = sld [smem:[#allocation30_spill]]  ;;  %s14764_s28 = sphi %s15050_s28, %s17552_s28   ;;  %s14760_s26 = sphi %s15048_s26, %s17551_s26   ;;  %s14756_s23 = sphi %s15046_s23, %s17550_s23   ;;  %s14752_s22 = sphi %s15044_s22, %s17549_s22  }
  0x5d   : > { %s17499_s14 = sld [smem:[#allocation35_spill]]  ;;  %s17500_s13 = sld [smem:[#allocation40_spill]] }
  0x5e   : > { %s17501_s12 = sld [smem:[#allocation33_spill]]  ;;  %s17502_s6 = sld [smem:[#allocation32_spill]] }
  0x5f   : > { %s17503_s4 = sld [smem:[#allocation29_spill]]  ;;  %s17504_s3 = sld [smem:[#allocation36_spill]] }
  0x60   : > { %s15065_s0 = sadd.s32 4294967295, %s14764_s28   ;;  %s17429_s1 = sadd.s32 4294967294, %s14764_s28  }
  0x61   : > { %s15069_s2 = sadd.s32 1, %s14764_s28   ;;  %s992_s7 = sadd.s32 1, %s14760_s26 }
  0x62   : > { %s989_s10 = ssub.s32 %s14764_s28, %s15069_s2  ;;  %p1002_p0 = scmp.ne.s32.totalorder %s14760_s26, %s14756_s23 }
  0x63   : > { %p990_p1 = scmp.eq.s32.totalorder %s989_s10, 0  ;;  %p1003_p2 = scmp.eq.s32.totalorder %s15065_s0, 1 }
  0x64   : > { %p1008_p3 = scmp.ne.s32.totalorder %s14756_s23, %s14752_s22  ;;  %p1009_p4 = scmp.eq.s32.totalorder %s17429_s1, 1 }
  0x65   : > { %s15082_s11 = scalar_select %p990_p1, %s14760_s26, %s992_s7  }
  0x66   : > { %p15084_p5 = por %p1003_p2, %p1002_p0  ;;  %p15088_p6 = por %p1009_p4, %p1008_p3 }
  0x67   : > { %p9872_p7 = scmp.ge.s32.totalorder %s14764_s28, 1  ;;  %p1210_p8 = scmp.lt.s32.totalorder %s14764_s28, 3 }
  0x69   : > { %p1211_p9 = pnand %p9872_p7, %p1210_p8 }
  0x6a   : > { %s17507_s5 = sld [smem:[#allocation9_spill]] (!%p1211_p9)  ;;  %p1332_p10 = scmp.lt.s32.totalorder (!%p1211_p9), %s15065_s0, 1  ;;  %vm1355_vm0 = vcmask (!%p1211_p9), 244736   ;;  %v9880_v0 = vld [vmem:[%s17503_s4 + $0x10] sm:$0xff] (!%p1211_p9)  ;;  %v1353_v1 = vld [vmem:[%s17503_s4] sm:$0xff] (!%p1211_p9)  ;;  %vm1362_vm1 = vcmask (!%p1211_p9), 1045504  }
  0x6b   : > { %1214 = sbr.rel (%p1211_p9) target bundleno = 6719 (0x1a3f), region = 180  ;;  %11317 = vmatprep.mubr.msk.f32.mxu1 (!%p1211_p9), %vm1355_vm0, %v9880_v0  ;;  %11306 = vmatprep.mubr.msk.f32.mxu0 (!%p1211_p9), %vm1355_vm0, %v1353_v1  ;;  %vm14809_vm2 = vmmov (!%p1211_p9), 1   ;;  %v9881_v9 = vld [vmem:[%s17503_s4 + $0x18] sm:$0x3f] (!%p1211_p9)  ;;  %v1354_v10 = vld [vmem:[%s17503_s4 + $0x8] sm:$0x3f] (!%p1211_p9) }
  0x6c   : > { %vm15108_vm3 = vmpackc.low (!%p1211_p9), %vm1362_vm1, %vm14809_vm2  ;;  %v9885_v11 = vld [vmem:[%s17503_s4 + $0x20] sm:$0xff] (!%p1211_p9)  ;;  %v9895_v12 = vld [vmem:[%s17498_s19 + $0xf0] sm:$0xff] (!%p1211_p9)  ;;  %vm1724_vm4 = vcmask (!%p1211_p9), 982016   ;;  %vm14811_vm5 = vmmov (!%p1211_p9), 0   ;;  %vm2763_vm12 = vcmask (!%p1211_p9), 113664   ;;  %vm3094_vm13 = vcmask (!%p1211_p9), 916480  }
  0x6d   : > { %v9896_v13 = vld [vmem:[%s17498_s19 + $0xf8] sm:$0xff] (!%p1211_p9)  ;;  %v9890_v14 = vld [vmem:[%s17503_s4 + $0x30] sm:$0xff] (!%p1211_p9)  ;;  %v9947_v15 = vld [vmem:[%s17498_s19 + $0x168] sm:$0xff] (!%p1211_p9)  ;;  %s17510_s20 = sld [smem:[#allocation31_spill]] (!%p1211_p9)  ;;  %s17513_s9 = sld [smem:[#allocation10_spill]] (!%p1211_p9) }
  0x6e   : > { %v9948_v16 = vld [vmem:[%s17498_s19 + $0x170] sm:$0xff] (!%p1211_p9)  ;;  %v15133_v17 = vpack.c.bf16 (!%p1211_p9), %v9896_v13, %v9895_v12  ;;  %v9897_v19 = vld [vmem:[%s17498_s19 + $0x100] sm:$0xff] (!%p1211_p9)  ;;  %v9898_v20 = vld [vmem:[%s17498_s19 + $0x108] sm:$0xff] (!%p1211_p9)  ;;  %s17517_s1 = sld [smem:[#allocation38_spill]] (!%p1211_p9) }
  0x6f   : > { %v15138_v18 = vpack.c.bf16 (!%p1211_p9), %v9948_v16, %v9947_v15  ;;  %v9949_v21 = vld [vmem:[%s17498_s19 + $0x178] sm:$0xff] (!%p1211_p9)  ;;  %v9950_v22 = vld [vmem:[%s17498_s19 + $0x180] sm:$0xff] (!%p1211_p9)  ;;  %v9886_v23 = vld [vmem:[%s17503_s4 + $0x28] sm:$0x3f] (!%p1211_p9)  ;;  %v15151_v25 = vpack.c.bf16 (!%p1211_p9), %v9898_v20, %v9897_v19 }
  0x70   : > { %v9891_v24 = vld [vmem:[%s17503_s4 + $0x38] sm:$0x3f] (!%p1211_p9)  ;;  %v15154_v26 = vpack.c.bf16 (!%p1211_p9), %v9950_v22, %v9949_v21  ;;  %v9899_v27 = vld [vmem:[%s17498_s19 + $0x110] sm:$0xff] (!%p1211_p9)  ;;  %v9951_v29 = vld [vmem:[%s17498_s19 + $0x188] sm:$0xff] (!%p1211_p9) }
  0x71   : > { %v9900_v28 = vld [vmem:[%s17498_s19 + $0x118] sm:$0xff] (!%p1211_p9)  ;;  %v9952_v30 = vld [vmem:[%s17498_s19 + $0x190] sm:$0xff] (!%p1211_p9)  ;;  %v9901_v33 = vld [vmem:[%s17498_s19 + $0x120] sm:$0xff] (!%p1211_p9) }
  0x72   : > { %s15100_s18 = scalar_select %p1332_p10, %s15065_s0, 1  ;;  %v15165_v31 = vpack.c.bf16 %v9900_v28, %v9899_v27  ;;  %v15168_v32 = vpack.c.bf16 %v9952_v30, %v9951_v29  ;;  %v9902_v34 = vld [vmem:[%s17498_s19 + $0x128] sm:$0xff]  ;;  %v9953_v35 = vld [vmem:[%s17498_s19 + $0x198] sm:$0xff]  ;;  %v9954_v36 = vld [vmem:[%s17498_s19 + $0x1a0] sm:$0xff] }
  0x73   : > { %v15177_v37 = vpack.c.bf16 %v9902_v34, %v9901_v33  ;;  %v15180_v38 = vpack.c.bf16 %v9954_v36, %v9953_v35  ;;  %v9903_v39 = vld [vmem:[%s17498_s19 + $0x130] sm:$0xff]  ;;  %v9904_v40 = vld [vmem:[%s17498_s19 + $0x138] sm:$0xff]  ;;  %v9955_v41 = vld [vmem:[%s17498_s19 + $0x1a8] sm:$0xff] }
  0x74   : > { %s17430_s7 = sshll.u32 %s15100_s18, 5  ;;  %v9956_v42 = vld [vmem:[%s17498_s19 + $0x1b0] sm:$0xff]  ;;  %v15189_v43 = vpack.c.bf16 %v9904_v40, %v9903_v39  ;;  %v9905_v45 = vld [vmem:[%s17498_s19 + $0x140] sm:$0xff]  ;;  %v9906_v46 = vld [vmem:[%s17498_s19 + $0x148] sm:$0xff] }
  0x75   : > { %s1336_s10 = scalar_lea.vmem %s17507_s5, %s17430_s7  ;;  %v15192_v44 = vpack.c.bf16 %v9956_v42, %v9955_v41  ;;  %v9957_v47 = vld [vmem:[%s17498_s19 + $0x1b8] sm:$0xff]  ;;  %v9958_v48 = vld [vmem:[%s17498_s19 + $0x1c0] sm:$0xff]  ;;  %v15201_v49 = vpack.c.bf16 %v9906_v46, %v9905_v45  ;;  %v9907_v51 = vld [vmem:[%s17498_s19 + $0x150] sm:$0xff]  ;;  %s17518_s7 = sld [smem:[#allocation39_spill]] }
  0x76   : > { %v1348_v2 = vld [vmem:[%s1336_s10] sm:$0xff]  ;;  %v1349_v3 = vld [vmem:[%s1336_s10 + $0x8] sm:$0xff]  ;;  %v1350_v4 = vld [vmem:[%s1336_s10 + $0x10] sm:$0xff]  ;;  %v15204_v50 = vpack.c.bf16 %v9958_v48, %v9957_v47  ;;  %s17520_s5 = sld [smem:[#allocation43_spill]] }
  0x77   : > { %v12867_v5 = vpack.c.bf16 %v1349_v3, %v1348_v2  ;;  %v1351_v6 = vld [vmem:[%s1336_s10 + $0x18] sm:$0x3f]  ;;  %v9959_v53 = vld [vmem:[%s17498_s19 + $0x1c8] sm:$0xff]  ;;  %v9960_v54 = vld [vmem:[%s17498_s19 + $0x1d0] sm:$0xff]  ;;  %s1339_s10 = scalar_lea.vmem %s17513_s9, %s15100_s18 }
  0x78   : > { %v12871_v7 = vpack.c.bf16 %v1351_v6, %v1350_v4  ;;  %v9908_v52 = vld [vmem:[%s17498_s19 + $0x158] sm:$0xff]  ;;  %v15216_v56 = vpack.c.bf16 %v9960_v54, %v9959_v53  ;;  %v15225_v57 = vld [vmem:[%s17498_s19 + $0x160] sm:$0xff]  ;;  %v1694_v60 = vld [vmem:[%s17498_s19 + $0x8] sm:$0xff] }
  0x79   : > { %12878 = vmatprep.subr.bf16.mxu1 %v12867_v5  ;;  %12868 = vmatprep.subr.bf16.mxu0 %v12867_v5  ;;  %v15213_v55 = vpack.c.bf16 %v9908_v52, %v9907_v51  ;;  %v15228_v58 = vld [vmem:[%s17498_s19 + $0x1d8] sm:$0xff]  ;;  %v1693_v59 = vld [vmem:[%s17498_s19] sm:$0xff]  ;;  %v1695_v1 = vld [vmem:[%s17498_s19 + $0x10] sm:$0xff] }
  0x7a   : > { %12880 = vmatpush3.bf16.msra.mxu1 %v12867_v5  ;;  %12870 = vmatpush3.bf16.msra.mxu0 %v12867_v5  ;;  %v9932_v61 = vld [vmem:[%s17498_s19 + $0x78] sm:$0xff]  ;;  %v9933_v62 = vld [vmem:[%s17498_s19 + $0x80] sm:$0xff]  ;;  %v15238_v63 = vpack.c.bf16 %v1694_v60, %v1693_v59  ;;  %v9934_v3 = vld [vmem:[%s17498_s19 + $0x88] sm:$0xff] }
  0x7b   : > { %12883 = vmatprep.subr.msk.bf16.mxu1 %vm15108_vm3, %v12871_v7  ;;  %12873 = vmatprep.subr.msk.bf16.mxu0 %vm15108_vm3, %v12871_v7  ;;  %v15240_v0 = vpack.c.bf16 %v9933_v62, %v9932_v61  ;;  %v1696_v2 = vld [vmem:[%s17498_s19 + $0x18] sm:$0xff]  ;;  %v9935_v4 = vld [vmem:[%s17498_s19 + $0x90] sm:$0xff]  ;;  %v1698_v13 = vld [vmem:[%s17498_s19 + $0x28] sm:$0xff] }
  0x7c   : > { %v9937_v15 = vld [vmem:[%s17498_s19 + $0xa0] sm:$0xff]  ;;  %v1699_v20 = vld [vmem:[%s17498_s19 + $0x30] sm:$0xff]  ;;  %v1700_v21 = vld [vmem:[%s17498_s19 + $0x38] sm:$0xff] }
  0x7d   : > { %v9938_v22 = vld [vmem:[%s17498_s19 + $0xa8] sm:$0xff]  ;;  %v15290_v27 = vpack.c.bf16 %v1700_v21, %v1699_v20  ;;  %v1701_v29 = vld [vmem:[%s17498_s19 + $0x40] sm:$0xff]  ;;  %v9940_v34 = vld [vmem:[%s17498_s19 + $0xb8] sm:$0xff] }
  0x7e   : > { %12886 = vmatpush3.bf16.msk.msra.mxu1 %vm15108_vm3, %v12871_v7  ;;  %12876 = vmatpush3.bf16.msk.msra.mxu0 %vm15108_vm3, %v12871_v7  ;;  %v1702_v33 = vld [vmem:[%s17498_s19 + $0x48] sm:$0xff]  ;;  %v9941_v35 = vld [vmem:[%s17498_s19 + $0xc0] sm:$0xff]  ;;  %v1703_v40 = vld [vmem:[%s17498_s19 + $0x50] sm:$0xff] }
  0x7f   : > { %12888 = vmatprep.subr.bf16.mxu0 %v12867_v5  ;;  %12898 = vmatprep.subr.bf16.mxu1 %v12867_v5  ;;  %v15304_v36 = vpack.c.bf16 %v1702_v33, %v1701_v29  ;;  %v15306_v39 = vpack.c.bf16 %v9941_v35, %v9940_v34  ;;  %v1704_v41 = vld [vmem:[%s17498_s19 + $0x58] sm:$0xff]  ;;  %v9942_v42 = vld [vmem:[%s17498_s19 + $0xc8] sm:$0xff]  ;;  %v9943_v45 = vld [vmem:[%s17498_s19 + $0xd0] sm:$0xff] }
  0x80   : > { %v15316_v46 = vpack.c.bf16 %v1704_v41, %v1703_v40  ;;  %v15318_v47 = vpack.c.bf16 %v9943_v45, %v9942_v42  ;;  %v1705_v48 = vld [vmem:[%s17498_s19 + $0x60] sm:$0xff]  ;;  %v1706_v51 = vld [vmem:[%s17498_s19 + $0x68] sm:$0xff]  ;;  %v9944_v52 = vld [vmem:[%s17498_s19 + $0xd8] sm:$0xff] }
  0x81   : > { %11318 = vmatmul.mubr.msk.f32.vlgmr.msra.gmra.mrb[0].mxu1 %vm1355_vm0, %v9881_v9  ;;  %11307 = vmatmul.mubr.msk.f32.vlgmr.msra.gmra.mrb[0].mxu0 %vm1355_vm0, %v1354_v10  ;;  %v15254_v9 = vpack.c.bf16 %v1696_v2, %v1695_v1  ;;  %v15256_v10 = vpack.c.bf16 %v9935_v4, %v9934_v3  ;;  %v9945_v53 = vld [vmem:[%s17498_s19 + $0xe0] sm:$0xff]  ;;  %v15328_v54 = vpack.c.bf16 %v1706_v51, %v1705_v48  ;;  %v15337_v60 = vld [vmem:[%s17498_s19 + $0x70] sm:$0xff]  ;;  %v15342_v62 = vld [vmem:[%s17498_s19 + $0xe8] sm:$0xff] }
  0x82   : > { %12890 = vmatpush3.bf16.msra.mxu0 %v12867_v5  ;;  %11328 = vmatprep.mubr.msk.f32.mxu0 %vm1355_vm0, %v9885_v11  ;;  %v1697_v11 = vld [vmem:[%s17498_s19 + $0x20] sm:$0xff]  ;;  %v15330_v59 = vpack.c.bf16 %v9945_v53, %v9944_v52  ;;  %v9915_v2 = vld [vmem:[%s17498_s19 + $0x1e8] sm:$0xff]  ;;  %v9966_v4 = vld [vmem:[%s17498_s19 + $0x258] sm:$0xff] }
  0x83   : > { %12893 = vmatprep.subr.msk.bf16.mxu0 %vm15108_vm3, %v12871_v7  ;;  %12900 = vmatpush3.bf16.msra.mxu1 %v12867_v5  ;;  %v15274_v16 = vpack.c.bf16 %v1698_v13, %v1697_v11  ;;  %v9914_v1 = vld [vmem:[%s17498_s19 + $0x1e0] sm:$0xff]  ;;  %v9969_v20 = vld [vmem:[%s17498_s19 + $0x270] sm:$0xff]  ;;  %v9919_v33 = vld [vmem:[%s17498_s19 + $0x208] sm:$0xff] }
  0x84   : > { %12903 = vmatprep.subr.msk.bf16.mxu1 %vm15108_vm3, %v12871_v7  ;;  %11339 = vmatprep.mubr.msk.f32.mxu1 %vm1355_vm0, %v9890_v14  ;;  %v9936_v14 = vld [vmem:[%s17498_s19 + $0x98] sm:$0xff]  ;;  %v9967_v11 = vld [vmem:[%s17498_s19 + $0x260] sm:$0xff]  ;;  %v15355_v13 = vpack.c.bf16 %v9915_v2, %v9914_v1  ;;  %v9920_v42 = vld [vmem:[%s17498_s19 + $0x210] sm:$0xff] }
  0x85   : > { %v15276_v19 = vpack.c.bf16 %v9937_v15, %v9936_v14  ;;  %v9917_v14 = vld [vmem:[%s17498_s19 + $0x1f8] sm:$0xff]  ;;  %v9968_v15 = vld [vmem:[%s17498_s19 + $0x268] sm:$0xff]  ;;  %v15360_v21 = vpack.c.bf16 %v9967_v11, %v9966_v4  ;;  %v9918_v29 = vld [vmem:[%s17498_s19 + $0x200] sm:$0xff] }
  0x86   : > { %12896 = vmatpush3.bf16.msk.msra.mxu0 %vm15108_vm3, %v12871_v7  ;;  %v9970_v34 = vld [vmem:[%s17498_s19 + $0x278] sm:$0xff]  ;;  %v9971_v35 = vld [vmem:[%s17498_s19 + $0x280] sm:$0xff]  ;;  %v15382_v40 = vpack.c.bf16 %v9919_v33, %v9918_v29  ;;  %v9972_v45 = vld [vmem:[%s17498_s19 + $0x288] sm:$0xff] }
  0x87   : > { %12906 = vmatpush3.bf16.msk.msra.mxu1 %vm15108_vm3, %v12871_v7  ;;  %12908 = vmatprep.subr.bf16.mxu0 %v15133_v17  ;;  %v15384_v41 = vpack.c.bf16 %v9971_v35, %v9970_v34  ;;  %v9973_v48 = vld [vmem:[%s17498_s19 + $0x290] sm:$0xff]  ;;  %v9922_v53 = vld [vmem:[%s17498_s19 + $0x220] sm:$0xff]  ;;  %v9923_v1 = vld [vmem:[%s17498_s19 + $0x228] sm:$0xff] }
  0x88   : > { %12992 = vmatprep.subr.bf16.mxu1 %v15138_v18  ;;  %v15400_v52 = vpack.c.bf16 %v9973_v48, %v9972_v45  ;;  %v9974_v2 = vld [vmem:[%s17498_s19 + $0x298] sm:$0xff]  ;;  %v9975_v4 = vld [vmem:[%s17498_s19 + $0x2a0] sm:$0xff]  ;;  %v15410_v11 = vpack.c.bf16 %v9923_v1, %v9922_v53  ;;  %v9977_v29 = vld [vmem:[%s17498_s19 + $0x2b0] sm:$0xff] }
  0x89   : > { %11329 = vmatmul.mubr.msk.f32.vlgmr.msra.gmra.mrb[2].mxu0 %vm1355_vm0, %v9886_v23  ;;  %v9939_v23 = vld [vmem:[%s17498_s19 + $0xb0] sm:$0xff]  ;;  %v9926_v35 = vld [vmem:[%s17498_s19 + $0x240] sm:$0xff] }
  0x8a   : > { %11340 = vmatmul.mubr.msk.f32.vlgmr.msra.gmra.mrb[2].mxu1 %vm1355_vm0, %v9891_v24  ;;  %12910 = vmatpush3.bf16.msra.mxu0 %v15133_v17  ;;  %v15292_v28 = vpack.c.bf16 %v9939_v23, %v9938_v22  ;;  %v15366_v23 = vpack.c.bf16 %v9969_v20, %v9968_v15  ;;  %v9925_v15 = vld [vmem:[%s17498_s19 + $0x238] sm:$0xff]  ;;  %v9976_v20 = vld [vmem:[%s17498_s19 + $0x2a8] sm:$0xff]  ;;  %v9979_v45 = vld [vmem:[%s17498_s19 + $0x2c0] sm:$0xff] }
  0x8b   : > { %12994 = vmatpush3.bf16.msra.mxu1 %v15138_v18  ;;  %12912 = vmatprep.subr.bf16.mxu0 %v15151_v25  ;;  %v15424_v34 = vpack.c.bf16 %v9977_v29, %v9976_v20  ;;  %v15443_v1 = vld [vmem:[%s17498_s19 + $0x250] sm:$0xff]  ;;  %v10009_v29 = vld [vmem:[%s17501_s12 + $0xf8] sm:$0xff] }
  0x8c   : > { %12996 = vmatprep.subr.bf16.mxu1 %v15154_v26  ;;  %v10008_v20 = vld [vmem:[%s17501_s12 + $0xf0] sm:$0xff] }
  0x8e   : > { %12914 = vmatpush3.bf16.msra.mxu0 %v15151_v25 }
  0x8f   : > { %12998 = vmatpush3.bf16.msra.mxu1 %v15154_v26  ;;  %12916 = vmatprep.subr.bf16.mxu0 %v15165_v31 }
  0x90   : > { %13000 = vmatprep.subr.bf16.mxu1 %v15168_v32 }
  0x92   : > { %12918 = vmatpush3.bf16.msra.mxu0 %v15165_v31 }
  0x93   : > { %13002 = vmatpush3.bf16.msra.mxu1 %v15168_v32  ;;  %12920 = vmatprep.subr.bf16.mxu0 %v15177_v37 }
  0x94   : > { %13004 = vmatprep.subr.bf16.mxu1 %v15180_v38 }
  0x96   : > { %12922 = vmatpush3.bf16.msra.mxu0 %v15177_v37 }
  0x97   : > { %13006 = vmatpush3.bf16.msra.mxu1 %v15180_v38  ;;  %12924 = vmatprep.subr.bf16.mxu0 %v15189_v43 }
  0x98   : > { %13008 = vmatprep.subr.bf16.mxu1 %v15192_v44 }
  0x9a   : > { %12926 = vmatpush3.bf16.msra.mxu0 %v15189_v43 }
  0x9b   : > { %13010 = vmatpush3.bf16.msra.mxu1 %v15192_v44  ;;  %12928 = vmatprep.subr.bf16.mxu0 %v15201_v49 }
  0x9c   : > { %13012 = vmatprep.subr.bf16.mxu1 %v15204_v50 }
  0x9e   : > { %12930 = vmatpush3.bf16.msra.mxu0 %v15201_v49 }
  0x9f   : > { %13014 = vmatpush3.bf16.msra.mxu1 %v15204_v50  ;;  %12932 = vmatprep.subr.bf16.mxu0 %v15213_v55 }
  0xa0   : > { %13016 = vmatprep.subr.bf16.mxu1 %v15216_v56 }
  0xa2   : > { %12934 = vmatpush3.bf16.msra.mxu0 %v15213_v55 }
  0xa3   : > { %13018 = vmatpush3.bf16.msra.mxu1 %v15216_v56  ;;  %11370 = vmatprep.subr.mxu0 %v15225_v57 }
  0xa4   : > { %11469 = vmatprep.subr.mxu1 %v15228_v58 }
  0xa6   : > { %11371 = vmatpush3.msra.mxu0 %v15225_v57 }
  0xa7   : > { %11470 = vmatpush3.msra.mxu1 %v15228_v58  ;;  %12936 = vmatprep.subr.bf16.mxu0 %v15238_v63 }
  0xa8   : > { %13020 = vmatprep.subr.bf16.mxu1 %v15240_v0 }
 0x154   : > { %v15248_v5 = vpop.f32.mrb[0].mxu1  ;;  %v15250_v6 = vpop.f32.mrb[0].mxu0 }
 0x155   : > { %v15252_v7 = vpop.f32.mrb[1].mxu1  ;;  %v1432_v12 = vpop.f32.mrb[1].mxu0 }
 0x156   : > { %11372 = vmatprep.mubr.msk.f32.mxu0 %vm1724_vm4, %v15252_v7  ;;  %11471 = vmatprep.mubr.msk.f32.mxu1 %vm1724_vm4, %v15252_v7 }
 0x157   : > { %11373 = vmatmul.mubr.msk.f32.vlgmr.msra.gmra.mrb[4].mxu0 %vm1724_vm4, %v15248_v5  ;;  %11472 = vmatmul.mubr.msk.f32.vlgmr.msra.gmra.mrb[4].mxu1 %vm1724_vm4, %v15248_v5 }
 0x158   : > { %12938 = vmatpush3.bf16.msra.mxu0 %v15238_v63  ;;  %13022 = vmatpush3.bf16.msra.mxu1 %v15240_v0 }
 0x159   : > { %12940 = vmatprep.subr.bf16.mxu0 %v15254_v9  ;;  %13024 = vmatprep.subr.bf16.mxu1 %v15256_v10 }
 0x15a   : > { %11405 = vmatprep.mubr.msk.f32.mxu0 %vm1724_vm4, %v1432_v12  ;;  %11504 = vmatprep.mubr.msk.f32.mxu1 %vm1724_vm4, %v1432_v12  ;;  %v9916_v12 = vld [vmem:[%s17498_s19 + $0x1f0] sm:$0xff] }
 0x15b   : > { %v15364_v22 = vpack.c.bf16 %v9917_v14, %v9916_v12  ;;  %v15412_v12 = vpack.c.bf16 %v9975_v4, %v9974_v2  ;;  %v9924_v14 = vld [vmem:[%s17498_s19 + $0x230] sm:$0xff]  ;;  %v15446_v2 = vld [vmem:[%s17498_s19 + $0x2c8] sm:$0xff] }
 0x15c   : > { %12942 = vmatpush3.bf16.msra.mxu0 %v15254_v9  ;;  %13026 = vmatpush3.bf16.msra.mxu1 %v15256_v10  ;;  %v15286_v24 = vpop.f32.mrb[2].mxu0  ;;  %v15422_v33 = vpack.c.bf16 %v9925_v15, %v9924_v14  ;;  %v3066_v4 = vld [vmem:[%s17501_s12 + $0x8] sm:$0xff] }
 0x15d   : > { %12944 = vmatprep.subr.bf16.mxu0 %v15274_v16  ;;  %13028 = vmatprep.subr.bf16.mxu1 %v15276_v19  ;;  %v15295_v30 = vpop.f32.mrb[3].mxu0  ;;  %v15339_v61 = vpop.f32.mrb[2].mxu1 }
 0x15e   : > { %v15346_v3 = vpop.f32.mrb[3].mxu1 }
 0x160   : > { %12946 = vmatpush3.bf16.msra.mxu0 %v15274_v16  ;;  %13030 = vmatpush3.bf16.msra.mxu1 %v15276_v19 }
 0x161   : > { %12948 = vmatprep.subr.bf16.mxu0 %v15290_v27  ;;  %13032 = vmatprep.subr.bf16.mxu1 %v15292_v28 }
 0x164   : > { %12950 = vmatpush3.bf16.msra.mxu0 %v15290_v27  ;;  %13034 = vmatpush3.bf16.msra.mxu1 %v15292_v28 }
 0x165   : > { %12952 = vmatprep.subr.bf16.mxu0 %v15304_v36  ;;  %13036 = vmatprep.subr.bf16.mxu1 %v15306_v39 }
 0x168   : > { %12954 = vmatpush3.bf16.msra.mxu0 %v15304_v36  ;;  %13038 = vmatpush3.bf16.msra.mxu1 %v15306_v39 }
 0x169   : > { %12956 = vmatprep.subr.bf16.mxu0 %v15316_v46  ;;  %13040 = vmatprep.subr.bf16.mxu1 %v15318_v47 }
 0x16c   : > { %12958 = vmatpush3.bf16.msra.mxu0 %v15316_v46  ;;  %13042 = vmatpush3.bf16.msra.mxu1 %v15318_v47 }
 0x16d   : > { %12960 = vmatprep.subr.bf16.mxu0 %v15328_v54  ;;  %13044 = vmatprep.subr.bf16.mxu1 %v15330_v59 }
 0x170   : > { %12962 = vmatpush3.bf16.msra.mxu0 %v15328_v54  ;;  %13046 = vmatpush3.bf16.msra.mxu1 %v15330_v59 }
 0x171   : > { %11403 = vmatprep.subr.mxu0 %v15337_v60  ;;  %11502 = vmatprep.subr.mxu1 %v15342_v62 }
 0x174   : > { %11404 = vmatpush3.msra.mxu0 %v15337_v60  ;;  %11503 = vmatpush3.msra.mxu1 %v15342_v62 }
 0x175   : > { %11406 = vmatmul.mubr.msk.f32.vlgmr.msra.gmra.mrb[4].mxu0 %vm1724_vm4, %v15250_v6  ;;  %12964 = vmatprep.subr.bf16.mxu0 %v15355_v13 }
 0x176   : > { %11505 = vmatmul.mubr.msk.f32.vlgmr.msra.gmra.mrb[4].mxu1 %vm1724_vm4, %v15250_v6  ;;  %13048 = vmatprep.subr.bf16.mxu1 %v15360_v21  ;;  %v9921_v6 = vld [vmem:[%s17498_s19 + $0x218] sm:$0xff] }
 0x177   : > { %12966 = vmatpush3.bf16.msra.mxu0 %v15355_v13  ;;  %13050 = vmatpush3.bf16.msra.mxu1 %v15360_v21  ;;  %v15398_v51 = vpack.c.bf16 %v9921_v6, %v9920_v42  ;;  %v9927_v42 = vld [vmem:[%s17498_s19 + $0x248] sm:$0xff]  ;;  %v9978_v6 = vld [vmem:[%s17498_s19 + $0x2b8] sm:$0xff] }
 0x178   : > { %12968 = vmatprep.subr.bf16.mxu0 %v15364_v22  ;;  %13052 = vmatprep.subr.bf16.mxu1 %v15366_v23  ;;  %v15434_v48 = vpack.c.bf16 %v9927_v42, %v9926_v35  ;;  %v15436_v53 = vpack.c.bf16 %v9979_v45, %v9978_v6  ;;  %v15629_v35 = vpack.c.bf16 %v10009_v29, %v10008_v20  ;;  %v10010_v6 = vld [vmem:[%s17501_s12 + $0x100] sm:$0xff]  ;;  %v10011_v45 = vld [vmem:[%s17501_s12 + $0x108] sm:$0xff] }
 0x179   : > { %11438 = vmatprep.mubr.msk.f32.mxu0 %vm1724_vm4, %v15295_v30  ;;  %11537 = vmatprep.mubr.msk.f32.mxu1 %vm1724_vm4, %v15295_v30 }
 0x17b   : > { %12970 = vmatpush3.bf16.msra.mxu0 %v15364_v22  ;;  %13054 = vmatpush3.bf16.msra.mxu1 %v15366_v23 }
 0x17c   : > { %12972 = vmatprep.subr.bf16.mxu0 %v15382_v40  ;;  %13056 = vmatprep.subr.bf16.mxu1 %v15384_v41 }
 0x17f   : > { %12974 = vmatpush3.bf16.msra.mxu0 %v15382_v40  ;;  %13058 = vmatpush3.bf16.msra.mxu1 %v15384_v41 }
 0x180   : > { %12976 = vmatprep.subr.bf16.mxu0 %v15398_v51  ;;  %13060 = vmatprep.subr.bf16.mxu1 %v15400_v52 }
 0x183   : > { %12978 = vmatpush3.bf16.msra.mxu0 %v15398_v51  ;;  %13062 = vmatpush3.bf16.msra.mxu1 %v15400_v52 }
 0x184   : > { %12980 = vmatprep.subr.bf16.mxu0 %v15410_v11  ;;  %13064 = vmatprep.subr.bf16.mxu1 %v15412_v12 }
 0x187   : > { %12982 = vmatpush3.bf16.msra.mxu0 %v15410_v11  ;;  %13066 = vmatpush3.bf16.msra.mxu1 %v15412_v12 }
 0x188   : > { %12984 = vmatprep.subr.bf16.mxu0 %v15422_v33  ;;  %13068 = vmatprep.subr.bf16.mxu1 %v15424_v34 }
 0x18b   : > { %12986 = vmatpush3.bf16.msra.mxu0 %v15422_v33  ;;  %13070 = vmatpush3.bf16.msra.mxu1 %v15424_v34 }
 0x18c   : > { %12988 = vmatprep.subr.bf16.mxu0 %v15434_v48  ;;  %13072 = vmatprep.subr.bf16.mxu1 %v15436_v53 }
 0x18f   : > { %12990 = vmatpush3.bf16.msra.mxu0 %v15434_v48  ;;  %13074 = vmatpush3.bf16.msra.mxu1 %v15436_v53 }
 0x190   : > { %11436 = vmatprep.subr.mxu0 %v15443_v1  ;;  %11535 = vmatprep.subr.mxu1 %v15446_v2 }
 0x193   : > { %11437 = vmatpush3.msra.mxu0 %v15443_v1  ;;  %11536 = vmatpush3.msra.mxu1 %v15446_v2 }
 0x194   : > { %11439 = vmatmul.mubr.msk.f32.vlgmr.msra.gmra.mrb[4].mxu0 %vm1724_vm4, %v15286_v24  ;;  %11538 = vmatmul.mubr.msk.f32.vlgmr.msra.gmra.mrb[4].mxu1 %vm1724_vm4, %v15286_v24 }
 0x195   : > { %13076 = vmatprep.subr.bf16.mxu0 %v15133_v17  ;;  %13160 = vmatprep.subr.bf16.mxu1 %v15138_v18 }
 0x196   : > { %13078 = vmatpush3.bf16.msra.mxu0 %v15133_v17  ;;  %11570 = vmatprep.mubr.msk.f32.mxu0 %vm1724_vm4, %v15295_v30  ;;  %v14810_v17 = vmov 0.0|0.0  }
 0x197   : > { %13162 = vmatpush3.bf16.msra.mxu1 %v15138_v18  ;;  %11669 = vmatprep.mubr.msk.f32.mxu1 %vm1724_vm4, %v15295_v30  ;;  %v14812_v18 = vmov 0.0   ;;  %v14813_v30 = vmov 0  }
 0x198   : > { %13080 = vmatprep.subr.bf16.mxu0 %v15151_v25  ;;  %13164 = vmatprep.subr.bf16.mxu1 %v15154_v26 }
 0x19a   : > { %13082 = vmatpush3.bf16.msra.mxu0 %v15151_v25  ;;  %v9931_v25 = vld [vmem:[%s14927_s27] ss:$0 sm:$0xff] }
 0x19b   : > { %13166 = vmatpush3.bf16.msra.mxu1 %v15154_v26  ;;  %13084 = vmatprep.subr.bf16.mxu0 %v15165_v31 }
 0x19c   : > { %13168 = vmatprep.subr.bf16.mxu1 %v15168_v32 }
 0x19e   : > { %13086 = vmatpush3.bf16.msra.mxu0 %v15165_v31 }
 0x19f   : > { %13170 = vmatpush3.bf16.msra.mxu1 %v15168_v32  ;;  %13088 = vmatprep.subr.bf16.mxu0 %v15177_v37 }
 0x1a0   : > { %13172 = vmatprep.subr.bf16.mxu1 %v15180_v38 }
 0x1a2   : > { %13090 = vmatpush3.bf16.msra.mxu0 %v15177_v37 }
 0x1a3   : > { %13174 = vmatpush3.bf16.msra.mxu1 %v15180_v38  ;;  %13092 = vmatprep.subr.bf16.mxu0 %v15189_v43 }
 0x1a4   : > { %13176 = vmatprep.subr.bf16.mxu1 %v15192_v44 }
 0x1a6   : > { %13094 = vmatpush3.bf16.msra.mxu0 %v15189_v43 }
 0x1a7   : > { %13178 = vmatpush3.bf16.msra.mxu1 %v15192_v44  ;;  %13096 = vmatprep.subr.bf16.mxu0 %v15201_v49 }
 0x1a8   : > { %13180 = vmatprep.subr.bf16.mxu1 %v15204_v50 }
 0x1aa   : > { %13098 = vmatpush3.bf16.msra.mxu0 %v15201_v49 }
 0x1ab   : > { %13182 = vmatpush3.bf16.msra.mxu1 %v15204_v50  ;;  %13100 = vmatprep.subr.bf16.mxu0 %v15213_v55 }
 0x1ac   : > { %13184 = vmatprep.subr.bf16.mxu1 %v15216_v56 }
 0x1ae   : > { %13102 = vmatpush3.bf16.msra.mxu0 %v15213_v55 }
 0x1af   : > { %13186 = vmatpush3.bf16.msra.mxu1 %v15216_v56  ;;  %11568 = vmatprep.subr.mxu0 %v15225_v57 }
 0x1b0   : > { %11667 = vmatprep.subr.mxu1 %v15228_v58 }
 0x1b2   : > { %11569 = vmatpush3.msra.mxu0 %v15225_v57 }
 0x1b3   : > { %11668 = vmatpush3.msra.mxu1 %v15228_v58  ;;  %11571 = vmatmul.mubr.msk.f32.vlgmr.msra.gmra.mrb[6].mxu0 %vm1724_vm4, %v15286_v24 }
 0x1b4   : > { %13104 = vmatprep.subr.bf16.mxu0 %v15238_v63  ;;  %11670 = vmatmul.mubr.msk.f32.vlgmr.msra.gmra.mrb[6].mxu1 %vm1724_vm4, %v15286_v24 }
 0x1b5   : > { %13188 = vmatprep.subr.bf16.mxu1 %v15240_v0  ;;  %13106 = vmatpush3.bf16.msra.mxu0 %v15238_v63 }
 0x1b6   : > { %11603 = vmatprep.mubr.msk.f32.mxu0 %vm1724_vm4, %v15252_v7  ;;  %13190 = vmatpush3.bf16.msra.mxu1 %v15240_v0 }
 0x1b7   : > { %11702 = vmatprep.mubr.msk.f32.mxu1 %vm1724_vm4, %v15252_v7  ;;  %13108 = vmatprep.subr.bf16.mxu0 %v15254_v9 }
 0x1b8   : > { %13192 = vmatprep.subr.bf16.mxu1 %v15256_v10 }
 0x1b9   : > { %13110 = vmatpush3.bf16.msra.mxu0 %v15254_v9 }
 0x1ba   : > { %13194 = vmatpush3.bf16.msra.mxu1 %v15256_v10  ;;  %13112 = vmatprep.subr.bf16.mxu0 %v15274_v16 }
 0x1bb   : > { %13196 = vmatprep.subr.bf16.mxu1 %v15276_v19 }
 0x1bd   : > { %13114 = vmatpush3.bf16.msra.mxu0 %v15274_v16 }
 0x1be   : > { %13198 = vmatpush3.bf16.msra.mxu1 %v15276_v19  ;;  %13116 = vmatprep.subr.bf16.mxu0 %v15290_v27 }
 0x1bf   : > { %13200 = vmatprep.subr.bf16.mxu1 %v15292_v28 }
 0x1c1   : > { %13118 = vmatpush3.bf16.msra.mxu0 %v15290_v27 }
 0x1c2   : > { %13202 = vmatpush3.bf16.msra.mxu1 %v15292_v28  ;;  %13120 = vmatprep.subr.bf16.mxu0 %v15304_v36 }
 0x1c3   : > { %13204 = vmatprep.subr.bf16.mxu1 %v15306_v39 }
 0x1c5   : > { %13122 = vmatpush3.bf16.msra.mxu0 %v15304_v36 }
 0x1c6   : > { %13206 = vmatpush3.bf16.msra.mxu1 %v15306_v39  ;;  %13124 = vmatprep.subr.bf16.mxu0 %v15316_v46 }
 0x1c7   : > { %13208 = vmatprep.subr.bf16.mxu1 %v15318_v47 }
 0x1c9   : > { %13126 = vmatpush3.bf16.msra.mxu0 %v15316_v46 }
 0x1ca   : > { %13210 = vmatpush3.bf16.msra.mxu1 %v15318_v47  ;;  %13128 = vmatprep.subr.bf16.mxu0 %v15328_v54 }
 0x1cb   : > { %13212 = vmatprep.subr.bf16.mxu1 %v15330_v59 }
 0x1cd   : > { %13130 = vmatpush3.bf16.msra.mxu0 %v15328_v54 }
 0x1ce   : > { %13214 = vmatpush3.bf16.msra.mxu1 %v15330_v59  ;;  %11601 = vmatprep.subr.mxu0 %v15337_v60 }
 0x1cf   : > { %11700 = vmatprep.subr.mxu1 %v15342_v62 }
 0x1d1   : > { %11602 = vmatpush3.msra.mxu0 %v15337_v60 }
 0x1d2   : > { %11701 = vmatpush3.msra.mxu1 %v15342_v62  ;;  %11604 = vmatmul.mubr.msk.f32.vlgmr.msra.gmra.mrb[6].mxu0 %vm1724_vm4, %v15248_v5 }
 0x1d3   : > { %13132 = vmatprep.subr.bf16.mxu0 %v15355_v13  ;;  %11703 = vmatmul.mubr.msk.f32.vlgmr.msra.gmra.mrb[6].mxu1 %vm1724_vm4, %v15248_v5 }
 0x1d4   : > { %13216 = vmatprep.subr.bf16.mxu1 %v15360_v21  ;;  %13134 = vmatpush3.bf16.msra.mxu0 %v15355_v13 }
 0x1d5   : > { %13218 = vmatpush3.bf16.msra.mxu1 %v15360_v21  ;;  %13136 = vmatprep.subr.bf16.mxu0 %v15364_v22 }
 0x1d6   : > { %13220 = vmatprep.subr.bf16.mxu1 %v15366_v23  ;;  %11636 = vmatprep.mubr.msk.f32.mxu0 %vm1724_vm4, %v15346_v3 }
 0x1d7   : > { %11735 = vmatprep.mubr.msk.f32.mxu1 %vm1724_vm4, %v15346_v3 }
 0x1d8   : > { %13138 = vmatpush3.bf16.msra.mxu0 %v15364_v22 }
 0x1d9   : > { %13222 = vmatpush3.bf16.msra.mxu1 %v15366_v23  ;;  %13140 = vmatprep.subr.bf16.mxu0 %v15382_v40  ;;  %v2762_v23 = vld [vmem:[%s17502_s6] sm:$0x3f] }
 0x1da   : > { %13224 = vmatprep.subr.bf16.mxu1 %v15384_v41 }
 0x1dc   : > { %13142 = vmatpush3.bf16.msra.mxu0 %v15382_v40  ;;  %v9997_v40 = vld [vmem:[%s17502_s6 + $0x8] sm:$0x3f] }
 0x1dd   : > { %13226 = vmatpush3.bf16.msra.mxu1 %v15384_v41  ;;  %13144 = vmatprep.subr.bf16.mxu0 %v15398_v51  ;;  %v10006_v41 = vld [vmem:[%s17501_s12 + $0xe0] sm:$0xff] }
 0x1de   : > { %13228 = vmatprep.subr.bf16.mxu1 %v15400_v52 }
 0x1e0   : > { %13146 = vmatpush3.bf16.msra.mxu0 %v15398_v51  ;;  %v10007_v51 = vld [vmem:[%s17501_s12 + $0xe8] sm:$0xff] }
 0x1e1   : > { %13230 = vmatpush3.bf16.msra.mxu1 %v15400_v52  ;;  %13148 = vmatprep.subr.bf16.mxu0 %v15410_v11  ;;  %v3065_v52 = vld [vmem:[%s17501_s12] sm:$0xff]  ;;  %v15611_v14 = vpack.c.bf16 %v10007_v51, %v10006_v41 }
 0x1e2   : > { %13232 = vmatprep.subr.bf16.mxu1 %v15412_v12  ;;  %v15613_v15 = vpack.c.bf16 %v3066_v4, %v3065_v52  ;;  %v10026_v52 = vld [vmem:[%s17501_s12 + $0x1e0] sm:$0xff]  ;;  %v10027_v4 = vld [vmem:[%s17501_s12 + $0x1e8] sm:$0xff] }
 0x1e4   : > { %13150 = vmatpush3.bf16.msra.mxu0 %v15410_v11  ;;  %v10000_v11 = vld [vmem:[%s17502_s6 + $0x10] sm:$0x3f] }
 0x1e5   : > { %13234 = vmatpush3.bf16.msra.mxu1 %v15412_v12  ;;  %13152 = vmatprep.subr.bf16.mxu0 %v15422_v33  ;;  %v10003_v12 = vld [vmem:[%s17502_s6 + $0x18] sm:$0x3f]  ;;  %s17303_s6 = sshll.u32 %s15065_s0, 4 }
 0x1e6   : > { %13236 = vmatprep.subr.bf16.mxu1 %v15424_v34 }
 0x1e8   : > { %13154 = vmatpush3.bf16.msra.mxu0 %v15422_v33  ;;  %v3067_v33 = vld [vmem:[%s17501_s12 + $0x10] sm:$0xff] }
 0x1e9   : > { %13238 = vmatpush3.bf16.msra.mxu1 %v15424_v34  ;;  %13156 = vmatprep.subr.bf16.mxu0 %v15434_v48  ;;  %v3068_v34 = vld [vmem:[%s17501_s12 + $0x18] sm:$0xff] }
 0x1ea   : > { %13240 = vmatprep.subr.bf16.mxu1 %v15436_v53  ;;  %v15631_v42 = vpack.c.bf16 %v3068_v34, %v3067_v33 }
 0x1ec   : > { %13158 = vmatpush3.bf16.msra.mxu0 %v15434_v48  ;;  %v3069_v48 = vld [vmem:[%s17501_s12 + $0x20] sm:$0xff] }
 0x1ed   : > { %13242 = vmatpush3.bf16.msra.mxu1 %v15436_v53  ;;  %11634 = vmatprep.subr.mxu0 %v15443_v1  ;;  %v3070_v53 = vld [vmem:[%s17501_s12 + $0x28] sm:$0xff] }
 0x1ee   : > { %11733 = vmatprep.subr.mxu1 %v15446_v2 }
 0x1f0   : > { %11635 = vmatpush3.msra.mxu0 %v15443_v1  ;;  %v15645_v1 = vpack.c.bf16 %v10011_v45, %v10010_v6  ;;  %v15745_v6 = vpack.c.bf16 %v10027_v4, %v10026_v52 }
 0x1f1   : > { %11734 = vmatpush3.msra.mxu1 %v15446_v2  ;;  %11637 = vmatmul.mubr.msk.f32.vlgmr.msra.gmra.mrb[6].mxu0 %vm1724_vm4, %v15339_v61  ;;  %v15647_v2 = vpack.c.bf16 %v3070_v53, %v3069_v48  ;;  %v10028_v48 = vld [vmem:[%s17501_s12 + $0x1f0] sm:$0xff]  ;;  %v10029_v53 = vld [vmem:[%s17501_s12 + $0x1f8] sm:$0xff] }
 0x1f2   : > { %11736 = vmatmul.mubr.msk.f32.vlgmr.msra.gmra.mrb[6].mxu1 %vm1724_vm4, %v15339_v61  ;;  %13243 = vmatprep.subr.bf16.mxu0 %v14810_v17 }
 0x1f3   : > { %13247 = vmatprep.subr.bf16.mxu1 %v14810_v17  ;;  %11742 = vmatprep.mubr.msk.f32.mxu0 %vm14811_vm5, %v14812_v18 }
 0x1f4   : > { %11749 = vmatprep.mubr.msk.f32.mxu1 %vm14811_vm5, %v14812_v18 }
 0x267   : > { %v11440_v26 = vpop.f32.mrb[4].mxu0  ;;  %v11539_v31 = vpop.f32.mrb[4].mxu1 }
 0x268   : > { %v1993_v32 = vadd.f32 %v11440_v26, %v9931_v25  ;;  %v2272_v37 = vadd.f32 %v11539_v31, %v9931_v25  ;;  %v1975_v38 = vpop.f32.mrb[5].mxu0  ;;  %v2260_v43 = vpop.f32.mrb[5].mxu1  ;;  %v10013_v26 = vld [vmem:[%s17501_s12 + $0x118] sm:$0xff]  ;;  %v3071_v31 = vld [vmem:[%s17501_s12 + $0x30] sm:$0xff] }
 0x269   : > { %v1992_v44 = vadd.f32 %v9931_v25, %v1975_v38  ;;  %v2271_v49 = vadd.f32 %v9931_v25, %v2260_v43  ;;  %v10014_v43 = vld [vmem:[%s17501_s12 + $0x120] sm:$0xff] }
 0x26a   : > { %v1995_v50 = vmax.f32 %v1993_v32, 0.0  ;;  %v2274_v55 = vmax.f32 %v2272_v37, 0.0  ;;  %v3072_v32 = vld [vmem:[%s17501_s12 + $0x38] sm:$0xff] }
 0x26b   : > { %v1994_v56 = vmax.f32 %v1992_v44, 0.0  ;;  %v2273_v57 = vmax.f32 %v2271_v49, 0.0  ;;  %v15659_v38 = vpack.c.bf16 %v3072_v32, %v3071_v31  ;;  %v10015_v44 = vld [vmem:[%s17501_s12 + $0x128] sm:$0xff]  ;;  %v3073_v49 = vld [vmem:[%s17501_s12 + $0x40] sm:$0xff]  ;;  %v15757_v31 = vpack.c.bf16 %v10029_v53, %v10028_v48 }
 0x26c   : > { %vm2276_vm6 = vcmp.gt.f32.partialorder %v2274_v55, %v1995_v50 }
 0x26d   : > { %vm2275_vm7 = vcmp.gt.f32.partialorder %v2273_v57, %v1994_v56  ;;  %v2278_v58 = vsel %vm2276_vm6, %v2274_v55, %v1995_v50  ;;  %v2280_v36 = vsel %vm2276_vm6, 1, %v14813_v30  ;;  %v3074_v50 = vld [vmem:[%s17501_s12 + $0x48] sm:$0xff]  ;;  %v15669_v55 = vpack.c.bf16 %v10015_v44, %v10014_v43  ;;  %v10030_v43 = vld [vmem:[%s17501_s12 + $0x200] sm:$0xff] }
 0x26e   : > { %v2277_v63 = vsel %vm2275_vm7, %v2273_v57, %v1994_v56  ;;  %v2279_v39 = vsel %vm2275_vm7, 1, %v14813_v30  ;;  %v15671_v56 = vpack.c.bf16 %v3074_v50, %v3073_v49  ;;  %v10016_v57 = vld [vmem:[%s17501_s12 + $0x130] sm:$0xff]  ;;  %v10031_v44 = vld [vmem:[%s17501_s12 + $0x208] sm:$0xff]  ;;  %v10061_v50 = vld [vmem:[%s17501_s12 + $0x198] sm:$0xff]  ;;  %vm4036_vm6 = vcmask 48128  }
 0x26f   : > { %v10060_v49 = vld [vmem:[%s17501_s12 + $0x190] sm:$0xff]  ;;  %vm4363_vm7 = vcmask 785408  }
 0x2c4   : > { %v11638_v0 = vpop.f32.mrb[6].mxu0 }
 0x2c5   : > { %v2515_v5 = vadd.f32 %v11638_v0, %v9931_v25  ;;  %v11737_v7 = vpop.f32.mrb[6].mxu1  ;;  %v2503_v9 = vpop.f32.mrb[7].mxu0  ;;  %v3076_v0 = vld [vmem:[%s17501_s12 + $0x58] sm:$0xff] }
 0x2c6   : > { %v2752_v10 = vadd.f32 %v11737_v7, %v9931_v25  ;;  %v2514_v16 = vadd.f32 %v9931_v25, %v2503_v9  ;;  %v2740_v19 = vpop.f32.mrb[7].mxu1  ;;  %v10018_v9 = vld [vmem:[%s17501_s12 + $0x140] sm:$0xff] }
 0x2c7   : > { %v2517_v24 = vmax.f32 %v2515_v5, 0.0  ;;  %v2751_v27 = vadd.f32 %v9931_v25, %v2740_v19  ;;  %v10012_v25 = vld [vmem:[%s17501_s12 + $0x110] sm:$0xff]  ;;  %v3078_v19 = vld [vmem:[%s17501_s12 + $0x68] sm:$0xff] }
 0x2c8   : > { %v2516_v28 = vmax.f32 %v2514_v16, 0.0  ;;  %v2754_v46 = vmax.f32 %v2752_v10, 0.0  ;;  %v15657_v37 = vpack.c.bf16 %v10013_v26, %v10012_v25  ;;  %v10019_v10 = vld [vmem:[%s17501_s12 + $0x148] sm:$0xff]  ;;  %v3077_v16 = vld [vmem:[%s17501_s12 + $0x60] sm:$0xff] }
 0x2c9   : > { %vm2519_vm8 = vcmp.gt.f32.partialorder %v2517_v24, %v2278_v58  ;;  %v2753_v59 = vmax.f32 %v2751_v27, 0.0  ;;  %v15695_v27 = vpack.c.bf16 %v3078_v19, %v3077_v16  ;;  %v10058_v25 = vld [vmem:[%s17501_s12 + $0x180] sm:$0xff]  ;;  %v10059_v26 = vld [vmem:[%s17501_s12 + $0x188] sm:$0xff] }
 0x2ca   : > { %v2523_v47 = vsel %vm2519_vm8, 2, %v2280_v36  ;;  %v2521_v54 = vsel %vm2519_vm8, %v2517_v24, %v2278_v58  ;;  %vm2518_vm9 = vcmp.gt.f32.partialorder %v2516_v28, %v2277_v63  ;;  %v10017_v58 = vld [vmem:[%s17501_s12 + $0x138] sm:$0xff]  ;;  %v15693_v24 = vpack.c.bf16 %v10019_v10, %v10018_v9  ;;  %v10023_v36 = vld [vmem:[%s17501_s12 + $0x1c8] sm:$0xff]  ;;  %v10062_v9 = vld [vmem:[%s17501_s12 + $0x1a0] sm:$0xff] }
 0x2cb   : > { %vm2756_vm10 = vcmp.gt.f32.partialorder %v2754_v46, %v2521_v54  ;;  %v2522_v60 = vsel %vm2518_vm9, 2, %v2279_v39  ;;  %v2520_v61 = vsel %vm2518_vm9, %v2516_v28, %v2277_v63  ;;  %v3075_v63 = vld [vmem:[%s17501_s12 + $0x50] sm:$0xff]  ;;  %v15681_v5 = vpack.c.bf16 %v10017_v58, %v10016_v57  ;;  %v10022_v28 = vld [vmem:[%s17501_s12 + $0x1c0] sm:$0xff]  ;;  %v10063_v10 = vld [vmem:[%s17501_s12 + $0x1a8] sm:$0xff] }
 0x2cc   : > { %v2758_v62 = vsel %vm2756_vm10, %v2754_v46, %v2521_v54  ;;  %v15587_v3 = vsel %vm2756_vm10, 3, %v2523_v47  ;;  %vm2755_vm11 = vcmp.gt.f32.partialorder %v2753_v59, %v2520_v61  ;;  %v15683_v7 = vpack.c.bf16 %v3076_v0, %v3075_v63  ;;  %v10052_v39 = vld [vmem:[%s17501_s12 + $0x150] sm:$0xff]  ;;  %v10053_v46 = vld [vmem:[%s17501_s12 + $0x158] sm:$0xff] }
 0x2cd   : > { %v2757_v13 = vsel %vm2755_vm11, %v2753_v59, %v2520_v61  ;;  %v15589_v21 = vsel %vm2755_vm11, 3, %v2522_v60  ;;  %v15707_v47 = vpack.c.bf16 %v10023_v36, %v10022_v28  ;;  %v15709_v54 = vpack.c.bf16 %v10053_v46, %v10052_v39  ;;  %v10024_v59 = vld [vmem:[%s17501_s12 + $0x1d0] sm:$0xff]  ;;  %v10025_v60 = vld [vmem:[%s17501_s12 + $0x1d8] sm:$0xff]  ;;  %v10054_v61 = vld [vmem:[%s17501_s12 + $0x160] sm:$0xff] }
 0x2ce   : > { %v13244_v22 = vpack.c.bf16 %v2758_v62, %v2757_v13  ;;  %v10055_v62 = vld [vmem:[%s17501_s12 + $0x168] sm:$0xff]  ;;  %v15725_v41 = vpack.c.bf16 %v10025_v60, %v10024_v59  ;;  %v15759_v32 = vpack.c.bf16 %v10059_v26, %v10058_v25  ;;  %v15769_v57 = vpack.c.bf16 %v10031_v44, %v10030_v43  ;;  %v10032_v63 = vld [vmem:[%s17501_s12 + $0x210] sm:$0xff]  ;;  %v10033_v0 = vld [vmem:[%s17501_s12 + $0x218] sm:$0xff] }
 0x2cf   : > { %v15727_v51 = vpack.c.bf16 %v10055_v62, %v10054_v61  ;;  %v15771_v58 = vpack.c.bf16 %v10061_v50, %v10060_v49  ;;  %v15781_v16 = vpack.c.bf16 %v10033_v0, %v10032_v63  ;;  %v15783_v19 = vpack.c.bf16 %v10063_v10, %v10062_v9  ;;  %v10034_v28 = vld [vmem:[%s17501_s12 + $0x220] sm:$0xff]  ;;  %v10035_v36 = vld [vmem:[%s17501_s12 + $0x228] sm:$0xff]  ;;  %v10064_v39 = vld [vmem:[%s17501_s12 + $0x1b0] sm:$0xff] }
 0x2d0   : > { %13246 = vmatpush3.bf16.msk.msra.mxu0 %vm15108_vm3, %v13244_v22  ;;  %13250 = vmatpush3.bf16.msk.msra.mxu1 %vm15108_vm3, %v13244_v22  ;;  %v10065_v46 = vld [vmem:[%s17501_s12 + $0x1b8] sm:$0xff]  ;;  %v15793_v59 = vpack.c.bf16 %v10035_v36, %v10034_v28  ;;  %v10038_v61 = vld [vmem:[%s17501_s12 + $0x70] sm:$0xff]  ;;  %v10044_v63 = vld [vmem:[%s17501_s12 + $0xa0] sm:$0xff]  ;;  %vm5316_vm10 = vcmask 523264   ;;  %vm5467_vm11 = vcmask 1042432  }
 0x2d1   : > { %13251 = vmatprep.subr.bf16.mxu0 %v14810_v17  ;;  %13255 = vmatprep.subr.bf16.mxu1 %v14810_v17  ;;  %v15795_v60 = vpack.c.bf16 %v10065_v46, %v10064_v39  ;;  %v10039_v62 = vld [vmem:[%s17501_s12 + $0x78] sm:$0xff]  ;;  %v10042_v25 = vld [vmem:[%s17501_s12 + $0x90] sm:$0xff]  ;;  %v10045_v0 = vld [vmem:[%s17501_s12 + $0xa8] sm:$0xff] }
 0x2d2   : > { %v15805_v52 = vpack.c.bf16 %v10039_v62, %v10038_v61  ;;  %v10043_v26 = vld [vmem:[%s17501_s12 + $0x98] sm:$0xff]  ;;  %v10072_v43 = vld [vmem:[%s17501_s12 + $0x250] sm:$0xff]  ;;  %v10074_v9 = vld [vmem:[%s17501_s12 + $0x260] sm:$0xff]  ;;  %v15849_v28 = vpack.c.bf16 %v10045_v0, %v10044_v63 }
 0x2d3   : > { %11743 = vmatmul.mubr.msk.f32.vlgmr.msra.gmra.mrb[8].mxu0 %vm2763_vm12, %v2762_v23  ;;  %11750 = vmatmul.mubr.msk.f32.vlgmr.msra.gmra.mrb[8].mxu1 %vm2763_vm12, %v9997_v40  ;;  %v10073_v44 = vld [vmem:[%s17501_s12 + $0x258] sm:$0xff]  ;;  %v15837_v49 = vpack.c.bf16 %v10043_v26, %v10042_v25  ;;  %v10075_v10 = vld [vmem:[%s17501_s12 + $0x268] sm:$0xff]  ;;  %v10046_v39 = vld [vmem:[%s17501_s12 + $0xb0] sm:$0xff] }
 0x2d4   : > { %13254 = vmatpush3.bf16.msk.msra.mxu0 %vm15108_vm3, %v13244_v22  ;;  %13258 = vmatpush3.bf16.msk.msra.mxu1 %vm15108_vm3, %v13244_v22  ;;  %v15839_v50 = vpack.c.bf16 %v10073_v44, %v10072_v43  ;;  %v15851_v36 = vpack.c.bf16 %v10075_v10, %v10074_v9  ;;  %v10047_v46 = vld [vmem:[%s17501_s12 + $0xb8] sm:$0xff]  ;;  %v10076_v61 = vld [vmem:[%s17501_s12 + $0x270] sm:$0xff] }
 0x2d5   : > { %11756 = vmatprep.mubr.msk.f32.mxu0 %vm14811_vm5, %v14812_v18  ;;  %11763 = vmatprep.mubr.msk.f32.mxu1 %vm14811_vm5, %v14812_v18  ;;  %v10077_v62 = vld [vmem:[%s17501_s12 + $0x278] sm:$0xff]  ;;  %v10050_v43 = vld [vmem:[%s17501_s12 + $0xd0] sm:$0xff] }
 0x2d6   : > { %13259 = vmatprep.subr.bf16.mxu0 %v14810_v17  ;;  %13280 = vmatprep.subr.bf16.mxu1 %v14810_v17  ;;  %v10051_v44 = vld [vmem:[%s17501_s12 + $0xd8] sm:$0xff]  ;;  %v10080_v63 = vld [vmem:[%s17501_s12 + $0x290] sm:$0xff] }
 0x2d7   : > { %11757 = vmatmul.mubr.msk.f32.vlgmr.msra.gmra.mrb[10].mxu0 %vm2763_vm12, %v10000_v11  ;;  %11764 = vmatmul.mubr.msk.f32.vlgmr.msra.gmra.mrb[10].mxu1 %vm2763_vm12, %v10003_v12  ;;  %v10056_v11 = vld [vmem:[%s17501_s12 + $0x170] sm:$0xff]  ;;  %v10057_v12 = vld [vmem:[%s17501_s12 + $0x178] sm:$0xff]  ;;  %v15885_v9 = vpack.c.bf16 %v10051_v44, %v10050_v43  ;;  %v10141_v43 = vld [vmem:[%s14967_s24 + $0x128] sm:$0xff] }
 0x2d8   : > { %13261 = vmatpush3.bf16.msra.mxu0 %v15611_v14  ;;  %13282 = vmatpush3.bf16.msra.mxu1 %v15613_v15  ;;  %v15747_v45 = vpack.c.bf16 %v10057_v12, %v10056_v11  ;;  %v10040_v11 = vld [vmem:[%s17501_s12 + $0x80] sm:$0xff]  ;;  %v10041_v12 = vld [vmem:[%s17501_s12 + $0x88] sm:$0xff]  ;;  %v10081_v0 = vld [vmem:[%s17501_s12 + $0x298] sm:$0xff] }
 0x2d9   : > { %13262 = vmatprep.subr.bf16.mxu0 %v14810_v17  ;;  %13283 = vmatprep.subr.bf16.mxu1 %v14810_v17  ;;  %v15821_v48 = vpack.c.bf16 %v10041_v12, %v10040_v11  ;;  %v10048_v11 = vld [vmem:[%s17501_s12 + $0xc0] sm:$0xff]  ;;  %v10049_v12 = vld [vmem:[%s17501_s12 + $0xc8] sm:$0xff]  ;;  %v15887_v10 = vpack.c.bf16 %v10081_v0, %v10080_v63 }
 0x2da   : > { %11794 = vmatprep.mubr.msk.f32.mxu0 %vm14811_vm5, %v14812_v18  ;;  %11825 = vmatprep.mubr.msk.f32.mxu1 %vm14811_vm5, %v14812_v18  ;;  %v15873_v25 = vpack.c.bf16 %v10049_v12, %v10048_v11  ;;  %v10097_v44 = vld [vmem:[%s14962_s25 + $0x6] sm:$0x3]  ;;  %v10094_v63 = vld [vmem:[%s14962_s25 + $0x4] sm:$0x3] }
 0x2dc   : > { %13264 = vmatpush3.bf16.msra.mxu0 %v15629_v35  ;;  %13285 = vmatpush3.bf16.msra.mxu1 %v15631_v42 }
 0x2dd   : > { %13265 = vmatprep.subr.bf16.mxu0 %v14810_v17  ;;  %13286 = vmatprep.subr.bf16.mxu1 %v14810_v17 }
 0x2e0   : > { %13267 = vmatpush3.bf16.msra.mxu0 %v15645_v1  ;;  %13288 = vmatpush3.bf16.msra.mxu1 %v15647_v2 }
 0x2e1   : > { %13268 = vmatprep.subr.bf16.mxu0 %v14810_v17  ;;  %13289 = vmatprep.subr.bf16.mxu1 %v14810_v17 }
 0x2e4   : > { %13270 = vmatpush3.bf16.msra.mxu0 %v15657_v37  ;;  %13291 = vmatpush3.bf16.msra.mxu1 %v15659_v38 }
 0x2e5   : > { %13271 = vmatprep.subr.bf16.mxu0 %v14810_v17  ;;  %13292 = vmatprep.subr.bf16.mxu1 %v14810_v17 }
 0x2e8   : > { %13273 = vmatpush3.bf16.msra.mxu0 %v15669_v55  ;;  %13294 = vmatpush3.bf16.msra.mxu1 %v15671_v56 }
 0x2e9   : > { %13274 = vmatprep.subr.bf16.mxu0 %v14810_v17  ;;  %13295 = vmatprep.subr.bf16.mxu1 %v14810_v17 }
 0x2ec   : > { %13276 = vmatpush3.bf16.msra.mxu0 %v15681_v5  ;;  %13297 = vmatpush3.bf16.msra.mxu1 %v15683_v7 }
 0x2ed   : > { %13277 = vmatprep.subr.bf16.mxu0 %v14810_v17  ;;  %13298 = vmatprep.subr.bf16.mxu1 %v14810_v17 }
 0x2f0   : > { %13279 = vmatpush3.bf16.msra.mxu0 %v15693_v24  ;;  %13300 = vmatpush3.bf16.msra.mxu1 %v15695_v27 }
 0x2f1   : > { %13301 = vmatprep.subr.bf16.mxu0 %v14810_v17  ;;  %13322 = vmatprep.subr.bf16.mxu1 %v14810_v17 }
 0x3a6   : > { %v15715_v13 = vpop.f32.mrb[8].mxu0  ;;  %v15717_v22 = vpop.f32.mrb[8].mxu1 }
 0x3a7   : > { %v11751_v23 = vpop.f32.mrb[9].mxu1  ;;  %11795 = vmatmul.mubr.msk.f32.vlgmr.msra.gmra.mrb[12].mxu0 %vm3094_vm13, %v15717_v22  ;;  %11826 = vmatmul.mubr.msk.f32.vlgmr.msra.gmra.mrb[12].mxu1 %vm3094_vm13, %v15715_v13  ;;  %v11744_v40 = vpop.f32.mrb[9].mxu0 }
 0x3a8   : > { %13303 = vmatpush3.bf16.msra.mxu0 %v15707_v47  ;;  %13324 = vmatpush3.bf16.msra.mxu1 %v15709_v54  ;;  %v10068_v23 = vld [vmem:[%s17501_s12 + $0x230] sm:$0xff]  ;;  %v10069_v40 = vld [vmem:[%s17501_s12 + $0x238] sm:$0xff] }
 0x3a9   : > { %13304 = vmatprep.subr.bf16.mxu0 %v14810_v17  ;;  %13325 = vmatprep.subr.bf16.mxu1 %v14810_v17  ;;  %v15807_v4 = vpack.c.bf16 %v10069_v40, %v10068_v23  ;;  %v15861_v23 = vpack.c.bf16 %v10047_v46, %v10046_v39  ;;  %v15863_v40 = vpack.c.bf16 %v10077_v62, %v10076_v61 }
 0x3aa   : > { %v15735_v20 = vpop.f32.mrb[10].mxu0  ;;  %11856 = vmatprep.mubr.msk.f32.mxu0 %vm14811_vm5, %v14812_v18  ;;  %11887 = vmatprep.mubr.msk.f32.mxu1 %vm14811_vm5, %v14812_v18  ;;  %v15741_v29 = vpop.f32.mrb[10].mxu1 }
 0x3ab   : > { %v11758_v33 = vpop.f32.mrb[11].mxu0  ;;  %v11765_v34 = vpop.f32.mrb[11].mxu1 }
 0x3ac   : > { %13306 = vmatpush3.bf16.msra.mxu0 %v15725_v41  ;;  %13327 = vmatpush3.bf16.msra.mxu1 %v15727_v51  ;;  %v10070_v33 = vld [vmem:[%s17501_s12 + $0x240] sm:$0xff]  ;;  %v10071_v34 = vld [vmem:[%s17501_s12 + $0x248] sm:$0xff] }
 0x3ad   : > { %13307 = vmatprep.subr.bf16.mxu0 %v14810_v17  ;;  %13328 = vmatprep.subr.bf16.mxu1 %v14810_v17  ;;  %v15823_v53 = vpack.c.bf16 %v10071_v34, %v10070_v33  ;;  %v10078_v33 = vld [vmem:[%s17501_s12 + $0x280] sm:$0xff]  ;;  %v10079_v34 = vld [vmem:[%s17501_s12 + $0x288] sm:$0xff]  ;;  %s17315_s12 = scalar_lea.hbm %s15032_s29, %s17303_s6 }
 0x3ae   : > { %v15875_v26 = vpack.c.bf16 %v10079_v34, %v10078_v33  ;;  %v4035_v33 = vld [vmem:[%s14962_s25] sm:$0x3] }
 0x3af   : > { %v10100_v34 = vld [vmem:[%s14967_s24 + $0xc0] sm:$0xff] }
 0x3b0   : > { %13309 = vmatpush3.bf16.msra.mxu0 %v15745_v6  ;;  %13330 = vmatpush3.bf16.msra.mxu1 %v15747_v45 }
 0x3b1   : > { %13310 = vmatprep.subr.bf16.mxu0 %v14810_v17  ;;  %13331 = vmatprep.subr.bf16.mxu1 %v14810_v17 }
 0x3b4   : > { %13312 = vmatpush3.bf16.msra.mxu0 %v15757_v31  ;;  %13333 = vmatpush3.bf16.msra.mxu1 %v15759_v32 }
 0x3b5   : > { %13313 = vmatprep.subr.bf16.mxu0 %v14810_v17  ;;  %13334 = vmatprep.subr.bf16.mxu1 %v14810_v17 }
 0x3b8   : > { %13315 = vmatpush3.bf16.msra.mxu0 %v15769_v57  ;;  %13336 = vmatpush3.bf16.msra.mxu1 %v15771_v58 }
 0x3b9   : > { %13316 = vmatprep.subr.bf16.mxu0 %v14810_v17  ;;  %13337 = vmatprep.subr.bf16.mxu1 %v14810_v17 }
 0x3bc   : > { %13318 = vmatpush3.bf16.msra.mxu0 %v15781_v16  ;;  %13339 = vmatpush3.bf16.msra.mxu1 %v15783_v19 }
 0x3bd   : > { %13319 = vmatprep.subr.bf16.mxu0 %v14810_v17  ;;  %13340 = vmatprep.subr.bf16.mxu1 %v14810_v17 }
 0x3c0   : > { %13321 = vmatpush3.bf16.msra.mxu0 %v15793_v59  ;;  %13342 = vmatpush3.bf16.msra.mxu1 %v15795_v60 }
 0x3c1   : > { %13343 = vmatprep.subr.bf16.mxu0 %v14810_v17  ;;  %13364 = vmatprep.subr.bf16.mxu1 %v14810_v17 }
 0x3c3   : > { %11857 = vmatmul.mubr.msk.f32.vlgmr.msra.gmra.mrb[14].mxu0 %vm3094_vm13, %v15735_v20  ;;  %11888 = vmatmul.mubr.msk.f32.vlgmr.msra.gmra.mrb[14].mxu1 %vm3094_vm13, %v15717_v22 }
 0x3c4   : > { %13345 = vmatpush3.bf16.msra.mxu0 %v15805_v52  ;;  %13366 = vmatpush3.bf16.msra.mxu1 %v15807_v4 }
 0x3c5   : > { %13346 = vmatprep.subr.bf16.mxu0 %v14810_v17  ;;  %13367 = vmatprep.subr.bf16.mxu1 %v14810_v17 }
 0x3c6   : > { %11918 = vmatprep.mubr.msk.f32.mxu0 %vm14811_vm5, %v14812_v18  ;;  %11949 = vmatprep.mubr.msk.f32.mxu1 %vm14811_vm5, %v14812_v18 }
 0x3c8   : > { %13348 = vmatpush3.bf16.msra.mxu0 %v15821_v48  ;;  %13369 = vmatpush3.bf16.msra.mxu1 %v15823_v53 }
 0x3c9   : > { %13349 = vmatprep.subr.bf16.mxu0 %v14810_v17  ;;  %13370 = vmatprep.subr.bf16.mxu1 %v14810_v17 }
 0x3cc   : > { %13351 = vmatpush3.bf16.msra.mxu0 %v15837_v49  ;;  %13372 = vmatpush3.bf16.msra.mxu1 %v15839_v50 }
 0x3cd   : > { %13352 = vmatprep.subr.bf16.mxu0 %v14810_v17  ;;  %13373 = vmatprep.subr.bf16.mxu1 %v14810_v17 }
 0x3d0   : > { %13354 = vmatpush3.bf16.msra.mxu0 %v15849_v28  ;;  %13375 = vmatpush3.bf16.msra.mxu1 %v15851_v36 }
 0x3d1   : > { %13355 = vmatprep.subr.bf16.mxu0 %v14810_v17  ;;  %13376 = vmatprep.subr.bf16.mxu1 %v14810_v17 }
 0x3d4   : > { %13357 = vmatpush3.bf16.msra.mxu0 %v15861_v23  ;;  %13378 = vmatpush3.bf16.msra.mxu1 %v15863_v40 }
 0x3d5   : > { %13358 = vmatprep.subr.bf16.mxu0 %v14810_v17  ;;  %13379 = vmatprep.subr.bf16.mxu1 %v14810_v17 }
 0x3d8   : > { %13360 = vmatpush3.bf16.msra.mxu0 %v15873_v25  ;;  %13381 = vmatpush3.bf16.msra.mxu1 %v15875_v26 }
 0x3d9   : > { %13361 = vmatprep.subr.bf16.mxu0 %v14810_v17  ;;  %13382 = vmatprep.subr.bf16.mxu1 %v14810_v17 }
 0x3dc   : > { %13363 = vmatpush3.bf16.msra.mxu0 %v15885_v9  ;;  %13384 = vmatpush3.bf16.msra.mxu1 %v15887_v10 }
 0x3dd   : > { %13385 = vmatprep.subr.bf16.mxu0 %v14810_v17  ;;  %13406 = vmatprep.subr.bf16.mxu1 %v14810_v17 }
 0x3df   : > { %11919 = vmatmul.mubr.msk.f32.vlgmr.msra.gmra.mrb[16].mxu0 %vm3094_vm13, %v15715_v13  ;;  %11950 = vmatmul.mubr.msk.f32.vlgmr.msra.gmra.mrb[16].mxu1 %vm3094_vm13, %v15735_v20 }
 0x3e0   : > { %13387 = vmatpush3.bf16.msra.mxu0 %v15611_v14  ;;  %13408 = vmatpush3.bf16.msra.mxu1 %v15613_v15 }
 0x3e1   : > { %13388 = vmatprep.subr.bf16.mxu0 %v14810_v17  ;;  %13409 = vmatprep.subr.bf16.mxu1 %v14810_v17 }
 0x3e2   : > { %11980 = vmatprep.mubr.msk.f32.mxu0 %vm14811_vm5, %v14812_v18  ;;  %12011 = vmatprep.mubr.msk.f32.mxu1 %vm14811_vm5, %v14812_v18 }
 0x3e4   : > { %13390 = vmatpush3.bf16.msra.mxu0 %v15629_v35  ;;  %13411 = vmatpush3.bf16.msra.mxu1 %v15631_v42 }
 0x3e5   : > { %13391 = vmatprep.subr.bf16.mxu0 %v14810_v17  ;;  %13412 = vmatprep.subr.bf16.mxu1 %v14810_v17 }
 0x3e8   : > { %13393 = vmatpush3.bf16.msra.mxu0 %v15645_v1  ;;  %13414 = vmatpush3.bf16.msra.mxu1 %v15647_v2 }
 0x3e9   : > { %13394 = vmatprep.subr.bf16.mxu0 %v14810_v17  ;;  %13415 = vmatprep.subr.bf16.mxu1 %v14810_v17 }
 0x3ec   : > { %13396 = vmatpush3.bf16.msra.mxu0 %v15657_v37  ;;  %13417 = vmatpush3.bf16.msra.mxu1 %v15659_v38 }
 0x3ed   : > { %13397 = vmatprep.subr.bf16.mxu0 %v14810_v17  ;;  %13418 = vmatprep.subr.bf16.mxu1 %v14810_v17 }
 0x3f0   : > { %13399 = vmatpush3.bf16.msra.mxu0 %v15669_v55  ;;  %13420 = vmatpush3.bf16.msra.mxu1 %v15671_v56 }
 0x3f1   : > { %13400 = vmatprep.subr.bf16.mxu0 %v14810_v17  ;;  %13421 = vmatprep.subr.bf16.mxu1 %v14810_v17 }
 0x3f4   : > { %13402 = vmatpush3.bf16.msra.mxu0 %v15681_v5  ;;  %13423 = vmatpush3.bf16.msra.mxu1 %v15683_v7  ;;  %v10037_v5 = vld [vmem:[%s17510_s20] ss:$0 sm:$0xff] }
 0x3f5   : > { %13403 = vmatprep.subr.bf16.mxu0 %v14810_v17  ;;  %13424 = vmatprep.subr.bf16.mxu1 %v14810_v17 }
 0x3f8   : > { %13405 = vmatpush3.bf16.msra.mxu0 %v15693_v24  ;;  %13426 = vmatpush3.bf16.msra.mxu1 %v15695_v27 }
 0x3f9   : > { %13427 = vmatprep.subr.bf16.mxu0 %v14810_v17  ;;  %13448 = vmatprep.subr.bf16.mxu1 %v14810_v17 }
 0x3fb   : > { %11981 = vmatmul.mubr.msk.f32.vlgmr.msra.gmra.mrb[18].mxu0 %vm3094_vm13, %v15735_v20  ;;  %12012 = vmatmul.mubr.msk.f32.vlgmr.msra.gmra.mrb[18].mxu1 %vm3094_vm13, %v15717_v22 }
 0x3fc   : > { %13429 = vmatpush3.bf16.msra.mxu0 %v15707_v47  ;;  %13450 = vmatpush3.bf16.msra.mxu1 %v15709_v54 }
 0x3fd   : > { %13430 = vmatprep.subr.bf16.mxu0 %v14810_v17  ;;  %13451 = vmatprep.subr.bf16.mxu1 %v14810_v17 }
 0x3fe   : > { %12042 = vmatprep.mubr.msk.f32.mxu0 %vm14811_vm5, %v14812_v18  ;;  %12073 = vmatprep.mubr.msk.f32.mxu1 %vm14811_vm5, %v14812_v18 }
 0x400   : > { %13432 = vmatpush3.bf16.msra.mxu0 %v15725_v41  ;;  %13453 = vmatpush3.bf16.msra.mxu1 %v15727_v51 }
 0x401   : > { %13433 = vmatprep.subr.bf16.mxu0 %v14810_v17  ;;  %13454 = vmatprep.subr.bf16.mxu1 %v14810_v17 }
 0x404   : > { %13435 = vmatpush3.bf16.msra.mxu0 %v15745_v6  ;;  %13456 = vmatpush3.bf16.msra.mxu1 %v15747_v45 }
 0x405   : > { %13436 = vmatprep.subr.bf16.mxu0 %v14810_v17  ;;  %13457 = vmatprep.subr.bf16.mxu1 %v14810_v17 }
 0x408   : > { %13438 = vmatpush3.bf16.msra.mxu0 %v15757_v31  ;;  %13459 = vmatpush3.bf16.msra.mxu1 %v15759_v32 }
 0x409   : > { %13439 = vmatprep.subr.bf16.mxu0 %v14810_v17  ;;  %13460 = vmatprep.subr.bf16.mxu1 %v14810_v17 }
 0x40c   : > { %13441 = vmatpush3.bf16.msra.mxu0 %v15769_v57  ;;  %13462 = vmatpush3.bf16.msra.mxu1 %v15771_v58 }
 0x40d   : > { %13442 = vmatprep.subr.bf16.mxu0 %v14810_v17  ;;  %13463 = vmatprep.subr.bf16.mxu1 %v14810_v17 }
 0x410   : > { %13444 = vmatpush3.bf16.msra.mxu0 %v15781_v16  ;;  %13465 = vmatpush3.bf16.msra.mxu1 %v15783_v19 }
 0x411   : > { %13445 = vmatprep.subr.bf16.mxu0 %v14810_v17  ;;  %13466 = vmatprep.subr.bf16.mxu1 %v14810_v17 }
 0x414   : > { %13447 = vmatpush3.bf16.msra.mxu0 %v15793_v59  ;;  %13468 = vmatpush3.bf16.msra.mxu1 %v15795_v60 }
 0x415   : > { %13469 = vmatprep.subr.bf16.mxu0 %v14810_v17  ;;  %13490 = vmatprep.subr.bf16.mxu1 %v14810_v17 }
 0x417   : > { %12043 = vmatmul.mubr.msk.f32.vlgmr.msra.gmra.mrb[20].mxu0 %vm3094_vm13, %v15741_v29  ;;  %12074 = vmatmul.mubr.msk.f32.vlgmr.msra.gmra.mrb[20].mxu1 %vm3094_vm13, %v15735_v20 }
 0x418   : > { %13471 = vmatpush3.bf16.msra.mxu0 %v15805_v52  ;;  %13492 = vmatpush3.bf16.msra.mxu1 %v15807_v4 }
 0x419   : > { %13472 = vmatprep.subr.bf16.mxu0 %v14810_v17  ;;  %13493 = vmatprep.subr.bf16.mxu1 %v14810_v17 }
 0x41a   : > { %12104 = vmatprep.mubr.msk.f32.mxu0 %vm14811_vm5, %v14812_v18  ;;  %12135 = vmatprep.mubr.msk.f32.mxu1 %vm14811_vm5, %v14812_v18 }
 0x41c   : > { %13474 = vmatpush3.bf16.msra.mxu0 %v15821_v48  ;;  %13495 = vmatpush3.bf16.msra.mxu1 %v15823_v53 }
 0x41d   : > { %13475 = vmatprep.subr.bf16.mxu0 %v14810_v17  ;;  %13496 = vmatprep.subr.bf16.mxu1 %v14810_v17 }
 0x420   : > { %13477 = vmatpush3.bf16.msra.mxu0 %v15837_v49  ;;  %13498 = vmatpush3.bf16.msra.mxu1 %v15839_v50 }
 0x421   : > { %13478 = vmatprep.subr.bf16.mxu0 %v14810_v17  ;;  %13499 = vmatprep.subr.bf16.mxu1 %v14810_v17 }
 0x424   : > { %13480 = vmatpush3.bf16.msra.mxu0 %v15849_v28  ;;  %13501 = vmatpush3.bf16.msra.mxu1 %v15851_v36 }
 0x425   : > { %13481 = vmatprep.subr.bf16.mxu0 %v14810_v17  ;;  %13502 = vmatprep.subr.bf16.mxu1 %v14810_v17 }
 0x428   : > { %13483 = vmatpush3.bf16.msra.mxu0 %v15861_v23  ;;  %13504 = vmatpush3.bf16.msra.mxu1 %v15863_v40  ;;  %v10091_v40 = vld [vmem:[%s14962_s25 + $0x2] sm:$0x3] }
 0x429   : > { %13484 = vmatprep.subr.bf16.mxu0 %v14810_v17  ;;  %13505 = vmatprep.subr.bf16.mxu1 %v14810_v17 }
 0x42c   : > { %13486 = vmatpush3.bf16.msra.mxu0 %v15873_v25  ;;  %13507 = vmatpush3.bf16.msra.mxu1 %v15875_v26  ;;  %v10101_v25 = vld [vmem:[%s14967_s24 + $0xc8] sm:$0xff]  ;;  %v10140_v26 = vld [vmem:[%s14967_s24 + $0x120] sm:$0xff] }
 0x42d   : > { %13487 = vmatprep.subr.bf16.mxu0 %v14810_v17  ;;  %13508 = vmatprep.subr.bf16.mxu1 %v14810_v17  ;;  %v16031_v0 = vpack.c.bf16 %v10101_v25, %v10100_v34  ;;  %v10159_v34 = vld [vmem:[%s14967_s24 + $0x208] sm:$0xff] }
 0x430   : > { %13489 = vmatpush3.bf16.msra.mxu0 %v15885_v9  ;;  %13510 = vmatpush3.bf16.msra.mxu1 %v15887_v10  ;;  %v16033_v9 = vpack.c.bf16 %v10141_v43, %v10140_v26  ;;  %v10102_v10 = vld [vmem:[%s14967_s24 + $0xd0] sm:$0xff] }
 0x431   : > { %12138 = vmatprep.subr.mxu0 %v14812_v18  ;;  %12143 = vmatprep.subr.mxu1 %v14812_v18 }
 0x433   : > { %12105 = vmatmul.mubr.msk.f32.vlgmr.msra.gmra.mrb[22].mxu0 %vm3094_vm13, %v15717_v22  ;;  %12136 = vmatmul.mubr.msk.f32.vlgmr.msra.gmra.mrb[22].mxu1 %vm3094_vm13, %v15741_v29 }
 0x434   : > { %12145 = vmatprep.mubr.msk.f32.mxu1 %vm14811_vm5, %v14812_v18  ;;  %12140 = vmatprep.mubr.msk.f32.mxu0 %vm14811_vm5, %v14812_v18 }
 0x47a   : > { %v3164_v14 = vpop.f32.mrb[12].mxu0  ;;  %v3237_v15 = vpop.f32.mrb[12].mxu1 }
 0x47b   : > { %v3238_v35 = vadd.f32 %v3237_v15, %v3164_v14  ;;  %v11796_v42 = vpop.f32.mrb[13].mxu0  ;;  %v11827_v1 = vpop.f32.mrb[13].mxu1  ;;  %v10103_v14 = vld [vmem:[%s14967_s24 + $0xd8] sm:$0xff]  ;;  %v10142_v15 = vld [vmem:[%s14967_s24 + $0x130] sm:$0xff] }
 0x47c   : > { %v16049_v42 = vpack.c.bf16 %v10103_v14, %v10102_v10  ;;  %v4344_v10 = vld [vmem:[%s14967_s24 + $0x30] sm:$0xff] }
 0x496   : > { %v3325_v2 = vpop.f32.mrb[14].mxu0  ;;  %v3434_v37 = vpop.f32.mrb[14].mxu1 }
 0x497   : > { %v3329_v38 = vadd.f32 %v3325_v2, %v3238_v35  ;;  %v11858_v55 = vpop.f32.mrb[15].mxu0  ;;  %v11889_v56 = vpop.f32.mrb[15].mxu1  ;;  %v10143_v35 = vld [vmem:[%s14967_s24 + $0x138] sm:$0xff]  ;;  %v10104_v2 = vld [vmem:[%s14967_s24 + $0xe0] sm:$0xff] }
 0x498   : > { %v16051_v1 = vpack.c.bf16 %v10143_v35, %v10142_v15  ;;  %v10145_v55 = vld [vmem:[%s14967_s24 + $0x148] sm:$0xff]  ;;  %v4345_v15 = vld [vmem:[%s14967_s24 + $0x38] sm:$0xff]  ;;  %v10160_v35 = vld [vmem:[%s14967_s24 + $0x210] sm:$0xff] }
 0x499   : > { %v3336_v13 = vadd.f32 %v10037_v5, %v3329_v38  ;;  %v10144_v38 = vld [vmem:[%s14967_s24 + $0x140] sm:$0xff] }
 0x49b   : > { %v3337_v51 = vmax.f32 %v3336_v13, 0.0 }
 0x4b2   : > { %v3504_v7 = vpop.f32.mrb[16].mxu0  ;;  %v3589_v24 = vpop.f32.mrb[16].mxu1 }
 0x4b3   : > { %v3505_v27 = vadd.f32 %v3504_v7, %v3434_v37  ;;  %v11920_v47 = vpop.f32.mrb[17].mxu0  ;;  %v11951_v54 = vpop.f32.mrb[17].mxu1  ;;  %v10105_v37 = vld [vmem:[%s14967_s24 + $0xe8] sm:$0xff]  ;;  %v10106_v7 = vld [vmem:[%s14967_s24 + $0xf0] sm:$0xff] }
 0x4b4   : > { %v16065_v56 = vpack.c.bf16 %v10105_v37, %v10104_v2  ;;  %v10147_v47 = vld [vmem:[%s14967_s24 + $0x158] sm:$0xff]  ;;  %v13539_v37 = vpack.c.bf16 %v4345_v15, %v4344_v10  ;;  %v10129_v10 = vld [vmem:[%s14967_s24 + $0x68] sm:$0xff]  ;;  %v10130_v15 = vld [vmem:[%s14967_s24 + $0x70] sm:$0xff] }
 0x4b5   : > { %v3593_v22 = vadd.f32 %v3589_v24, %v3505_v27  ;;  %v10107_v24 = vld [vmem:[%s14967_s24 + $0xf8] sm:$0xff]  ;;  %v10146_v27 = vld [vmem:[%s14967_s24 + $0x150] sm:$0xff] }
 0x4b6   : > { %v16077_v54 = vpack.c.bf16 %v10107_v24, %v10106_v7  ;;  %v16079_v13 = vpack.c.bf16 %v10147_v47, %v10146_v27  ;;  %v10161_v2 = vld [vmem:[%s14967_s24 + $0x218] sm:$0xff]  ;;  %v4347_v7 = vld [vmem:[%s14967_s24 + $0x48] sm:$0xff]  ;;  %v10162_v24 = vld [vmem:[%s14967_s24 + $0x220] sm:$0xff] }
 0x4b7   : > { %v3594_v41 = vadd.f32 %v10037_v5, %v3593_v22  ;;  %v10108_v22 = vld [vmem:[%s14967_s24 + $0x100] sm:$0xff]  ;;  %v10163_v27 = vld [vmem:[%s14967_s24 + $0x228] sm:$0xff] }
 0x4b9   : > { %v3595_v20 = vmax.f32 %v3594_v41, 0.0  ;;  %v10109_v41 = vld [vmem:[%s14967_s24 + $0x108] sm:$0xff] }
 0x4bb   : > { %vm3596_vm14 = vcmp.gt.f32.partialorder %v3595_v20, %v3337_v51 }
 0x4bc   : > { %v3597_v29 = vsel %vm3596_vm14, %v3595_v20, %v3337_v51  ;;  %v3598_v48 = vsel %vm3596_vm14, 1, %v14813_v30  ;;  %v10148_v51 = vld [vmem:[%s14967_s24 + $0x160] sm:$0xff]  ;;  %v10149_v20 = vld [vmem:[%s14967_s24 + $0x168] sm:$0xff] }
 0x4ce   : > { %v3665_v6 = vpop.f32.mrb[18].mxu0  ;;  %v3735_v45 = vpop.f32.mrb[18].mxu1 }
 0x4cf   : > { %v3736_v31 = vadd.f32 %v3735_v45, %v3665_v6  ;;  %v11982_v32 = vpop.f32.mrb[19].mxu0  ;;  %v12013_v57 = vpop.f32.mrb[19].mxu1  ;;  %v16091_v6 = vpack.c.bf16 %v10149_v20, %v10148_v51  ;;  %v10110_v45 = vld [vmem:[%s14967_s24 + $0x110] sm:$0xff]  ;;  %v4349_v51 = vld [vmem:[%s14967_s24 + $0x58] sm:$0xff] }
 0x4d0   : > { %v10150_v32 = vld [vmem:[%s14967_s24 + $0x170] sm:$0xff]  ;;  %v10151_v57 = vld [vmem:[%s14967_s24 + $0x178] sm:$0xff] }
 0x4d1   : > { %v10164_v20 = vld [vmem:[%s14967_s24 + $0x230] sm:$0xff] }
 0x4ea   : > { %v3808_v58 = vpop.f32.mrb[20].mxu0  ;;  %v3884_v16 = vpop.f32.mrb[20].mxu1 }
 0x4eb   : > { %v3812_v19 = vadd.f32 %v3808_v58, %v3736_v31  ;;  %v12044_v59 = vpop.f32.mrb[21].mxu0  ;;  %v12075_v60 = vpop.f32.mrb[21].mxu1  ;;  %v10111_v31 = vld [vmem:[%s14967_s24 + $0x118] sm:$0xff] }
 0x4ec   : > { %v16101_v58 = vpack.c.bf16 %v10111_v31, %v10110_v45  ;;  %v4339_v59 = vld [vmem:[%s14967_s24 + $0x8] sm:$0xff]  ;;  %v10154_v60 = vld [vmem:[%s14967_s24 + $0x1e0] sm:$0xff]  ;;  %v10165_v45 = vld [vmem:[%s14967_s24 + $0x238] sm:$0xff] }
 0x4ed   : > { %v3813_v52 = vadd.f32 %v10037_v5, %v3812_v19  ;;  %v4338_v19 = vld [vmem:[%s14967_s24] sm:$0xff] }
 0x4ef   : > { %v3814_v4 = vmax.f32 %v3813_v52, 0.0  ;;  %v10155_v52 = vld [vmem:[%s14967_s24 + $0x1e8] sm:$0xff] }
 0x4f1   : > { %vm3815_vm15 = vcmp.gt.f32.partialorder %v3814_v4, %v3597_v29 }
 0x4f2   : > { %v3817_v53 = vsel %vm3815_vm15, 2, %v3598_v48  ;;  %v3816_v49 = vsel %vm3815_vm15, %v3814_v4, %v3597_v29  ;;  %v16089_v29 = vpack.c.bf16 %v10109_v41, %v10108_v22  ;;  %v16115_v4 = vpack.c.bf16 %v4339_v59, %v4338_v19  ;;  %v4348_v41 = vld [vmem:[%s14967_s24 + $0x50] sm:$0xff]  ;;  %v10115_v19 = vld [vmem:[%s14967_s24 + $0x188] sm:$0xff]  ;;  %vm16407_vm15 = vmpackc.low %vm5467_vm11, %vm14809_vm2 }
 0x4f3   : > { %v16117_v48 = vpack.c.bf16 %v10155_v52, %v10154_v60  ;;  %v16171_v22 = vpack.c.bf16 %v10163_v27, %v10162_v24  ;;  %v13545_v31 = vpack.c.bf16 %v4349_v51, %v4348_v41  ;;  %v10116_v60 = vld [vmem:[%s14967_s24 + $0x190] sm:$0xff]  ;;  %v10117_v52 = vld [vmem:[%s14967_s24 + $0x198] sm:$0xff]  ;;  %vm9613_vm11 = vcmask 253952  }
 0x4f4   : > { %v10135_v24 = vld [vmem:[%s14967_s24 + $0x98] sm:$0xff]  ;;  %v10138_v51 = vld [vmem:[%s14967_s24 + $0xb0] sm:$0xff] }
 0x506   : > { %v3954_v50 = vpop.f32.mrb[22].mxu0  ;;  %v4024_v28 = vpop.f32.mrb[22].mxu1 }
 0x507   : > { %v3955_v36 = vadd.f32 %v3954_v50, %v3884_v16  ;;  %v12106_v39 = vpop.f32.mrb[23].mxu0  ;;  %v12137_v46 = vpop.f32.mrb[23].mxu1  ;;  %v16103_v16 = vpack.c.bf16 %v10151_v57, %v10150_v32  ;;  %v10156_v50 = vld [vmem:[%s14967_s24 + $0x1f0] sm:$0xff]  ;;  %v16180_v32 = vpack.c.bf16 %v10165_v45, %v10164_v20  ;;  %v10114_v57 = vld [vmem:[%s14967_s24 + $0x180] sm:$0xff] }
 0x508   : > { %v16187_v59 = vpack.c.bf16 %v10115_v19, %v10114_v57  ;;  %v5303_v19 = vld [vmem:[%s17499_s14 + $0x30] sm:$0xff] }
 0x509   : > { %v4028_v61 = vadd.f32 %v4024_v28, %v3955_v36  ;;  %v10157_v28 = vld [vmem:[%s14967_s24 + $0x1f8] sm:$0xff] }
 0x50b   : > { %v4029_v62 = vadd.f32 %v10037_v5, %v4028_v61  ;;  %v16067_v5 = vpack.c.bf16 %v10145_v55, %v10144_v38  ;;  %v16162_v38 = vpack.c.bf16 %v10161_v2, %v10160_v35  ;;  %v4346_v55 = vld [vmem:[%s14967_s24 + $0x40] sm:$0xff]  ;;  %v10131_v35 = vld [vmem:[%s14967_s24 + $0x78] sm:$0xff] }
 0x50c   : > { %v13542_v47 = vpack.c.bf16 %v4347_v7, %v4346_v55  ;;  %v16251_v2 = vpack.c.bf16 %v10131_v35, %v10130_v15  ;;  %v10133_v55 = vld [vmem:[%s14967_s24 + $0x88] sm:$0xff]  ;;  %v10134_v7 = vld [vmem:[%s14967_s24 + $0x90] sm:$0xff] }
 0x50d   : > { %v4030_v23 = vmax.f32 %v4029_v62, 0.0  ;;  %v16135_v62 = vpack.c.bf16 %v10157_v28, %v10156_v50  ;;  %v10119_v50 = vld [vmem:[%s14967_s24 + $0x1a8] sm:$0xff]  ;;  %v10120_v28 = vld [vmem:[%s14967_s24 + $0x1b0] sm:$0xff]  ;;  %v16271_v27 = vpack.c.bf16 %v10135_v24, %v10134_v7 }
 0x50f   : > { %vm4031_vm0 = vcmp.gt.f32.partialorder %v4030_v23, %v3816_v49 }
 0x510   : > { %v16014_v11 = vsel %vm4031_vm0, 3, %v3817_v53  ;;  %v4032_v12 = vsel %vm4031_vm0, %v4030_v23, %v3816_v49  ;;  %v4340_v53 = vld [vmem:[%s14967_s24 + $0x10] sm:$0xff]  ;;  %v4341_v49 = vld [vmem:[%s14967_s24 + $0x18] sm:$0xff]  ;;  %v4342_v23 = vld [vmem:[%s14967_s24 + $0x20] sm:$0xff]  ;;  %vm5463_vm0 = vcmask 89088  }
 0x511   : > { %12139 = vmatpush3.msk.msra.mxu0 %vm1362_vm1, %v4032_v12  ;;  %12144 = vmatpush3.msk.msra.mxu1 %vm1362_vm1, %v4032_v12  ;;  %v16133_v61 = vpack.c.bf16 %v4341_v49, %v4340_v53  ;;  %v16199_v53 = vpack.c.bf16 %v10117_v52, %v10116_v60  ;;  %v10118_v49 = vld [vmem:[%s14967_s24 + $0x1a0] sm:$0xff]  ;;  %v10179_v52 = vld [vmem:[%s17499_s14 + $0x70] sm:$0xff] }
 0x512   : > { %12146 = vmatmul.mubr.msk.f32.vlgmr.msra.gmra.mrb[24].mxu1 %vm4036_vm6, %v10091_v40  ;;  %12148 = vmatprep.subr.mxu0 %v14812_v18 }
 0x513   : > { %12153 = vmatprep.subr.mxu1 %v14812_v18  ;;  %12141 = vmatmul.mubr.msk.f32.vlgmr.msra.gmra.mrb[24].mxu0 %vm4036_vm6, %v4035_v33  ;;  %v10158_v33 = vld [vmem:[%s14967_s24 + $0x200] sm:$0xff] }
 0x514   : > { %12149 = vmatpush3.msk.msra.mxu0 %vm1362_vm1, %v4032_v12  ;;  %12154 = vmatpush3.msk.msra.mxu1 %vm1362_vm1, %v4032_v12  ;;  %v4343_v12 = vld [vmem:[%s14967_s24 + $0x28] sm:$0xff] }
 0x515   : > { %12150 = vmatprep.mubr.msk.f32.mxu0 %vm14811_vm5, %v14812_v18  ;;  %12155 = vmatprep.mubr.msk.f32.mxu1 %vm14811_vm5, %v14812_v18 }
 0x516   : > { %12156 = vmatmul.mubr.msk.f32.vlgmr.msra.gmra.mrb[26].mxu1 %vm4036_vm6, %v10097_v44  ;;  %13511 = vmatprep.subr.bf16.mxu0 %v14810_v17  ;;  %v13536_v44 = vpack.c.bf16 %v4343_v12, %v4342_v23 }
 0x517   : > { %12151 = vmatmul.mubr.msk.f32.vlgmr.msra.gmra.mrb[26].mxu0 %vm4036_vm6, %v10094_v63  ;;  %13565 = vmatprep.subr.bf16.mxu1 %v14810_v17  ;;  %v16153_v63 = vpack.c.bf16 %v10159_v34, %v10158_v33  ;;  %v10124_v33 = vld [vmem:[%s14967_s24 + $0x1d0] sm:$0xff]  ;;  %v10125_v34 = vld [vmem:[%s14967_s24 + $0x1d8] sm:$0xff] }
 0x518   : > { %13513 = vmatpush3.bf16.msra.mxu0 %v16031_v0  ;;  %13567 = vmatpush3.bf16.msra.mxu1 %v16033_v9 }
 0x519   : > { %13514 = vmatprep.subr.bf16.mxu0 %v14810_v17  ;;  %13568 = vmatprep.subr.bf16.mxu1 %v14810_v17 }
 0x51a   : > { %12182 = vmatprep.mubr.msk.f32.mxu0 %vm14811_vm5, %v14812_v18  ;;  %12263 = vmatprep.mubr.msk.f32.mxu1 %vm14811_vm5, %v14812_v18 }
 0x51c   : > { %13516 = vmatpush3.bf16.msra.mxu0 %v16049_v42  ;;  %13570 = vmatpush3.bf16.msra.mxu1 %v16051_v1 }
 0x51d   : > { %13517 = vmatprep.subr.bf16.mxu0 %v14810_v17  ;;  %13571 = vmatprep.subr.bf16.mxu1 %v14810_v17 }
 0x520   : > { %13519 = vmatpush3.bf16.msra.mxu0 %v16065_v56  ;;  %13573 = vmatpush3.bf16.msra.mxu1 %v16067_v5 }
 0x521   : > { %13520 = vmatprep.subr.bf16.mxu0 %v14810_v17  ;;  %13574 = vmatprep.subr.bf16.mxu1 %v14810_v17 }
 0x524   : > { %13522 = vmatpush3.bf16.msra.mxu0 %v16077_v54  ;;  %13576 = vmatpush3.bf16.msra.mxu1 %v16079_v13 }
 0x525   : > { %13523 = vmatprep.subr.bf16.mxu0 %v14810_v17  ;;  %13577 = vmatprep.subr.bf16.mxu1 %v14810_v17 }
 0x528   : > { %13525 = vmatpush3.bf16.msra.mxu0 %v16089_v29  ;;  %13579 = vmatpush3.bf16.msra.mxu1 %v16091_v6 }
 0x529   : > { %13526 = vmatprep.subr.bf16.mxu0 %v14810_v17  ;;  %13580 = vmatprep.subr.bf16.mxu1 %v14810_v17 }
 0x52c   : > { %13528 = vmatpush3.bf16.msra.mxu0 %v16101_v58  ;;  %13582 = vmatpush3.bf16.msra.mxu1 %v16103_v16 }
 0x52d   : > { %13529 = vmatprep.subr.bf16.mxu0 %v14810_v17  ;;  %13601 = vmatprep.subr.bf16.mxu1 %v14810_v17 }
 0x5e5   : > { %v16123_v36 = vpop.f32.mrb[24].mxu1 }
 0x5e6   : > { %v12147_v39 = vpop.f32.mrb[25].mxu1  ;;  %12183 = vmatmul.mubr.msk.f32.vlgmr.msra.gmra.mrb[28].mxu0 %vm4363_vm7, %v16123_v36  ;;  %12264 = vmatmul.mubr.msk.f32.vlgmr.msra.gmra.mrb[28].mxu1 %vm4363_vm7, %v16123_v36  ;;  %v16129_v46 = vpop.f32.mrb[24].mxu0 }
 0x5e7   : > { %13531 = vmatpush3.bf16.msra.mxu0 %v16115_v4  ;;  %13603 = vmatpush3.bf16.msra.mxu1 %v16117_v48  ;;  %v12142_v40 = vpop.f32.mrb[25].mxu0  ;;  %v10121_v39 = vld [vmem:[%s14967_s24 + $0x1b8] sm:$0xff] }
 0x5e8   : > { %13532 = vmatprep.subr.bf16.mxu0 %v14810_v17  ;;  %13604 = vmatprep.subr.bf16.mxu1 %v14810_v17  ;;  %v16218_v23 = vpack.c.bf16 %v10121_v39, %v10120_v28  ;;  %v10123_v40 = vld [vmem:[%s14967_s24 + $0x1c8] sm:$0xff] }
 0x5e9   : > { %12209 = vmatprep.mubr.msk.f32.mxu0 %vm14811_vm5, %v14812_v18  ;;  %12317 = vmatprep.mubr.msk.f32.mxu1 %vm14811_vm5, %v14812_v18  ;;  %v16147_v25 = vpop.f32.mrb[26].mxu1 }
 0x5ea   : > { %v16149_v26 = vpop.f32.mrb[26].mxu0  ;;  %v12157_v43 = vpop.f32.mrb[27].mxu1 }
 0x5eb   : > { %13534 = vmatpush3.bf16.msra.mxu0 %v16133_v61  ;;  %13606 = vmatpush3.bf16.msra.mxu1 %v16135_v62  ;;  %v12152_v14 = vpop.f32.mrb[27].mxu0  ;;  %v16232_v43 = vpack.c.bf16 %v10125_v34, %v10124_v33 }
 0x5ec   : > { %13535 = vmatprep.subr.bf16.mxu0 %v14810_v17  ;;  %13607 = vmatprep.subr.bf16.mxu1 %v14810_v17 }
 0x5ef   : > { %13537 = vmatpush3.bf16.msra.mxu0 %v13536_v44  ;;  %13609 = vmatpush3.bf16.msra.mxu1 %v16153_v63 }
 0x5f0   : > { %13538 = vmatprep.subr.bf16.mxu0 %v14810_v17  ;;  %13610 = vmatprep.subr.bf16.mxu1 %v14810_v17 }
 0x5f3   : > { %13540 = vmatpush3.bf16.msra.mxu0 %v13539_v37  ;;  %13612 = vmatpush3.bf16.msra.mxu1 %v16162_v38 }
 0x5f4   : > { %13541 = vmatprep.subr.bf16.mxu0 %v14810_v17  ;;  %13613 = vmatprep.subr.bf16.mxu1 %v14810_v17 }
 0x5f7   : > { %13543 = vmatpush3.bf16.msra.mxu0 %v13542_v47  ;;  %13615 = vmatpush3.bf16.msra.mxu1 %v16171_v22 }
 0x5f8   : > { %13544 = vmatprep.subr.bf16.mxu0 %v14810_v17  ;;  %13616 = vmatprep.subr.bf16.mxu1 %v14810_v17 }
 0x5fb   : > { %13546 = vmatpush3.bf16.msra.mxu0 %v13545_v31  ;;  %13618 = vmatpush3.bf16.msra.mxu1 %v16180_v32 }
 0x5fc   : > { %13547 = vmatprep.subr.bf16.mxu0 %v14810_v17  ;;  %13637 = vmatprep.subr.bf16.mxu1 %v14810_v17 }
 0x5fe   : > { %12210 = vmatmul.mubr.msk.f32.vlgmr.msra.gmra.mrb[30].mxu0 %vm4363_vm7, %v16129_v46  ;;  %12318 = vmatmul.mubr.msk.f32.vlgmr.msra.gmra.mrb[30].mxu1 %vm4363_vm7, %v16149_v26 }
 0x5ff   : > { %13549 = vmatpush3.bf16.msra.mxu0 %v16187_v59  ;;  %13639 = vmatpush3.bf16.msra.mxu1 %v16115_v4  ;;  %v16211_v4 = vpack.c.bf16 %v10119_v50, %v10118_v49 }
 0x600   : > { %13550 = vmatprep.subr.bf16.mxu0 %v14810_v17  ;;  %13640 = vmatprep.subr.bf16.mxu1 %v14810_v17 }
 0x601   : > { %12236 = vmatprep.mubr.msk.f32.mxu0 %vm14811_vm5, %v14812_v18  ;;  %12371 = vmatprep.mubr.msk.f32.mxu1 %vm14811_vm5, %v14812_v18 }
 0x603   : > { %13552 = vmatpush3.bf16.msra.mxu0 %v16199_v53  ;;  %13642 = vmatpush3.bf16.msra.mxu1 %v16133_v61  ;;  %v10122_v61 = vld [vmem:[%s14967_s24 + $0x1c0] sm:$0xff] }
 0x604   : > { %13553 = vmatprep.subr.bf16.mxu0 %v14810_v17  ;;  %13643 = vmatprep.subr.bf16.mxu1 %v14810_v17  ;;  %v16225_v12 = vpack.c.bf16 %v10123_v40, %v10122_v61 }
 0x607   : > { %13555 = vmatpush3.bf16.msra.mxu0 %v16211_v4  ;;  %13645 = vmatpush3.bf16.msra.mxu1 %v13536_v44  ;;  %v10128_v44 = vld [vmem:[%s14967_s24 + $0x60] sm:$0xff] }
 0x608   : > { %13556 = vmatprep.subr.bf16.mxu0 %v14810_v17  ;;  %13646 = vmatprep.subr.bf16.mxu1 %v14810_v17  ;;  %v16239_v14 = vpack.c.bf16 %v10129_v10, %v10128_v44 }
 0x60b   : > { %13558 = vmatpush3.bf16.msra.mxu0 %v16218_v23  ;;  %13648 = vmatpush3.bf16.msra.mxu1 %v13539_v37  ;;  %v10132_v37 = vld [vmem:[%s14967_s24 + $0x80] sm:$0xff] }
 0x60c   : > { %13559 = vmatprep.subr.bf16.mxu0 %v14810_v17  ;;  %13649 = vmatprep.subr.bf16.mxu1 %v14810_v17 }
 0x60f   : > { %13561 = vmatpush3.bf16.msra.mxu0 %v16225_v12  ;;  %13651 = vmatpush3.bf16.msra.mxu1 %v13542_v47  ;;  %v10137_v47 = vld [vmem:[%s14967_s24 + $0xa8] sm:$0xff] }
 0x610   : > { %13562 = vmatprep.subr.bf16.mxu0 %v14810_v17  ;;  %13652 = vmatprep.subr.bf16.mxu1 %v14810_v17 }
 0x613   : > { %13564 = vmatpush3.bf16.msra.mxu0 %v16232_v43  ;;  %13654 = vmatpush3.bf16.msra.mxu1 %v13545_v31  ;;  %v10177_v31 = vld [vmem:[%s17499_s14 + $0x60] sm:$0xff] }
 0x614   : > { %13583 = vmatprep.subr.bf16.mxu0 %v14810_v17  ;;  %13673 = vmatprep.subr.bf16.mxu1 %v14810_v17 }
 0x616   : > { %12237 = vmatmul.mubr.msk.f32.vlgmr.msra.gmra.mrb[32].mxu0 %vm4363_vm7, %v16149_v26  ;;  %12372 = vmatmul.mubr.msk.f32.vlgmr.msra.gmra.mrb[32].mxu1 %vm4363_vm7, %v16123_v36 }
 0x617   : > { %13585 = vmatpush3.bf16.msra.mxu0 %v16239_v14  ;;  %13675 = vmatpush3.bf16.msra.mxu1 %v16033_v9  ;;  %v16263_v9 = vpack.c.bf16 %v10133_v55, %v10132_v37 }
 0x618   : > { %13586 = vmatprep.subr.bf16.mxu0 %v14810_v17  ;;  %13676 = vmatprep.subr.bf16.mxu1 %v14810_v17 }
 0x619   : > { %12290 = vmatprep.mubr.msk.f32.mxu0 %vm14811_vm5, %v14812_v18  ;;  %12425 = vmatprep.mubr.msk.f32.mxu1 %vm14811_vm5, %v14812_v18 }
 0x61b   : > { %13588 = vmatpush3.bf16.msra.mxu0 %v16251_v2  ;;  %13678 = vmatpush3.bf16.msra.mxu1 %v16051_v1  ;;  %v10136_v1 = vld [vmem:[%s14967_s24 + $0xa0] sm:$0xff] }
 0x61c   : > { %13589 = vmatprep.subr.bf16.mxu0 %v14810_v17  ;;  %13679 = vmatprep.subr.bf16.mxu1 %v14810_v17  ;;  %v16279_v41 = vpack.c.bf16 %v10137_v47, %v10136_v1 }
 0x61f   : > { %13591 = vmatpush3.bf16.msra.mxu0 %v16263_v9  ;;  %13681 = vmatpush3.bf16.msra.mxu1 %v16067_v5  ;;  %v10139_v5 = vld [vmem:[%s14967_s24 + $0xb8] sm:$0xff] }
 0x620   : > { %13592 = vmatprep.subr.bf16.mxu0 %v14810_v17  ;;  %13682 = vmatprep.subr.bf16.mxu1 %v14810_v17  ;;  %v13599_v20 = vpack.c.bf16 %v10139_v5, %v10138_v51 }
 0x623   : > { %13594 = vmatpush3.bf16.msra.mxu0 %v16271_v27  ;;  %13684 = vmatpush3.bf16.msra.mxu1 %v16079_v13  ;;  %v10173_v13 = vld [vmem:[%s17499_s14 + $0x40] sm:$0xff] }
 0x624   : > { %13595 = vmatprep.subr.bf16.mxu0 %v14810_v17  ;;  %13685 = vmatprep.subr.bf16.mxu1 %v14810_v17 }
 0x627   : > { %13597 = vmatpush3.bf16.msra.mxu0 %v16279_v41  ;;  %13687 = vmatpush3.bf16.msra.mxu1 %v16091_v6 }
 0x628   : > { %13598 = vmatprep.subr.bf16.mxu0 %v14810_v17  ;;  %13688 = vmatprep.subr.bf16.mxu1 %v14810_v17 }
 0x62b   : > { %13600 = vmatpush3.bf16.msra.mxu0 %v13599_v20  ;;  %13690 = vmatpush3.bf16.msra.mxu1 %v16103_v16  ;;  %v10174_v16 = vld [vmem:[%s17499_s14 + $0x48] sm:$0xff] }
 0x62c   : > { %13619 = vmatprep.subr.bf16.mxu0 %v14810_v17  ;;  %13709 = vmatprep.subr.bf16.mxu1 %v14810_v17 }
 0x62e   : > { %12291 = vmatmul.mubr.msk.f32.vlgmr.msra.gmra.mrb[34].mxu0 %vm4363_vm7, %v16129_v46  ;;  %12426 = vmatmul.mubr.msk.f32.vlgmr.msra.gmra.mrb[34].mxu1 %vm4363_vm7, %v16149_v26  ;;  %v5300_v46 = vld [vmem:[%s17499_s14 + $0x18] sm:$0xff] }
 0x62f   : > { %13621 = vmatpush3.bf16.msra.mxu0 %v16031_v0  ;;  %12344 = vmatprep.mubr.msk.f32.mxu0 %vm14811_vm5, %v14812_v18 }
 0x630   : > { %13622 = vmatprep.subr.bf16.mxu0 %v14810_v17  ;;  %13711 = vmatpush3.bf16.msra.mxu1 %v16117_v48  ;;  %v13728_v48 = vpack.c.bf16 %v10174_v16, %v10173_v13  ;;  %v5644_v13 = vlaneseq }
 0x631   : > { %13712 = vmatprep.subr.bf16.mxu1 %v14810_v17  ;;  %12479 = vmatprep.mubr.msk.f32.mxu1 %vm14811_vm5, %v14812_v18 }
 0x633   : > { %13624 = vmatpush3.bf16.msra.mxu0 %v16049_v42 }
 0x634   : > { %13625 = vmatprep.subr.bf16.mxu0 %v14810_v17  ;;  %13714 = vmatpush3.bf16.msra.mxu1 %v16135_v62 }
 0x635   : > { %13715 = vmatprep.subr.bf16.mxu1 %v14810_v17 }
 0x637   : > { %13627 = vmatpush3.bf16.msra.mxu0 %v16065_v56  ;;  %v5297_v56 = vld [vmem:[%s17499_s14] sm:$0xff] }
 0x638   : > { %13628 = vmatprep.subr.bf16.mxu0 %v14810_v17  ;;  %13717 = vmatpush3.bf16.msra.mxu1 %v16153_v63 }
 0x639   : > { %13718 = vmatprep.subr.bf16.mxu1 %v14810_v17 }
 0x63b   : > { %13630 = vmatpush3.bf16.msra.mxu0 %v16077_v54  ;;  %v5298_v54 = vld [vmem:[%s17499_s14 + $0x8] sm:$0xff] }
 0x63c   : > { %13631 = vmatprep.subr.bf16.mxu0 %v14810_v17  ;;  %13720 = vmatpush3.bf16.msra.mxu1 %v16162_v38  ;;  %v5301_v38 = vld [vmem:[%s17499_s14 + $0x20] sm:$0xff] }
 0x63d   : > { %13721 = vmatprep.subr.bf16.mxu1 %v14810_v17 }
 0x63f   : > { %13633 = vmatpush3.bf16.msra.mxu0 %v16089_v29 }
 0x640   : > { %13634 = vmatprep.subr.bf16.mxu0 %v14810_v17  ;;  %13723 = vmatpush3.bf16.msra.mxu1 %v16171_v22  ;;  %v5302_v22 = vld [vmem:[%s17499_s14 + $0x28] sm:$0xff] }
 0x641   : > { %13724 = vmatprep.subr.bf16.mxu1 %v14810_v17  ;;  %v13746_v45 = vpack.c.bf16 %v5302_v22, %v5301_v38  ;;  %v5547_v22 = vld [vmem:[%s17500_s13 + $0x10] sm:$0xff] }
 0x643   : > { %13636 = vmatpush3.bf16.msra.mxu0 %v16101_v58  ;;  %v13740_v58 = vpack.c.bf16 %v5298_v54, %v5297_v56 }
 0x644   : > { %13655 = vmatprep.subr.bf16.mxu0 %v14810_v17  ;;  %13726 = vmatpush3.bf16.msra.mxu1 %v16180_v32  ;;  %v10178_v32 = vld [vmem:[%s17499_s14 + $0x68] sm:$0xff] }
 0x645   : > { %13739 = vmatprep.subr.bf16.mxu1 %v14810_v17  ;;  %v13734_v57 = vpack.c.bf16 %v10178_v32, %v10177_v31 }
 0x646   : > { %12345 = vmatmul.mubr.msk.f32.vlgmr.msra.gmra.mrb[36].mxu0 %vm4363_vm7, %v16149_v26  ;;  %v10176_v26 = vld [vmem:[%s17499_s14 + $0x58] sm:$0xff] }
 0x647   : > { %13657 = vmatpush3.bf16.msra.mxu0 %v16187_v59  ;;  %12398 = vmatprep.mubr.msk.f32.mxu0 %vm14811_vm5, %v14812_v18  ;;  %v5304_v59 = vld [vmem:[%s17499_s14 + $0x38] sm:$0xff] }
 0x648   : > { %13658 = vmatprep.subr.bf16.mxu0 %v14810_v17  ;;  %12480 = vmatmul.mubr.msk.f32.vlgmr.msra.gmra.mrb[36].mxu1 %vm4363_vm7, %v16147_v25  ;;  %v13749_v60 = vpack.c.bf16 %v5304_v59, %v5303_v19 }
 0x649   : > { %12517 = vmatprep.mubr.msk.f32.mxu1 %vm14811_vm5, %v14812_v18  ;;  %13741 = vmatpush3.bf16.msra.mxu1 %v13740_v58 }
 0x64a   : > { %13742 = vmatprep.subr.bf16.mxu1 %v14810_v17 }
 0x64b   : > { %13660 = vmatpush3.bf16.msra.mxu0 %v16199_v53  ;;  %v10180_v53 = vld [vmem:[%s17499_s14 + $0x78] sm:$0xff] }
 0x64c   : > { %13661 = vmatprep.subr.bf16.mxu0 %v14810_v17 }
 0x64f   : > { %13663 = vmatpush3.bf16.msra.mxu0 %v16211_v4  ;;  %v13737_v4 = vpack.c.bf16 %v10180_v53, %v10179_v52  ;;  %v5549_v52 = vld [vmem:[%s17500_s13 + $0x20] sm:$0xff]  ;;  %v5550_v53 = vld [vmem:[%s17500_s13 + $0x28] sm:$0xff] }
 0x650   : > { %13664 = vmatprep.subr.bf16.mxu0 %v14810_v17 }
 0x653   : > { %13666 = vmatpush3.bf16.msra.mxu0 %v16218_v23 }
 0x654   : > { %13667 = vmatprep.subr.bf16.mxu0 %v14810_v17 }
 0x657   : > { %13669 = vmatpush3.bf16.msra.mxu0 %v16225_v12 }
 0x658   : > { %13670 = vmatprep.subr.bf16.mxu0 %v14810_v17 }
 0x65b   : > { %13672 = vmatpush3.bf16.msra.mxu0 %v16232_v43  ;;  %v10127_v43 = vld [vmem:[%s14957_s30] ss:$0 sm:$0xff] }
 0x65c   : > { %13691 = vmatprep.subr.bf16.mxu0 %v14810_v17 }
 0x65e   : > { %12399 = vmatmul.mubr.msk.f32.vlgmr.msra.gmra.mrb[38].mxu0 %vm4363_vm7, %v16147_v25  ;;  %v10175_v25 = vld [vmem:[%s17499_s14 + $0x50] sm:$0xff] }
 0x65f   : > { %13693 = vmatpush3.bf16.msra.mxu0 %v16239_v14  ;;  %12452 = vmatprep.mubr.msk.f32.mxu0 %vm14811_vm5, %v14812_v18  ;;  %v13731_v63 = vpack.c.bf16 %v10176_v26, %v10175_v25  ;;  %v5546_v25 = vld [vmem:[%s17500_s13 + $0x8] sm:$0xff]  ;;  %v5461_v26 = vld [vmem:[%s17504_s3] sm:$0xff] }
 0x660   : > { %13694 = vmatprep.subr.bf16.mxu0 %v14810_v17 }
 0x663   : > { %13696 = vmatpush3.bf16.msra.mxu0 %v16251_v2 }
 0x664   : > { %13697 = vmatprep.subr.bf16.mxu0 %v14810_v17 }
 0x667   : > { %13699 = vmatpush3.bf16.msra.mxu0 %v16263_v9 }
 0x668   : > { %13700 = vmatprep.subr.bf16.mxu0 %v14810_v17 }
 0x66b   : > { %13702 = vmatpush3.bf16.msra.mxu0 %v16271_v27 }
 0x66c   : > { %13703 = vmatprep.subr.bf16.mxu0 %v14810_v17 }
 0x66f   : > { %13705 = vmatpush3.bf16.msra.mxu0 %v16279_v41 }
 0x670   : > { %13706 = vmatprep.subr.bf16.mxu0 %v14810_v17 }
 0x673   : > { %13708 = vmatpush3.bf16.msra.mxu0 %v13599_v20 }
 0x674   : > { %13727 = vmatprep.subr.bf16.mxu0 %v14810_v17 }
 0x676   : > { %12453 = vmatmul.mubr.msk.f32.vlgmr.msra.gmra.mrb[40].mxu0 %vm4363_vm7, %v16123_v36  ;;  %v5299_v36 = vld [vmem:[%s17499_s14 + $0x10] sm:$0xff] }
 0x677   : > { %12498 = vmatprep.mubr.msk.f32.mxu0 %vm14811_vm5, %v14812_v18  ;;  %13729 = vmatpush3.bf16.msra.mxu0 %v13728_v48  ;;  %v13743_v62 = vpack.c.bf16 %v5300_v46, %v5299_v36 }
 0x678   : > { %13730 = vmatprep.subr.bf16.mxu0 %v14810_v17 }
 0x679   : > { %13744 = vmatpush3.bf16.msra.mxu1 %v13743_v62  ;;  %v5545_v62 = vld [vmem:[%s17500_s13] sm:$0xff] }
 0x67a   : > { %13745 = vmatprep.subr.bf16.mxu1 %v14810_v17  ;;  %v13756_v38 = vpack.c.bf16 %v5546_v25, %v5545_v62 }
 0x67b   : > { %13732 = vmatpush3.bf16.msra.mxu0 %v13731_v63  ;;  %v5462_v63 = vld [vmem:[%s17504_s3 + $0x8] sm:$0x7]  ;;  %s16449_s3 = sand.u32 1, %s14756_s23  }
 0x67c   : > { %13733 = vmatprep.subr.bf16.mxu0 %v14810_v17  ;;  %s17433_s4 = scalar_lea.vmem [#allocation4], %s16449_s3  ;;  %s17544_s9 = scalar_lea.vmem [#allocation4], %s16449_s3 }
 0x67d   : > { %13747 = vmatpush3.bf16.msra.mxu1 %v13746_v45  ;;  %v5548_v45 = vld [vmem:[%s17500_s13 + $0x18] sm:$0xff] }
 0x67e   : > { %13748 = vmatprep.subr.bf16.mxu1 %v14810_v17 }
 0x67f   : > { %13735 = vmatpush3.bf16.msra.mxu0 %v13734_v57  ;;  %v13752_v57 = vpack.c.bf16 %v5462_v63, %v5461_v26  ;;  %v5740_v63 = vld [vmem:[%s17520_s5] sm:$0xff] }
 0x680   : > { %13736 = vmatprep.subr.bf16.mxu0 %v14810_v17 }
 0x681   : > { %13750 = vmatpush3.bf16.msra.mxu1 %v13749_v60  ;;  %v13759_v60 = vpack.c.bf16 %v5548_v45, %v5547_v22 }
 0x682   : > { %13755 = vmatprep.subr.bf16.mxu1 %v14810_v17 }
 0x683   : > { %13738 = vmatpush3.bf16.msra.mxu0 %v13737_v4  ;;  %v5551_v4 = vld [vmem:[%s17500_s13 + $0x30] sm:$0xff] }
 0x684   : > { %13751 = vmatprep.subr.bf16.mxu0 %v14810_v17 }
 0x6b9   : > { %v4433_v0 = vpop.f32.mrb[28].mxu0  ;;  %v4697_v42 = vpop.f32.mrb[28].mxu1 }
 0x6ba   : > { %v12184_v29 = vpop.f32.mrb[29].mxu0  ;;  %v12265_v6 = vpop.f32.mrb[29].mxu1 }
 0x6d1   : > { %v4506_v49 = vpop.f32.mrb[30].mxu0  ;;  %v4850_v50 = vpop.f32.mrb[30].mxu1 }
 0x6d2   : > { %v4507_v28 = vadd.f32 %v4506_v49, %v4433_v0  ;;  %v12211_v39 = vpop.f32.mrb[31].mxu0  ;;  %v12319_v23 = vpop.f32.mrb[31].mxu1  ;;  %v5295_v49 = vld [vmem:[%s1339_s10] sm:$0x1]  ;;  %s17516_s10 = sld [smem:[#allocation34_spill]] }
 0x6d3   : > { %v5553_v23 = vld [vmem:[%s17500_s13 + $0x40] sm:$0xff] }
 0x6e9   : > { %v4592_v61 = vpop.f32.mrb[32].mxu0  ;;  %v4996_v40 = vpop.f32.mrb[32].mxu1 }
 0x6ea   : > { %v4596_v12 = vadd.f32 %v4592_v61, %v4507_v28  ;;  %v12238_v33 = vpop.f32.mrb[33].mxu0  ;;  %v12373_v34 = vpop.f32.mrb[33].mxu1  ;;  %v5552_v28 = vld [vmem:[%s17500_s13 + $0x38] sm:$0xff]  ;;  %v5554_v61 = vld [vmem:[%s17500_s13 + $0x48] sm:$0xff] }
 0x6eb   : > { %v13765_v39 = vpack.c.bf16 %v5552_v28, %v5551_v4  ;;  %v5556_v33 = vld [vmem:[%s17500_s13 + $0x58] sm:$0xff]  ;;  %v5746_v4 = vld [vmem:[%s17520_s5 + $0x30] sm:$0xff] }
 0x6ec   : > { %v4603_v2 = vadd.f32 %v10127_v43, %v4596_v12  ;;  %v5555_v12 = vld [vmem:[%s17500_s13 + $0x50] sm:$0xff]  ;;  %v5747_v28 = vld [vmem:[%s17520_s5 + $0x38] sm:$0xff] }
 0x6ed   : > { %v13771_v34 = vpack.c.bf16 %v5556_v33, %v5555_v12  ;;  %v5750_v12 = vld [vmem:[%s17520_s5 + $0x50] sm:$0xff]  ;;  %v5751_v33 = vld [vmem:[%s17520_s5 + $0x58] sm:$0xff] }
 0x6ee   : > { %v4604_v9 = vmax.f32 %v4603_v2, 0.0 }
 0x701   : > { %v4767_v44 = vpop.f32.mrb[34].mxu0  ;;  %v5145_v10 = vpop.f32.mrb[34].mxu1 }
 0x702   : > { %v4768_v14 = vadd.f32 %v4767_v44, %v4697_v42  ;;  %v12292_v15 = vpop.f32.mrb[35].mxu0  ;;  %v12427_v35 = vpop.f32.mrb[35].mxu1 }
 0x704   : > { %v4854_v37 = vadd.f32 %v4850_v50, %v4768_v14  ;;  %v13762_v50 = vpack.c.bf16 %v5550_v53, %v5549_v52  ;;  %v5744_v53 = vld [vmem:[%s17520_s5 + $0x20] sm:$0xff] }
 0x706   : > { %v4855_v55 = vadd.f32 %v10127_v43, %v4854_v37  ;;  %v5542_v37 = vld [vmem:[%s17516_s10] sm:$0x1]  ;;  %s14814_s10 = smov 96  }
 0x708   : > { %v4856_v7 = vmax.f32 %v4855_v55, 0.0 }
 0x70a   : > { %vm4857_vm8 = vcmp.gt.f32.partialorder %v4856_v7, %v4604_v9 }
 0x70b   : > { %v4858_v24 = vsel %vm4857_vm8, %v4856_v7, %v4604_v9  ;;  %v4859_v54 = vsel %vm4857_vm8, 1, %v14813_v30  ;;  %vm5563_vm8 = vcmask 1043456  }
 0x719   : > { %v4926_v27 = vpop.f32.mrb[36].mxu0 }
 0x71a   : > { %v4997_v1 = vadd.f32 %v4996_v40, %v4926_v27  ;;  %v12346_v47 = vpop.f32.mrb[37].mxu0  ;;  %v13768_v40 = vpack.c.bf16 %v5554_v61, %v5553_v23  ;;  %v5660_v27 = vld [vmem:[%s17517_s1] sm:$0xff]  ;;  %v5749_v61 = vld [vmem:[%s17520_s5 + $0x48] sm:$0xff] }
 0x71b   : > { %v5285_v41 = vpop.f32.mrb[36].mxu1  ;;  %v5748_v23 = vld [vmem:[%s17520_s5 + $0x40] sm:$0xff] }
 0x71c   : > { %v12481_v51 = vpop.f32.mrb[37].mxu1 }
 0x731   : > { %v5069_v5 = vpop.f32.mrb[38].mxu0 }
 0x732   : > { %v5073_v20 = vadd.f32 %v5069_v5, %v4997_v1  ;;  %v12400_v0 = vpop.f32.mrb[39].mxu0  ;;  %v5661_v1 = vld [vmem:[%s17517_s1 + $0x8] sm:$0xff] }
 0x733   : > { %v13774_v47 = vpack.c.bf16 %v5661_v1, %v5660_v27 }
 0x734   : > { %v5074_v42 = vadd.f32 %v10127_v43, %v5073_v20 }
 0x736   : > { %v5075_v56 = vmax.f32 %v5074_v42, 0.0 }
 0x738   : > { %vm16389_vm9 = vcmp.gt.f32.partialorder %v5075_v56, %v4858_v24 }
 0x739   : > { %v5077_v29 = vsel %vm16389_vm9, %v5075_v56, %v4858_v24  ;;  %v5078_v6 = vsel %vm16389_vm9, 2, %v4859_v54  ;;  %vm5559_vm9 = vcmask 818176   ;;  %v14815_v56 = vmov 1966171168  }
 0x73a   : > { %v5642_v54 = vunpack.c.l.s4 %v14815_v56 }
 0x749   : > { %v5215_v58 = vpop.f32.mrb[40].mxu0 }
 0x74a   : > { %v5216_v16 = vadd.f32 %v5215_v58, %v5145_v10  ;;  %v12454_v48 = vpop.f32.mrb[41].mxu0 }
 0x74b   : > { %v16458_v48 = vshrl.u32 %v5644_v13, 7 }
 0x74c   : > { %v5289_v36 = vadd.f32 %v5285_v41, %v5216_v16  ;;  %v5558_v41 = vld [vmem:[%s17518_s7] sm:$0x1]  ;;  %s17519_s7 = sld [smem:[#allocation11_spill]]  ;;  %v5643_v16 = vunpack.c.0.s8 %v5642_v54 }
 0x74e   : > { %v5290_v46 = vadd.f32 %v10127_v43, %v5289_v36  ;;  %v5557_v43 = vld [vmem:[%s17500_s13 + $0x60] sm:$0xf]  ;;  %v5646_v36 = vsub.s32 %v5643_v16, %v16458_v48 }
 0x750   : > { %v5291_v30 = vmax.f32 %v5290_v46, 0.0 }
 0x752   : > { %vm5292_vm14 = vcmp.gt.f32.partialorder %v5291_v30, %v5077_v29 }
 0x753   : > { %v16403_v31 = vsel %vm5292_vm14, 3, %v5078_v6  ;;  %v5293_v32 = vsel %vm5292_vm14, %v5291_v30, %v5077_v29  ;;  %v5662_v29 = vld [vmem:[%s17517_s1 + $0x10] sm:$0xff]  ;;  %v5663_v6 = vld [vmem:[%s17517_s1 + $0x18] sm:$0xff]  ;;  %s1342_s1 = scalar_lea.vmem %s17519_s7, %s15100_s18  ;;  %vm5665_vm14 = vcmask 261120   ;;  %s17523_s7 = sld [smem:[#allocation41_spill]] }
 0x754   : > { %v5315_v19 = vrot.slane %v5293_v32, 1  ;;  %12518 = vmatmul.mubr.msk.f32.vlgmr.msra.gmra.mrb[38].mxu1 %vm5316_vm10, %v5293_v32  ;;  %v13777_v58 = vpack.c.bf16 %v5663_v6, %v5662_v29  ;;  %v5296_v26 = vld [vmem:[%s1342_s1] sm:$0x1]  ;;  %s17521_s1 = sld [smem:[#allocation37_spill]] }
 0x755   : > { %13757 = vmatpush3.bf16.msra.mxu1 %v13756_v38  ;;  %12553 = vmatprep.mubr.msk.f32.mxu1 %vm14811_vm5, %v14812_v18  ;;  %v5741_v38 = vld [vmem:[%s17520_s5 + $0x8] sm:$0xff] }
 0x756   : > { %12499 = vmatmul.mubr.msk.f32.vlgmr.msra.gmra.mrb[42].mxu0 %vm5316_vm10, %v5315_v19  ;;  %13758 = vmatprep.subr.bf16.mxu1 %v14810_v17  ;;  %v13780_v32 = vpack.c.bf16 %v5741_v38, %v5740_v63  ;;  %v5742_v19 = vld [vmem:[%s17520_s5 + $0x10] sm:$0xff] }
 0x757   : > { %13754 = vmatpush3.bf16.msk.msra.mxu0 %vm16407_vm15, %v13752_v57  ;;  %12524 = vmatprep.mubr.msk.f32.mxu0 %vm14811_vm5, %v14812_v18 }
 0x758   : > { %13773 = vmatprep.subr.bf16.mxu0 %v14810_v17 }
 0x759   : > { %13760 = vmatpush3.bf16.msra.mxu1 %v13759_v60  ;;  %v5743_v60 = vld [vmem:[%s17520_s5 + $0x18] sm:$0xff]  ;;  %v5753_v6 = vld [vmem:[%s17523_s7] sm:$0x1]  ;;  %s17525_s7 = sld [smem:[#allocation15_spill]] }
 0x75a   : > { %12525 = vmatmul.mubr.msk.f32.vlgmr.msra.gmra.mrb[44].mxu0 %vm5463_vm0, %v5295_v49  ;;  %13761 = vmatprep.subr.bf16.mxu1 %v14810_v17  ;;  %v13783_v52 = vpack.c.bf16 %v5743_v60, %v5742_v19  ;;  %v5745_v49 = vld [vmem:[%s17520_s5 + $0x28] sm:$0xff] }
 0x75b   : > { %12564 = vmatprep.mubr.msk.f32.mxu0 %vm14811_vm5, %v14812_v18  ;;  %13775 = vmatpush3.bf16.msra.mxu0 %v13774_v47 }
 0x75c   : > { %13776 = vmatprep.subr.bf16.mxu0 %v14810_v17 }
 0x75d   : > { %13763 = vmatpush3.bf16.msra.mxu1 %v13762_v50  ;;  %v13786_v50 = vpack.c.bf16 %v5745_v49, %v5744_v53 }
 0x75e   : > { %13764 = vmatprep.subr.bf16.mxu1 %v14810_v17 }
 0x75f   : > { %13778 = vmatpush3.bf16.msra.mxu0 %v13777_v58 }
 0x760   : > { %13779 = vmatprep.subr.bf16.mxu0 %v14810_v17 }
 0x761   : > { %13766 = vmatpush3.bf16.msra.mxu1 %v13765_v39  ;;  %v13789_v39 = vpack.c.bf16 %v5747_v28, %v5746_v4 }
 0x762   : > { %13767 = vmatprep.subr.bf16.mxu1 %v14810_v17 }
 0x765   : > { %13769 = vmatpush3.bf16.msra.mxu1 %v13768_v40  ;;  %v13792_v40 = vpack.c.bf16 %v5749_v61, %v5748_v23 }
 0x766   : > { %13770 = vmatprep.subr.bf16.mxu1 %v14810_v17 }
 0x769   : > { %13772 = vmatpush3.bf16.msra.mxu1 %v13771_v34  ;;  %v13795_v34 = vpack.c.bf16 %v5751_v33, %v5750_v12 }
 0x76a   : > { %12551 = vmatprep.subr.mxu1 %v14812_v18 }
 0x76d   : > { %12552 = vmatpush3.msk.msra.mxu1 %vm5563_vm8, %v5557_v43  ;;  %v5752_v43 = vld [vmem:[%s17520_s5 + $0x60] sm:$0xf]  ;;  %s17438_s5 = scalar_lea.vmem [#allocation2], %s16449_s3 }
 0x76e   : > { %13797 = vmatprep.subr.bf16.mxu1 %v14810_v17 }
 0x827   : > { %v5457_v44 = vpop.f32.mrb[38].mxu1 }
 0x828   : > { %v12519_v10 = vpop.f32.mrb[39].mxu1 }
 0x829   : > { %v5385_v14 = vpop.f32.mrb[42].mxu0 }
 0x82a   : > { %v5458_v15 = vadd.f32 %v5457_v44, %v5385_v14  ;;  %v12500_v35 = vpop.f32.mrb[43].mxu0  ;;  %v5664_v44 = vld [vmem:[%s17521_s1] sm:$0x1]  ;;  %s17524_s1 = sld [smem:[#allocation42_spill]] }
 0x82d   : > { %v5537_v2 = vpop.f32.mrb[44].mxu0 }
 0x82e   : > { %v5541_v55 = vadd.f32 %v5537_v2, %v5458_v15  ;;  %v12526_v9 = vpop.f32.mrb[45].mxu0 }
 0x830   : > { %v5543_v7 = vadd.f32 %v5542_v37, %v5541_v55 }
 0x832   : > { %v5544_v24 = vmax.f32 %v5543_v7, 0.0 }
 0x834   : > { %12554 = vmatmul.mubr.msk.f32.vlgmr.msra.gmra.mrb[40].mxu1 %vm5559_vm9, %v5544_v24 }
 0x835   : > { %12600 = vmatprep.mubr.msk.f32.mxu1 %vm14811_vm5, %v14812_v18 }
 0x907   : > { %v5633_v51 = vpop.f32.mrb[40].mxu1 }
 0x908   : > { %v5634_v5 = vadd.f32 %v5633_v51, %v5558_v41  ;;  %v12555_v20 = vpop.f32.mrb[41].mxu1 }
 0x90a   : > { %v5637_v0 = vmul.f32 0.5, %v5634_v5  ;;  %9616 = vrot.lane.b32.xlu1 %v5634_v5, %s14814_s10  ;;  %9614 = vst.msk [vmem:[%s17433_s4] sm:$0x1] %vm9613_vm11, %v5634_v5  ;;  %s17435_s4 = scalar_lea.vmem [#allocation6], %s16449_s3 }
 0x90c   : > { %v5638_v42 = vmul.f32 1.442695, %v5637_v0 }
 0x90e   : > { %14604 = vpow2.f32 %v5638_v42 }
 0x918   : > { %v14605_v46 = vpop.eup %14604 }
 0x919   : > { %v5647_v62 = vrot.slane %v14605_v46, %v5646_v36 }
 0x91b   : > { %v5654_v25 = vrot.slane %v5647_v62, %v5646_v36  ;;  %v5837_v62 = vld [vmem:[%s17524_s1] sm:$0xff] }
 0x91d   : > { %5655 = vrot.lane.b32.xlu0 %v5654_v25, %s14814_s10  ;;  %s17522_s10 = sld [smem:[#allocation13_spill]]  ;;  %v5838_v25 = vld [vmem:[%s17524_s1 + $0x8] sm:$0x7]  ;;  %s17527_s1 = sld [smem:[#allocation44_spill]] }
 0x923   : > { %v10194_v10 = vld [vmem:[%s17522_s10 + $0x68] sm:$0xff]  ;;  %v10195_v14 = vld [vmem:[%s17522_s10 + $0x70] sm:$0xff]  ;;  %v10196_v9 = vld [vmem:[%s17522_s10 + $0x78] sm:$0xff] }
 0x924   : > { %v13820_v37 = vpack.c.bf16 %v10195_v14, %v10194_v10  ;;  %v10197_v7 = vld [vmem:[%s17522_s10 + $0x80] sm:$0xff]  ;;  %v10198_v27 = vld [vmem:[%s17522_s10 + $0x88] sm:$0xff]  ;;  %v10199_v1 = vld [vmem:[%s17522_s10 + $0x90] sm:$0xff] }
 0x925   : > { %v13823_v24 = vpack.c.bf16 %v10197_v7, %v10196_v9  ;;  %v13826_v47 = vpack.c.bf16 %v10199_v1, %v10198_v27  ;;  %v10200_v41 = vld [vmem:[%s17522_s10 + $0x98] sm:$0xff]  ;;  %v10201_v51 = vld [vmem:[%s17522_s10 + $0xa0] sm:$0xff]  ;;  %v10202_v20 = vld [vmem:[%s17522_s10 + $0xa8] sm:$0xff] }
 0x926   : > { %v10203_v0 = vld [vmem:[%s17522_s10 + $0xb0] sm:$0xff]  ;;  %v10204_v56 = vld [vmem:[%s17522_s10 + $0xb8] sm:$0xff]  ;;  %v10205_v54 = vld [vmem:[%s17522_s10 + $0xc0] sm:$0xff] }
 0x927   : > { %v13832_v42 = vpack.c.bf16 %v10203_v0, %v10202_v20  ;;  %v13835_v13 = vpack.c.bf16 %v10205_v54, %v10204_v56  ;;  %v10206_v29 = vld [vmem:[%s17522_s10 + $0xc8] sm:$0xf]  ;;  %v5919_v60 = vld [vmem:[%s17522_s10 + $0x10] sm:$0xff]  ;;  %v5921_v49 = vld [vmem:[%s17522_s10 + $0x20] sm:$0xff]  ;;  %v6008_v56 = vsub.s32 0, %v16458_v48 }
 0x928   : > { %v5923_v28 = vld [vmem:[%s17522_s10 + $0x30] sm:$0xff]  ;;  %v5925_v61 = vld [vmem:[%s17522_s10 + $0x40] sm:$0xff]  ;;  %v10212_v14 = vld [vmem:[%s17525_s7 + $0x48] sm:$0xff] }
 0x929   : > { %v5927_v33 = vld [vmem:[%s17522_s10 + $0x50] sm:$0xff]  ;;  %v10211_v10 = vld [vmem:[%s17525_s7 + $0x40] sm:$0xff]  ;;  %v10216_v9 = vld [vmem:[%s17525_s7 + $0x68] sm:$0xff] }
 0x92a   : > { %v10218_v27 = vld [vmem:[%s17525_s7 + $0x78] sm:$0xff]  ;;  %v6114_v48 = vld [vmem:[%s17525_s7 + $0x10] sm:$0xff] }
 0x97c   : > { %v9617_v30 = vpop.permute.xlu1 %9616 }
 0x97d   : > { %9619 = vst.msk [vmem:[%s17435_s4] sm:$0x1] %vm9613_vm11, %v9617_v30  ;;  %vm5830_vm11 = vcmask 81920   ;;  %v13798_v30 = vpack.c.bf16 %v5838_v25, %v5837_v62  ;;  %s17526_s4 = sld [smem:[#allocation12_spill]]  ;;  %v6112_v25 = vld [vmem:[%s17525_s7] sm:$0xff] }
 0x97f   : > { %13800 = vmatpush3.bf16.msk.msra.mxu1 %vm16407_vm15, %v13798_v30  ;;  %v6113_v30 = vld [vmem:[%s17525_s7 + $0x8] sm:$0xff]  ;;  %vm6120_vm15 = vcmp.eq.s32.totalorder %v16403_v31, 1 }
 0x980   : > { %13801 = vmatprep.subr.bf16.mxu1 %v14810_v17 }
 0x983   : > { %v10207_v20 = vld [vmem:[%s17526_s4 + $0x1] sm:$0x1] }
 0x98f   : > { %v5656_v22 = vpop.permute.xlu0 %5655 }
 0x990   : > { %v5658_v45 = vmul.f32 %v5656_v22, %v5296_v26 }
 0x992   : > { %v5659_v57 = vadd.f32 %v5658_v45, %v5634_v5  ;;  %v13829_v5 = vpack.c.bf16 %v10201_v51, %v10200_v41 }
 0x994   : > { %12565 = vmatmul.mubr.msk.f32.vlgmr.msra.gmra.mrb[46].mxu0 %vm5665_vm14, %v5659_v57  ;;  %v5918_v57 = vld [vmem:[%s17522_s10 + $0x8] sm:$0xff]  ;;  %vm6278_vm14 = vcmp.eq.s32.totalorder %v16403_v31, 2 }
 0x995   : > { %13781 = vmatpush3.bf16.msra.mxu0 %v13780_v32  ;;  %12593 = vmatprep.mubr.msk.f32.mxu0 %vm14811_vm5, %v14812_v18  ;;  %v5917_v32 = vld [vmem:[%s17522_s10] sm:$0xff] }
 0x996   : > { %13782 = vmatprep.subr.bf16.mxu0 %v14810_v17  ;;  %v13802_v19 = vpack.c.bf16 %v5918_v57, %v5917_v32 }
 0x999   : > { %13784 = vmatpush3.bf16.msra.mxu0 %v13783_v52  ;;  %v5920_v52 = vld [vmem:[%s17522_s10 + $0x18] sm:$0xff] }
 0x99a   : > { %13785 = vmatprep.subr.bf16.mxu0 %v14810_v17  ;;  %v13805_v53 = vpack.c.bf16 %v5920_v52, %v5919_v60 }
 0x99d   : > { %13787 = vmatpush3.bf16.msra.mxu0 %v13786_v50  ;;  %v5922_v50 = vld [vmem:[%s17522_s10 + $0x28] sm:$0xff] }
 0x99e   : > { %13788 = vmatprep.subr.bf16.mxu0 %v14810_v17  ;;  %v13808_v4 = vpack.c.bf16 %v5922_v50, %v5921_v49  ;;  %v6118_v49 = vld [vmem:[%s17525_s7 + $0x30] sm:$0xff]  ;;  %v6119_v50 = vld [vmem:[%s17525_s7 + $0x38] sm:$0xff] }
 0x9a1   : > { %13790 = vmatpush3.bf16.msra.mxu0 %v13789_v39  ;;  %v5924_v39 = vld [vmem:[%s17522_s10 + $0x38] sm:$0xff] }
 0x9a2   : > { %13791 = vmatprep.subr.bf16.mxu0 %v14810_v17  ;;  %v13811_v23 = vpack.c.bf16 %v5924_v39, %v5923_v28 }
 0x9a5   : > { %13793 = vmatpush3.bf16.msra.mxu0 %v13792_v40  ;;  %v5926_v40 = vld [vmem:[%s17522_s10 + $0x48] sm:$0xff] }
 0x9a6   : > { %13794 = vmatprep.subr.bf16.mxu0 %v14810_v17  ;;  %v13814_v12 = vpack.c.bf16 %v5926_v40, %v5925_v61 }
 0x9a9   : > { %13796 = vmatpush3.bf16.msra.mxu0 %v13795_v34  ;;  %v5928_v34 = vld [vmem:[%s17522_s10 + $0x58] sm:$0xff] }
 0x9aa   : > { %12591 = vmatprep.subr.mxu0 %v14812_v18 }
 0x9ad   : > { %12592 = vmatpush3.msk.msra.mxu0 %vm5563_vm8, %v5752_v43  ;;  %v13817_v43 = vpack.c.bf16 %v5928_v34, %v5927_v33 }
 0x9ae   : > { %13819 = vmatprep.subr.bf16.mxu0 %v14810_v17 }
 0xa67   : > { %v5735_v15 = vpop.f32.mrb[46].mxu0 }
 0xa68   : > { %v5736_v35 = vadd.f32 %v5735_v15, %v5664_v44  ;;  %v12566_v2 = vpop.f32.mrb[47].mxu0  ;;  %v5929_v44 = vld [vmem:[%s17522_s10 + $0x60] sm:$0xf]  ;;  %v13838_v15 = vpack.c.bf16 %v10212_v14, %v10211_v10  ;;  %s9662_s10 = sshll.u32 %s17544_s9, 4  ;;  %s17311_s10 = int_to_ptr.vmem [resolvable:$true] %s9662_s10 }
 0xa69   : > { %v10214_v2 = vld [vmem:[%s17525_s7 + $0x58] sm:$0xff] }
 0xa6a   : > { %v16494_v55 = vmax.f32 %v5736_v35, 0.0  ;;  %v10213_v35 = vld [vmem:[%s17525_s7 + $0x50] sm:$0xff] }
 0xa6c   : > { %12594 = vmatmul.mubr.msk.f32.vlgmr.msra.gmra.mrb[48].mxu0 %vm5559_vm9, %v16494_v55 }
 0xa6d   : > { %13821 = vmatpush3.bf16.msra.mxu0 %v13820_v37  ;;  %12658 = vmatprep.mubr.msk.f32.mxu0 %vm14811_vm5, %v14812_v18  ;;  %v13841_v37 = vpack.c.bf16 %v10214_v2, %v10213_v35 }
 0xa6e   : > { %13822 = vmatprep.subr.bf16.mxu0 %v14810_v17 }
 0xa71   : > { %13824 = vmatpush3.bf16.msra.mxu0 %v13823_v24  ;;  %v10217_v24 = vld [vmem:[%s17525_s7 + $0x70] sm:$0xff] }
 0xa72   : > { %13825 = vmatprep.subr.bf16.mxu0 %v14810_v17  ;;  %v13847_v1 = vpack.c.bf16 %v10218_v27, %v10217_v24 }
 0xa75   : > { %13827 = vmatpush3.bf16.msra.mxu0 %v13826_v47 }
 0xa76   : > { %13828 = vmatprep.subr.bf16.mxu0 %v14810_v17 }
 0xa79   : > { %13830 = vmatpush3.bf16.msra.mxu0 %v13829_v5 }
 0xa7a   : > { %13831 = vmatprep.subr.bf16.mxu0 %v14810_v17 }
 0xa7d   : > { %13833 = vmatpush3.bf16.msra.mxu0 %v13832_v42  ;;  %v5930_v42 = vld [vmem:[%s17526_s4] sm:$0x1]  ;;  %s17530_s4 = sld [smem:[#allocation17_spill]] }
 0xa7e   : > { %13834 = vmatprep.subr.bf16.mxu0 %v14810_v17 }
 0xa81   : > { %13836 = vmatpush3.bf16.msra.mxu0 %v13835_v13 }
 0xa82   : > { %12656 = vmatprep.subr.mxu0 %v14812_v18 }
 0xa83   : > { %v6584_v10 = vld [vmem:[%s17530_s4] sm:$0x3f]  ;;  %v10230_v14 = vld [vmem:[%s17530_s4 + $0x8] sm:$0x3f] }
 0xa85   : > { %12657 = vmatpush3.msk.msra.mxu0 %vm5563_vm8, %v10206_v29 }
 0xa86   : > { %12659 = vmatmul.mubr.msk.f32.vlgmr.msra.gmra.mrb[50].mxu0 %vm5559_vm9, %v16494_v55  ;;  %13861 = vmatprep.subr.bf16.mxu0 %v14810_v17 }
 0xa87   : > { %12715 = vmatprep.mubr.msk.f32.mxu0 %vm14811_vm5, %v14812_v18  ;;  %13863 = vmatpush3.bf16.msra.mxu0 %v13838_v15 }
 0xa88   : > { %13864 = vmatprep.subr.bf16.mxu0 %v14810_v17 }
 0xa8b   : > { %13866 = vmatpush3.bf16.msra.mxu0 %v13841_v37 }
 0xa8c   : > { %13867 = vmatprep.subr.bf16.mxu0 %v14810_v17 }
 0xb3f   : > { %v5826_v58 = vpop.f32.mrb[48].mxu0 }
 0xb40   : > { %v5827_v16 = vadd.f32 %v5826_v58, %v5753_v6  ;;  %v12595_v36 = vpop.f32.mrb[49].mxu0 }
 0xb41   : > { %v10210_v36 = vld [vmem:[%s17527_s1 + $0x2] sm:$0x3] }
 0xb42   : > { %v5831_v46 = vsel %vm5830_vm11, %v5827_v16, -inf }
 0xb43   : > { %5832 = vmax.xlane.f32.xlu0 %v5831_v46  ;;  %v6005_v46 = vld [vmem:[%s17527_s1] sm:$0x3]  ;;  %s17529_s1 = sld [smem:[#allocation18_spill]] }
 0xb49   : > { %v10233_v33 = vld [vmem:[%s17529_s1 + $0x80] sm:$0xff]  ;;  %v10234_v34 = vld [vmem:[%s17529_s1 + $0x88] sm:$0xff]  ;;  %v6665_v24 = vld [vmem:[%s17529_s1 + $0x18] sm:$0xff] }
 0xb4a   : > { %v13886_v35 = vpack.c.bf16 %v10234_v34, %v10233_v33  ;;  %v10255_v33 = vld [vmem:[%s17529_s1 + $0x118] sm:$0xff] }
 0xb59   : > { %v16529_v26 = vpop.f32.mrb[50].mxu0 }
 0xb5a   : > { %v12660_v63 = vpop.f32.mrb[51].mxu0  ;;  %v6097_v0 = vadd.f32 %v10207_v20, %v16529_v26  ;;  %v13850_v26 = vpack.c.bf16 %v6113_v30, %v6112_v25  ;;  %v10243_v30 = vld [vmem:[%s17529_s1 + $0xd0] sm:$0xff] }
 0xb5c   : > { %v6100_v54 = vmax.f32 %v6097_v0, 0.0 }
 0xb5e   : > { %v6106_v58 = vrot.slane %v6100_v54, %v6008_v56  ;;  %v6668_v54 = vld [vmem:[%s17529_s1 + $0x30] sm:$0xff] }
 0xb60   : > { %v6107_v63 = vmul.f32 %v10210_v36, %v6106_v58  ;;  %v10241_v58 = vld [vmem:[%s17529_s1 + $0xc0] sm:$0xff] }
 0xb61   : > { %v6670_v36 = vld [vmem:[%s17529_s1 + $0x40] sm:$0xff] }
 0xbd0   : > { %v5833_v38 = vpop.xlane.xlu0 %5832 }
 0xbd1   : > { %v5834_v22 = vsub.f32 %v5827_v16, %v5833_v38 }
 0xbd3   : > { %v5835_v45 = vmul.f32 1.442695, %v5834_v22 }
 0xbd5   : > { %14606 = vpow2.f32 %v5835_v45  ;;  %v6115_v45 = vld [vmem:[%s17525_s7 + $0x18] sm:$0xff] }
 0xbd6   : > { %v13853_v52 = vpack.c.bf16 %v6115_v45, %v6114_v48  ;;  %v10245_v45 = vld [vmem:[%s17529_s1 + $0xe0] sm:$0xff] }
 0xbdf   : > { %v16536_v59 = vpop.eup %14606 }
 0xbe0   : > { %12601 = vmatmul.mubr.msk.f32.vlgmr.msra.gmra.mrb[42].mxu1 %vm5463_vm0, %v16536_v59  ;;  %vm6280_vm0 = vcmp.eq.s32.totalorder %v16403_v31, 3 }
 0xbe1   : > { %13803 = vmatpush3.bf16.msra.mxu1 %v13802_v19  ;;  %12629 = vmatprep.mubr.msk.f32.mxu1 %vm14811_vm5, %v14812_v18 }
 0xbe2   : > { %13804 = vmatprep.subr.bf16.mxu1 %v14810_v17 }
 0xbe5   : > { %13806 = vmatpush3.bf16.msra.mxu1 %v13805_v53  ;;  %v6117_v53 = vld [vmem:[%s17525_s7 + $0x28] sm:$0xff] }
 0xbe6   : > { %13807 = vmatprep.subr.bf16.mxu1 %v14810_v17 }
 0xbe9   : > { %13809 = vmatpush3.bf16.msra.mxu1 %v13808_v4  ;;  %v13859_v4 = vpack.c.bf16 %v6119_v50, %v6118_v49  ;;  %v6677_v49 = vld [vmem:[%s17529_s1 + $0x78] sm:$0xff] }
 0xbea   : > { %13810 = vmatprep.subr.bf16.mxu1 %v14810_v17 }
 0xbed   : > { %13812 = vmatpush3.bf16.msra.mxu1 %v13811_v23 }
 0xbee   : > { %13813 = vmatprep.subr.bf16.mxu1 %v14810_v17 }
 0xbf1   : > { %13815 = vmatpush3.bf16.msra.mxu1 %v13814_v12 }
 0xbf2   : > { %13816 = vmatprep.subr.bf16.mxu1 %v14810_v17 }
 0xbf5   : > { %13818 = vmatpush3.bf16.msra.mxu1 %v13817_v43  ;;  %v6662_v43 = vld [vmem:[%s17529_s1] sm:$0xff] }
 0xbf6   : > { %12627 = vmatprep.subr.mxu1 %v14812_v18 }
 0xbf9   : > { %12628 = vmatpush3.msk.msra.mxu1 %vm5563_vm8, %v5929_v44  ;;  %v6663_v44 = vld [vmem:[%s17529_s1 + $0x8] sm:$0xff] }
 0xbfa   : > { %12630 = vmatmul.mubr.msk.f32.vlgmr.msra.gmra.mrb[44].mxu1 %vm5559_vm9, %v16494_v55  ;;  %13837 = vmatprep.subr.bf16.mxu1 %v14810_v17  ;;  %v10215_v55 = vld [vmem:[%s17525_s7 + $0x60] sm:$0xff]  ;;  %vm6110_vm9 = vcmp.eq.s32.totalorder %v16403_v31, 0  ;;  %v13910_v2 = vpack.c.bf16 %v6663_v44, %v6662_v43  ;;  %v10249_v44 = vld [vmem:[%s17530_s4 + $0x10] sm:$0x3f]  ;;  %s17531_s4 = sld [smem:[#allocation20_spill]] }
 0xbfb   : > { %12677 = vmatprep.mubr.msk.f32.mxu1 %vm14811_vm5, %v14812_v18  ;;  %13839 = vmatpush3.bf16.msra.mxu1 %v13838_v15  ;;  %v13844_v7 = vpack.c.bf16 %v10216_v9, %v10215_v55  ;;  %v10236_v9 = vld [vmem:[%s17529_s1 + $0x98] sm:$0xff] }
 0xbfc   : > { %13840 = vmatprep.subr.bf16.mxu1 %v14810_v17 }
 0xbfd   : > { %13869 = vmatpush3.bf16.msra.mxu0 %v13844_v7 }
 0xbfe   : > { %13870 = vmatprep.subr.bf16.mxu0 %v14810_v17 }
 0xbff   : > { %13842 = vmatpush3.bf16.msra.mxu1 %v13841_v37  ;;  %v10235_v37 = vld [vmem:[%s17529_s1 + $0x90] sm:$0xff] }
 0xc00   : > { %13843 = vmatprep.subr.bf16.mxu1 %v14810_v17  ;;  %v13889_v27 = vpack.c.bf16 %v10236_v9, %v10235_v37  ;;  %v10259_v37 = vld [vmem:[%s17529_s1 + $0x138] sm:$0xff]  ;;  %v10260_v9 = vld [vmem:[%s17529_s1 + $0x140] sm:$0xff] }
 0xc01   : > { %13872 = vmatpush3.bf16.msra.mxu0 %v13847_v1 }
 0xc02   : > { %13873 = vmatprep.subr.bf16.mxu0 %v14810_v17 }
 0xc03   : > { %13845 = vmatpush3.bf16.msra.mxu1 %v13844_v7  ;;  %v6664_v7 = vld [vmem:[%s17529_s1 + $0x10] sm:$0xff] }
 0xc04   : > { %13846 = vmatprep.subr.bf16.mxu1 %v14810_v17 }
 0xc07   : > { %13848 = vmatpush3.bf16.msra.mxu1 %v13847_v1  ;;  %v13913_v1 = vpack.c.bf16 %v6665_v24, %v6664_v7  ;;  %v10261_v7 = vld [vmem:[%s17529_s1 + $0x148] sm:$0xff] }
 0xc08   : > { %13849 = vmatprep.subr.bf16.mxu1 %v14810_v17  ;;  %v13946_v24 = vpack.c.bf16 %v10261_v7, %v10260_v9 }
 0xcb3   : > { %v5911_v47 = vpop.f32.mrb[42].mxu1 }
 0xcb4   : > { %14608 = vrcp.f32 %v5911_v47  ;;  %v12602_v41 = vpop.f32.mrb[43].mxu1  ;;  %v10237_v47 = vld [vmem:[%s17529_s1 + $0xa0] sm:$0xff] }
 0xcb5   : > { %v10238_v41 = vld [vmem:[%s17529_s1 + $0xa8] sm:$0xff] }
 0xcb6   : > { %v13892_v20 = vpack.c.bf16 %v10238_v41, %v10237_v47  ;;  %v10264_v41 = vld [vmem:[%s17529_s1 + $0x160] sm:$0xff] }
 0xcbe   : > { %v14609_v51 = vpop.eup %14608 }
 0xcbf   : > { %v5916_v5 = vmul.f32 %v14609_v51, %v16536_v59  ;;  %v6116_v59 = vld [vmem:[%s17525_s7 + $0x20] sm:$0xff]  ;;  %s17307_s7 = scalar_lea.hbm %s17497_s21, %s17303_s6 }
 0xcc0   : > { %v13856_v31 = vpack.c.bf16 %v6117_v53, %v6116_v59  ;;  %v6666_v51 = vld [vmem:[%s17529_s1 + $0x20] sm:$0xff]  ;;  %v10247_v59 = vld [vmem:[%s17529_s1 + $0xf0] sm:$0xff]  ;;  %v10248_v53 = vld [vmem:[%s17529_s1 + $0xf8] sm:$0xff] }
 0xcc1   : > { %9612 = vst.msk [vmem:[%s17438_s5] sm:$0x1] %vm5830_vm11, %v5916_v5  ;;  %s17528_s5 = sld [smem:[#allocation16_spill]]  ;;  %vm6434_vm11 = vcmask 1041408   ;;  %v6667_v5 = vld [vmem:[%s17529_s1 + $0x28] sm:$0xff]  ;;  %v13907_v50 = vpack.c.bf16 %v10248_v53, %v10247_v59 }
 0xcc2   : > { %v13916_v0 = vpack.c.bf16 %v6667_v5, %v6666_v51  ;;  %v10265_v51 = vld [vmem:[%s17529_s1 + $0x168] sm:$0xff] }
 0xcc3   : > { %v13952_v5 = vpack.c.bf16 %v10265_v51, %v10264_v41  ;;  %v10286_v53 = vld [vmem:[%s17531_s4 + $0x148] sm:$0xff] }
 0xcc4   : > { %v7089_v51 = vld [vmem:[%s17531_s4 + $0x28] sm:$0xff] }
 0xcc7   : > { %v10223_v28 = vld [vmem:[%s17528_s5 + $0x4] sm:$0xf]  ;;  %v6277_v12 = vld [vmem:[%s17528_s5] sm:$0xf]  ;;  %s9629_s5 = sand.u32 1, %s15065_s0   ;;  %s14816_s0 = smov [#allocation4]  }
 0xcc8   : > { %s17317_s13 = scalar_lea.sflag [#allocation5], %s9629_s5  ;;  %s14646_s14 = sshll.u32 %s14816_s0, 4  ;;  %s14647_s14 = int_to_ptr.vmem [resolvable:$false] %s14646_s14 }
 0xcc9   : > { %s14648_s19 = scalar_lea.vmem %s14647_s14, 32  ;;  %p14649_p0 = scmp.lt.s32.totalorder %s17311_s10, %s14647_s14 }
 0xccd   : > { %v6000_v13 = vpop.f32.mrb[44].mxu1 }
 0xcce   : > { %v6001_v29 = vadd.f32 %v6000_v13, %v5930_v42  ;;  %v12631_v6 = vpop.f32.mrb[45].mxu1  ;;  %v10239_v42 = vld [vmem:[%s17529_s1 + $0xb0] sm:$0xff]  ;;  %v6669_v13 = vld [vmem:[%s17529_s1 + $0x38] sm:$0xff] }
 0xccf   : > { %v13919_v6 = vpack.c.bf16 %v6669_v13, %v6668_v54  ;;  %v10272_v54 = vld [vmem:[%s17531_s4 + $0xd8] sm:$0xff]  ;;  %v10269_v13 = vld [vmem:[%s17531_s4 + $0xc0] sm:$0xff] }
 0xcd0   : > { %v6004_v16 = vmax.f32 %v6001_v29, 0.0 }
 0xcd2   : > { %v6009_v62 = vrot.slane %v6004_v16, %v6008_v56  ;;  %v10240_v56 = vld [vmem:[%s17529_s1 + $0xb8] sm:$0xff]  ;;  %v10242_v16 = vld [vmem:[%s17529_s1 + $0xc8] sm:$0xff] }
 0xcd3   : > { %v13895_v29 = vpack.c.bf16 %v10240_v56, %v10239_v42  ;;  %v10270_v56 = vld [vmem:[%s17531_s4 + $0xc8] sm:$0xff] }
 0xcd4   : > { %v6010_v38 = vmul.f32 %v6009_v62, %v6005_v46  ;;  %v6671_v46 = vld [vmem:[%s17529_s1 + $0x48] sm:$0xff]  ;;  %v13898_v62 = vpack.c.bf16 %v10242_v16, %v10241_v58  ;;  %v10276_v16 = vld [vmem:[%s17531_s4 + $0xf8] sm:$0xff] }
 0xcd5   : > { %v13922_v25 = vpack.c.bf16 %v6671_v46, %v6670_v36  ;;  %v10274_v58 = vld [vmem:[%s17531_s4 + $0xe8] sm:$0xff] }
 0xcd6   : > { %v6108_v22 = vadd.f32 %v6107_v63, %v6010_v38  ;;  %v10244_v63 = vld [vmem:[%s17529_s1 + $0xd8] sm:$0xff]  ;;  %v6672_v38 = vld [vmem:[%s17529_s1 + $0x50] sm:$0xff]  ;;  %v13961_v46 = vpack.c.bf16 %v10276_v16, %v10274_v58 }
 0xcd7   : > { %v7095_v58 = vld [vmem:[%s17531_s4 + $0x58] sm:$0xff] }
 0xcd8   : > { %v6121_v32 = vsel %vm6120_vm15, %v6108_v22, 0.0  ;;  %v6281_v57 = vsel %vm6280_vm0, %v6108_v22, 0.0  ;;  %v6111_v19 = vsel %vm6110_vm9, %v6108_v22, 0.0  ;;  %v6279_v60 = vsel %vm6278_vm14, %v6108_v22, 0.0  ;;  %v6673_v22 = vld [vmem:[%s17529_s1 + $0x58] sm:$0xff] }
 0xcd9   : > { %12678 = vmatmul.mubr.msk.f32.vlgmr.msra.gmra.mrb[46].mxu1 %vm5316_vm10, %v6121_v32  ;;  %12716 = vmatmul.mubr.msk.f32.vlgmr.msra.gmra.mrb[52].mxu0 %vm5316_vm10, %v6281_v57  ;;  %vm6430_vm15 = vcmask 15360   ;;  %vm6585_vm0 = vcmask 31744   ;;  %v13925_v48 = vpack.c.bf16 %v6673_v22, %v6672_v38  ;;  %v10246_v32 = vld [vmem:[%s17529_s1 + $0xe8] sm:$0xff]  ;;  %v6674_v57 = vld [vmem:[%s17529_s1 + $0x60] sm:$0xff]  ;;  %v10280_v38 = vld [vmem:[%s17531_s4 + $0x118] sm:$0xff]  ;;  %vm7287_vm9 = vcmp.eq.s32.totalorder %v16014_v11, 3 }
 0xcda   : > { %13851 = vmatpush3.bf16.msra.mxu1 %v13850_v26  ;;  %13875 = vmatpush3.bf16.msra.mxu0 %v13850_v26  ;;  %v13901_v26 = vpack.c.bf16 %v10244_v63, %v10243_v30  ;;  %v10278_v63 = vld [vmem:[%s17531_s4 + $0x108] sm:$0xff]  ;;  %vm7082_vm14 = vcmp.eq.s32.totalorder %v16014_v11, 0 }
 0xcdb   : > { %13852 = vmatprep.subr.bf16.mxu1 %v14810_v17  ;;  %13876 = vmatprep.subr.bf16.mxu0 %v14810_v17  ;;  %v13965_v22 = vpack.c.bf16 %v10280_v38, %v10278_v63  ;;  %v7099_v63 = vld [vmem:[%s17531_s4 + $0x78] sm:$0xff] }
 0xcdc   : > { %12696 = vmatprep.mubr.msk.f32.mxu1 %vm14811_vm5, %v14812_v18  ;;  %12734 = vmatprep.mubr.msk.f32.mxu0 %vm14811_vm5, %v14812_v18 }
 0xcde   : > { %13854 = vmatpush3.bf16.msra.mxu1 %v13853_v52  ;;  %13878 = vmatpush3.bf16.msra.mxu0 %v13853_v52 }
 0xcdf   : > { %13855 = vmatprep.subr.bf16.mxu1 %v14810_v17  ;;  %13879 = vmatprep.subr.bf16.mxu0 %v14810_v17 }
 0xce2   : > { %13857 = vmatpush3.bf16.msra.mxu1 %v13856_v31  ;;  %13881 = vmatpush3.bf16.msra.mxu0 %v13856_v31  ;;  %v6676_v31 = vld [vmem:[%s17529_s1 + $0x70] sm:$0xff] }
 0xce3   : > { %13858 = vmatprep.subr.bf16.mxu1 %v14810_v17  ;;  %13882 = vmatprep.subr.bf16.mxu0 %v14810_v17 }
 0xce6   : > { %13860 = vmatpush3.bf16.msra.mxu1 %v13859_v4  ;;  %13884 = vmatpush3.bf16.msra.mxu0 %v13859_v4  ;;  %v13931_v4 = vpack.c.bf16 %v6677_v49, %v6676_v31  ;;  %v10288_v31 = vld [vmem:[%s17531_s4 + $0x158] sm:$0xff] }
 0xce7   : > { %12737 = vmatprep.subr.mxu1 %v14812_v18  ;;  %12747 = vmatprep.subr.mxu0 %v14812_v18  ;;  %v13973_v49 = vpack.c.bf16 %v10288_v31, %v10286_v53  ;;  %v7107_v53 = vld [vmem:[%s17531_s4 + $0xb8] sm:$0xff] }
 0xce9   : > { %12697 = vmatmul.mubr.msk.f32.vlgmr.msra.gmra.mrb[46].mxu1 %vm5316_vm10, %v6111_v19  ;;  %12735 = vmatmul.mubr.msk.f32.vlgmr.msra.gmra.mrb[52].mxu0 %vm5316_vm10, %v6279_v60  ;;  %v6675_v19 = vld [vmem:[%s17529_s1 + $0x68] sm:$0xff]  ;;  %v13904_v60 = vpack.c.bf16 %v10246_v32, %v10245_v45 }
 0xcea   : > { %12739 = vmatprep.mubr.msk.f32.mxu1 %vm14811_vm5, %v14812_v18  ;;  %12749 = vmatprep.mubr.msk.f32.mxu0 %vm14811_vm5, %v14812_v18  ;;  %v13928_v52 = vpack.c.bf16 %v6675_v19, %v6674_v57  ;;  %v10282_v32 = vld [vmem:[%s17531_s4 + $0x128] sm:$0xff]  ;;  %v10284_v57 = vld [vmem:[%s17531_s4 + $0x138] sm:$0xff] }
 0xceb   : > { %v13969_v19 = vpack.c.bf16 %v10284_v57, %v10282_v32  ;;  %v7103_v32 = vld [vmem:[%s17531_s4 + $0x98] sm:$0xff] }
 0xdbc   : > { %v6273_v39 = vpop.f32.mrb[46].mxu1  ;;  %v6424_v23 = vpop.f32.mrb[52].mxu0 }
 0xdbd   : > { %v12698_v61 = vpop.f32.mrb[47].mxu1  ;;  %v12736_v40 = vpop.f32.mrb[53].mxu0  ;;  %12738 = vmatpush3.msk.msra.mxu1 %vm6434_vm11, %v6424_v23 }
 0xdbe   : > { %12740 = vmatmul.mubr.msk.f32.vlgmr.msra.gmra.mrb[48].mxu1 %vm6430_vm15, %v10223_v28  ;;  %12742 = vmatprep.subr.mxu1 %v14812_v18  ;;  %v10252_v28 = vld [vmem:[%s17529_s1 + $0x100] sm:$0xff] }
 0xdbf   : > { %12743 = vmatpush3.msk.msra.mxu1 %vm6434_vm11, %v6273_v39  ;;  %12744 = vmatprep.mubr.msk.f32.mxu1 %vm14811_vm5, %v14812_v18  ;;  %v10253_v39 = vld [vmem:[%s17529_s1 + $0x108] sm:$0xff]  ;;  %vm7285_vm11 = vcmp.eq.s32.totalorder %v16014_v11, 2 }
 0xdc0   : > { %12752 = vmatprep.subr.mxu1 %v14812_v18  ;;  %v13934_v23 = vpack.c.bf16 %v10253_v39, %v10252_v28 }
 0xdc6   : > { %12745 = vmatmul.mubr.msk.f32.vlgmr.msra.gmra.mrb[48].mxu1 %vm6430_vm15, %v6277_v12  ;;  %v10254_v12 = vld [vmem:[%s17529_s1 + $0x110] sm:$0xff]  ;;  %vm8451_vm15 = vcmp.eq.s32.totalorder %v15589_v21, 3 }
 0xdc7   : > { %12754 = vmatprep.mubr.msk.f32.mxu1 %vm14811_vm5, %v14812_v18 }
 0xe99   : > { %v16636_v15 = vpop.f32.mrb[48].mxu1 }
 0xe9a   : > { %v12746_v55 = vpop.f32.mrb[49].mxu1  ;;  %12748 = vmatpush3.msk.msra.mxu0 %vm5563_vm8, %v16636_v15  ;;  %12753 = vmatpush3.msk.msra.mxu1 %vm5563_vm8, %v16636_v15 }
 0xe9b   : > { %12750 = vmatmul.mubr.msk.f32.vlgmr.msra.gmra.mrb[54].mxu0 %vm6585_vm0, %v6584_v10  ;;  %12755 = vmatmul.mubr.msk.f32.vlgmr.msra.gmra.mrb[50].mxu1 %vm6585_vm0, %v10230_v14  ;;  %v13937_v10 = vpack.c.bf16 %v10255_v33, %v10254_v12  ;;  %v10256_v14 = vld [vmem:[%s17529_s1 + $0x120] sm:$0xff]  ;;  %v10287_v33 = vld [vmem:[%s17531_s4 + $0x150] sm:$0xff] }
 0xe9c   : > { %13885 = vmatprep.subr.bf16.mxu0 %v14810_v17  ;;  %13909 = vmatprep.subr.bf16.mxu1 %v14810_v17  ;;  %v10285_v12 = vld [vmem:[%s17531_s4 + $0x140] sm:$0xff] }
 0xe9d   : > { %13887 = vmatpush3.bf16.msra.mxu0 %v13886_v35  ;;  %13911 = vmatpush3.bf16.msra.mxu1 %v13910_v2  ;;  %v10257_v35 = vld [vmem:[%s17529_s1 + $0x128] sm:$0xff]  ;;  %v10258_v2 = vld [vmem:[%s17529_s1 + $0x130] sm:$0xff] }
 0xe9e   : > { %13888 = vmatprep.subr.bf16.mxu0 %v14810_v17  ;;  %13912 = vmatprep.subr.bf16.mxu1 %v14810_v17  ;;  %v13943_v55 = vpack.c.bf16 %v10259_v37, %v10258_v2  ;;  %v7085_v2 = vld [vmem:[%s17531_s4 + $0x8] sm:$0xff]  ;;  %v7087_v37 = vld [vmem:[%s17531_s4 + $0x18] sm:$0xff] }
 0xe9f   : > { %12789 = vmatprep.mubr.msk.f32.mxu0 %vm14811_vm5, %v14812_v18  ;;  %12824 = vmatprep.mubr.msk.f32.mxu1 %vm14811_vm5, %v14812_v18 }
 0xea1   : > { %13890 = vmatpush3.bf16.msra.mxu0 %v13889_v27  ;;  %13914 = vmatpush3.bf16.msra.mxu1 %v13913_v1  ;;  %v10262_v27 = vld [vmem:[%s17529_s1 + $0x150] sm:$0xff]  ;;  %v10263_v1 = vld [vmem:[%s17529_s1 + $0x158] sm:$0xff] }
 0xea2   : > { %13891 = vmatprep.subr.bf16.mxu0 %v14810_v17  ;;  %13915 = vmatprep.subr.bf16.mxu1 %v14810_v17  ;;  %v13949_v47 = vpack.c.bf16 %v10263_v1, %v10262_v27  ;;  %v7084_v1 = vld [vmem:[%s17531_s4] sm:$0xff] }
 0xea5   : > { %13893 = vmatpush3.bf16.msra.mxu0 %v13892_v20  ;;  %13917 = vmatpush3.bf16.msra.mxu1 %v13916_v0  ;;  %v10266_v20 = vld [vmem:[%s17529_s1 + $0x170] sm:$0xff]  ;;  %v10267_v0 = vld [vmem:[%s17529_s1 + $0x178] sm:$0xff]  ;;  %s17532_s1 = sld [smem:[#allocation14_spill]] }
 0xea6   : > { %13894 = vmatprep.subr.bf16.mxu0 %v14810_v17  ;;  %13918 = vmatprep.subr.bf16.mxu1 %v14810_v17  ;;  %v13955_v42 = vpack.c.bf16 %v10267_v0, %v10266_v20 }
 0xea9   : > { %13896 = vmatpush3.bf16.msra.mxu0 %v13895_v29  ;;  %13920 = vmatpush3.bf16.msra.mxu1 %v13919_v6  ;;  %v13957_v29 = vpack.c.bf16 %v10272_v54, %v10270_v56  ;;  %v10271_v6 = vld [vmem:[%s17531_s4 + $0xd0] sm:$0xff]  ;;  %v7088_v56 = vld [vmem:[%s17531_s4 + $0x20] sm:$0xff] }
 0xeaa   : > { %13897 = vmatprep.subr.bf16.mxu0 %v14810_v17  ;;  %13921 = vmatprep.subr.bf16.mxu1 %v14810_v17  ;;  %v13959_v36 = vpack.c.bf16 %v10271_v6, %v10269_v13  ;;  %v7090_v54 = vld [vmem:[%s17531_s4 + $0x30] sm:$0xff]  ;;  %v7093_v6 = vld [vmem:[%s17531_s4 + $0x48] sm:$0xff] }
 0xeab   : > { %v10268_v9 = vld [vmem:[%s17532_s1] ss:$0 sm:$0xff]  ;;  %s17533_s1 = sld [smem:[#allocation21_spill]] }
 0xead   : > { %13899 = vmatpush3.bf16.msra.mxu0 %v13898_v62  ;;  %13923 = vmatpush3.bf16.msra.mxu1 %v13922_v25  ;;  %v10273_v62 = vld [vmem:[%s17531_s4 + $0xe0] sm:$0xff]  ;;  %v10275_v25 = vld [vmem:[%s17531_s4 + $0xf0] sm:$0xff] }
 0xeae   : > { %13900 = vmatprep.subr.bf16.mxu0 %v14810_v17  ;;  %13924 = vmatprep.subr.bf16.mxu1 %v14810_v17  ;;  %v13963_v30 = vpack.c.bf16 %v10275_v25, %v10273_v62  ;;  %v7092_v62 = vld [vmem:[%s17531_s4 + $0x40] sm:$0xff]  ;;  %v7094_v25 = vld [vmem:[%s17531_s4 + $0x50] sm:$0xff] }
 0xeaf   : > { %v13991_v38 = vpack.c.bf16 %v7094_v25, %v7092_v62 }
 0xeb1   : > { %13902 = vmatpush3.bf16.msra.mxu0 %v13901_v26  ;;  %13926 = vmatpush3.bf16.msra.mxu1 %v13925_v48  ;;  %v10277_v26 = vld [vmem:[%s17531_s4 + $0x100] sm:$0xff]  ;;  %v10279_v48 = vld [vmem:[%s17531_s4 + $0x110] sm:$0xff] }
 0xeb2   : > { %13903 = vmatprep.subr.bf16.mxu0 %v14810_v17  ;;  %13927 = vmatprep.subr.bf16.mxu1 %v14810_v17  ;;  %v13967_v45 = vpack.c.bf16 %v10279_v48, %v10277_v26  ;;  %v7096_v26 = vld [vmem:[%s17531_s4 + $0x60] sm:$0xff]  ;;  %v7098_v48 = vld [vmem:[%s17531_s4 + $0x70] sm:$0xff] }
 0xeb3   : > { %v13995_v57 = vpack.c.bf16 %v7098_v48, %v7096_v26 }
 0xeb5   : > { %13905 = vmatpush3.bf16.msra.mxu0 %v13904_v60  ;;  %13929 = vmatpush3.bf16.msra.mxu1 %v13928_v52  ;;  %v10281_v60 = vld [vmem:[%s17531_s4 + $0x120] sm:$0xff]  ;;  %v10283_v52 = vld [vmem:[%s17531_s4 + $0x130] sm:$0xff] }
 0xeb6   : > { %13906 = vmatprep.subr.bf16.mxu0 %v14810_v17  ;;  %13930 = vmatprep.subr.bf16.mxu1 %v14810_v17  ;;  %v13971_v59 = vpack.c.bf16 %v10283_v52, %v10281_v60  ;;  %v7100_v60 = vld [vmem:[%s17531_s4 + $0x80] sm:$0xff]  ;;  %v7102_v52 = vld [vmem:[%s17531_s4 + $0x90] sm:$0xff] }
 0xeb7   : > { %v13999_v31 = vpack.c.bf16 %v7102_v52, %v7100_v60 }
 0xeb9   : > { %13908 = vmatpush3.bf16.msra.mxu0 %v13907_v50  ;;  %13932 = vmatpush3.bf16.msra.mxu1 %v13931_v4 }
 0xeba   : > { %12827 = vmatprep.subr.mxu0 %v14812_v18  ;;  %13933 = vmatprep.subr.bf16.mxu1 %v14810_v17 }
 0xf6e   : > { %v6658_v61 = vpop.f32.mrb[54].mxu0  ;;  %v6749_v40 = vpop.f32.mrb[50].mxu1 }
 0xf6f   : > { %v12756_v34 = vpop.f32.mrb[51].mxu1  ;;  %12790 = vmatmul.mubr.f32.vlgmr.msra.gmra.mrb[56].mxu0 %v6749_v40  ;;  %12825 = vmatmul.mubr.f32.vlgmr.msra.gmra.mrb[52].mxu1 %v6658_v61  ;;  %v12751_v43 = vpop.f32.mrb[55].mxu0 }
 0xf70   : > { %12828 = vmatpush3.msk.msra.mxu0 %vm5563_vm8, %v16636_v15  ;;  %12829 = vmatprep.mubr.msk.f32.mxu0 %vm14811_vm5, %v14812_v18  ;;  %v13940_v15 = vpack.c.bf16 %v10257_v35, %v10256_v14  ;;  %v13975_v34 = vpack.c.bf16 %v10287_v33, %v10285_v12  ;;  %v10290_v43 = vld [vmem:[%s17531_s4 + $0x168] sm:$0xff]  ;;  %v10289_v14 = vld [vmem:[%s17531_s4 + $0x160] sm:$0xff]  ;;  %v10291_v35 = vld [vmem:[%s17531_s4 + $0x170] sm:$0xff] }
 0xf71   : > { %13935 = vmatpush3.bf16.msra.mxu1 %v13934_v23  ;;  %12864 = vmatprep.mubr.msk.f32.mxu1 %vm14811_vm5, %v14812_v18  ;;  %vm7108_vm5 = vcmp.eq.s32.totalorder %v16014_v11, 1  ;;  %v13989_v11 = vpack.c.bf16 %v7095_v58, %v7093_v6  ;;  %v10297_v12 = vld [vmem:[%s17533_s1 + $0x10] sm:$0xff]  ;;  %v10298_v33 = vld [vmem:[%s17533_s1 + $0x18] sm:$0xf] }
 0xf72   : > { %13936 = vmatprep.subr.bf16.mxu1 %v14810_v17  ;;  %13958 = vmatprep.subr.bf16.mxu0 %v13957_v29 }
 0xf73   : > { %12830 = vmatmul.mubr.msk.f32.vlgmr.msra.gmra.mrb[58].mxu0 %vm6585_vm0, %v10249_v44  ;;  %v10292_v44 = vld [vmem:[%s17531_s4 + $0x178] sm:$0xff]  ;;  %vm8245_vm0 = vcmp.eq.s32.totalorder %v15587_v3, 1 }
 0xf74   : > { %7202 = vmatprep.mubr.f32.mxu0 %v14812_v18  ;;  %13960 = vmatpush1.bf16.msra.mxu0 %v13959_v36 }
 0xf75   : > { %13938 = vmatpush3.bf16.msra.mxu1 %v13937_v10  ;;  %13962 = vmatprep.subr.bf16.mxu0 %v13961_v46  ;;  %v13977_v10 = vpack.c.bf16 %v10292_v44, %v10290_v43  ;;  %v7284_v43 = vld [vmem:[%s17533_s1 + $0x8] sm:$0xf] }
 0xf76   : > { %13939 = vmatprep.subr.bf16.mxu1 %v14810_v17 }
 0xf78   : > { %13964 = vmatpush1.bf16.msra.mxu0 %v13963_v30 }
 0xf79   : > { %13941 = vmatpush3.bf16.msra.mxu1 %v13940_v15  ;;  %13966 = vmatprep.subr.bf16.mxu0 %v13965_v22  ;;  %v13979_v15 = vpack.c.bf16 %v10291_v35, %v10289_v14 }
 0xf7a   : > { %13942 = vmatprep.subr.bf16.mxu1 %v14810_v17 }
 0xf7c   : > { %13968 = vmatpush1.bf16.msra.mxu0 %v13967_v45 }
 0xf7d   : > { %13944 = vmatpush3.bf16.msra.mxu1 %v13943_v55  ;;  %13970 = vmatprep.subr.bf16.mxu0 %v13969_v19  ;;  %v13981_v55 = vpack.c.bf16 %v7087_v37, %v7085_v2 }
 0xf7e   : > { %13945 = vmatprep.subr.bf16.mxu1 %v14810_v17 }
 0xf80   : > { %13972 = vmatpush1.bf16.msra.mxu0 %v13971_v59 }
 0xf81   : > { %13947 = vmatpush3.bf16.msra.mxu1 %v13946_v24  ;;  %13974 = vmatprep.subr.bf16.mxu0 %v13973_v49 }
 0xf82   : > { %13948 = vmatprep.subr.bf16.mxu1 %v14810_v17 }
 0xf84   : > { %13976 = vmatpush1.bf16.msra.mxu0 %v13975_v34 }
 0xf85   : > { %13950 = vmatpush3.bf16.msra.mxu1 %v13949_v47  ;;  %13978 = vmatprep.subr.bf16.mxu0 %v13977_v10  ;;  %v7086_v47 = vld [vmem:[%s17531_s4 + $0x10] sm:$0xff] }
 0xf86   : > { %13951 = vmatprep.subr.bf16.mxu1 %v14810_v17  ;;  %v13983_v0 = vpack.c.bf16 %v7086_v47, %v7084_v1 }
 0xf88   : > { %13980 = vmatpush1.bf16.msra.mxu0 %v13979_v15 }
 0xf89   : > { %13953 = vmatpush3.bf16.msra.mxu1 %v13952_v5  ;;  %13982 = vmatprep.subr.bf16.mxu0 %v13981_v55  ;;  %v7091_v5 = vld [vmem:[%s17531_s4 + $0x38] sm:$0xff] }
 0xf8a   : > { %13954 = vmatprep.subr.bf16.mxu1 %v14810_v17 }
 0xf8d   : > { %13956 = vmatpush3.bf16.msra.mxu1 %v13955_v42  ;;  %v13985_v42 = vpack.c.bf16 %v7091_v5, %v7089_v51 }
 0xf8e   : > { %14006 = vmatprep.subr.bf16.mxu1 %v13957_v29 }
0x1042   : > { %v6836_v50 = vpop.f32.mrb[56].mxu0  ;;  %v6906_v4 = vpop.f32.mrb[52].mxu1 }
0x1043   : > { %v6907_v28 = vadd.f32 %v6906_v4, %v6836_v50  ;;  %v12791_v39 = vpop.f32.mrb[57].mxu0  ;;  %v12826_v23 = vpop.f32.mrb[53].mxu1  ;;  %v7104_v50 = vld [vmem:[%s17531_s4 + $0xa0] sm:$0xff]  ;;  %v7106_v4 = vld [vmem:[%s17531_s4 + $0xb0] sm:$0xff] }
0x1046   : > { %v6981_v61 = vpop.f32.mrb[58].mxu0 }
0x1047   : > { %v12831_v40 = vpop.f32.mrb[59].mxu0  ;;  %12865 = vmatmul.mubr.f32.vlgmr.msra.gmra.mrb[54].mxu1 %v6981_v61 }
0x1048   : > { %14008 = vmatpush1.bf16.msra.mxu1 %v13959_v36  ;;  %7356 = vmatprep.mubr.f32.mxu1 %v14812_v18 }
0x1049   : > { %14010 = vmatprep.subr.bf16.mxu1 %v13961_v46  ;;  %v13987_v46 = vpack.c.bf16 %v7090_v54, %v7088_v56 }
0x104c   : > { %14012 = vmatpush1.bf16.msra.mxu1 %v13963_v30  ;;  %v7097_v30 = vld [vmem:[%s17531_s4 + $0x68] sm:$0xff] }
0x104d   : > { %14014 = vmatprep.subr.bf16.mxu1 %v13965_v22  ;;  %v13993_v22 = vpack.c.bf16 %v7099_v63, %v7097_v30 }
0x1050   : > { %14016 = vmatpush1.bf16.msra.mxu1 %v13967_v45  ;;  %v7101_v45 = vld [vmem:[%s17531_s4 + $0x88] sm:$0xff] }
0x1051   : > { %14018 = vmatprep.subr.bf16.mxu1 %v13969_v19  ;;  %v13997_v19 = vpack.c.bf16 %v7103_v32, %v7101_v45 }
0x1054   : > { %14020 = vmatpush1.bf16.msra.mxu1 %v13971_v59  ;;  %v7105_v59 = vld [vmem:[%s17531_s4 + $0xa8] sm:$0xff]  ;;  %s17534_s4 = sld [smem:[#allocation23_spill]] }
0x1055   : > { %14022 = vmatprep.subr.bf16.mxu1 %v13973_v49  ;;  %v14001_v49 = vpack.c.bf16 %v7107_v53, %v7105_v59 }
0x1058   : > { %14024 = vmatpush1.bf16.msra.mxu1 %v13975_v34  ;;  %v7283_v34 = vld [vmem:[%s17533_s1] sm:$0xff]  ;;  %s17535_s1 = sld [smem:[#allocation22_spill]] }
0x1059   : > { %14026 = vmatprep.subr.bf16.mxu1 %v13977_v10 }
0x105a   : > { %v7710_v44 = vld [vmem:[%s17534_s4] sm:$0xff]  ;;  %v7711_v10 = vld [vmem:[%s17534_s4 + $0x8] sm:$0xff]  ;;  %v7712_v14 = vld [vmem:[%s17534_s4 + $0x10] sm:$0xff] }
0x105b   : > { %v14102_v35 = vpack.c.bf16 %v7711_v10, %v7710_v44  ;;  %v7714_v37 = vld [vmem:[%s17534_s4 + $0x20] sm:$0xff]  ;;  %v7719_v47 = vld [vmem:[%s17534_s4 + $0x48] sm:$0xff]  ;;  %v7720_v51 = vld [vmem:[%s17534_s4 + $0x50] sm:$0xff] }
0x105c   : > { %14028 = vmatpush1.bf16.msra.mxu1 %v13979_v15  ;;  %v7713_v15 = vld [vmem:[%s17534_s4 + $0x18] sm:$0xff]  ;;  %v7718_v1 = vld [vmem:[%s17534_s4 + $0x40] sm:$0xff]  ;;  %v7724_v54 = vld [vmem:[%s17534_s4 + $0x70] sm:$0xff] }
0x105d   : > { %14030 = vmatprep.subr.bf16.mxu1 %v13981_v55  ;;  %v14105_v2 = vpack.c.bf16 %v7713_v15, %v7712_v14  ;;  %v7715_v55 = vld [vmem:[%s17534_s4 + $0x28] sm:$0xff]  ;;  %v7721_v5 = vld [vmem:[%s17534_s4 + $0x58] sm:$0xff]  ;;  %v7726_v6 = vld [vmem:[%s17534_s4 + $0x80] sm:$0xff] }
0x105e   : > { %v7727_v58 = vld [vmem:[%s17534_s4 + $0x88] sm:$0xff]  ;;  %v7730_v62 = vld [vmem:[%s17534_s4 + $0xa0] sm:$0xff]  ;;  %v10311_v59 = vld [vmem:[%s17535_s1 + $0x10] sm:$0xff] }
0x105f   : > { %v7731_v25 = vld [vmem:[%s17534_s4 + $0xa8] sm:$0xff]  ;;  %v10317_v60 = vld [vmem:[%s17534_s4 + $0xc0] sm:$0xff]  ;;  %v10327_v44 = vld [vmem:[%s17534_s4 + $0x110] sm:$0xff] }
0x1060   : > { %v14132_v30 = vpack.c.bf16 %v7731_v25, %v7730_v62  ;;  %v10318_v52 = vld [vmem:[%s17534_s4 + $0xc8] sm:$0xff]  ;;  %v10328_v10 = vld [vmem:[%s17534_s4 + $0x118] sm:$0xff] }
0x1061   : > { %v14066_v53 = vpack.c.bf16 %v10318_v52, %v10317_v60  ;;  %v14081_v14 = vpack.c.bf16 %v10328_v10, %v10327_v44  ;;  %v10330_v15 = vld [vmem:[%s17534_s4 + $0x128] sm:$0xff]  ;;  %v10354_v62 = vld [vmem:[%s17534_s4 + $0x198] sm:$0xff]  ;;  %v10367_v44 = vld [vmem:[%s17534_s4 + $0x200] sm:$0xff] }
0x1062   : > { %v10358_v60 = vld [vmem:[%s17534_s4 + $0x1b8] sm:$0xff]  ;;  %v10368_v10 = vld [vmem:[%s17534_s4 + $0x208] sm:$0xff] }
0x111a   : > { %v7068_v7 = vpop.f32.mrb[54].mxu1 }
0x111b   : > { %v7072_v24 = vadd.f32 %v7068_v7, %v6907_v28  ;;  %v12866_v27 = vpop.f32.mrb[55].mxu1  ;;  %v14003_v28 = vpack.c.bf16 %v7106_v4, %v7104_v50  ;;  %v7716_v7 = vld [vmem:[%s17534_s4 + $0x30] sm:$0xff]  ;;  %v10312_v50 = vld [vmem:[%s17535_s1 + $0x18] sm:$0x3f] }
0x111d   : > { %v7079_v41 = vadd.f32 %v10268_v9, %v7072_v24  ;;  %v14108_v9 = vpack.c.bf16 %v7715_v55, %v7714_v37  ;;  %v7717_v24 = vld [vmem:[%s17534_s4 + $0x38] sm:$0xff]  ;;  %v10331_v37 = vld [vmem:[%s17534_s4 + $0x130] sm:$0xff] }
0x111e   : > { %v14111_v27 = vpack.c.bf16 %v7717_v24, %v7716_v7  ;;  %v10332_v55 = vld [vmem:[%s17534_s4 + $0x138] sm:$0xff]  ;;  %v10333_v7 = vld [vmem:[%s17534_s4 + $0x140] sm:$0xff]  ;;  %v10334_v24 = vld [vmem:[%s17534_s4 + $0x148] sm:$0xff] }
0x111f   : > { %v7080_v20 = vmax.f32 %v7079_v41, 0.0  ;;  %v14114_v41 = vpack.c.bf16 %v7719_v47, %v7718_v1  ;;  %v10335_v1 = vld [vmem:[%s17534_s4 + $0x150] sm:$0xff]  ;;  %v10336_v47 = vld [vmem:[%s17534_s4 + $0x158] sm:$0xff] }
0x1121   : > { %v7109_v13 = vsel %vm7108_vm5, %v7080_v20, 0.0  ;;  %v7288_v29 = vsel %vm7287_vm9, %v7080_v20, 0.0  ;;  %v7083_v16 = vsel %vm7082_vm14, %v7080_v20, 0.0  ;;  %v7286_v36 = vsel %vm7285_vm11, %v7080_v20, 0.0 }
0x1122   : > { %10293 = vmatmul.mubr.msk.f32.vlgmr.msra.gmra.mrb[60].mxu0 %vm4363_vm7, %v7109_v13  ;;  %10295 = vmatmul.mubr.msk.f32.vlgmr.msra.gmra.mrb[56].mxu1 %vm4363_vm7, %v7288_v29  ;;  %v14117_v20 = vpack.c.bf16 %v7721_v5, %v7720_v51  ;;  %v7725_v13 = vld [vmem:[%s17534_s4 + $0x78] sm:$0xff]  ;;  %v10337_v51 = vld [vmem:[%s17534_s4 + $0x160] sm:$0xff]  ;;  %v10338_v5 = vld [vmem:[%s17534_s4 + $0x168] sm:$0xff]  ;;  %vm8452_vm5 = vcmp.eq.s32.totalorder %v15587_v3, 3  ;;  %vm8213_vm9 = vcmp.eq.s32.totalorder %v15587_v3, 0  ;;  %vm8448_vm14 = vcmp.eq.s32.totalorder %v15587_v3, 2 }
0x1123   : > { %13984 = vmatpush1.bf16.msra.mxu0 %v13983_v0  ;;  %14032 = vmatpush1.bf16.msra.mxu1 %v13983_v0  ;;  %v7722_v0 = vld [vmem:[%s17534_s4 + $0x60] sm:$0xff]  ;;  %v14123_v29 = vpack.c.bf16 %v7725_v13, %v7724_v54  ;;  %v7732_v54 = vld [vmem:[%s17534_s4 + $0xb0] sm:$0xff]  ;;  %v7733_v13 = vld [vmem:[%s17534_s4 + $0xb8] sm:$0xff] }
0x1124   : > { %13986 = vmatprep.subr.bf16.mxu0 %v13985_v42  ;;  %14034 = vmatprep.subr.bf16.mxu1 %v13985_v42  ;;  %v7723_v42 = vld [vmem:[%s17534_s4 + $0x68] sm:$0xff] }
0x1125   : > { %7276 = vmatprep.mubr.f32.mxu0 %v14812_v18  ;;  %7430 = vmatprep.mubr.f32.mxu1 %v14812_v18  ;;  %v14120_v56 = vpack.c.bf16 %v7723_v42, %v7722_v0  ;;  %v10339_v0 = vld [vmem:[%s17534_s4 + $0x170] sm:$0xff]  ;;  %v10340_v42 = vld [vmem:[%s17534_s4 + $0x178] sm:$0xff] }
0x1127   : > { %13988 = vmatpush1.bf16.msra.mxu0 %v13987_v46  ;;  %14036 = vmatpush1.bf16.msra.mxu1 %v13987_v46  ;;  %v7729_v46 = vld [vmem:[%s17534_s4 + $0x98] sm:$0xff] }
0x1128   : > { %13990 = vmatprep.subr.bf16.mxu0 %v13989_v11  ;;  %14038 = vmatprep.subr.bf16.mxu1 %v13989_v11 }
0x112b   : > { %13992 = vmatpush1.bf16.msra.mxu0 %v13991_v38  ;;  %14040 = vmatpush1.bf16.msra.mxu1 %v13991_v38 }
0x112c   : > { %13994 = vmatprep.subr.bf16.mxu0 %v13993_v22  ;;  %14042 = vmatprep.subr.bf16.mxu1 %v13993_v22 }
0x112f   : > { %13996 = vmatpush1.bf16.msra.mxu0 %v13995_v57  ;;  %14044 = vmatpush1.bf16.msra.mxu1 %v13995_v57  ;;  %v7618_v57 = vld [vmem:[%s17535_s1] sm:$0xff] }
0x1130   : > { %13998 = vmatprep.subr.bf16.mxu0 %v13997_v19  ;;  %14046 = vmatprep.subr.bf16.mxu1 %v13997_v19  ;;  %v7619_v19 = vld [vmem:[%s17535_s1 + $0x8] sm:$0x3f] }
0x1133   : > { %14000 = vmatpush1.bf16.msra.mxu0 %v13999_v31  ;;  %14048 = vmatpush1.bf16.msra.mxu1 %v13999_v31  ;;  %v10319_v31 = vld [vmem:[%s17534_s4 + $0xd0] sm:$0xff] }
0x1134   : > { %14002 = vmatprep.subr.bf16.mxu0 %v14001_v49  ;;  %14050 = vmatprep.subr.bf16.mxu1 %v14001_v49  ;;  %v10320_v49 = vld [vmem:[%s17534_s4 + $0xd8] sm:$0xff] }
0x1135   : > { %v14069_v4 = vpack.c.bf16 %v10320_v49, %v10319_v31  ;;  %v10359_v31 = vld [vmem:[%s17534_s4 + $0x1c0] sm:$0xff]  ;;  %v10360_v49 = vld [vmem:[%s17534_s4 + $0x1c8] sm:$0xff] }
0x1137   : > { %14004 = vmatpush1.bf16.msra.mxu0 %v14003_v28  ;;  %14052 = vmatpush1.bf16.msra.mxu1 %v14003_v28  ;;  %v10321_v28 = vld [vmem:[%s17534_s4 + $0xe0] sm:$0xff] }
0x1138   : > { %14101 = vmatprep.subr.bf16.mxu1 %v14810_v17 }
0x113a   : > { %10294 = vmatmul.mubr.msk.f32.vlgmr.msra.gmra.mrb[60].mxu0 %vm4363_vm7, %v7083_v16  ;;  %10296 = vmatmul.mubr.msk.f32.vlgmr.msra.gmra.mrb[56].mxu1 %vm4363_vm7, %v7286_v36  ;;  %v14126_v16 = vpack.c.bf16 %v7727_v58, %v7726_v6  ;;  %v7728_v36 = vld [vmem:[%s17534_s4 + $0x90] sm:$0xff]  ;;  %v10351_v6 = vld [vmem:[%s17534_s4 + $0x180] sm:$0xff]  ;;  %v10352_v58 = vld [vmem:[%s17534_s4 + $0x188] sm:$0xff] }
0x113b   : > { %7516 = vmatprep.mubr.f32.mxu0 %v14812_v18  ;;  %14103 = vmatpush1.bf16.msra.mxu1 %v14102_v35  ;;  %v14129_v11 = vpack.c.bf16 %v7729_v46, %v7728_v36  ;;  %v10329_v35 = vld [vmem:[%s17534_s4 + $0x120] sm:$0xff]  ;;  %v14144_v36 = vpack.c.bf16 %v10352_v58, %v10351_v6 }
0x113c   : > { %14104 = vmatprep.subr.bf16.mxu1 %v14810_v17 }
0x113f   : > { %14106 = vmatpush1.bf16.msra.mxu1 %v14105_v2  ;;  %v14084_v2 = vpack.c.bf16 %v10330_v15, %v10329_v35  ;;  %v10369_v35 = vld [vmem:[%s17534_s4 + $0x210] sm:$0xff]  ;;  %v10370_v15 = vld [vmem:[%s17534_s4 + $0x218] sm:$0xff] }
0x1140   : > { %14107 = vmatprep.subr.bf16.mxu1 %v14810_v17 }
0x1143   : > { %14109 = vmatpush1.bf16.msra.mxu1 %v14108_v9  ;;  %v14087_v9 = vpack.c.bf16 %v10332_v55, %v10331_v37  ;;  %v10371_v37 = vld [vmem:[%s17534_s4 + $0x220] sm:$0xff]  ;;  %v10372_v55 = vld [vmem:[%s17534_s4 + $0x228] sm:$0xff] }
0x1144   : > { %14110 = vmatprep.subr.bf16.mxu1 %v14810_v17 }
0x1147   : > { %14112 = vmatpush1.bf16.msra.mxu1 %v14111_v27  ;;  %v14090_v27 = vpack.c.bf16 %v10334_v24, %v10333_v7  ;;  %v10373_v7 = vld [vmem:[%s17534_s4 + $0x230] sm:$0xff]  ;;  %v10374_v24 = vld [vmem:[%s17534_s4 + $0x238] sm:$0xff] }
0x1148   : > { %14113 = vmatprep.subr.bf16.mxu1 %v14810_v17 }
0x114b   : > { %14115 = vmatpush1.bf16.msra.mxu1 %v14114_v41  ;;  %v14093_v41 = vpack.c.bf16 %v10336_v47, %v10335_v1 }
0x114c   : > { %14116 = vmatprep.subr.bf16.mxu1 %v14810_v17 }
0x114f   : > { %14118 = vmatpush1.bf16.msra.mxu1 %v14117_v20  ;;  %v14096_v20 = vpack.c.bf16 %v10338_v5, %v10337_v51 }
0x1150   : > { %14119 = vmatprep.subr.bf16.mxu1 %v14810_v17 }
0x1153   : > { %14121 = vmatpush1.bf16.msra.mxu1 %v14120_v56  ;;  %v14099_v56 = vpack.c.bf16 %v10340_v42, %v10339_v0 }
0x1154   : > { %14122 = vmatprep.subr.bf16.mxu1 %v14810_v17 }
0x1157   : > { %14124 = vmatpush1.bf16.msra.mxu1 %v14123_v29  ;;  %v14135_v29 = vpack.c.bf16 %v7733_v13, %v7732_v54 }
0x1158   : > { %14125 = vmatprep.subr.bf16.mxu1 %v14810_v17 }
0x115b   : > { %14127 = vmatpush1.bf16.msra.mxu1 %v14126_v16 }
0x115c   : > { %14128 = vmatprep.subr.bf16.mxu1 %v14810_v17 }
0x115f   : > { %14130 = vmatpush1.bf16.msra.mxu1 %v14129_v11  ;;  %v10353_v11 = vld [vmem:[%s17534_s4 + $0x190] sm:$0xff] }
0x1160   : > { %14131 = vmatprep.subr.bf16.mxu1 %v14810_v17 }
0x1163   : > { %14133 = vmatpush1.bf16.msra.mxu1 %v14132_v30  ;;  %v14147_v30 = vpack.c.bf16 %v10354_v62, %v10353_v11 }
0x1164   : > { %14134 = vmatprep.subr.bf16.mxu1 %v14810_v17 }
0x1167   : > { %14136 = vmatpush1.bf16.msra.mxu1 %v14135_v29 }
0x1168   : > { %14143 = vmatprep.subr.bf16.mxu1 %v14810_v17 }
0x120d   : > { %v7278_v39 = vpop.f32.mrb[60].mxu0  ;;  %v7432_v23 = vpop.f32.mrb[56].mxu1 }
0x120e   : > { %v7280_v61 = vpop.f32.mrb[61].mxu0  ;;  %v7434_v40 = vpop.f32.mrb[57].mxu1 }
0x120f   : > { %10299 = vmatprep.subr.msk.mxu0 %vm1362_vm1, %v7434_v40  ;;  %v10324_v40 = vld [vmem:[%s17534_s4 + $0xf8] sm:$0xff] }
0x1210   : > { %10300 = vmatpush1.msk.msra.mxu0 %vm1362_vm1, %v7432_v23 }
0x1211   : > { %10301 = vmatmul.mubr.msk.f32.vlgmr.msra.gmra.mrb[62].mxu0 %vm4036_vm6, %v10297_v12  ;;  %10303 = vmatprep.subr.msk.mxu0 %vm1362_vm1, %v7280_v61  ;;  %v10323_v61 = vld [vmem:[%s17534_s4 + $0xf0] sm:$0xff] }
0x1212   : > { %10304 = vmatpush1.msk.msra.mxu0 %vm1362_vm1, %v7278_v39  ;;  %7522 = vmatprep.mubr.f32.mxu0 %v14812_v18  ;;  %vm16839_vm1 = vmpackc.low %vm5563_vm8, %vm14809_vm2  ;;  %vm7620_vm2 = vcmask 97280   ;;  %v10322_v39 = vld [vmem:[%s17534_s4 + $0xe8] sm:$0xff]  ;;  %v14075_v12 = vpack.c.bf16 %v10324_v40, %v10323_v61  ;;  %v10363_v61 = vld [vmem:[%s17534_s4 + $0x1e0] sm:$0xff]  ;;  %vm8447_vm8 = vcmp.eq.s32.totalorder %v15589_v21, 2 }
0x1213   : > { %v14072_v23 = vpack.c.bf16 %v10322_v39, %v10321_v28  ;;  %v10362_v28 = vld [vmem:[%s17534_s4 + $0x1d8] sm:$0xff]  ;;  %v10346_v39 = vld [vmem:[%s17535_s1 + $0x28] sm:$0x3f] }
0x1214   : > { %v10364_v40 = vld [vmem:[%s17534_s4 + $0x1e8] sm:$0xff] }
0x1215   : > { %10302 = vmatmul.mubr.msk.f32.gmra.mrb[64].mxu0 %vm4036_vm6, %v10298_v33  ;;  %v10325_v33 = vld [vmem:[%s17534_s4 + $0x100] sm:$0xff] }
0x1216   : > { %7605 = vmatprep.mubr.f32.mxu0 %v14812_v18 }
0x1219   : > { %10305 = vmatmul.mubr.msk.f32.vlgmr.msra.gmra.mrb[62].mxu0 %vm4036_vm6, %v7283_v34  ;;  %v10326_v34 = vld [vmem:[%s17534_s4 + $0x108] sm:$0xff] }
0x121a   : > { %7611 = vmatprep.mubr.f32.mxu0 %v14812_v18 }
0x121d   : > { %10306 = vmatmul.mubr.msk.f32.gmra.mrb[64].mxu0 %vm4036_vm6, %v7284_v43  ;;  %v14078_v43 = vpack.c.bf16 %v10326_v34, %v10325_v33  ;;  %v10365_v33 = vld [vmem:[%s17534_s4 + $0x1f0] sm:$0xff]  ;;  %v10366_v34 = vld [vmem:[%s17534_s4 + $0x1f8] sm:$0xff]  ;;  %vm8212_vm6 = vcmp.eq.s32.totalorder %v15589_v21, 0 }
0x121e   : > { %7697 = vmatprep.mubr.f32.mxu0 %v14812_v18 }
0x12ec   : > { %v7607_v63 = vpop.f32.mrb[62].mxu0 }
0x12ed   : > { %v7609_v38 = vpop.f32.mrb[63].mxu0 }
0x12f0   : > { %v7613_v22 = vpop.f32.mrb[64].mxu0 }
0x12f1   : > { %v16843_v48 = vpack.c.bf16 %v7613_v22, %v7607_v63  ;;  %v7615_v45 = vpop.f32.mrb[65].mxu0  ;;  %v10356_v22 = vld [vmem:[%s17534_s4 + $0x1a8] sm:$0xff] }
0x12f2   : > { %v16845_v32 = vpack.c.bf16 %v7615_v45, %v7609_v38  ;;  %v10355_v38 = vld [vmem:[%s17534_s4 + $0x1a0] sm:$0xff] }
0x12f4   : > { %14055 = vmatprep.subr.msk.bf16.mxu0 %vm16839_vm1, %v16845_v32 }
0x12f5   : > { %14058 = vmatpush1.bf16.msk.msra.mxu0 %vm16839_vm1, %v16843_v48 }
0x12f6   : > { %14061 = vmatprep.subr.msk.bf16.mxu0 %vm16839_vm1, %v16845_v32 }
0x12f8   : > { %10309 = vmatmul.mubr.msk.f32.vlgmr.msra.gmra.mrb[66].mxu0 %vm7620_vm2, %v7618_v57 }
0x12f9   : > { %14064 = vmatpush1.bf16.msk.msra.mxu0 %vm16839_vm1, %v16843_v48  ;;  %7703 = vmatprep.mubr.f32.mxu0 %v14812_v18 }
0x12fa   : > { %14065 = vmatprep.subr.bf16.mxu0 %v14810_v17 }
0x12fc   : > { %10310 = vmatmul.mubr.msk.f32.gmra.mrb[68].mxu0 %vm7620_vm2, %v7619_v19  ;;  %v10357_v19 = vld [vmem:[%s17534_s4 + $0x1b0] sm:$0xff] }
0x12fd   : > { %7807 = vmatprep.mubr.f32.mxu0 %v14812_v18 }
0x1300   : > { %10315 = vmatmul.mubr.msk.f32.vlgmr.msra.gmra.mrb[70].mxu0 %vm7620_vm2, %v10311_v59  ;;  %v14153_v59 = vpack.c.bf16 %v10358_v60, %v10357_v19 }
0x1301   : > { %14067 = vmatpush1.bf16.msra.mxu0 %v14066_v53  ;;  %7813 = vmatprep.mubr.f32.mxu0 %v14812_v18 }
0x1302   : > { %14068 = vmatprep.subr.bf16.mxu0 %v14810_v17 }
0x1304   : > { %10316 = vmatmul.mubr.msk.f32.gmra.mrb[72].mxu0 %vm7620_vm2, %v10312_v50  ;;  %v10345_v50 = vld [vmem:[%s17535_s1 + $0x20] sm:$0xff]  ;;  %s17538_s1 = sld [smem:[#allocation25_spill]] }
0x1305   : > { %14070 = vmatpush1.bf16.msra.mxu0 %v14069_v4  ;;  %v10361_v4 = vld [vmem:[%s17534_s4 + $0x1d0] sm:$0xff]  ;;  %s17539_s4 = sld [smem:[#allocation19_spill]] }
0x1306   : > { %14071 = vmatprep.subr.bf16.mxu0 %v14810_v17 }
0x1309   : > { %14073 = vmatpush1.bf16.msra.mxu0 %v14072_v23  ;;  %v14159_v23 = vpack.c.bf16 %v10362_v28, %v10361_v4 }
0x130a   : > { %14074 = vmatprep.subr.bf16.mxu0 %v14810_v17  ;;  %v10379_v1 = vld [vmem:[%s17538_s1 + $0xe8] sm:$0xff]  ;;  %v10381_v47 = vld [vmem:[%s17538_s1 + $0xf8] sm:$0xff]  ;;  %v10380_v5 = vld [vmem:[%s17538_s1 + $0xf0] sm:$0xff] }
0x130b   : > { %v14179_v51 = vpack.c.bf16 %v10381_v47, %v10379_v1  ;;  %v10385_v0 = vld [vmem:[%s17538_s1 + $0x118] sm:$0xff]  ;;  %v10382_v54 = vld [vmem:[%s17538_s1 + $0x100] sm:$0xff]  ;;  %v10384_v13 = vld [vmem:[%s17538_s1 + $0x110] sm:$0xff] }
0x130c   : > { %v10387_v29 = vld [vmem:[%s17538_s1 + $0x128] sm:$0xff]  ;;  %v10389_v6 = vld [vmem:[%s17538_s1 + $0x138] sm:$0xff]  ;;  %v14185_v58 = vpack.c.bf16 %v10384_v13, %v10382_v54  ;;  %v10394_v19 = vld [vmem:[%s17538_s1 + $0x160] sm:$0xff] }
0x130d   : > { %14076 = vmatpush1.bf16.msra.mxu0 %v14075_v12  ;;  %v14162_v12 = vpack.c.bf16 %v10364_v40, %v10363_v61  ;;  %v10391_v11 = vld [vmem:[%s17538_s1 + $0x148] sm:$0xff]  ;;  %v10393_v62 = vld [vmem:[%s17538_s1 + $0x158] sm:$0xff]  ;;  %v10396_v60 = vld [vmem:[%s17538_s1 + $0x170] sm:$0xff] }
0x130e   : > { %14077 = vmatprep.subr.bf16.mxu0 %v14810_v17  ;;  %v10377_v47 = vld [vmem:[%s17539_s4] ss:$0 sm:$0xff]  ;;  %v8223_v54 = vld [vmem:[%s17538_s1 + $0x38] sm:$0xff]  ;;  %s17540_s4 = sld [smem:[#allocation26_spill]] }
0x1311   : > { %14079 = vmatpush1.bf16.msra.mxu0 %v14078_v43  ;;  %v14165_v43 = vpack.c.bf16 %v10366_v34, %v10365_v33 }
0x1312   : > { %14080 = vmatprep.subr.bf16.mxu0 %v14810_v17 }
0x1314   : > { %v8443_v8 = vld [vmem:[%s17540_s4] sm:$0xff] }
0x1315   : > { %14082 = vmatpush1.bf16.msra.mxu0 %v14081_v14  ;;  %v14168_v14 = vpack.c.bf16 %v10368_v10, %v10367_v44  ;;  %v10398_v10 = vld [vmem:[%s17538_s1 + $0x180] sm:$0xff] }
0x1316   : > { %14083 = vmatprep.subr.bf16.mxu0 %v14810_v17 }
0x1319   : > { %14085 = vmatpush1.bf16.msra.mxu0 %v14084_v2  ;;  %v14171_v2 = vpack.c.bf16 %v10370_v15, %v10369_v35  ;;  %v10403_v15 = vld [vmem:[%s17538_s1 + $0x1a8] sm:$0xff] }
0x131a   : > { %14086 = vmatprep.subr.bf16.mxu0 %v14810_v17 }
0x131d   : > { %14088 = vmatpush1.bf16.msra.mxu0 %v14087_v9  ;;  %v14174_v9 = vpack.c.bf16 %v10372_v55, %v10371_v37  ;;  %v10402_v55 = vld [vmem:[%s17538_s1 + $0x1a0] sm:$0xff] }
0x131e   : > { %14089 = vmatprep.subr.bf16.mxu0 %v14810_v17 }
0x1321   : > { %14091 = vmatpush1.bf16.msra.mxu0 %v14090_v27  ;;  %v14177_v27 = vpack.c.bf16 %v10374_v24, %v10373_v7  ;;  %v8217_v24 = vld [vmem:[%s17538_s1 + $0x8] sm:$0xff] }
0x1322   : > { %14092 = vmatprep.subr.bf16.mxu0 %v14810_v17 }
0x1325   : > { %14094 = vmatpush1.bf16.msra.mxu0 %v14093_v41  ;;  %v10378_v41 = vld [vmem:[%s17538_s1 + $0xe0] sm:$0xff] }
0x1326   : > { %14095 = vmatprep.subr.bf16.mxu0 %v14810_v17  ;;  %v14181_v42 = vpack.c.bf16 %v10380_v5, %v10378_v41 }
0x1329   : > { %14097 = vmatpush1.bf16.msra.mxu0 %v14096_v20  ;;  %v10383_v20 = vld [vmem:[%s17538_s1 + $0x108] sm:$0xff] }
0x132a   : > { %14098 = vmatprep.subr.bf16.mxu0 %v14810_v17 }
0x132d   : > { %14100 = vmatpush1.bf16.msra.mxu0 %v14099_v56  ;;  %v14183_v56 = vpack.c.bf16 %v10385_v0, %v10383_v20  ;;  %v8216_v20 = vld [vmem:[%s17538_s1] sm:$0xff]  ;;  %v8218_v0 = vld [vmem:[%s17538_s1 + $0x10] sm:$0xff] }
0x132e   : > { %14139 = vmatprep.subr.msk.bf16.mxu0 %vm16839_vm1, %v16845_v32  ;;  %v14150_v32 = vpack.c.bf16 %v10356_v22, %v10355_v38  ;;  %v10392_v38 = vld [vmem:[%s17538_s1 + $0x150] sm:$0xff]  ;;  %v10395_v22 = vld [vmem:[%s17538_s1 + $0x168] sm:$0xff] }
0x13cb   : > { %v7699_v16 = vpop.f32.mrb[66].mxu0 }
0x13cc   : > { %v7701_v46 = vpop.f32.mrb[67].mxu0 }
0x13cd   : > { %10343 = vmatprep.mubr.msk.f32.mxu1 %vm5316_vm10, %v7701_v46  ;;  %v10388_v46 = vld [vmem:[%s17538_s1 + $0x130] sm:$0xff] }
0x13ce   : > { %7997 = vmatmul.mubr.f32.vlgmr.msra.gmra.mrb[58].mxu1 %v7699_v16  ;;  %v14187_v16 = vpack.c.bf16 %v10389_v6, %v10387_v29 }
0x13cf   : > { %v7705_v25 = vpop.f32.mrb[68].mxu0  ;;  %14145 = vmatpush1.bf16.msra.mxu1 %v14144_v36  ;;  %v10386_v36 = vld [vmem:[%s17538_s1 + $0x120] sm:$0xff] }
0x13d0   : > { %v7707_v63 = vpop.f32.mrb[69].mxu0  ;;  %14146 = vmatprep.subr.bf16.mxu1 %v14810_v17 }
0x13d1   : > { %10344 = vmatprep.mubr.msk.f32.mxu1 %vm5316_vm10, %v7707_v63  ;;  %v10390_v63 = vld [vmem:[%s17538_s1 + $0x140] sm:$0xff] }
0x13d2   : > { %8002 = vmatmul.mubr.f32.gmra.mrb[60].mxu1 %v7705_v25  ;;  %v14189_v25 = vpack.c.bf16 %v10388_v46, %v10386_v36  ;;  %v8220_v46 = vld [vmem:[%s17538_s1 + $0x20] sm:$0xff] }
0x13d3   : > { %v7809_v45 = vpop.f32.mrb[70].mxu0  ;;  %14148 = vmatpush1.bf16.msra.mxu1 %v14147_v30  ;;  %v14191_v30 = vpack.c.bf16 %v10393_v62, %v10391_v11  ;;  %v8222_v11 = vld [vmem:[%s17538_s1 + $0x30] sm:$0xff] }
0x13d4   : > { %v7811_v57 = vpop.f32.mrb[71].mxu0  ;;  %14149 = vmatprep.subr.bf16.mxu1 %v14810_v17 }
0x13d5   : > { %10341 = vmatprep.mubr.msk.f32.mxu0 %vm5316_vm10, %v7811_v57 }
0x13d6   : > { %7916 = vmatmul.mubr.f32.vlgmr.msra.gmra.mrb[74].mxu0 %v7809_v45  ;;  %v10397_v45 = vld [vmem:[%s17538_s1 + $0x178] sm:$0xff] }
0x13d7   : > { %14142 = vmatpush1.bf16.msk.msra.mxu0 %vm16839_vm1, %v16843_v48  ;;  %v7815_v52 = vpop.f32.mrb[72].mxu0  ;;  %14151 = vmatpush1.bf16.msra.mxu1 %v14150_v32  ;;  %v14156_v48 = vpack.c.bf16 %v10360_v49, %v10359_v31  ;;  %v14193_v32 = vpack.c.bf16 %v10392_v38, %v10390_v63  ;;  %v14195_v57 = vpack.c.bf16 %v10397_v45, %v10395_v22  ;;  %v8225_v63 = vld [vmem:[%s17538_s1 + $0x48] sm:$0xff]  ;;  %v8227_v38 = vld [vmem:[%s17538_s1 + $0x58] sm:$0xff] }
0x13d8   : > { %v7817_v53 = vpop.f32.mrb[73].mxu0  ;;  %14152 = vmatprep.subr.bf16.mxu1 %v14810_v17  ;;  %14180 = vmatprep.subr.bf16.mxu0 %v14179_v51 }
0x13d9   : > { %10342 = vmatprep.mubr.msk.f32.mxu0 %vm5316_vm10, %v7817_v53  ;;  %v14197_v53 = vpack.c.bf16 %v10396_v60, %v10394_v19  ;;  %v8224_v19 = vld [vmem:[%s17538_s1 + $0x40] sm:$0xff]  ;;  %v8226_v60 = vld [vmem:[%s17538_s1 + $0x50] sm:$0xff] }
0x13da   : > { %7921 = vmatmul.mubr.f32.gmra.mrb[76].mxu0 %v7815_v52  ;;  %v10399_v52 = vld [vmem:[%s17538_s1 + $0x188] sm:$0xff]  ;;  %v14217_v3 = vpack.c.bf16 %v8226_v60, %v8224_v19 }
0x13db   : > { %8080 = vmatprep.mubr.f32.mxu0 %v14812_v18  ;;  %14154 = vmatpush1.bf16.msra.mxu1 %v14153_v59  ;;  %v10401_v59 = vld [vmem:[%s17538_s1 + $0x198] sm:$0xff] }
0x13dc   : > { %14155 = vmatprep.subr.bf16.mxu1 %v14810_v17  ;;  %v14199_v31 = vpack.c.bf16 %v10401_v59, %v10399_v52 }
0x13de   : > { %10349 = vmatmul.mubr.msk.f32.vlgmr.msra.gmra.mrb[78].mxu0 %vm7620_vm2, %v10345_v50 }
0x13df   : > { %8086 = vmatprep.mubr.f32.mxu0 %v14812_v18  ;;  %14157 = vmatpush1.bf16.msra.mxu1 %v14156_v48 }
0x13e0   : > { %14158 = vmatprep.subr.bf16.mxu1 %v14810_v17  ;;  %14182 = vmatpush1.bf16.msra.mxu0 %v14181_v42 }
0x13e1   : > { %14184 = vmatprep.subr.bf16.mxu0 %v14183_v56 }
0x13e2   : > { %10350 = vmatmul.mubr.msk.f32.gmra.mrb[80].mxu0 %vm7620_vm2, %v10346_v39 }
0x13e3   : > { %14160 = vmatpush1.bf16.msra.mxu1 %v14159_v23  ;;  %8347 = vmatprep.mubr.f32.mxu0 %v14812_v18 }
0x13e4   : > { %14161 = vmatprep.subr.bf16.mxu1 %v14810_v17  ;;  %14186 = vmatpush1.bf16.msra.mxu0 %v14185_v58 }
0x13e5   : > { %14188 = vmatprep.subr.bf16.mxu0 %v14187_v16 }
0x13e7   : > { %14163 = vmatpush1.bf16.msra.mxu1 %v14162_v12 }
0x13e8   : > { %14164 = vmatprep.subr.bf16.mxu1 %v14810_v17  ;;  %14190 = vmatpush1.bf16.msra.mxu0 %v14189_v25 }
0x13e9   : > { %14192 = vmatprep.subr.bf16.mxu0 %v14191_v30 }
0x13eb   : > { %14166 = vmatpush1.bf16.msra.mxu1 %v14165_v43 }
0x13ec   : > { %14167 = vmatprep.subr.bf16.mxu1 %v14810_v17  ;;  %14194 = vmatpush1.bf16.msra.mxu0 %v14193_v32 }
0x13ed   : > { %14196 = vmatprep.subr.bf16.mxu0 %v14195_v57 }
0x13ef   : > { %14169 = vmatpush1.bf16.msra.mxu1 %v14168_v14  ;;  %v10400_v14 = vld [vmem:[%s17538_s1 + $0x190] sm:$0xff] }
0x13f0   : > { %14170 = vmatprep.subr.bf16.mxu1 %v14810_v17  ;;  %14198 = vmatpush1.bf16.msra.mxu0 %v14197_v53  ;;  %v14201_v35 = vpack.c.bf16 %v10400_v14, %v10398_v10  ;;  %v8236_v14 = vld [vmem:[%s17538_s1 + $0xa0] sm:$0xff] }
0x13f1   : > { %14200 = vmatprep.subr.bf16.mxu0 %v14199_v31 }
0x13f3   : > { %14172 = vmatpush1.bf16.msra.mxu1 %v14171_v2  ;;  %v10405_v2 = vld [vmem:[%s17538_s1 + $0x1b8] sm:$0xff] }
0x13f4   : > { %14173 = vmatprep.subr.bf16.mxu1 %v14810_v17  ;;  %14202 = vmatpush1.bf16.msra.mxu0 %v14201_v35  ;;  %v14203_v37 = vpack.c.bf16 %v10405_v2, %v10403_v15  ;;  %v8241_v15 = vld [vmem:[%s17538_s1 + $0xc8] sm:$0xff]  ;;  %v8243_v2 = vld [vmem:[%s17538_s1 + $0xd8] sm:$0xff] }
0x13f6   : > { %14204 = vmatprep.subr.bf16.mxu0 %v14203_v37 }
0x13f7   : > { %14175 = vmatpush1.bf16.msra.mxu1 %v14174_v9  ;;  %v10404_v9 = vld [vmem:[%s17538_s1 + $0x1b0] sm:$0xff] }
0x13f8   : > { %14176 = vmatprep.subr.bf16.mxu1 %v14810_v17  ;;  %v14205_v7 = vpack.c.bf16 %v10404_v9, %v10402_v55  ;;  %v14231_v55 = vpack.c.bf16 %v8243_v2, %v8241_v15  ;;  %v8240_v9 = vld [vmem:[%s17538_s1 + $0xc0] sm:$0xff] }
0x13fa   : > { %14206 = vmatpush1.bf16.msra.mxu0 %v14205_v7 }
0x13fb   : > { %14178 = vmatpush1.bf16.msra.mxu1 %v14177_v27  ;;  %v8219_v27 = vld [vmem:[%s17538_s1 + $0x18] sm:$0xff] }
0x13fc   : > { %14236 = vmatprep.subr.bf16.mxu1 %v14179_v51  ;;  %v14207_v1 = vpack.c.bf16 %v8219_v27, %v8217_v24 }
0x13fe   : > { %14208 = vmatprep.subr.bf16.mxu0 %v14207_v1 }
0x14a1   : > { %v7998_v49 = vpop.f32.mrb[58].mxu1 }
0x14a2   : > { %v8000_v50 = vpop.f32.mrb[59].mxu1 }
0x14a5   : > { %v8003_v48 = vpop.f32.mrb[60].mxu1 }
0x14a6   : > { %v8005_v4 = vpop.f32.mrb[61].mxu1 }
0x14a7   : > { %v8228_v4 = vld [vmem:[%s17538_s1 + $0x60] sm:$0xff] }
0x14a9   : > { %v7917_v28 = vpop.f32.mrb[74].mxu0 }
0x14aa   : > { %v7999_v39 = vadd.f32 %v7998_v49, %v7917_v28  ;;  %v7919_v23 = vpop.f32.mrb[75].mxu0  ;;  %v8230_v28 = vld [vmem:[%s17538_s1 + $0x70] sm:$0xff] }
0x14ab   : > { %v8235_v23 = vld [vmem:[%s17538_s1 + $0x98] sm:$0xff] }
0x14ad   : > { %v7922_v61 = vpop.f32.mrb[76].mxu0 }
0x14ae   : > { %v8004_v40 = vadd.f32 %v8003_v48, %v7922_v61  ;;  %v7924_v12 = vpop.f32.mrb[77].mxu0  ;;  %v14221_v61 = vpack.c.bf16 %v8230_v28, %v8228_v4 }
0x14af   : > { %v8232_v12 = vld [vmem:[%s17538_s1 + $0x80] sm:$0xff] }
0x14b1   : > { %v8082_v33 = vpop.f32.mrb[78].mxu0 }
0x14b2   : > { %v8084_v34 = vpop.f32.mrb[79].mxu0 }
0x14b3   : > { %10375 = vmatprep.mubr.msk.f32.mxu1 %vm5316_vm10, %v8084_v34  ;;  %v8237_v34 = vld [vmem:[%s17538_s1 + $0xa8] sm:$0xff] }
0x14b4   : > { %8189 = vmatmul.mubr.f32.vlgmr.msra.gmra.mrb[62].mxu1 %v8082_v33  ;;  %v8234_v33 = vld [vmem:[%s17538_s1 + $0x90] sm:$0xff] }
0x14b5   : > { %v8088_v43 = vpop.f32.mrb[80].mxu0  ;;  %14238 = vmatpush1.bf16.msra.mxu1 %v14181_v42 }
0x14b6   : > { %v8090_v44 = vpop.f32.mrb[81].mxu0  ;;  %14240 = vmatprep.subr.bf16.mxu1 %v14183_v56  ;;  %v8221_v56 = vld [vmem:[%s17538_s1 + $0x28] sm:$0xff] }
0x14b7   : > { %10376 = vmatprep.mubr.msk.f32.mxu1 %vm5316_vm10, %v8090_v44  ;;  %vm8244_vm10 = vcmp.eq.s32.totalorder %v15589_v21, 1  ;;  %v14211_v36 = vpack.c.bf16 %v8223_v54, %v8221_v56  ;;  %v14215_v21 = vpack.c.bf16 %v8227_v38, %v8225_v63  ;;  %v14225_v44 = vpack.c.bf16 %v8234_v33, %v8232_v12 }
0x14b8   : > { %8194 = vmatmul.mubr.f32.gmra.mrb[64].mxu1 %v8088_v43  ;;  %v8239_v43 = vld [vmem:[%s17538_s1 + $0xb8] sm:$0xff] }
0x14b9   : > { %14242 = vmatpush1.bf16.msra.mxu1 %v14185_v58  ;;  %8525 = vmatprep.mubr.f32.mxu1 %v14812_v18  ;;  %v14209_v58 = vpack.c.bf16 %v8218_v0, %v8216_v20  ;;  %v14227_v10 = vpack.c.bf16 %v8239_v43, %v8237_v34 }
0x14ba   : > { %14244 = vmatprep.subr.bf16.mxu1 %v14187_v16 }
0x14bd   : > { %14246 = vmatpush1.bf16.msra.mxu1 %v14189_v25 }
0x14be   : > { %14248 = vmatprep.subr.bf16.mxu1 %v14191_v30 }
0x14c1   : > { %14250 = vmatpush1.bf16.msra.mxu1 %v14193_v32 }
0x14c2   : > { %14252 = vmatprep.subr.bf16.mxu1 %v14195_v57  ;;  %v14213_v57 = vpack.c.bf16 %v8222_v11, %v8220_v46  ;;  %v8445_v46 = vld [vmem:[%s17540_s4 + $0x10] sm:$0xff]  ;;  %v8446_v11 = vld [vmem:[%s17540_s4 + $0x18] sm:$0xf] }
0x14c5   : > { %14254 = vmatpush1.bf16.msra.mxu1 %v14197_v53  ;;  %v8229_v53 = vld [vmem:[%s17538_s1 + $0x68] sm:$0xff] }
0x14c6   : > { %14256 = vmatprep.subr.bf16.mxu1 %v14199_v31  ;;  %v8231_v31 = vld [vmem:[%s17538_s1 + $0x78] sm:$0xff] }
0x14c7   : > { %v14219_v48 = vpack.c.bf16 %v8231_v31, %v8229_v53 }
0x14c9   : > { %14258 = vmatpush1.bf16.msra.mxu1 %v14201_v35  ;;  %v8238_v35 = vld [vmem:[%s17538_s1 + $0xb0] sm:$0xff] }
0x14ca   : > { %14260 = vmatprep.subr.bf16.mxu1 %v14203_v37  ;;  %v14229_v37 = vpack.c.bf16 %v8238_v35, %v8236_v14 }
0x14cd   : > { %14262 = vmatpush1.bf16.msra.mxu1 %v14205_v7  ;;  %v8242_v7 = vld [vmem:[%s17538_s1 + $0xd0] sm:$0xff] }
0x14ce   : > { %14264 = vmatprep.subr.bf16.mxu1 %v14207_v1  ;;  %v14233_v24 = vpack.c.bf16 %v8242_v7, %v8240_v9 }
0x1587   : > { %v8190_v41 = vpop.f32.mrb[62].mxu1 }
0x1588   : > { %v8199_v51 = vadd.f32 %v8190_v41, %v7999_v39  ;;  %v8192_v5 = vpop.f32.mrb[63].mxu1  ;;  %v8233_v39 = vld [vmem:[%s17538_s1 + $0x88] sm:$0xff]  ;;  %s17541_s1 = sld [smem:[#allocation28_spill]] }
0x158a   : > { %v8207_v42 = vadd.f32 %v10377_v47, %v8199_v51 }
0x158b   : > { %v8195_v13 = vpop.f32.mrb[64].mxu1 }
0x158c   : > { %v8209_v29 = vmax.f32 %v8207_v42, 0.0  ;;  %v8200_v6 = vadd.f32 %v8195_v13, %v8004_v40  ;;  %v8197_v16 = vpop.f32.mrb[65].mxu1  ;;  %v14223_v40 = vpack.c.bf16 %v8235_v23, %v8233_v39 }
0x158d   : > { %v10417_v16 = vld [vmem:[%s17540_s4 + $0x38] sm:$0xf] }
0x158e   : > { %v8208_v62 = vadd.f32 %v10377_v47, %v8200_v6  ;;  %v8246_v25 = vsel %vm8244_vm10, %v8209_v29, 0.0  ;;  %v8453_v30 = vsel %vm8451_vm15, %v8209_v29, 0.0  ;;  %v17009_v22 = vsel %vm8212_vm6, %v8209_v29, 0.0  ;;  %v10415_v6 = vld [vmem:[%s17540_s4 + $0x28] sm:$0xff]  ;;  %v8952_v53 = vld [vmem:[%s17541_s1] sm:$0xff]  ;;  %v10449_v4 = vld [vmem:[%s17541_s1 + $0xf8] sm:$0xff] }
0x158f   : > { %10406 = vmatmul.mubr.msk.f32.vlgmr.msra.gmra.mrb[82].mxu0 %vm3094_vm13, %v8246_v25  ;;  %10410 = vmatmul.mubr.msk.f32.vlgmr.msra.gmra.mrb[66].mxu1 %vm3094_vm13, %v8453_v30  ;;  %v17013_v45 = vsel %vm8447_vm8, %v8209_v29, 0.0  ;;  %v10414_v29 = vld [vmem:[%s17540_s4 + $0x20] sm:$0xff]  ;;  %v8953_v31 = vld [vmem:[%s17541_s1 + $0x8] sm:$0xff]  ;;  %v8954_v33 = vld [vmem:[%s17541_s1 + $0x10] sm:$0xff] }
0x1590   : > { %v8210_v32 = vmax.f32 %v8208_v62, 0.0  ;;  %14210 = vmatpush1.bf16.msra.mxu0 %v14209_v58  ;;  %14266 = vmatpush1.bf16.msra.mxu1 %v14209_v58  ;;  %v10416_v58 = vld [vmem:[%s17540_s4 + $0x30] sm:$0xff]  ;;  %v14366_v28 = vpack.c.bf16 %v8953_v31, %v8952_v53  ;;  %v10451_v12 = vld [vmem:[%s17541_s1 + $0x108] sm:$0xff]  ;;  %v8955_v34 = vld [vmem:[%s17541_s1 + $0x18] sm:$0xff] }
0x1591   : > { %8353 = vmatprep.mubr.f32.mxu0 %v14812_v18  ;;  %14212 = vmatprep.subr.bf16.mxu0 %v14211_v36  ;;  %v10452_v14 = vld [vmem:[%s17541_s1 + $0x110] sm:$0xff]  ;;  %v10453_v35 = vld [vmem:[%s17541_s1 + $0x118] sm:$0xff]  ;;  %v14369_v15 = vpack.c.bf16 %v8955_v34, %v8954_v33  ;;  %v8956_v2 = vld [vmem:[%s17541_s1 + $0x20] sm:$0xff] }
0x1592   : > { %8531 = vmatprep.mubr.f32.mxu1 %v14812_v18  ;;  %14268 = vmatprep.subr.bf16.mxu1 %v14211_v36  ;;  %v8247_v52 = vsel %vm8245_vm0, %v8210_v32, 0.0  ;;  %v8454_v59 = vsel %vm8452_vm5, %v8210_v32, 0.0  ;;  %v8215_v49 = vsel %vm8213_vm9, %v8210_v32, 0.0  ;;  %v8450_v50 = vsel %vm8448_vm14, %v8210_v32, 0.0  ;;  %v8444_v36 = vld [vmem:[%s17540_s4 + $0x8] sm:$0xff]  ;;  %s17542_s4 = sld [smem:[#allocation27_spill]] }
0x1593   : > { %10407 = vmatmul.mubr.msk.f32.gmra.mrb[84].mxu0 %vm3094_vm13, %v8247_v52  ;;  %10411 = vmatmul.mubr.msk.f32.gmra.mrb[68].mxu1 %vm3094_vm13, %v8454_v59  ;;  %v10446_v52 = vld [vmem:[%s17541_s1 + $0xe0] sm:$0xff]  ;;  %v10447_v59 = vld [vmem:[%s17541_s1 + $0xe8] sm:$0xff]  ;;  %v14333_v9 = vpack.c.bf16 %v10453_v35, %v10452_v14  ;;  %v10465_v53 = vld [vmem:[%s17541_s1 + $0x178] sm:$0xff] }
0x1594   : > { %14214 = vmatpush1.bf16.msra.mxu0 %v14213_v57  ;;  %14270 = vmatpush1.bf16.msra.mxu1 %v14213_v57  ;;  %v8972_v34 = vld [vmem:[%s17541_s1 + $0xa0] sm:$0xff]  ;;  %v10471_v14 = vld [vmem:[%s17541_s1 + $0x1a8] sm:$0xff] }
0x1595   : > { %14216 = vmatprep.subr.bf16.mxu0 %v14215_v21  ;;  %14272 = vmatprep.subr.bf16.mxu1 %v14215_v21 }
0x1596   : > { %8430 = vmatprep.mubr.f32.mxu0 %v14812_v18  ;;  %8608 = vmatprep.mubr.f32.mxu1 %v14812_v18 }
0x1598   : > { %14218 = vmatpush1.bf16.msra.mxu0 %v14217_v3  ;;  %14274 = vmatpush1.bf16.msra.mxu1 %v14217_v3  ;;  %v14324_v3 = vpack.c.bf16 %v10447_v59, %v10446_v52  ;;  %v10437_v39 = vld [vmem:[%s17542_s4 + $0x28] sm:$0xff]  ;;  %v10438_v43 = vld [vmem:[%s17542_s4 + $0x30] sm:$0xff]  ;;  %v8843_v7 = vld [vmem:[%s17542_s4 + $0x18] sm:$0x3f] }
0x1599   : > { %14220 = vmatprep.subr.bf16.mxu0 %v14219_v48  ;;  %14276 = vmatprep.subr.bf16.mxu1 %v14219_v48  ;;  %v10448_v48 = vld [vmem:[%s17541_s1 + $0xf0] sm:$0xff] }
0x159a   : > { %v14327_v23 = vpack.c.bf16 %v10449_v4, %v10448_v48  ;;  %v10464_v59 = vld [vmem:[%s17541_s1 + $0x170] sm:$0xff]  ;;  %v10466_v48 = vld [vmem:[%s17541_s1 + $0x180] sm:$0xff]  ;;  %v10467_v4 = vld [vmem:[%s17541_s1 + $0x188] sm:$0xff] }
0x159c   : > { %14222 = vmatpush1.bf16.msra.mxu0 %v14221_v61  ;;  %14278 = vmatpush1.bf16.msra.mxu1 %v14221_v61  ;;  %v8841_v61 = vld [vmem:[%s17542_s4 + $0x8] sm:$0xff] }
0x159d   : > { %14224 = vmatprep.subr.bf16.mxu0 %v14223_v40  ;;  %14280 = vmatprep.subr.bf16.mxu1 %v14223_v40  ;;  %v10450_v40 = vld [vmem:[%s17541_s1 + $0x100] sm:$0xff] }
0x15a0   : > { %14226 = vmatpush1.bf16.msra.mxu0 %v14225_v44  ;;  %14282 = vmatpush1.bf16.msra.mxu1 %v14225_v44  ;;  %v14330_v44 = vpack.c.bf16 %v10451_v12, %v10450_v40  ;;  %v10468_v40 = vld [vmem:[%s17541_s1 + $0x190] sm:$0xff]  ;;  %v10469_v12 = vld [vmem:[%s17541_s1 + $0x198] sm:$0xff] }
0x15a1   : > { %14228 = vmatprep.subr.bf16.mxu0 %v14227_v10  ;;  %14284 = vmatprep.subr.bf16.mxu1 %v14227_v10  ;;  %v8842_v10 = vld [vmem:[%s17542_s4 + $0x10] sm:$0xff] }
0x15a4   : > { %14230 = vmatpush1.bf16.msra.mxu0 %v14229_v37  ;;  %14286 = vmatpush1.bf16.msra.mxu1 %v14229_v37  ;;  %v8957_v37 = vld [vmem:[%s17541_s1 + $0x28] sm:$0xff] }
0x15a5   : > { %14232 = vmatprep.subr.bf16.mxu0 %v14231_v55  ;;  %14288 = vmatprep.subr.bf16.mxu1 %v14231_v55  ;;  %v10439_v55 = vld [vmem:[%s17542_s4 + $0x38] sm:$0x3f] }
0x15a8   : > { %14234 = vmatpush1.bf16.msra.mxu0 %v14233_v24  ;;  %14290 = vmatpush1.bf16.msra.mxu1 %v14233_v24  ;;  %v10454_v24 = vld [vmem:[%s17541_s1 + $0x120] sm:$0xff] }
0x15ab   : > { %10408 = vmatmul.mubr.msk.f32.vlgmr.msra.gmra.mrb[82].mxu0 %vm3094_vm13, %v17009_v22  ;;  %10412 = vmatmul.mubr.msk.f32.vlgmr.msra.gmra.mrb[66].mxu1 %vm3094_vm13, %v17013_v45 }
0x15ac   : > { %8436 = vmatprep.mubr.f32.mxu0 %v14812_v18  ;;  %8614 = vmatprep.mubr.f32.mxu1 %v14812_v18 }
0x15af   : > { %10409 = vmatmul.mubr.msk.f32.gmra.mrb[84].mxu0 %vm3094_vm13, %v8215_v49  ;;  %10413 = vmatmul.mubr.msk.f32.gmra.mrb[68].mxu1 %vm3094_vm13, %v8450_v50  ;;  %v10436_v49 = vld [vmem:[%s17542_s4 + $0x20] sm:$0xff] }
0x15b0   : > { %8708 = vmatprep.mubr.f32.mxu0 %v14812_v18  ;;  %9061 = vmatprep.mubr.f32.mxu1 %v14812_v18  ;;  %v8840_v50 = vld [vmem:[%s17542_s4] sm:$0xff] }
0x167e   : > { %v8432_v27 = vpop.f32.mrb[82].mxu0  ;;  %v8610_v1 = vpop.f32.mrb[66].mxu1 }
0x167f   : > { %v8434_v47 = vpop.f32.mrb[83].mxu0  ;;  %v8612_v41 = vpop.f32.mrb[67].mxu1 }
0x1682   : > { %v8438_v51 = vpop.f32.mrb[84].mxu0  ;;  %v8616_v5 = vpop.f32.mrb[68].mxu1 }
0x1683   : > { %v14300_v20 = vpack.c.bf16 %v8438_v51, %v8432_v27  ;;  %v14294_v0 = vpack.c.bf16 %v8616_v5, %v8610_v1  ;;  %v8440_v42 = vpop.f32.mrb[85].mxu0  ;;  %v8618_v56 = vpop.f32.mrb[69].mxu1  ;;  %v10455_v27 = vld [vmem:[%s17541_s1 + $0x128] sm:$0xff]  ;;  %v14372_v1 = vpack.c.bf16 %v8957_v37, %v8956_v2  ;;  %v10456_v5 = vld [vmem:[%s17541_s1 + $0x130] sm:$0xff]  ;;  %v8975_v2 = vld [vmem:[%s17541_s1 + $0xb8] sm:$0xff] }
0x1684   : > { %v14297_v54 = vpack.c.bf16 %v8440_v42, %v8434_v47  ;;  %v14291_v13 = vpack.c.bf16 %v8618_v56, %v8612_v41  ;;  %v8958_v47 = vld [vmem:[%s17541_s1 + $0x30] sm:$0xff]  ;;  %v8959_v41 = vld [vmem:[%s17541_s1 + $0x38] sm:$0xff]  ;;  %v14336_v51 = vpack.c.bf16 %v10455_v27, %v10454_v24  ;;  %v8960_v42 = vld [vmem:[%s17541_s1 + $0x40] sm:$0xff] }
0x1685   : > { %v8961_v56 = vld [vmem:[%s17541_s1 + $0x48] sm:$0xff]  ;;  %v8976_v24 = vld [vmem:[%s17541_s1 + $0xc0] sm:$0xff] }
0x1686   : > { %14293 = vmatprep.subr.msk.bf16.mxu0 %vm15108_vm3, %v14291_v13  ;;  %v10458_v13 = vld [vmem:[%s17541_s1 + $0x140] sm:$0xff]  ;;  %v8977_v27 = vld [vmem:[%s17541_s1 + $0xc8] sm:$0xff] }
0x1687   : > { %14296 = vmatpush1.bf16.msk.msra.mxu0 %vm15108_vm3, %v14294_v0  ;;  %v14375_v0 = vpack.c.bf16 %v8959_v41, %v8958_v47  ;;  %v14402_v47 = vpack.c.bf16 %v8977_v27, %v8976_v24  ;;  %v8978_v41 = vld [vmem:[%s17541_s1 + $0xd0] sm:$0xff]  ;;  %v10516_v24 = vld [vmem:[%s17541_s1 + $0x280] sm:$0xff]  ;;  %v10517_v27 = vld [vmem:[%s17541_s1 + $0x288] sm:$0xff] }
0x1688   : > { %14299 = vmatprep.subr.msk.bf16.mxu0 %vm15108_vm3, %v14297_v54 }
0x168a   : > { %10420 = vmatmul.mubr.msk.f32.vlgmr.msra.gmra.mrb[86].mxu0 %vm2763_vm12, %v10414_v29  ;;  %v10459_v29 = vld [vmem:[%s17541_s1 + $0x148] sm:$0xff] }
0x168b   : > { %14302 = vmatpush1.bf16.msk.msra.mxu0 %vm15108_vm3, %v14300_v20  ;;  %8714 = vmatprep.mubr.f32.mxu0 %v14812_v18  ;;  %vm8844_vm3 = vcmask 228352   ;;  %v10457_v20 = vld [vmem:[%s17541_s1 + $0x138] sm:$0xff] }
0x168c   : > { %v14339_v54 = vpack.c.bf16 %v10457_v20, %v10456_v5  ;;  %v10492_v20 = vld [vmem:[%s17541_s1 + $0x1c0] sm:$0xff] }
0x168e   : > { %10421 = vmatmul.mubr.msk.f32.gmra.mrb[88].mxu0 %vm2763_vm12, %v10415_v6  ;;  %v14378_v6 = vpack.c.bf16 %v8961_v56, %v8960_v42 }
0x168f   : > { %8720 = vmatprep.mubr.f32.mxu0 %v14812_v18 }
0x1692   : > { %10422 = vmatmul.mubr.msk.f32.gmra.mrb[90].mxu0 %vm2763_vm12, %v10416_v58  ;;  %v8962_v58 = vld [vmem:[%s17541_s1 + $0x50] sm:$0xff] }
0x1693   : > { %8726 = vmatprep.mubr.f32.mxu0 %v14812_v18 }
0x1696   : > { %10423 = vmatmul.mubr.msk.f32.gmra.mrb[92].mxu0 %vm2763_vm12, %v10417_v16  ;;  %v8963_v16 = vld [vmem:[%s17541_s1 + $0x58] sm:$0xff] }
0x1697   : > { %8815 = vmatprep.mubr.f32.mxu0 %v14812_v18 }
0x169a   : > { %10426 = vmatmul.mubr.msk.f32.vlgmr.msra.gmra.mrb[86].mxu0 %vm2763_vm12, %v8443_v8  ;;  %v14342_v8 = vpack.c.bf16 %v10459_v29, %v10458_v13 }
0x169b   : > { %8821 = vmatprep.mubr.f32.mxu0 %v14812_v18 }
0x169e   : > { %10427 = vmatmul.mubr.msk.f32.gmra.mrb[88].mxu0 %vm2763_vm12, %v8444_v36  ;;  %v10460_v36 = vld [vmem:[%s17541_s1 + $0x150] sm:$0xff] }
0x169f   : > { %8827 = vmatprep.mubr.f32.mxu0 %v14812_v18 }
0x16a2   : > { %10428 = vmatmul.mubr.msk.f32.gmra.mrb[90].mxu0 %vm2763_vm12, %v8445_v46  ;;  %v10461_v46 = vld [vmem:[%s17541_s1 + $0x158] sm:$0xff] }
0x16a3   : > { %8833 = vmatprep.mubr.f32.mxu0 %v14812_v18 }
0x16a6   : > { %10429 = vmatmul.mubr.msk.f32.gmra.mrb[92].mxu0 %vm2763_vm12, %v8446_v11  ;;  %v14381_v11 = vpack.c.bf16 %v8963_v16, %v8962_v58 }
0x16a7   : > { %8927 = vmatprep.mubr.f32.mxu0 %v14812_v18 }
0x176d   : > { %v8817_v62 = vpop.f32.mrb[86].mxu0 }
0x176e   : > { %v8819_v25 = vpop.f32.mrb[87].mxu0 }
0x1771   : > { %v8823_v30 = vpop.f32.mrb[88].mxu0 }
0x1772   : > { %v17085_v63 = vpack.c.bf16 %v8823_v30, %v8817_v62  ;;  %v8825_v38 = vpop.f32.mrb[89].mxu0  ;;  %v8964_v62 = vld [vmem:[%s17541_s1 + $0x60] sm:$0xff]  ;;  %v14345_v30 = vpack.c.bf16 %v10461_v46, %v10460_v36 }
0x1773   : > { %v17087_v22 = vpack.c.bf16 %v8825_v38, %v8819_v25  ;;  %v8965_v25 = vld [vmem:[%s17541_s1 + $0x68] sm:$0xff]  ;;  %v10462_v38 = vld [vmem:[%s17541_s1 + $0x160] sm:$0xff] }
0x1775   : > { %v8829_v45 = vpop.f32.mrb[90].mxu0  ;;  %14304 = vmatprep.subr.bf16.mxu0 %v17087_v22  ;;  %14314 = vmatprep.subr.bf16.mxu1 %v17087_v22 }
0x1776   : > { %v8831_v32 = vpop.f32.mrb[91].mxu0  ;;  %14306 = vmatpush1.bf16.msra.mxu0 %v17085_v63  ;;  %14316 = vmatpush1.bf16.msra.mxu1 %v17085_v63 }
0x1779   : > { %v8835_v57 = vpop.f32.mrb[92].mxu0 }
0x177a   : > { %v17093_v21 = vpack.c.bf16 %v8835_v57, %v8829_v45  ;;  %v8837_v19 = vpop.f32.mrb[93].mxu0  ;;  %v10463_v45 = vld [vmem:[%s17541_s1 + $0x168] sm:$0xff]  ;;  %v8966_v57 = vld [vmem:[%s17541_s1 + $0x70] sm:$0xff] }
0x177b   : > { %v17095_v60 = vpack.c.bf16 %v8837_v19, %v8831_v32  ;;  %v14384_v32 = vpack.c.bf16 %v8965_v25, %v8964_v62  ;;  %v8967_v19 = vld [vmem:[%s17541_s1 + $0x78] sm:$0xff]  ;;  %v14348_v52 = vpack.c.bf16 %v10463_v45, %v10462_v38  ;;  %v10497_v62 = vld [vmem:[%s17541_s1 + $0x1e8] sm:$0xff]  ;;  %v10498_v45 = vld [vmem:[%s17541_s1 + $0x1f0] sm:$0xff] }
0x177c   : > { %v14387_v31 = vpack.c.bf16 %v8967_v19, %v8966_v57 }
0x177d   : > { %14309 = vmatprep.subr.msk.bf16.mxu0 %vm16839_vm1, %v17095_v60  ;;  %14319 = vmatprep.subr.msk.bf16.mxu1 %vm16839_vm1, %v17095_v60 }
0x177e   : > { %14312 = vmatpush1.bf16.msk.msra.mxu0 %vm16839_vm1, %v17093_v21  ;;  %14322 = vmatpush1.bf16.msk.msra.mxu1 %vm16839_vm1, %v17093_v21 }
0x177f   : > { %14323 = vmatprep.subr.bf16.mxu0 %v14810_v17  ;;  %14365 = vmatprep.subr.bf16.mxu1 %v14810_v17 }
0x1781   : > { %10442 = vmatmul.mubr.msk.f32.vlgmr.msra.gmra.mrb[70].mxu1 %vm8844_vm3, %v10436_v49  ;;  %10432 = vmatmul.mubr.msk.f32.vlgmr.msra.gmra.mrb[94].mxu0 %vm8844_vm3, %v8840_v50  ;;  %v8968_v49 = vld [vmem:[%s17541_s1 + $0x80] sm:$0xff]  ;;  %v8969_v50 = vld [vmem:[%s17541_s1 + $0x88] sm:$0xff] }
0x1782   : > { %14325 = vmatpush1.bf16.msra.mxu0 %v14324_v3  ;;  %9067 = vmatprep.mubr.f32.mxu1 %v14812_v18  ;;  %v14351_v3 = vpack.c.bf16 %v10465_v53, %v10464_v59  ;;  %v10500_v59 = vld [vmem:[%s17541_s1 + $0x200] sm:$0xff]  ;;  %v10501_v53 = vld [vmem:[%s17541_s1 + $0x208] sm:$0xff] }
0x1783   : > { %14326 = vmatprep.subr.bf16.mxu0 %v14810_v17  ;;  %8933 = vmatprep.mubr.f32.mxu0 %v14812_v18 }
0x1784   : > { %14367 = vmatpush1.bf16.msra.mxu1 %v14366_v28  ;;  %v14390_v28 = vpack.c.bf16 %v8969_v50, %v8968_v49  ;;  %v14430_v49 = vpack.c.bf16 %v10501_v53, %v10500_v59  ;;  %v10502_v50 = vld [vmem:[%s17541_s1 + $0x210] sm:$0xff] }
0x1785   : > { %10443 = vmatmul.mubr.msk.f32.gmra.mrb[72].mxu1 %vm8844_vm3, %v10437_v39  ;;  %10433 = vmatmul.mubr.msk.f32.gmra.mrb[96].mxu0 %vm8844_vm3, %v8841_v61  ;;  %v8970_v39 = vld [vmem:[%s17541_s1 + $0x90] sm:$0xff]  ;;  %v14354_v61 = vpack.c.bf16 %v10467_v4, %v10466_v48  ;;  %v10483_v48 = vld [vmem:[%s17542_s4 + $0x48] sm:$0xff] }
0x1786   : > { %14328 = vmatpush1.bf16.msra.mxu0 %v14327_v23  ;;  %9073 = vmatprep.mubr.f32.mxu1 %v14812_v18  ;;  %v8971_v23 = vld [vmem:[%s17541_s1 + $0x98] sm:$0xff] }
0x1787   : > { %14329 = vmatprep.subr.bf16.mxu0 %v14810_v17  ;;  %8939 = vmatprep.mubr.f32.mxu0 %v14812_v18  ;;  %v14393_v33 = vpack.c.bf16 %v8971_v23, %v8970_v39  ;;  %v10505_v39 = vld [vmem:[%s17541_s1 + $0x228] sm:$0xff]  ;;  %v10484_v23 = vld [vmem:[%s17542_s4 + $0x50] sm:$0xff] }
0x1788   : > { %14368 = vmatprep.subr.bf16.mxu1 %v14810_v17 }
0x1789   : > { %10444 = vmatmul.mubr.msk.f32.gmra.mrb[74].mxu1 %vm8844_vm3, %v10438_v43  ;;  %10434 = vmatmul.mubr.msk.f32.gmra.mrb[98].mxu0 %vm8844_vm3, %v8842_v10  ;;  %v8973_v43 = vld [vmem:[%s17541_s1 + $0xa8] sm:$0xff]  ;;  %v10470_v10 = vld [vmem:[%s17541_s1 + $0x1a0] sm:$0xff] }
0x178a   : > { %14331 = vmatpush1.bf16.msra.mxu0 %v14330_v44  ;;  %9079 = vmatprep.mubr.f32.mxu1 %v14812_v18  ;;  %v14357_v44 = vpack.c.bf16 %v10469_v12, %v10468_v40  ;;  %v14396_v35 = vpack.c.bf16 %v8973_v43, %v8972_v34  ;;  %v14360_v37 = vpack.c.bf16 %v10471_v14, %v10470_v10  ;;  %v10506_v40 = vld [vmem:[%s17541_s1 + $0x230] sm:$0xff]  ;;  %v10507_v12 = vld [vmem:[%s17541_s1 + $0x238] sm:$0xff]  ;;  %v10508_v43 = vld [vmem:[%s17541_s1 + $0x240] sm:$0xff] }
0x178b   : > { %14332 = vmatprep.subr.bf16.mxu0 %v14810_v17  ;;  %8945 = vmatprep.mubr.f32.mxu0 %v14812_v18  ;;  %v14439_v34 = vpack.c.bf16 %v10507_v12, %v10506_v40  ;;  %v10510_v14 = vld [vmem:[%s17541_s1 + $0x250] sm:$0xff] }
0x178c   : > { %14370 = vmatpush1.bf16.msra.mxu1 %v14369_v15  ;;  %v8974_v15 = vld [vmem:[%s17541_s1 + $0xb0] sm:$0xff] }
0x178d   : > { %10445 = vmatmul.mubr.msk.f32.gmra.mrb[76].mxu1 %vm8844_vm3, %v10439_v55  ;;  %10435 = vmatmul.mubr.msk.f32.gmra.mrb[100].mxu0 %vm8844_vm3, %v8843_v7  ;;  %v10472_v55 = vld [vmem:[%s17541_s1 + $0x1b0] sm:$0xff]  ;;  %v14399_v7 = vpack.c.bf16 %v8975_v2, %v8974_v15  ;;  %v10512_v15 = vld [vmem:[%s17541_s1 + $0x260] sm:$0xff]  ;;  %v10513_v2 = vld [vmem:[%s17541_s1 + $0x268] sm:$0xff] }
0x178e   : > { %14334 = vmatpush1.bf16.msra.mxu0 %v14333_v9  ;;  %14371 = vmatprep.subr.bf16.mxu1 %v14810_v17  ;;  %v10473_v9 = vld [vmem:[%s17541_s1 + $0x1b8] sm:$0xff] }
0x178f   : > { %14335 = vmatprep.subr.bf16.mxu0 %v14810_v17 }
0x1790   : > { %14373 = vmatpush1.bf16.msra.mxu1 %v14372_v1  ;;  %v14363_v1 = vpack.c.bf16 %v10473_v9, %v10472_v55  ;;  %v10514_v55 = vld [vmem:[%s17541_s1 + $0x270] sm:$0xff]  ;;  %v10515_v9 = vld [vmem:[%s17541_s1 + $0x278] sm:$0xff] }
0x1791   : > { %14374 = vmatprep.subr.bf16.mxu1 %v14810_v17 }
0x1792   : > { %14337 = vmatpush1.bf16.msra.mxu0 %v14336_v51  ;;  %v8979_v51 = vld [vmem:[%s17541_s1 + $0xd8] sm:$0xff] }
0x1793   : > { %14338 = vmatprep.subr.bf16.mxu0 %v14810_v17  ;;  %v14405_v5 = vpack.c.bf16 %v8979_v51, %v8978_v41  ;;  %v10519_v41 = vld [vmem:[%s17541_s1 + $0x298] sm:$0xff] }
0x1794   : > { %14376 = vmatpush1.bf16.msra.mxu1 %v14375_v0  ;;  %v10493_v0 = vld [vmem:[%s17541_s1 + $0x1c8] sm:$0xff] }
0x1795   : > { %14377 = vmatprep.subr.bf16.mxu1 %v14810_v17 }
0x1796   : > { %14340 = vmatpush1.bf16.msra.mxu0 %v14339_v54  ;;  %v14418_v54 = vpack.c.bf16 %v10493_v0, %v10492_v20 }
0x1797   : > { %14341 = vmatprep.subr.bf16.mxu0 %v14810_v17 }
0x1798   : > { %14379 = vmatpush1.bf16.msra.mxu1 %v14378_v6  ;;  %v10494_v6 = vld [vmem:[%s17541_s1 + $0x1d0] sm:$0xff] }
0x1799   : > { %14380 = vmatprep.subr.bf16.mxu1 %v14810_v17 }
0x179a   : > { %14343 = vmatpush1.bf16.msra.mxu0 %v14342_v8 }
0x179b   : > { %14344 = vmatprep.subr.bf16.mxu0 %v14810_v17 }
0x179c   : > { %14382 = vmatpush1.bf16.msra.mxu1 %v14381_v11  ;;  %v10496_v11 = vld [vmem:[%s17541_s1 + $0x1e0] sm:$0xff] }
0x179d   : > { %14383 = vmatprep.subr.bf16.mxu1 %v14810_v17  ;;  %v14424_v25 = vpack.c.bf16 %v10497_v62, %v10496_v11 }
0x179e   : > { %14346 = vmatpush1.bf16.msra.mxu0 %v14345_v30 }
0x179f   : > { %14347 = vmatprep.subr.bf16.mxu0 %v14810_v17 }
0x17a0   : > { %14385 = vmatpush1.bf16.msra.mxu1 %v14384_v32  ;;  %v10499_v32 = vld [vmem:[%s17541_s1 + $0x1f8] sm:$0xff] }
0x17a1   : > { %14386 = vmatprep.subr.bf16.mxu1 %v14810_v17  ;;  %v14427_v57 = vpack.c.bf16 %v10499_v32, %v10498_v45 }
0x17a2   : > { %14349 = vmatpush1.bf16.msra.mxu0 %v14348_v52 }
0x17a3   : > { %14350 = vmatprep.subr.bf16.mxu0 %v14810_v17 }
0x17a4   : > { %14388 = vmatpush1.bf16.msra.mxu1 %v14387_v31  ;;  %v10482_v31 = vld [vmem:[%s17542_s4 + $0x40] sm:$0xff] }
0x17a5   : > { %14389 = vmatprep.subr.bf16.mxu1 %v14810_v17 }
0x17a6   : > { %14352 = vmatpush1.bf16.msra.mxu0 %v14351_v3  ;;  %v10503_v3 = vld [vmem:[%s17541_s1 + $0x218] sm:$0xff] }
0x17a7   : > { %14353 = vmatprep.subr.bf16.mxu0 %v14810_v17  ;;  %v14433_v4 = vpack.c.bf16 %v10503_v3, %v10502_v50 }
0x17a8   : > { %14391 = vmatpush1.bf16.msra.mxu1 %v14390_v28  ;;  %v10504_v28 = vld [vmem:[%s17541_s1 + $0x220] sm:$0xff] }
0x17a9   : > { %14392 = vmatprep.subr.bf16.mxu1 %v14810_v17 }
0x17aa   : > { %14355 = vmatpush1.bf16.msra.mxu0 %v14354_v61  ;;  %v14436_v61 = vpack.c.bf16 %v10505_v39, %v10504_v28 }
0x17ab   : > { %14356 = vmatprep.subr.bf16.mxu0 %v14810_v17 }
0x17ac   : > { %14394 = vmatpush1.bf16.msra.mxu1 %v14393_v33  ;;  %v10485_v33 = vld [vmem:[%s17542_s4 + $0x58] sm:$0x3f] }
0x17ad   : > { %14395 = vmatprep.subr.bf16.mxu1 %v14810_v17 }
0x17ae   : > { %14358 = vmatpush1.bf16.msra.mxu0 %v14357_v44  ;;  %v10509_v44 = vld [vmem:[%s17541_s1 + $0x248] sm:$0xff] }
0x17af   : > { %14359 = vmatprep.subr.bf16.mxu0 %v14810_v17  ;;  %v14442_v10 = vpack.c.bf16 %v10509_v44, %v10508_v43 }
0x17b0   : > { %14397 = vmatpush1.bf16.msra.mxu1 %v14396_v35  ;;  %v10511_v35 = vld [vmem:[%s17541_s1 + $0x258] sm:$0xff] }
0x17b1   : > { %14398 = vmatprep.subr.bf16.mxu1 %v14810_v17 }
0x17b2   : > { %14361 = vmatpush1.bf16.msra.mxu0 %v14360_v37  ;;  %v14448_v37 = vpack.c.bf16 %v10513_v2, %v10512_v15 }
0x17b3   : > { %14362 = vmatprep.subr.bf16.mxu0 %v14810_v17 }
0x17b4   : > { %14400 = vmatpush1.bf16.msra.mxu1 %v14399_v7  ;;  %v14451_v7 = vpack.c.bf16 %v10515_v9, %v10514_v55 }
0x17b5   : > { %14401 = vmatprep.subr.bf16.mxu1 %v14810_v17 }
0x17b6   : > { %14364 = vmatpush1.bf16.msra.mxu0 %v14363_v1  ;;  %v14454_v1 = vpack.c.bf16 %v10517_v27, %v10516_v24 }
0x17b7   : > { %14408 = vmatprep.subr.bf16.mxu0 %v17087_v22  ;;  %v10495_v22 = vld [vmem:[%s17541_s1 + $0x1d8] sm:$0xff] }
0x17b8   : > { %14403 = vmatpush1.bf16.msra.mxu1 %v14402_v47  ;;  %v14421_v8 = vpack.c.bf16 %v10495_v22, %v10494_v6  ;;  %v10518_v47 = vld [vmem:[%s17541_s1 + $0x290] sm:$0xff]  ;;  %s17543_s1 = scalar_lea.vmem [#allocation6], %s16449_s3 }
0x17b9   : > { %14404 = vmatprep.subr.bf16.mxu1 %v14810_v17  ;;  %v14457_v51 = vpack.c.bf16 %v10519_v41, %v10518_v47  ;;  %s9675_s4 = sshll.u32 %s17543_s1, 4  ;;  %s14642_s1 = scalar_lea.vmem %s17311_s10, 16  ;;  %s17299_s4 = int_to_ptr.vmem [resolvable:$true] %s9675_s4 }
0x17ba   : > { %p14643_p11 = scmp.ne.s32.totalorder %s17311_s10, %s14642_s1  ;;  %p14650_p1 = scmp.lt.s32.totalorder %s14648_s19, %s14642_s1 }
0x17bc   : > { %14406 = vmatpush1.bf16.msra.mxu1 %v14405_v5  ;;  %p14644_p12 = pnand %p14643_p11, %p15084_p5  ;;  %p14651_p2 = por %p14650_p1, %p14649_p0 }
0x17bd   : > { %14417 = vmatprep.subr.bf16.mxu1 %v14810_v17 }
0x17be   : > { %p14645_p13 = pneg %p14644_p12 }
0x17c0   : > { %p14652_p3 = pnand %p14651_p2, %p14645_p13 }
0x1854   : > { %v9063_v42 = vpop.f32.mrb[70].mxu1  ;;  %v8929_v56 = vpop.f32.mrb[94].mxu0 }
0x1855   : > { %v9065_v13 = vpop.f32.mrb[71].mxu1  ;;  %v8931_v29 = vpop.f32.mrb[95].mxu0 }
0x1856   : > { %10474 = vmatprep.mubr.msk.f32.mxu0 %vm4363_vm7, %v9065_v13  ;;  %10478 = vmatprep.mubr.msk.f32.mxu1 %vm4363_vm7, %v8931_v29 }
0x1857   : > { %9192 = vmatmul.mubr.f32.vlgmr.msra.gmra.mrb[102].mxu0 %v9063_v42  ;;  %9289 = vmatmul.mubr.f32.vlgmr.msra.gmra.mrb[78].mxu1 %v8929_v56 }
0x1858   : > { %14410 = vmatpush1.bf16.msra.mxu0 %v17085_v63  ;;  %v9069_v58 = vpop.f32.mrb[72].mxu1  ;;  %v8935_v16 = vpop.f32.mrb[96].mxu0  ;;  %14419 = vmatpush1.bf16.msra.mxu1 %v14418_v54 }
0x1859   : > { %14413 = vmatprep.subr.msk.bf16.mxu0 %vm16839_vm1, %v17095_v60  ;;  %v9071_v36 = vpop.f32.mrb[73].mxu1  ;;  %v8937_v46 = vpop.f32.mrb[97].mxu0  ;;  %14420 = vmatprep.subr.bf16.mxu1 %v14810_v17 }
0x185a   : > { %10475 = vmatprep.mubr.msk.f32.mxu0 %vm4363_vm7, %v9071_v36  ;;  %10479 = vmatprep.mubr.msk.f32.mxu1 %vm4363_vm7, %v8937_v46 }
0x185b   : > { %9197 = vmatmul.mubr.f32.gmra.mrb[104].mxu0 %v9069_v58  ;;  %9294 = vmatmul.mubr.f32.gmra.mrb[80].mxu1 %v8935_v16 }
0x185c   : > { %14416 = vmatpush1.bf16.msk.msra.mxu0 %vm16839_vm1, %v17093_v21  ;;  %v9075_v63 = vpop.f32.mrb[74].mxu1  ;;  %v8941_v60 = vpop.f32.mrb[98].mxu0  ;;  %14422 = vmatpush1.bf16.msra.mxu1 %v14421_v8 }
0x185d   : > { %v9077_v30 = vpop.f32.mrb[75].mxu1  ;;  %v8943_v38 = vpop.f32.mrb[99].mxu0  ;;  %14423 = vmatprep.subr.bf16.mxu1 %v14810_v17 }
0x185e   : > { %10476 = vmatprep.mubr.msk.f32.mxu0 %vm4363_vm7, %v9077_v30  ;;  %10480 = vmatprep.mubr.msk.f32.mxu1 %vm4363_vm7, %v8943_v38 }
0x185f   : > { %9202 = vmatmul.mubr.f32.gmra.mrb[106].mxu0 %v9075_v63  ;;  %9299 = vmatmul.mubr.f32.gmra.mrb[82].mxu1 %v8941_v60 }
0x1860   : > { %v9081_v26 = vpop.f32.mrb[76].mxu1  ;;  %v8947_v21 = vpop.f32.mrb[100].mxu0  ;;  %14425 = vmatpush1.bf16.msra.mxu1 %v14424_v25 }
0x1861   : > { %v9083_v19 = vpop.f32.mrb[77].mxu1  ;;  %v8949_v52 = vpop.f32.mrb[101].mxu0  ;;  %14426 = vmatprep.subr.bf16.mxu1 %v14810_v17 }
0x1862   : > { %10477 = vmatprep.mubr.msk.f32.mxu0 %vm4363_vm7, %v9083_v19  ;;  %10481 = vmatprep.mubr.msk.f32.mxu1 %vm4363_vm7, %v8949_v52 }
0x1863   : > { %9207 = vmatmul.mubr.f32.gmra.mrb[108].mxu0 %v9081_v26  ;;  %9304 = vmatmul.mubr.f32.gmra.mrb[84].mxu1 %v8947_v21 }
0x1864   : > { %9390 = vmatprep.mubr.f32.mxu0 %v14812_v18  ;;  %14428 = vmatpush1.bf16.msra.mxu1 %v14427_v57 }
0x1865   : > { %14429 = vmatprep.subr.bf16.mxu1 %v14810_v17 }
0x1867   : > { %10488 = vmatmul.mubr.msk.f32.vlgmr.msra.gmra.mrb[110].mxu0 %vm8844_vm3, %v10482_v31 }
0x1868   : > { %9396 = vmatprep.mubr.f32.mxu0 %v14812_v18  ;;  %14431 = vmatpush1.bf16.msra.mxu1 %v14430_v49 }
0x1869   : > { %14432 = vmatprep.subr.bf16.mxu1 %v14810_v17 }
0x186b   : > { %10489 = vmatmul.mubr.msk.f32.gmra.mrb[112].mxu0 %vm8844_vm3, %v10483_v48 }
0x186c   : > { %9402 = vmatprep.mubr.f32.mxu0 %v14812_v18  ;;  %14434 = vmatpush1.bf16.msra.mxu1 %v14433_v4 }
0x186d   : > { %14435 = vmatprep.subr.bf16.mxu1 %v14810_v17 }
0x186f   : > { %10490 = vmatmul.mubr.msk.f32.gmra.mrb[114].mxu0 %vm8844_vm3, %v10484_v23 }
0x1870   : > { %9408 = vmatprep.mubr.f32.mxu0 %v14812_v18  ;;  %14437 = vmatpush1.bf16.msra.mxu1 %v14436_v61  ;;  %v14445_v18 = vpack.c.bf16 %v10511_v35, %v10510_v14 }
0x1871   : > { %14438 = vmatprep.subr.bf16.mxu1 %v14810_v17 }
0x1873   : > { %10491 = vmatmul.mubr.msk.f32.gmra.mrb[116].mxu0 %vm8844_vm3, %v10485_v33 }
0x1874   : > { %14440 = vmatpush1.bf16.msra.mxu1 %v14439_v34 }
0x1875   : > { %14441 = vmatprep.subr.bf16.mxu1 %v14810_v17 }
0x1878   : > { %14443 = vmatpush1.bf16.msra.mxu1 %v14442_v10 }
0x1879   : > { %14444 = vmatprep.subr.bf16.mxu1 %v14810_v17 }
0x187c   : > { %14446 = vmatpush1.bf16.msra.mxu1 %v14445_v18 }
0x187d   : > { %14447 = vmatprep.subr.bf16.mxu1 %v14810_v17 }
0x1880   : > { %14449 = vmatpush1.bf16.msra.mxu1 %v14448_v37 }
0x1881   : > { %14450 = vmatprep.subr.bf16.mxu1 %v14810_v17 }
0x1884   : > { %14452 = vmatpush1.bf16.msra.mxu1 %v14451_v7 }
0x1885   : > { %14453 = vmatprep.subr.bf16.mxu1 %v14810_v17 }
0x1888   : > { %14455 = vmatpush1.bf16.msra.mxu1 %v14454_v1 }
0x1889   : > { %14456 = vmatprep.subr.bf16.mxu1 %v14810_v17 }
0x188c   : > { %14458 = vmatpush1.bf16.msra.mxu1 %v14457_v51 }
0x192a   : > { %v9193_v5 = vpop.f32.mrb[102].mxu0  ;;  %v9290_v20 = vpop.f32.mrb[78].mxu1 }
0x192b   : > { %v9195_v0 = vpop.f32.mrb[103].mxu0  ;;  %v17285_v42 = vadd.f32 %v9290_v20, %v9193_v5  ;;  %v9292_v56 = vpop.f32.mrb[79].mxu1 }
0x192e   : > { %v9198_v54 = vpop.f32.mrb[104].mxu0  ;;  %v9295_v13 = vpop.f32.mrb[80].mxu1 }
0x192f   : > { %v9200_v29 = vpop.f32.mrb[105].mxu0  ;;  %v17287_v6 = vadd.f32 %v9295_v13, %v9198_v54  ;;  %v9297_v22 = vpop.f32.mrb[81].mxu1 }
0x1932   : > { %v9203_v58 = vpop.f32.mrb[106].mxu0  ;;  %v9300_v16 = vpop.f32.mrb[82].mxu1 }
0x1933   : > { %v9205_v8 = vpop.f32.mrb[107].mxu0  ;;  %v17289_v17 = vadd.f32 %v9300_v16, %v9203_v58  ;;  %v9302_v36 = vpop.f32.mrb[83].mxu1 }
0x1936   : > { %v9208_v46 = vpop.f32.mrb[108].mxu0  ;;  %v9305_v11 = vpop.f32.mrb[84].mxu1 }
0x1937   : > { %v9210_v62 = vpop.f32.mrb[109].mxu0  ;;  %v17291_v63 = vadd.f32 %v9305_v11, %v9208_v46  ;;  %v9307_v60 = vpop.f32.mrb[85].mxu1 }
0x193a   : > { %v9392_v25 = vpop.f32.mrb[110].mxu0 }
0x193b   : > { %v9394_v30 = vpop.f32.mrb[111].mxu0 }
0x193c   : > { %10520 = vmatprep.mubr.msk.f32.mxu1 %vm4363_vm7, %v9394_v30 }
0x193d   : > { %9521 = vmatmul.mubr.f32.vlgmr.msra.gmra.mrb[86].mxu1 %v9392_v25 }
0x193e   : > { %v9398_v38 = vpop.f32.mrb[112].mxu0 }
0x193f   : > { %v9400_v45 = vpop.f32.mrb[113].mxu0 }
0x1940   : > { %10521 = vmatprep.mubr.msk.f32.mxu1 %vm4363_vm7, %v9400_v45 }
0x1941   : > { %9526 = vmatmul.mubr.f32.gmra.mrb[88].mxu1 %v9398_v38 }
0x1942   : > { %v9404_v32 = vpop.f32.mrb[114].mxu0 }
0x1943   : > { %v9406_v26 = vpop.f32.mrb[115].mxu0 }
0x1944   : > { %10522 = vmatprep.mubr.msk.f32.mxu1 %vm4363_vm7, %v9406_v26 }
0x1945   : > { %9531 = vmatmul.mubr.f32.gmra.mrb[90].mxu1 %v9404_v32 }
0x1946   : > { %v9410_v21 = vpop.f32.mrb[116].mxu0 }
0x1947   : > { %v9412_v57 = vpop.f32.mrb[117].mxu0 }
0x1948   : > { %10523 = vmatprep.mubr.msk.f32.mxu1 %vm4363_vm7, %v9412_v57 }
0x1949   : > { %9536 = vmatmul.mubr.f32.gmra.mrb[92].mxu1 %v9410_v21 }
0x194a   : > { %14655 = shalt.err (!%p14652_p3)
}
0x194b   : > { %s14656_s5 = scalar_lea.hbm %s17307_s7, 16  ;;  %s14660_s9 = scalar_lea.hbm %s17497_s21, 32 }
0x194c   : > { %p14657_p4 = scmp.ne.s32.totalorder %s17307_s7, %s14656_s5  ;;  %p14661_p9 = scmp.lt.u32.totalorder %s17307_s7, %s17497_s21 }
0x194d   : > { %p14662_p10 = scmp.lt.u32.totalorder %s14660_s9, %s14656_s5  ;;  %p14664_p12 = scmp.lt.u32.totalorder %s14656_s5, %s17307_s7 }
0x194e   : > { %p14658_p7 = pnand %p14657_p4, %p15084_p5 }
0x194f   : > { %p14663_p11 = por %p14662_p10, %p14661_p9 }
0x1950   : > { %p14659_p8 = pneg %p14658_p7 }
0x1951   : > { %p14665_p0 = por %p14664_p12, %p14663_p11 }
0x1953   : > { %p14666_p13 = pnand %p14665_p0, %p14659_p8 }
0x1955   : > { %14669 = shalt.err (!%p14666_p13)
}
0x1956   : > { %14506 = dma.vmem_to_hbm [thread:$0]  (%p15084_p5), %s17311_s10, 16, %s17307_s7, %s17317_s13  }
0x1957   : > { %s17545_s14 = scalar_lea.vmem [#allocation2], %s16449_s3  ;;  %s17341_s1 = scalar_lea.hbm %s15042_s8, %s17303_s6 }
0x1958   : > { %s9649_s19 = sshll.u32 %s17545_s14, 4  ;;  %s9626_s0 = scalar_lea.sflag [#allocation3], %s16449_s3  ;;  %s9650_s19 = int_to_ptr.vmem [resolvable:$true] %s9649_s19 }
0x1959   : > { %s14670_s5 = scalar_lea.vmem %s9650_s19, 16  ;;  %s14817_s9 = smov [#allocation2]  }
0x195a   : > { %p14671_p1 = scmp.ne.s32.totalorder %s9650_s19, %s14670_s5  ;;  %s14674_s20 = sshll.u32 %s14817_s9, 4  ;;  %s14675_s20 = int_to_ptr.vmem [resolvable:$false] %s14674_s20 }
0x195b   : > { %s14676_s21 = scalar_lea.vmem %s14675_s20, 32  ;;  %p14677_p4 = scmp.lt.s32.totalorder %s9650_s19, %s14675_s20 }
0x195c   : > { %p14672_p2 = pnand %p14671_p1, %p15084_p5  ;;  %p14678_p7 = scmp.lt.s32.totalorder %s14676_s21, %s14670_s5 }
0x195e   : > { %p14673_p3 = pneg %p14672_p2  ;;  %p14679_p8 = por %p14678_p7, %p14677_p4 }
0x1960   : > { %p14680_p9 = pnand %p14679_p8, %p14673_p3 }
0x1962   : > { %14683 = shalt.err (!%p14680_p9)
}
0x1963   : > { %s14684_s3 = scalar_lea.hbm %s17315_s12, 16  ;;  %s14688_s6 = scalar_lea.hbm %s15032_s29, 32 }
0x1964   : > { %p14685_p10 = scmp.ne.s32.totalorder %s17315_s12, %s14684_s3  ;;  %p14689_p0 = scmp.lt.u32.totalorder %s17315_s12, %s15032_s29 }
0x1965   : > { %p14690_p13 = scmp.lt.u32.totalorder %s14688_s6, %s14684_s3  ;;  %p14692_p2 = scmp.lt.u32.totalorder %s14684_s3, %s17315_s12 }
0x1966   : > { %p14686_p11 = pnand %p14685_p10, %p15084_p5 }
0x1967   : > { %p14691_p1 = por %p14690_p13, %p14689_p0 }
0x1968   : > { %p14687_p12 = pneg %p14686_p11 }
0x1969   : > { %p14693_p4 = por %p14692_p2, %p14691_p1 }
0x196b   : > { %p14694_p3 = pnand %p14693_p4, %p14687_p12 }
0x196d   : > { %14697 = shalt.err (!%p14694_p3)
}
0x196e   : > { %14505 = dma.vmem_to_hbm [thread:$0]  (%p15084_p5), %s9650_s19, 16, %s17315_s12, %s9626_s0  }
0x196f   : > { %s14698_s21 = scalar_lea.vmem %s17299_s4, 16  ;;  %s14818_s20 = smov [#allocation6]  }
0x1970   : > { %p14699_p7 = scmp.ne.s32.totalorder %s17299_s4, %s14698_s21  ;;  %s14702_s10 = sshll.u32 %s14818_s20, 4  ;;  %s14703_s10 = int_to_ptr.vmem [resolvable:$false] %s14702_s10 }
0x1971   : > { %s14704_s7 = scalar_lea.vmem %s14703_s10, 32  ;;  %p14705_p10 = scmp.lt.s32.totalorder %s17299_s4, %s14703_s10 }
0x1972   : > { %p14700_p8 = pnand %p14699_p7, %p15084_p5  ;;  %p14706_p11 = scmp.lt.s32.totalorder %s14704_s7, %s14698_s21 }
0x1974   : > { %p14701_p9 = pneg %p14700_p8  ;;  %p14707_p12 = por %p14706_p11, %p14705_p10 }
0x1976   : > { %p14708_p0 = pnand %p14707_p12, %p14701_p9 }
0x1978   : > { %14711 = shalt.err (!%p14708_p0)
}
0x1979   : > { %s14712_s12 = scalar_lea.hbm %s17341_s1, 16  ;;  %s14716_s14 = scalar_lea.hbm %s15042_s8, 32 }
0x197a   : > { %p14713_p13 = scmp.ne.s32.totalorder %s17341_s1, %s14712_s12  ;;  %p14717_p4 = scmp.lt.u32.totalorder %s17341_s1, %s15042_s8 }
0x197b   : > { %p14718_p3 = scmp.lt.u32.totalorder %s14716_s14, %s14712_s12  ;;  %p14720_p8 = scmp.lt.u32.totalorder %s14712_s12, %s17341_s1 }
0x197c   : > { %p14714_p1 = pnand %p14713_p13, %p15084_p5 }
0x197d   : > { %p14719_p7 = por %p14718_p3, %p14717_p4 }
0x197e   : > { %p14715_p2 = pneg %p14714_p1 }
0x197f   : > { %p14721_p10 = por %p14720_p8, %p14719_p7 }
0x1981   : > { %p14722_p9 = pnand %p14721_p10, %p14715_p2 }
0x1983   : > { %14725 = shalt.err (!%p14722_p9)
}
0x1984   : > { %s17546_s19 = sld [smem:[#allocation24_spill]]  ;;  %vm9610_vm11 = vcmask 979968  }
0x1985   : > { %14507 = dma.vmem_to_hbm [thread:$0]  (%p15084_p5), %s17299_s4, 16, %s17341_s1, %s17317_s13  }
0x1986   : > { %s17547_s13 = sshll.u32 %s15100_s18, 5 }
0x1987   : > { %s1347_s15 = scalar_lea.vmem %s15027_s17, %s17547_s13 }
0x198a   : > { %v10524_v19 = vld [vmem:[%s17546_s19] ss:$0 sm:$0xff] }
0x1a10   : > { %v9522_v52 = vpop.f32.mrb[86].mxu1 }
0x1a11   : > { %v9541_v59 = vadd.f32 %v9522_v52, %v17285_v42  ;;  %v9524_v53 = vpop.f32.mrb[87].mxu1 }
0x1a13   : > { %v17377_v31 = vadd.f32 %v10524_v19, %v9541_v59 }
0x1a14   : > { %v9527_v49 = vpop.f32.mrb[88].mxu1 }
0x1a15   : > { %v9555_v50 = vsub.f32 0.0, %v17377_v31  ;;  %v9579_v3 = vmul.f32 1.442695, %v17377_v31  ;;  %v9542_v48 = vadd.f32 %v9527_v49, %v17287_v6  ;;  %v9529_v4 = vpop.f32.mrb[89].mxu1  ;;  %vm9587_vm12 = vcmp.ge.f32.partialorder %v17377_v31, 0.0 }
0x1a17   : > { %v9559_v28 = vmul.f32 1.442695, %v9555_v50  ;;  %14610 = vpow2.f32 %v9579_v3  ;;  %v9552_v39 = vadd.f32 %v10524_v19, %v9542_v48 }
0x1a18   : > { %v9532_v23 = vpop.f32.mrb[90].mxu1 }
0x1a19   : > { %14612 = vpow2.f32 %v9559_v28  ;;  %v9556_v61 = vsub.f32 0.0, %v9552_v39  ;;  %v9581_v40 = vmul.f32 1.442695, %v9552_v39  ;;  %v9534_v12 = vpop.f32.mrb[91].mxu1  ;;  %v9543_v33 = vadd.f32 %v9532_v23, %v17289_v17 }
0x1a1a   : > { %vm9588_vm13 = vcmp.ge.f32.partialorder %v9552_v39, 0.0 }
0x1a1b   : > { %v9561_v34 = vmul.f32 1.442695, %v9556_v61  ;;  %14614 = vpow2.f32 %v9581_v40  ;;  %v9553_v43 = vadd.f32 %v10524_v19, %v9543_v33 }
0x1a1c   : > { %v9537_v44 = vpop.f32.mrb[92].mxu1 }
0x1a1d   : > { %14616 = vpow2.f32 %v9561_v34  ;;  %v9544_v10 = vadd.f32 %v9537_v44, %v17291_v63  ;;  %v9539_v14 = vpop.f32.mrb[93].mxu1  ;;  %v9557_v35 = vsub.f32 0.0, %v9553_v43  ;;  %v9583_v18 = vmul.f32 1.442695, %v9553_v43 }
0x1a1e   : > { %vm9589_vm7 = vcmp.ge.f32.partialorder %v9553_v43, 0.0 }
0x1a1f   : > { %v9554_v15 = vadd.f32 %v10524_v19, %v9544_v10  ;;  %v9563_v2 = vmul.f32 1.442695, %v9557_v35  ;;  %14618 = vpow2.f32 %v9583_v18 }
0x1a21   : > { %v14611_v37 = vpop.eup %14610  ;;  %v9558_v55 = vsub.f32 0.0, %v9554_v15  ;;  %v9585_v9 = vmul.f32 1.442695, %v9554_v15  ;;  %14620 = vpow2.f32 %v9563_v2  ;;  %vm9590_vm1 = vcmp.ge.f32.partialorder %v9554_v15, 0.0 }
0x1a22   : > { %v9591_v7 = vadd.f32 1.0, %v14611_v37 }
0x1a23   : > { %v14613_v24 = vpop.eup %14612  ;;  %v9565_v27 = vmul.f32 1.442695, %v9558_v55  ;;  %14622 = vpow2.f32 %v9585_v9 }
0x1a24   : > { %v9567_v1 = vadd.f32 1.0, %v14613_v24  ;;  %14624 = vrcp.f32 %v9591_v7 }
0x1a25   : > { %v14615_v47 = vpop.eup %14614  ;;  %14626 = vpow2.f32 %v9565_v27 }
0x1a26   : > { %14628 = vrcp.f32 %v9567_v1  ;;  %v9592_v41 = vadd.f32 1.0, %v14615_v47 }
0x1a27   : > { %v14617_v51 = vpop.eup %14616 }
0x1a28   : > { %v9568_v5 = vadd.f32 1.0, %v14617_v51  ;;  %14630 = vrcp.f32 %v9592_v41 }
0x1a29   : > { %v14619_v20 = vpop.eup %14618 }
0x1a2a   : > { %14632 = vrcp.f32 %v9568_v5  ;;  %v9593_v0 = vadd.f32 1.0, %v14619_v20 }
0x1a2b   : > { %v14621_v42 = vpop.eup %14620 }
0x1a2c   : > { %v9569_v54 = vadd.f32 1.0, %v14621_v42  ;;  %14634 = vrcp.f32 %v9593_v0 }
0x1a2d   : > { %v14623_v56 = vpop.eup %14622 }
0x1a2e   : > { %v14625_v13 = vpop.eup %14624  ;;  %v9594_v29 = vadd.f32 1.0, %v14623_v56  ;;  %14636 = vrcp.f32 %v9569_v54 }
0x1a2f   : > { %v14627_v6 = vpop.eup %14626  ;;  %v9596_v22 = vmul.f32 %v14625_v13, %v14611_v37 }
0x1a30   : > { %v14629_v58 = vpop.eup %14628  ;;  %v9570_v16 = vadd.f32 1.0, %v14627_v6  ;;  %14638 = vrcp.f32 %v9594_v29 }
0x1a31   : > { %v9603_v8 = vsel %vm9587_vm12, %v14629_v58, %v9596_v22 }
0x1a32   : > { %v14631_v17 = vpop.eup %14630  ;;  %9607 = vst.msk [vmem:[%s1347_s15] sm:$0xff] %vm1724_vm4, %v9603_v8  ;;  %14640 = vrcp.f32 %v9570_v16 }
0x1a33   : > { %v9598_v36 = vmul.f32 %v14631_v17, %v14615_v47 }
0x1a34   : > { %v14633_v46 = vpop.eup %14632 }
0x1a35   : > { %v9604_v11 = vsel %vm9588_vm13, %v14633_v46, %v9598_v36 }
0x1a36   : > { %9608 = vst.msk [vmem:[%s1347_s15 + $0x8] sm:$0xff] %vm1724_vm4, %v9604_v11  ;;  %v14635_v62 = vpop.eup %14634 }
0x1a37   : > { %v9600_v63 = vmul.f32 %v14635_v62, %v14619_v20 }
0x1a38   : > { %v14637_v60 = vpop.eup %14636 }
0x1a39   : > { %v9605_v30 = vsel %vm9589_vm7, %v14637_v60, %v9600_v63 }
0x1a3a   : > { %v14639_v25 = vpop.eup %14638  ;;  %9609 = vst.msk [vmem:[%s1347_s15 + $0x10] sm:$0xff] %vm1724_vm4, %v9605_v30 }
0x1a3b   : > { %v9602_v38 = vmul.f32 %v14639_v25, %v14623_v56 }
0x1a3c   : > { %v14641_v45 = vpop.eup %14640 }
0x1a3d   : > { %v9606_v32 = vsel %vm9590_vm1, %v14641_v45, %v9602_v38 }
0x1a3e   : > { %9611 = vst.msk [vmem:[%s1347_s15 + $0x18] sm:$0x3f] %vm9610_vm11, %v9606_v32 }
0x1a3f PF: > { %p14521_p5 = scmp.ge.s32.totalorder %s14764_s28, 2  ;;  %s9695_s18 = sand.u32 1, %s14752_s22  }
0x1a40   : > { %s9696_s4 = scalar_lea.sflag [#allocation3], %s9695_s18 }
0x1a41   : > { %p14512_p11 = pnand %p14521_p5, %p15088_p6 }
0x1a43   : > { %14743 = dma.done.wait (!%p14512_p11), %s9696_s4, 16  }
0x1a44   : > { %14745 = vsyncadd (!%p14512_p11), %s9696_s4, 4294967280  ;;  %s17548_s1 = sadd.s32 4294967294, %s14764_s28  }
0x1a45   : > { %s9703_s0 = sand.u32 1, %s17548_s1  }
0x1a46   : > { %s9704_s5 = scalar_lea.sflag [#allocation5], %s9703_s0 }
0x1a47   : > { %14747 = dma.done.wait (!%p14512_p11), %s9704_s5, 32  }
0x1a48   : > { %14749 = vsyncadd (!%p14512_p11), %s9704_s5, 4294967264  ;;  %p101_p12 = scmp.ge.s32.totalorder %s15069_s2, 4   ;;  %s17549_s22 = smov %s14756_s23 }
0x1a49   : > { %s17550_s23 = smov %s14760_s26  ;;  %s17551_s26 = smov %s15082_s11 }
0x1a4a   : > { %s17552_s28 = smov %s15069_s2  ;;  %103 = sbr.rel (!%p101_p12) target bundleno = 92 (0x5c), region = 354 }
0x1a51   :  { %9716 = vsyncpa [#allocation3], 1 }
0x1a52   :  { %9718 = vsyncpa [#allocation3 + $0x1], 1 }
0x1a53   :  { %9719 = vsyncpa [#allocation5], 1 }
0x1a54   :  { %9721 = vsyncpa [#allocation5 + $0x1], 1 }

</bundles_post_ra>
